<compile_context>
chip_gen: v7x
topology: tpu7x:2x2x1
jax: 0.10.0
libtpu: 0.0.40
codegen_flags: <defaults>
</compile_context>

<pallas_src>
import math

import jax
import jax.numpy as jnp
import numpy as np
from jax import lax
from jax.experimental import pallas as pl
from jax.experimental.pallas import tpu as pltpu

EMBED = 384        # embed_size
FF_HIDDEN = 64     # ff_hidden_dim
HEADS = 32
HEAD_DIM = EMBED // HEADS   # 12
LN_EPS = 1e-5


def transformer_block_kernel(v_ref, k_ref, q_ref, mask_ref,
                             wv_ref, bv_ref, wk_ref, bk_ref, wq_ref, bq_ref,
                             wo_ref, bo_ref,
                             g1_ref, be1_ref, g2_ref, be2_ref,
                             w1_ref, bf1_ref, w2_ref, bf2_ref,
                             out_ref):
    f32 = jnp.float32
    bf16 = jnp.bfloat16

    xv = v_ref[...]            # (S, E)  f32
    xk = k_ref[...]            # (S, E)  f32
    xq = q_ref[...]            # (TQ, E) f32

    # Additive attention bias computed ONCE (hoisted out of the per-head loop:
    # avoids 32 identical (S,S) compares/selects). mask==0 => -1e20, else 0.
    mbias = jnp.where(mask_ref[...].astype(f32) == 0.0, f32(-1e20), f32(0.0))  # (TQ, S)

    # --- Q / K / V projections: bf16 operands, f32 accumulation (MXU) ---
    V = jnp.dot(xv.astype(bf16), wv_ref[...], preferred_element_type=f32) + bv_ref[...]
    K = jnp.dot(xk.astype(bf16), wk_ref[...], preferred_element_type=f32) + bk_ref[...]
    Q = jnp.dot(xq.astype(bf16), wq_ref[...], preferred_element_type=f32) + bq_ref[...]

    # Fold 1/sqrt(head_dim) into Q once (one (TQ,E) multiply instead of 32
    # (TQ,S) multiplies). Masked logits become -1e20 instead of -1e20/sqrt(d);
    # both underflow to exactly 0 after the max-subtracted softmax, so this
    # matches torch's masked_fill-then-scale ordering.
    Q = Q * f32(1.0 / math.sqrt(HEAD_DIM))

    # --- per-head attention ---
    # TODO(synk): with head_dim=12 the heads are never lane-aligned; batching
    # all heads into one einsum needs an in-kernel (S,E)->(S,H,12) reshape /
    # 3-D transpose that Mosaic does not reliably lower, so the statically
    # unrolled per-head loop is kept (softmax itself is already minimal here).
    head_outs = []
    for h in range(HEADS):
        lo = h * HEAD_DIM
        qh = lax.slice_in_dim(Q, lo, lo + HEAD_DIM, axis=1)   # (TQ, D)
        kh = lax.slice_in_dim(K, lo, lo + HEAD_DIM, axis=1)   # (S, D)
        vh = lax.slice_in_dim(V, lo, lo + HEAD_DIM, axis=1)   # (S, D)
        e = jnp.dot(qh, kh.T, preferred_element_type=f32) + mbias          # (TQ, S)
        e = e - jnp.max(e, axis=-1, keepdims=True)
        p = jnp.exp(e)
        # softmax denominator via EUP approx reciprocal (free slot) instead of VALU divide
        a = p * pl.reciprocal(jnp.sum(p, axis=-1, keepdims=True), approx=True)
        head_outs.append(jnp.dot(a, vh, preferred_element_type=f32))
    attn = jnp.concatenate(head_outs, axis=-1)                              # (TQ, E)
    attn = jnp.dot(attn.astype(bf16), wo_ref[...], preferred_element_type=f32) + bo_ref[...]

    # TODO(synk): nn.Dropout modeled as identity (eval/inference semantics).
    # --- residual + LayerNorm 1 (all f32 elementwise) ---
    x = xq + attn
    mu = jnp.mean(x, axis=-1, keepdims=True)
    var = jnp.mean((x - mu) ** 2, axis=-1, keepdims=True)
    x = (x - mu) * lax.rsqrt(var + LN_EPS) * g1_ref[...] + be1_ref[...]

    # --- feed-forward: Linear -> ReLU -> Linear (bf16 operands, f32 accum) ---
    # TODO(synk): FF_HIDDEN=64 (<128) halves MXU lane utilization on the second
    # matmul; padding the hidden dim to 128 would be a model-level change.
    h1 = jnp.dot(x.astype(bf16), w1_ref[...], preferred_element_type=f32) + bf1_ref[...]
    h1 = jnp.maximum(h1, 0.0)
    ff = jnp.dot(h1.astype(bf16), w2_ref[...], preferred_element_type=f32) + bf2_ref[...]

    # --- residual + LayerNorm 2 ---
    y = x + ff
    mu2 = jnp.mean(y, axis=-1, keepdims=True)
    var2 = jnp.mean((y - mu2) ** 2, axis=-1, keepdims=True)
    out_ref[...] = (y - mu2) * lax.rsqrt(var2 + LN_EPS) * g2_ref[...] + be2_ref[...]


def transformer_block(value, key, query, mask, params):
    N, S, E = query.shape
    assert E == EMBED

    # Query-tile grid axis: bounds per-step VMEM residency and gives a 2-D
    # fully-parallel grid (v7x has 2 TensorCores per chip).
    tq = S if S <= 128 else 128
    assert S % tq == 0, "sequence length must be a multiple of the query tile"
    n_q = S // tq

    # Narrow the mask to int8 (boolean semantics: nonzero == keep) — the S^2
    # mask would otherwise be the largest HBM read at real sequence lengths.
    mask_i8 = (mask != 0).astype(jnp.int8)          # (N, 1, S, S)

    (wv, bv, wk, bk, wq, bq, wo, bo, g1, be1, g2, be2, w1, bf1, w2, bf2) = params
    # Matmul operands in bf16 (MXU-native on v6e/v7x); accumulation stays f32
    # in-kernel, and all elementwise math (softmax/LN/residual) stays f32
    # (v5e's VPU/EUP have no bf16).
    wv_b = wv.astype(jnp.bfloat16)
    wk_b = wk.astype(jnp.bfloat16)
    wq_b = wq.astype(jnp.bfloat16)
    wo_b = wo.astype(jnp.bfloat16)
    w1_b = w1.astype(jnp.bfloat16)
    w2_b = w2.astype(jnp.bfloat16)

    kv_spec = pl.BlockSpec((None, S, E), lambda n, qi: (n, 0, 0))       # full rows for K/V
    q_spec = pl.BlockSpec((None, tq, E), lambda n, qi: (n, qi, 0))
    mask_spec = pl.BlockSpec((None, None, tq, S), lambda n, qi: (n, 0, qi, 0))

    # Grid-invariant params: constant index_map, so their blocks are not
    # re-fetched across grid steps (single-resident weights).
    def full_spec(shape):
        return pl.BlockSpec(shape, lambda n, qi, _nd=len(shape): (0,) * _nd)

    in_specs = [
        kv_spec, kv_spec, q_spec, mask_spec,
        full_spec(wv_b.shape), full_spec(bv.shape),
        full_spec(wk_b.shape), full_spec(bk.shape),
        full_spec(wq_b.shape), full_spec(bq.shape),
        full_spec(wo_b.shape), full_spec(bo.shape),
        full_spec(g1.shape), full_spec(be1.shape),
        full_spec(g2.shape), full_spec(be2.shape),
        full_spec(w1_b.shape), full_spec(bf1.shape),
        full_spec(w2_b.shape), full_spec(bf2.shape),
    ]

    # Advisory cost estimate so XLA can schedule surrounding work around the kernel.
    flops = int(N * (8 * S * E * E + 4 * S * S * E + 4 * S * E * FF_HIDDEN))
    transcendentals = int(N * (HEADS * S * S + 4 * S))
    bytes_accessed = int(
        4 * (4 * N * S * E)                                   # V,K,Q in + out (f32)
        + N * S * S                                           # int8 mask
        + 2 * (4 * E * E + 2 * E * FF_HIDDEN)                 # bf16 weights
        + 4 * (9 * E + FF_HIDDEN))                            # f32 biases + LN params

    return pl.pallas_call(
        transformer_block_kernel,
        out_shape=jax.ShapeDtypeStruct((N, S, E), jnp.float32),
        grid_spec=pltpu.PrefetchScalarGridSpec(
            num_scalar_prefetch=0,
            grid=(N, n_q),
            in_specs=in_specs,
            out_specs=pl.BlockSpec((None, tq, E), lambda n, qi: (n, qi, 0)),
        ),
        compiler_params=pltpu.CompilerParams(
            dimension_semantics=("parallel", "parallel"),
            vmem_limit_bytes=64 * 1024 * 1024,
        ),
        cost_estimate=pl.CostEstimate(
            flops=flops, transcendentals=transcendentals, bytes_accessed=bytes_accessed),
    )(value, key, query, mask_i8,
      wv_b, bv, wk_b, bk, wq_b, bq, wo_b, bo, g1, be1, g2, be2, w1_b, bf1, w2_b, bf2)


def init_params(rng):
    """Deterministic init mimicking nn.Linear (uniform +-1/sqrt(fan_in))."""
    def linear(k, fan_in, fan_out):
        kw, kb = jax.random.split(k)
        bound = 1.0 / math.sqrt(fan_in)
        W = jax.random.uniform(kw, (fan_in, fan_out), jnp.float32, -bound, bound)
        b = jax.random.uniform(kb, (1, fan_out), jnp.float32, -bound, bound)
        return W, b

    ks = jax.random.split(rng, 6)
    wv, bv = linear(ks[0], EMBED, EMBED)
    wk, bk = linear(ks[1], EMBED, EMBED)
    wq, bq = linear(ks[2], EMBED, EMBED)
    wo, bo = linear(ks[3], EMBED, EMBED)
    w1, bf1 = linear(ks[4], EMBED, FF_HIDDEN)
    w2, bf2 = linear(ks[5], FF_HIDDEN, EMBED)
    g1 = jnp.ones((1, EMBED), jnp.float32)
    be1 = jnp.zeros((1, EMBED), jnp.float32)
    g2 = jnp.ones((1, EMBED), jnp.float32)
    be2 = jnp.zeros((1, EMBED), jnp.float32)
    return (wv, bv, wk, bk, wq, bq, wo, bo, g1, be1, g2, be2, w1, bf1, w2, bf2)


def reference(value, key, query, mask, params):
    """Pure-JAX f32 reference of the PyTorch forward (dropout = identity)."""
    (wv, bv, wk, bk, wq, bq, wo, bo, g1, be1, g2, be2, w1, bf1, w2, bf2) = params
    N, S, E = query.shape
    V = (value @ wv + bv).reshape(N, S, HEADS, HEAD_DIM)
    K = (key @ wk + bk).reshape(N, S, HEADS, HEAD_DIM)
    Q = (query @ wq + bq).reshape(N, S, HEADS, HEAD_DIM)
    energy = jnp.einsum('nqhd,nkhd->nhqk', Q, K)
    energy = jnp.where(mask == 0, -1e20, energy)
    attn = jax.nn.softmax(energy / math.sqrt(HEAD_DIM), axis=-1)
    out = jnp.einsum('nhql,nlhd->nqhd', attn, V).reshape(N, S, E)
    out = out @ wo + bo

    def ln(x, g, b):
        mu = x.mean(-1, keepdims=True)
        var = ((x - mu) ** 2).mean(-1, keepdims=True)
        return (x - mu) * lax.rsqrt(var + LN_EPS) * g + b

    x = ln(query + out, g1, be1)
    ff = jnp.maximum(x @ w1 + bf1, 0.0) @ w2 + bf2
    return ln(x + ff, g2, be2)


if __name__ == "__main__":
    N, S = 2, 8
    root = jax.random.PRNGKey(0)
    k_v, k_k, k_q, k_p = jax.random.split(root, 4)

    value = jax.random.normal(k_v, (N, S, EMBED), jnp.float32)
    key = jax.random.normal(k_k, (N, S, EMBED), jnp.float32)
    query = jax.random.normal(k_q, (N, S, EMBED), jnp.float32)
    # causal mask, broadcast over heads: (N, 1, S, S)
    mask = jnp.broadcast_to(jnp.tril(jnp.ones((S, S), jnp.float32)), (N, 1, S, S))

    params = init_params(k_p)

    out = transformer_block(value, key, query, mask, params)
    out = jax.block_until_ready(out)

    ref = reference(value, key, query, mask, params)
    # Tolerance loosened vs pure-f32: the kernel runs matmul operands in bf16
    # (f32 accumulation); the f32 reference differs by O(1e-2) after two LayerNorms.
    np.testing.assert_allclose(np.asarray(out), np.asarray(ref), rtol=3e-2, atol=3e-2)

    print("KERNEL_OK")
</pallas_src>

<mosaic_0001>
module attributes {stable_mosaic.version = 11 : i64} {
  func.func @transformer_block_kernel(%arg0: i32, %arg1: i32, %arg2: memref<1x8x384xf32, #tpu.memory_space<vmem>>, %arg3: memref<1x8x384xf32, #tpu.memory_space<vmem>>, %arg4: memref<1x8x384xf32, #tpu.memory_space<vmem>>, %arg5: memref<1x1x8x8xi8, #tpu.memory_space<vmem>>, %arg6: memref<384x384xbf16, #tpu.memory_space<vmem>>, %arg7: memref<1x384xf32, #tpu.memory_space<vmem>>, %arg8: memref<384x384xbf16, #tpu.memory_space<vmem>>, %arg9: memref<1x384xf32, #tpu.memory_space<vmem>>, %arg10: memref<384x384xbf16, #tpu.memory_space<vmem>>, %arg11: memref<1x384xf32, #tpu.memory_space<vmem>>, %arg12: memref<384x384xbf16, #tpu.memory_space<vmem>>, %arg13: memref<1x384xf32, #tpu.memory_space<vmem>>, %arg14: memref<1x384xf32, #tpu.memory_space<vmem>>, %arg15: memref<1x384xf32, #tpu.memory_space<vmem>>, %arg16: memref<1x384xf32, #tpu.memory_space<vmem>>, %arg17: memref<1x384xf32, #tpu.memory_space<vmem>>, %arg18: memref<384x64xbf16, #tpu.memory_space<vmem>>, %arg19: memref<1x64xf32, #tpu.memory_space<vmem>>, %arg20: memref<64x384xbf16, #tpu.memory_space<vmem>>, %arg21: memref<1x384xf32, #tpu.memory_space<vmem>>, %arg22: memref<1x8x384xf32, #tpu.memory_space<vmem>>) attributes {dimension_semantics = [#tpu.dimension_semantics<parallel>, #tpu.dimension_semantics<parallel>], iteration_bounds = array<i64: 2, 1>, scalar_prefetch = 0 : i64, scratch_operands = 0 : i64, tpu.core_type = #tpu.core_type<tc>, window_params = [{transform_indices = @transform_0, window_bounds = array<i64: 1, 8, 384>}, {transform_indices = @transform_1, window_bounds = array<i64: 1, 8, 384>}, {transform_indices = @transform_2, window_bounds = array<i64: 1, 8, 384>}, {transform_indices = @transform_3, window_bounds = array<i64: 1, 1, 8, 8>}, {pipeline_mode = #tpu.pipeline_mode<synchronous>, transform_indices = @transform_4, window_bounds = array<i64: 384, 384>}, {pipeline_mode = #tpu.pipeline_mode<synchronous>, transform_indices = @transform_5, window_bounds = array<i64: 1, 384>}, {pipeline_mode = #tpu.pipeline_mode<synchronous>, transform_indices = @transform_6, window_bounds = array<i64: 384, 384>}, {pipeline_mode = #tpu.pipeline_mode<synchronous>, transform_indices = @transform_7, window_bounds = array<i64: 1, 384>}, {pipeline_mode = #tpu.pipeline_mode<synchronous>, transform_indices = @transform_8, window_bounds = array<i64: 384, 384>}, {pipeline_mode = #tpu.pipeline_mode<synchronous>, transform_indices = @transform_9, window_bounds = array<i64: 1, 384>}, {pipeline_mode = #tpu.pipeline_mode<synchronous>, transform_indices = @transform_10, window_bounds = array<i64: 384, 384>}, {pipeline_mode = #tpu.pipeline_mode<synchronous>, transform_indices = @transform_11, window_bounds = array<i64: 1, 384>}, {pipeline_mode = #tpu.pipeline_mode<synchronous>, transform_indices = @transform_12, window_bounds = array<i64: 1, 384>}, {pipeline_mode = #tpu.pipeline_mode<synchronous>, transform_indices = @transform_13, window_bounds = array<i64: 1, 384>}, {pipeline_mode = #tpu.pipeline_mode<synchronous>, transform_indices = @transform_14, window_bounds = array<i64: 1, 384>}, {pipeline_mode = #tpu.pipeline_mode<synchronous>, transform_indices = @transform_15, window_bounds = array<i64: 1, 384>}, {pipeline_mode = #tpu.pipeline_mode<synchronous>, transform_indices = @transform_16, window_bounds = array<i64: 384, 64>}, {pipeline_mode = #tpu.pipeline_mode<synchronous>, transform_indices = @transform_17, window_bounds = array<i64: 1, 64>}, {pipeline_mode = #tpu.pipeline_mode<synchronous>, transform_indices = @transform_18, window_bounds = array<i64: 64, 384>}, {pipeline_mode = #tpu.pipeline_mode<synchronous>, transform_indices = @transform_19, window_bounds = array<i64: 1, 384>}, {transform_indices = @transform_20, window_bounds = array<i64: 1, 8, 384>}]} {
    %c0 = arith.constant 0 : index
    %c0_0 = arith.constant 0 : index
    %c0_1 = arith.constant 0 : index
    %0 = vector.load %arg2[%c0, %c0_0, %c0_1] : memref<1x8x384xf32, #tpu.memory_space<vmem>>, vector<1x8x384xf32>
    %1 = vector.shape_cast %0 : vector<1x8x384xf32> to vector<8x384xf32>
    %c0_2 = arith.constant 0 : index
    %c0_3 = arith.constant 0 : index
    %c0_4 = arith.constant 0 : index
    %2 = vector.load %arg3[%c0_2, %c0_3, %c0_4] : memref<1x8x384xf32, #tpu.memory_space<vmem>>, vector<1x8x384xf32>
    %3 = vector.shape_cast %2 : vector<1x8x384xf32> to vector<8x384xf32>
    %c0_5 = arith.constant 0 : index
    %c0_6 = arith.constant 0 : index
    %c0_7 = arith.constant 0 : index
    %4 = vector.load %arg4[%c0_5, %c0_6, %c0_7] : memref<1x8x384xf32, #tpu.memory_space<vmem>>, vector<1x8x384xf32>
    %5 = vector.shape_cast %4 : vector<1x8x384xf32> to vector<8x384xf32>
    %c0_8 = arith.constant 0 : index
    %c0_9 = arith.constant 0 : index
    %c0_10 = arith.constant 0 : index
    %c0_11 = arith.constant 0 : index
    %6 = vector.load %arg5[%c0_8, %c0_9, %c0_10, %c0_11] : memref<1x1x8x8xi8, #tpu.memory_space<vmem>>, vector<1x1x8x8xi8>
    %7 = vector.shape_cast %6 : vector<1x1x8x8xi8> to vector<8x8xi8>
    %8 = arith.sitofp %7 : vector<8x8xi8> to vector<8x8xf32>
    %cst = arith.constant 0.000000e+00 : f32
    %9 = vector.broadcast %cst : f32 to vector<8x8xf32>
    %10 = arith.cmpf oeq, %8, %9 : vector<8x8xf32>
    %cst_12 = arith.constant -1.000000e+20 : f32
    %cst_13 = arith.constant 0.000000e+00 : f32
    %11 = vector.broadcast %cst_12 : f32 to vector<8x8xf32>
    %12 = vector.broadcast %cst_13 : f32 to vector<8x8xf32>
    %13 = arith.select %10, %11, %12 : vector<8x8xi1>, vector<8x8xf32>
    %14 = arith.truncf %1 : vector<8x384xf32> to vector<8x384xbf16>
    %c0_14 = arith.constant 0 : index
    %c0_15 = arith.constant 0 : index
    %15 = vector.load %arg6[%c0_14, %c0_15] : memref<384x384xbf16, #tpu.memory_space<vmem>>, vector<384x384xbf16>
    %cst_16 = arith.constant dense<0.000000e+00> : vector<8x384xf32>
    %16 = tpu.matmul %14, %15, %cst_16 {dimension_numbers = #tpu.dot_dimension_numbers<[1], [0], [0], [1], [0, 0, 1, 1], [], []>} : vector<8x384xbf16>, vector<384x384xbf16>, vector<8x384xf32> -> vector<8x384xf32>
    %c0_17 = arith.constant 0 : index
    %c0_18 = arith.constant 0 : index
    %17 = vector.load %arg7[%c0_17, %c0_18] : memref<1x384xf32, #tpu.memory_space<vmem>>, vector<1x384xf32>
    %18 = vector.broadcast %17 : vector<1x384xf32> to vector<8x384xf32>
    %19 = arith.addf %16, %18 : vector<8x384xf32>
    %20 = arith.truncf %3 : vector<8x384xf32> to vector<8x384xbf16>
    %c0_19 = arith.constant 0 : index
    %c0_20 = arith.constant 0 : index
    %21 = vector.load %arg8[%c0_19, %c0_20] : memref<384x384xbf16, #tpu.memory_space<vmem>>, vector<384x384xbf16>
    %cst_21 = arith.constant dense<0.000000e+00> : vector<8x384xf32>
    %22 = tpu.matmul %20, %21, %cst_21 {dimension_numbers = #tpu.dot_dimension_numbers<[1], [0], [0], [1], [0, 0, 1, 1], [], []>} : vector<8x384xbf16>, vector<384x384xbf16>, vector<8x384xf32> -> vector<8x384xf32>
    %c0_22 = arith.constant 0 : index
    %c0_23 = arith.constant 0 : index
    %23 = vector.load %arg9[%c0_22, %c0_23] : memref<1x384xf32, #tpu.memory_space<vmem>>, vector<1x384xf32>
    %24 = vector.broadcast %23 : vector<1x384xf32> to vector<8x384xf32>
    %25 = arith.addf %22, %24 : vector<8x384xf32>
    %26 = arith.truncf %5 : vector<8x384xf32> to vector<8x384xbf16>
    %c0_24 = arith.constant 0 : index
    %c0_25 = arith.constant 0 : index
    %27 = vector.load %arg10[%c0_24, %c0_25] : memref<384x384xbf16, #tpu.memory_space<vmem>>, vector<384x384xbf16>
    %cst_26 = arith.constant dense<0.000000e+00> : vector<8x384xf32>
    %28 = tpu.matmul %26, %27, %cst_26 {dimension_numbers = #tpu.dot_dimension_numbers<[1], [0], [0], [1], [0, 0, 1, 1], [], []>} : vector<8x384xbf16>, vector<384x384xbf16>, vector<8x384xf32> -> vector<8x384xf32>
    %c0_27 = arith.constant 0 : index
    %c0_28 = arith.constant 0 : index
    %29 = vector.load %arg11[%c0_27, %c0_28] : memref<1x384xf32, #tpu.memory_space<vmem>>, vector<1x384xf32>
    %30 = vector.broadcast %29 : vector<1x384xf32> to vector<8x384xf32>
    %31 = arith.addf %28, %30 : vector<8x384xf32>
    %cst_29 = arith.constant 0.288675129 : f32
    %32 = vector.broadcast %cst_29 : f32 to vector<8x384xf32>
    %33 = arith.mulf %31, %32 : vector<8x384xf32>
    %34 = vector.extract_strided_slice %33 {offsets = [0, 0], sizes = [8, 12], strides = [1, 1]} : vector<8x384xf32> to vector<8x12xf32>
    %35 = vector.extract_strided_slice %25 {offsets = [0, 0], sizes = [8, 12], strides = [1, 1]} : vector<8x384xf32> to vector<8x12xf32>
    %36 = vector.extract_strided_slice %19 {offsets = [0, 0], sizes = [8, 12], strides = [1, 1]} : vector<8x384xf32> to vector<8x12xf32>
    %37 = tpu.transpose %35, [1, 0] : vector<8x12xf32> -> vector<12x8xf32>
    %cst_30 = arith.constant dense<0.000000e+00> : vector<8x8xf32>
    %38 = tpu.matmul %34, %37, %cst_30 {dimension_numbers = #tpu.dot_dimension_numbers<[1], [0], [0], [1], [0, 0, 1, 1], [], []>} : vector<8x12xf32>, vector<12x8xf32>, vector<8x8xf32> -> vector<8x8xf32>
    %39 = arith.addf %38, %13 : vector<8x8xf32>
    %cst_31 = arith.constant dense<0xFF800000> : vector<8xf32>
    %40 = vector.multi_reduction <maximumf>, %39, %cst_31 [1] : vector<8x8xf32> to vector<8xf32>
    %41 = vector.shape_cast %40 : vector<8xf32> to vector<8x1xf32>
    %42 = vector.broadcast %41 : vector<8x1xf32> to vector<8x8xf32>
    %43 = arith.subf %39, %42 : vector<8x8xf32>
    %44 = math.exp %43 : vector<8x8xf32>
    %cst_32 = arith.constant dense<0.000000e+00> : vector<8xf32>
    %45 = vector.multi_reduction <add>, %44, %cst_32 [1] : vector<8x8xf32> to vector<8xf32>
    %46 = vector.shape_cast %45 : vector<8xf32> to vector<8x1xf32>
    %47 = tpu.reciprocal %46 {approx = true} : vector<8x1xf32> -> vector<8x1xf32>
    %48 = vector.broadcast %47 : vector<8x1xf32> to vector<8x8xf32>
    %49 = arith.mulf %44, %48 : vector<8x8xf32>
    %cst_33 = arith.constant dense<0.000000e+00> : vector<8x12xf32>
    %50 = tpu.matmul %49, %36, %cst_33 {dimension_numbers = #tpu.dot_dimension_numbers<[1], [0], [0], [1], [0, 0, 1, 1], [], []>} : vector<8x8xf32>, vector<8x12xf32>, vector<8x12xf32> -> vector<8x12xf32>
    %51 = vector.extract_strided_slice %33 {offsets = [0, 12], sizes = [8, 12], strides = [1, 1]} : vector<8x384xf32> to vector<8x12xf32>
    %52 = vector.extract_strided_slice %25 {offsets = [0, 12], sizes = [8, 12], strides = [1, 1]} : vector<8x384xf32> to vector<8x12xf32>
    %53 = vector.extract_strided_slice %19 {offsets = [0, 12], sizes = [8, 12], strides = [1, 1]} : vector<8x384xf32> to vector<8x12xf32>
    %54 = tpu.transpose %52, [1, 0] : vector<8x12xf32> -> vector<12x8xf32>
    %cst_34 = arith.constant dense<0.000000e+00> : vector<8x8xf32>
    %55 = tpu.matmul %51, %54, %cst_34 {dimension_numbers = #tpu.dot_dimension_numbers<[1], [0], [0], [1], [0, 0, 1, 1], [], []>} : vector<8x12xf32>, vector<12x8xf32>, vector<8x8xf32> -> vector<8x8xf32>
    %56 = arith.addf %55, %13 : vector<8x8xf32>
    %cst_35 = arith.constant dense<0xFF800000> : vector<8xf32>
    %57 = vector.multi_reduction <maximumf>, %56, %cst_35 [1] : vector<8x8xf32> to vector<8xf32>
    %58 = vector.shape_cast %57 : vector<8xf32> to vector<8x1xf32>
    %59 = vector.broadcast %58 : vector<8x1xf32> to vector<8x8xf32>
    %60 = arith.subf %56, %59 : vector<8x8xf32>
    %61 = math.exp %60 : vector<8x8xf32>
    %cst_36 = arith.constant dense<0.000000e+00> : vector<8xf32>
    %62 = vector.multi_reduction <add>, %61, %cst_36 [1] : vector<8x8xf32> to vector<8xf32>
    %63 = vector.shape_cast %62 : vector<8xf32> to vector<8x1xf32>
    %64 = tpu.reciprocal %63 {approx = true} : vector<8x1xf32> -> vector<8x1xf32>
    %65 = vector.broadcast %64 : vector<8x1xf32> to vector<8x8xf32>
    %66 = arith.mulf %61, %65 : vector<8x8xf32>
    %cst_37 = arith.constant dense<0.000000e+00> : vector<8x12xf32>
    %67 = tpu.matmul %66, %53, %cst_37 {dimension_numbers = #tpu.dot_dimension_numbers<[1], [0], [0], [1], [0, 0, 1, 1], [], []>} : vector<8x8xf32>, vector<8x12xf32>, vector<8x12xf32> -> vector<8x12xf32>
    %68 = vector.extract_strided_slice %33 {offsets = [0, 24], sizes = [8, 12], strides = [1, 1]} : vector<8x384xf32> to vector<8x12xf32>
    %69 = vector.extract_strided_slice %25 {offsets = [0, 24], sizes = [8, 12], strides = [1, 1]} : vector<8x384xf32> to vector<8x12xf32>
    %70 = vector.extract_strided_slice %19 {offsets = [0, 24], sizes = [8, 12], strides = [1, 1]} : vector<8x384xf32> to vector<8x12xf32>
    %71 = tpu.transpose %69, [1, 0] : vector<8x12xf32> -> vector<12x8xf32>
    %cst_38 = arith.constant dense<0.000000e+00> : vector<8x8xf32>
    %72 = tpu.matmul %68, %71, %cst_38 {dimension_numbers = #tpu.dot_dimension_numbers<[1], [0], [0], [1], [0, 0, 1, 1], [], []>} : vector<8x12xf32>, vector<12x8xf32>, vector<8x8xf32> -> vector<8x8xf32>
    %73 = arith.addf %72, %13 : vector<8x8xf32>
    %cst_39 = arith.constant dense<0xFF800000> : vector<8xf32>
    %74 = vector.multi_reduction <maximumf>, %73, %cst_39 [1] : vector<8x8xf32> to vector<8xf32>
    %75 = vector.shape_cast %74 : vector<8xf32> to vector<8x1xf32>
    %76 = vector.broadcast %75 : vector<8x1xf32> to vector<8x8xf32>
    %77 = arith.subf %73, %76 : vector<8x8xf32>
    %78 = math.exp %77 : vector<8x8xf32>
    %cst_40 = arith.constant dense<0.000000e+00> : vector<8xf32>
    %79 = vector.multi_reduction <add>, %78, %cst_40 [1] : vector<8x8xf32> to vector<8xf32>
    %80 = vector.shape_cast %79 : vector<8xf32> to vector<8x1xf32>
    %81 = tpu.reciprocal %80 {approx = true} : vector<8x1xf32> -> vector<8x1xf32>
    %82 = vector.broadcast %81 : vector<8x1xf32> to vector<8x8xf32>
    %83 = arith.mulf %78, %82 : vector<8x8xf32>
    %cst_41 = arith.constant dense<0.000000e+00> : vector<8x12xf32>
    %84 = tpu.matmul %83, %70, %cst_41 {dimension_numbers = #tpu.dot_dimension_numbers<[1], [0], [0], [1], [0, 0, 1, 1], [], []>} : vector<8x8xf32>, vector<8x12xf32>, vector<8x12xf32> -> vector<8x12xf32>
    %85 = vector.extract_strided_slice %33 {offsets = [0, 36], sizes = [8, 12], strides = [1, 1]} : vector<8x384xf32> to vector<8x12xf32>
    %86 = vector.extract_strided_slice %25 {offsets = [0, 36], sizes = [8, 12], strides = [1, 1]} : vector<8x384xf32> to vector<8x12xf32>
    %87 = vector.extract_strided_slice %19 {offsets = [0, 36], sizes = [8, 12], strides = [1, 1]} : vector<8x384xf32> to vector<8x12xf32>
    %88 = tpu.transpose %86, [1, 0] : vector<8x12xf32> -> vector<12x8xf32>
    %cst_42 = arith.constant dense<0.000000e+00> : vector<8x8xf32>
    %89 = tpu.matmul %85, %88, %cst_42 {dimension_numbers = #tpu.dot_dimension_numbers<[1], [0], [0], [1], [0, 0, 1, 1], [], []>} : vector<8x12xf32>, vector<12x8xf32>, vector<8x8xf32> -> vector<8x8xf32>
    %90 = arith.addf %89, %13 : vector<8x8xf32>
    %cst_43 = arith.constant dense<0xFF800000> : vector<8xf32>
    %91 = vector.multi_reduction <maximumf>, %90, %cst_43 [1] : vector<8x8xf32> to vector<8xf32>
    %92 = vector.shape_cast %91 : vector<8xf32> to vector<8x1xf32>
    %93 = vector.broadcast %92 : vector<8x1xf32> to vector<8x8xf32>
    %94 = arith.subf %90, %93 : vector<8x8xf32>
    %95 = math.exp %94 : vector<8x8xf32>
    %cst_44 = arith.constant dense<0.000000e+00> : vector<8xf32>
    %96 = vector.multi_reduction <add>, %95, %cst_44 [1] : vector<8x8xf32> to vector<8xf32>
    %97 = vector.shape_cast %96 : vector<8xf32> to vector<8x1xf32>
    %98 = tpu.reciprocal %97 {approx = true} : vector<8x1xf32> -> vector<8x1xf32>
    %99 = vector.broadcast %98 : vector<8x1xf32> to vector<8x8xf32>
    %100 = arith.mulf %95, %99 : vector<8x8xf32>
    %cst_45 = arith.constant dense<0.000000e+00> : vector<8x12xf32>
    %101 = tpu.matmul %100, %87, %cst_45 {dimension_numbers = #tpu.dot_dimension_numbers<[1], [0], [0], [1], [0, 0, 1, 1], [], []>} : vector<8x8xf32>, vector<8x12xf32>, vector<8x12xf32> -> vector<8x12xf32>
    %102 = vector.extract_strided_slice %33 {offsets = [0, 48], sizes = [8, 12], strides = [1, 1]} : vector<8x384xf32> to vector<8x12xf32>
    %103 = vector.extract_strided_slice %25 {offsets = [0, 48], sizes = [8, 12], strides = [1, 1]} : vector<8x384xf32> to vector<8x12xf32>
    %104 = vector.extract_strided_slice %19 {offsets = [0, 48], sizes = [8, 12], strides = [1, 1]} : vector<8x384xf32> to vector<8x12xf32>
    %105 = tpu.transpose %103, [1, 0] : vector<8x12xf32> -> vector<12x8xf32>
    %cst_46 = arith.constant dense<0.000000e+00> : vector<8x8xf32>
    %106 = tpu.matmul %102, %105, %cst_46 {dimension_numbers = #tpu.dot_dimension_numbers<[1], [0], [0], [1], [0, 0, 1, 1], [], []>} : vector<8x12xf32>, vector<12x8xf32>, vector<8x8xf32> -> vector<8x8xf32>
    %107 = arith.addf %106, %13 : vector<8x8xf32>
    %cst_47 = arith.constant dense<0xFF800000> : vector<8xf32>
    %108 = vector.multi_reduction <maximumf>, %107, %cst_47 [1] : vector<8x8xf32> to vector<8xf32>
    %109 = vector.shape_cast %108 : vector<8xf32> to vector<8x1xf32>
    %110 = vector.broadcast %109 : vector<8x1xf32> to vector<8x8xf32>
    %111 = arith.subf %107, %110 : vector<8x8xf32>
    %112 = math.exp %111 : vector<8x8xf32>
    %cst_48 = arith.constant dense<0.000000e+00> : vector<8xf32>
    %113 = vector.multi_reduction <add>, %112, %cst_48 [1] : vector<8x8xf32> to vector<8xf32>
    %114 = vector.shape_cast %113 : vector<8xf32> to vector<8x1xf32>
    %115 = tpu.reciprocal %114 {approx = true} : vector<8x1xf32> -> vector<8x1xf32>
    %116 = vector.broadcast %115 : vector<8x1xf32> to vector<8x8xf32>
    %117 = arith.mulf %112, %116 : vector<8x8xf32>
    %cst_49 = arith.constant dense<0.000000e+00> : vector<8x12xf32>
    %118 = tpu.matmul %117, %104, %cst_49 {dimension_numbers = #tpu.dot_dimension_numbers<[1], [0], [0], [1], [0, 0, 1, 1], [], []>} : vector<8x8xf32>, vector<8x12xf32>, vector<8x12xf32> -> vector<8x12xf32>
    %119 = vector.extract_strided_slice %33 {offsets = [0, 60], sizes = [8, 12], strides = [1, 1]} : vector<8x384xf32> to vector<8x12xf32>
    %120 = vector.extract_strided_slice %25 {offsets = [0, 60], sizes = [8, 12], strides = [1, 1]} : vector<8x384xf32> to vector<8x12xf32>
    %121 = vector.extract_strided_slice %19 {offsets = [0, 60], sizes = [8, 12], strides = [1, 1]} : vector<8x384xf32> to vector<8x12xf32>
    %122 = tpu.transpose %120, [1, 0] : vector<8x12xf32> -> vector<12x8xf32>
    %cst_50 = arith.constant dense<0.000000e+00> : vector<8x8xf32>
    %123 = tpu.matmul %119, %122, %cst_50 {dimension_numbers = #tpu.dot_dimension_numbers<[1], [0], [0], [1], [0, 0, 1, 1], [], []>} : vector<8x12xf32>, vector<12x8xf32>, vector<8x8xf32> -> vector<8x8xf32>
    %124 = arith.addf %123, %13 : vector<8x8xf32>
    %cst_51 = arith.constant dense<0xFF800000> : vector<8xf32>
    %125 = vector.multi_reduction <maximumf>, %124, %cst_51 [1] : vector<8x8xf32> to vector<8xf32>
    %126 = vector.shape_cast %125 : vector<8xf32> to vector<8x1xf32>
    %127 = vector.broadcast %126 : vector<8x1xf32> to vector<8x8xf32>
    %128 = arith.subf %124, %127 : vector<8x8xf32>
    %129 = math.exp %128 : vector<8x8xf32>
    %cst_52 = arith.constant dense<0.000000e+00> : vector<8xf32>
    %130 = vector.multi_reduction <add>, %129, %cst_52 [1] : vector<8x8xf32> to vector<8xf32>
    %131 = vector.shape_cast %130 : vector<8xf32> to vector<8x1xf32>
    %132 = tpu.reciprocal %131 {approx = true} : vector<8x1xf32> -> vector<8x1xf32>
    %133 = vector.broadcast %132 : vector<8x1xf32> to vector<8x8xf32>
    %134 = arith.mulf %129, %133 : vector<8x8xf32>
    %cst_53 = arith.constant dense<0.000000e+00> : vector<8x12xf32>
    %135 = tpu.matmul %134, %121, %cst_53 {dimension_numbers = #tpu.dot_dimension_numbers<[1], [0], [0], [1], [0, 0, 1, 1], [], []>} : vector<8x8xf32>, vector<8x12xf32>, vector<8x12xf32> -> vector<8x12xf32>
    %136 = vector.extract_strided_slice %33 {offsets = [0, 72], sizes = [8, 12], strides = [1, 1]} : vector<8x384xf32> to vector<8x12xf32>
    %137 = vector.extract_strided_slice %25 {offsets = [0, 72], sizes = [8, 12], strides = [1, 1]} : vector<8x384xf32> to vector<8x12xf32>
    %138 = vector.extract_strided_slice %19 {offsets = [0, 72], sizes = [8, 12], strides = [1, 1]} : vector<8x384xf32> to vector<8x12xf32>
    %139 = tpu.transpose %137, [1, 0] : vector<8x12xf32> -> vector<12x8xf32>
    %cst_54 = arith.constant dense<0.000000e+00> : vector<8x8xf32>
    %140 = tpu.matmul %136, %139, %cst_54 {dimension_numbers = #tpu.dot_dimension_numbers<[1], [0], [0], [1], [0, 0, 1, 1], [], []>} : vector<8x12xf32>, vector<12x8xf32>, vector<8x8xf32> -> vector<8x8xf32>
    %141 = arith.addf %140, %13 : vector<8x8xf32>
    %cst_55 = arith.constant dense<0xFF800000> : vector<8xf32>
    %142 = vector.multi_reduction <maximumf>, %141, %cst_55 [1] : vector<8x8xf32> to vector<8xf32>
    %143 = vector.shape_cast %142 : vector<8xf32> to vector<8x1xf32>
    %144 = vector.broadcast %143 : vector<8x1xf32> to vector<8x8xf32>
    %145 = arith.subf %141, %144 : vector<8x8xf32>
    %146 = math.exp %145 : vector<8x8xf32>
    %cst_56 = arith.constant dense<0.000000e+00> : vector<8xf32>
    %147 = vector.multi_reduction <add>, %146, %cst_56 [1] : vector<8x8xf32> to vector<8xf32>
    %148 = vector.shape_cast %147 : vector<8xf32> to vector<8x1xf32>
    %149 = tpu.reciprocal %148 {approx = true} : vector<8x1xf32> -> vector<8x1xf32>
    %150 = vector.broadcast %149 : vector<8x1xf32> to vector<8x8xf32>
    %151 = arith.mulf %146, %150 : vector<8x8xf32>
    %cst_57 = arith.constant dense<0.000000e+00> : vector<8x12xf32>
    %152 = tpu.matmul %151, %138, %cst_57 {dimension_numbers = #tpu.dot_dimension_numbers<[1], [0], [0], [1], [0, 0, 1, 1], [], []>} : vector<8x8xf32>, vector<8x12xf32>, vector<8x12xf32> -> vector<8x12xf32>
    %153 = vector.extract_strided_slice %33 {offsets = [0, 84], sizes = [8, 12], strides = [1, 1]} : vector<8x384xf32> to vector<8x12xf32>
    %154 = vector.extract_strided_slice %25 {offsets = [0, 84], sizes = [8, 12], strides = [1, 1]} : vector<8x384xf32> to vector<8x12xf32>
    %155 = vector.extract_strided_slice %19 {offsets = [0, 84], sizes = [8, 12], strides = [1, 1]} : vector<8x384xf32> to vector<8x12xf32>
    %156 = tpu.transpose %154, [1, 0] : vector<8x12xf32> -> vector<12x8xf32>
    %cst_58 = arith.constant dense<0.000000e+00> : vector<8x8xf32>
    %157 = tpu.matmul %153, %156, %cst_58 {dimension_numbers = #tpu.dot_dimension_numbers<[1], [0], [0], [1], [0, 0, 1, 1], [], []>} : vector<8x12xf32>, vector<12x8xf32>, vector<8x8xf32> -> vector<8x8xf32>
    %158 = arith.addf %157, %13 : vector<8x8xf32>
    %cst_59 = arith.constant dense<0xFF800000> : vector<8xf32>
    %159 = vector.multi_reduction <maximumf>, %158, %cst_59 [1] : vector<8x8xf32> to vector<8xf32>
    %160 = vector.shape_cast %159 : vector<8xf32> to vector<8x1xf32>
    %161 = vector.broadcast %160 : vector<8x1xf32> to vector<8x8xf32>
    %162 = arith.subf %158, %161 : vector<8x8xf32>
    %163 = math.exp %162 : vector<8x8xf32>
    %cst_60 = arith.constant dense<0.000000e+00> : vector<8xf32>
    %164 = vector.multi_reduction <add>, %163, %cst_60 [1] : vector<8x8xf32> to vector<8xf32>
    %165 = vector.shape_cast %164 : vector<8xf32> to vector<8x1xf32>
    %166 = tpu.reciprocal %165 {approx = true} : vector<8x1xf32> -> vector<8x1xf32>
    %167 = vector.broadcast %166 : vector<8x1xf32> to vector<8x8xf32>
    %168 = arith.mulf %163, %167 : vector<8x8xf32>
    %cst_61 = arith.constant dense<0.000000e+00> : vector<8x12xf32>
    %169 = tpu.matmul %168, %155, %cst_61 {dimension_numbers = #tpu.dot_dimension_numbers<[1], [0], [0], [1], [0, 0, 1, 1], [], []>} : vector<8x8xf32>, vector<8x12xf32>, vector<8x12xf32> -> vector<8x12xf32>
    %170 = vector.extract_strided_slice %33 {offsets = [0, 96], sizes = [8, 12], strides = [1, 1]} : vector<8x384xf32> to vector<8x12xf32>
    %171 = vector.extract_strided_slice %25 {offsets = [0, 96], sizes = [8, 12], strides = [1, 1]} : vector<8x384xf32> to vector<8x12xf32>
    %172 = vector.extract_strided_slice %19 {offsets = [0, 96], sizes = [8, 12], strides = [1, 1]} : vector<8x384xf32> to vector<8x12xf32>
    %173 = tpu.transpose %171, [1, 0] : vector<8x12xf32> -> vector<12x8xf32>
    %cst_62 = arith.constant dense<0.000000e+00> : vector<8x8xf32>
    %174 = tpu.matmul %170, %173, %cst_62 {dimension_numbers = #tpu.dot_dimension_numbers<[1], [0], [0], [1], [0, 0, 1, 1], [], []>} : vector<8x12xf32>, vector<12x8xf32>, vector<8x8xf32> -> vector<8x8xf32>
    %175 = arith.addf %174, %13 : vector<8x8xf32>
    %cst_63 = arith.constant dense<0xFF800000> : vector<8xf32>
    %176 = vector.multi_reduction <maximumf>, %175, %cst_63 [1] : vector<8x8xf32> to vector<8xf32>
    %177 = vector.shape_cast %176 : vector<8xf32> to vector<8x1xf32>
    %178 = vector.broadcast %177 : vector<8x1xf32> to vector<8x8xf32>
    %179 = arith.subf %175, %178 : vector<8x8xf32>
    %180 = math.exp %179 : vector<8x8xf32>
    %cst_64 = arith.constant dense<0.000000e+00> : vector<8xf32>
    %181 = vector.multi_reduction <add>, %180, %cst_64 [1] : vector<8x8xf32> to vector<8xf32>
    %182 = vector.shape_cast %181 : vector<8xf32> to vector<8x1xf32>
    %183 = tpu.reciprocal %182 {approx = true} : vector<8x1xf32> -> vector<8x1xf32>
    %184 = vector.broadcast %183 : vector<8x1xf32> to vector<8x8xf32>
    %185 = arith.mulf %180, %184 : vector<8x8xf32>
    %cst_65 = arith.constant dense<0.000000e+00> : vector<8x12xf32>
    %186 = tpu.matmul %185, %172, %cst_65 {dimension_numbers = #tpu.dot_dimension_numbers<[1], [0], [0], [1], [0, 0, 1, 1], [], []>} : vector<8x8xf32>, vector<8x12xf32>, vector<8x12xf32> -> vector<8x12xf32>
    %187 = vector.extract_strided_slice %33 {offsets = [0, 108], sizes = [8, 12], strides = [1, 1]} : vector<8x384xf32> to vector<8x12xf32>
    %188 = vector.extract_strided_slice %25 {offsets = [0, 108], sizes = [8, 12], strides = [1, 1]} : vector<8x384xf32> to vector<8x12xf32>
    %189 = vector.extract_strided_slice %19 {offsets = [0, 108], sizes = [8, 12], strides = [1, 1]} : vector<8x384xf32> to vector<8x12xf32>
    %190 = tpu.transpose %188, [1, 0] : vector<8x12xf32> -> vector<12x8xf32>
    %cst_66 = arith.constant dense<0.000000e+00> : vector<8x8xf32>
    %191 = tpu.matmul %187, %190, %cst_66 {dimension_numbers = #tpu.dot_dimension_numbers<[1], [0], [0], [1], [0, 0, 1, 1], [], []>} : vector<8x12xf32>, vector<12x8xf32>, vector<8x8xf32> -> vector<8x8xf32>
    %192 = arith.addf %191, %13 : vector<8x8xf32>
    %cst_67 = arith.constant dense<0xFF800000> : vector<8xf32>
    %193 = vector.multi_reduction <maximumf>, %192, %cst_67 [1] : vector<8x8xf32> to vector<8xf32>
    %194 = vector.shape_cast %193 : vector<8xf32> to vector<8x1xf32>
    %195 = vector.broadcast %194 : vector<8x1xf32> to vector<8x8xf32>
    %196 = arith.subf %192, %195 : vector<8x8xf32>
    %197 = math.exp %196 : vector<8x8xf32>
    %cst_68 = arith.constant dense<0.000000e+00> : vector<8xf32>
    %198 = vector.multi_reduction <add>, %197, %cst_68 [1] : vector<8x8xf32> to vector<8xf32>
    %199 = vector.shape_cast %198 : vector<8xf32> to vector<8x1xf32>
    %200 = tpu.reciprocal %199 {approx = true} : vector<8x1xf32> -> vector<8x1xf32>
    %201 = vector.broadcast %200 : vector<8x1xf32> to vector<8x8xf32>
    %202 = arith.mulf %197, %201 : vector<8x8xf32>
    %cst_69 = arith.constant dense<0.000000e+00> : vector<8x12xf32>
    %203 = tpu.matmul %202, %189, %cst_69 {dimension_numbers = #tpu.dot_dimension_numbers<[1], [0], [0], [1], [0, 0, 1, 1], [], []>} : vector<8x8xf32>, vector<8x12xf32>, vector<8x12xf32> -> vector<8x12xf32>
    %204 = vector.extract_strided_slice %33 {offsets = [0, 120], sizes = [8, 12], strides = [1, 1]} : vector<8x384xf32> to vector<8x12xf32>
    %205 = vector.extract_strided_slice %25 {offsets = [0, 120], sizes = [8, 12], strides = [1, 1]} : vector<8x384xf32> to vector<8x12xf32>
    %206 = vector.extract_strided_slice %19 {offsets = [0, 120], sizes = [8, 12], strides = [1, 1]} : vector<8x384xf32> to vector<8x12xf32>
    %207 = tpu.transpose %205, [1, 0] : vector<8x12xf32> -> vector<12x8xf32>
    %cst_70 = arith.constant dense<0.000000e+00> : vector<8x8xf32>
    %208 = tpu.matmul %204, %207, %cst_70 {dimension_numbers = #tpu.dot_dimension_numbers<[1], [0], [0], [1], [0, 0, 1, 1], [], []>} : vector<8x12xf32>, vector<12x8xf32>, vector<8x8xf32> -> vector<8x8xf32>
    %209 = arith.addf %208, %13 : vector<8x8xf32>
    %cst_71 = arith.constant dense<0xFF800000> : vector<8xf32>
    %210 = vector.multi_reduction <maximumf>, %209, %cst_71 [1] : vector<8x8xf32> to vector<8xf32>
    %211 = vector.shape_cast %210 : vector<8xf32> to vector<8x1xf32>
    %212 = vector.broadcast %211 : vector<8x1xf32> to vector<8x8xf32>
    %213 = arith.subf %209, %212 : vector<8x8xf32>
    %214 = math.exp %213 : vector<8x8xf32>
    %cst_72 = arith.constant dense<0.000000e+00> : vector<8xf32>
    %215 = vector.multi_reduction <add>, %214, %cst_72 [1] : vector<8x8xf32> to vector<8xf32>
    %216 = vector.shape_cast %215 : vector<8xf32> to vector<8x1xf32>
    %217 = tpu.reciprocal %216 {approx = true} : vector<8x1xf32> -> vector<8x1xf32>
    %218 = vector.broadcast %217 : vector<8x1xf32> to vector<8x8xf32>
    %219 = arith.mulf %214, %218 : vector<8x8xf32>
    %cst_73 = arith.constant dense<0.000000e+00> : vector<8x12xf32>
    %220 = tpu.matmul %219, %206, %cst_73 {dimension_numbers = #tpu.dot_dimension_numbers<[1], [0], [0], [1], [0, 0, 1, 1], [], []>} : vector<8x8xf32>, vector<8x12xf32>, vector<8x12xf32> -> vector<8x12xf32>
    %221 = vector.extract_strided_slice %33 {offsets = [0, 132], sizes = [8, 12], strides = [1, 1]} : vector<8x384xf32> to vector<8x12xf32>
    %222 = vector.extract_strided_slice %25 {offsets = [0, 132], sizes = [8, 12], strides = [1, 1]} : vector<8x384xf32> to vector<8x12xf32>
    %223 = vector.extract_strided_slice %19 {offsets = [0, 132], sizes = [8, 12], strides = [1, 1]} : vector<8x384xf32> to vector<8x12xf32>
    %224 = tpu.transpose %222, [1, 0] : vector<8x12xf32> -> vector<12x8xf32>
    %cst_74 = arith.constant dense<0.000000e+00> : vector<8x8xf32>
    %225 = tpu.matmul %221, %224, %cst_74 {dimension_numbers = #tpu.dot_dimension_numbers<[1], [0], [0], [1], [0, 0, 1, 1], [], []>} : vector<8x12xf32>, vector<12x8xf32>, vector<8x8xf32> -> vector<8x8xf32>
    %226 = arith.addf %225, %13 : vector<8x8xf32>
    %cst_75 = arith.constant dense<0xFF800000> : vector<8xf32>
    %227 = vector.multi_reduction <maximumf>, %226, %cst_75 [1] : vector<8x8xf32> to vector<8xf32>
    %228 = vector.shape_cast %227 : vector<8xf32> to vector<8x1xf32>
    %229 = vector.broadcast %228 : vector<8x1xf32> to vector<8x8xf32>
    %230 = arith.subf %226, %229 : vector<8x8xf32>
    %231 = math.exp %230 : vector<8x8xf32>
    %cst_76 = arith.constant dense<0.000000e+00> : vector<8xf32>
    %232 = vector.multi_reduction <add>, %231, %cst_76 [1] : vector<8x8xf32> to vector<8xf32>
    %233 = vector.shape_cast %232 : vector<8xf32> to vector<8x1xf32>
    %234 = tpu.reciprocal %233 {approx = true} : vector<8x1xf32> -> vector<8x1xf32>
    %235 = vector.broadcast %234 : vector<8x1xf32> to vector<8x8xf32>
    %236 = arith.mulf %231, %235 : vector<8x8xf32>
    %cst_77 = arith.constant dense<0.000000e+00> : vector<8x12xf32>
    %237 = tpu.matmul %236, %223, %cst_77 {dimension_numbers = #tpu.dot_dimension_numbers<[1], [0], [0], [1], [0, 0, 1, 1], [], []>} : vector<8x8xf32>, vector<8x12xf32>, vector<8x12xf32> -> vector<8x12xf32>
    %238 = vector.extract_strided_slice %33 {offsets = [0, 144], sizes = [8, 12], strides = [1, 1]} : vector<8x384xf32> to vector<8x12xf32>
    %239 = vector.extract_strided_slice %25 {offsets = [0, 144], sizes = [8, 12], strides = [1, 1]} : vector<8x384xf32> to vector<8x12xf32>
    %240 = vector.extract_strided_slice %19 {offsets = [0, 144], sizes = [8, 12], strides = [1, 1]} : vector<8x384xf32> to vector<8x12xf32>
    %241 = tpu.transpose %239, [1, 0] : vector<8x12xf32> -> vector<12x8xf32>
    %cst_78 = arith.constant dense<0.000000e+00> : vector<8x8xf32>
    %242 = tpu.matmul %238, %241, %cst_78 {dimension_numbers = #tpu.dot_dimension_numbers<[1], [0], [0], [1], [0, 0, 1, 1], [], []>} : vector<8x12xf32>, vector<12x8xf32>, vector<8x8xf32> -> vector<8x8xf32>
    %243 = arith.addf %242, %13 : vector<8x8xf32>
    %cst_79 = arith.constant dense<0xFF800000> : vector<8xf32>
    %244 = vector.multi_reduction <maximumf>, %243, %cst_79 [1] : vector<8x8xf32> to vector<8xf32>
    %245 = vector.shape_cast %244 : vector<8xf32> to vector<8x1xf32>
    %246 = vector.broadcast %245 : vector<8x1xf32> to vector<8x8xf32>
    %247 = arith.subf %243, %246 : vector<8x8xf32>
    %248 = math.exp %247 : vector<8x8xf32>
    %cst_80 = arith.constant dense<0.000000e+00> : vector<8xf32>
    %249 = vector.multi_reduction <add>, %248, %cst_80 [1] : vector<8x8xf32> to vector<8xf32>
    %250 = vector.shape_cast %249 : vector<8xf32> to vector<8x1xf32>
    %251 = tpu.reciprocal %250 {approx = true} : vector<8x1xf32> -> vector<8x1xf32>
    %252 = vector.broadcast %251 : vector<8x1xf32> to vector<8x8xf32>
    %253 = arith.mulf %248, %252 : vector<8x8xf32>
    %cst_81 = arith.constant dense<0.000000e+00> : vector<8x12xf32>
    %254 = tpu.matmul %253, %240, %cst_81 {dimension_numbers = #tpu.dot_dimension_numbers<[1], [0], [0], [1], [0, 0, 1, 1], [], []>} : vector<8x8xf32>, vector<8x12xf32>, vector<8x12xf32> -> vector<8x12xf32>
    %255 = vector.extract_strided_slice %33 {offsets = [0, 156], sizes = [8, 12], strides = [1, 1]} : vector<8x384xf32> to vector<8x12xf32>
    %256 = vector.extract_strided_slice %25 {offsets = [0, 156], sizes = [8, 12], strides = [1, 1]} : vector<8x384xf32> to vector<8x12xf32>
    %257 = vector.extract_strided_slice %19 {offsets = [0, 156], sizes = [8, 12], strides = [1, 1]} : vector<8x384xf32> to vector<8x12xf32>
    %258 = tpu.transpose %256, [1, 0] : vector<8x12xf32> -> vector<12x8xf32>
    %cst_82 = arith.constant dense<0.000000e+00> : vector<8x8xf32>
    %259 = tpu.matmul %255, %258, %cst_82 {dimension_numbers = #tpu.dot_dimension_numbers<[1], [0], [0], [1], [0, 0, 1, 1], [], []>} : vector<8x12xf32>, vector<12x8xf32>, vector<8x8xf32> -> vector<8x8xf32>
    %260 = arith.addf %259, %13 : vector<8x8xf32>
    %cst_83 = arith.constant dense<0xFF800000> : vector<8xf32>
    %261 = vector.multi_reduction <maximumf>, %260, %cst_83 [1] : vector<8x8xf32> to vector<8xf32>
    %262 = vector.shape_cast %261 : vector<8xf32> to vector<8x1xf32>
    %263 = vector.broadcast %262 : vector<8x1xf32> to vector<8x8xf32>
    %264 = arith.subf %260, %263 : vector<8x8xf32>
    %265 = math.exp %264 : vector<8x8xf32>
    %cst_84 = arith.constant dense<0.000000e+00> : vector<8xf32>
    %266 = vector.multi_reduction <add>, %265, %cst_84 [1] : vector<8x8xf32> to vector<8xf32>
    %267 = vector.shape_cast %266 : vector<8xf32> to vector<8x1xf32>
    %268 = tpu.reciprocal %267 {approx = true} : vector<8x1xf32> -> vector<8x1xf32>
    %269 = vector.broadcast %268 : vector<8x1xf32> to vector<8x8xf32>
    %270 = arith.mulf %265, %269 : vector<8x8xf32>
    %cst_85 = arith.constant dense<0.000000e+00> : vector<8x12xf32>
    %271 = tpu.matmul %270, %257, %cst_85 {dimension_numbers = #tpu.dot_dimension_numbers<[1], [0], [0], [1], [0, 0, 1, 1], [], []>} : vector<8x8xf32>, vector<8x12xf32>, vector<8x12xf32> -> vector<8x12xf32>
    %272 = vector.extract_strided_slice %33 {offsets = [0, 168], sizes = [8, 12], strides = [1, 1]} : vector<8x384xf32> to vector<8x12xf32>
    %273 = vector.extract_strided_slice %25 {offsets = [0, 168], sizes = [8, 12], strides = [1, 1]} : vector<8x384xf32> to vector<8x12xf32>
    %274 = vector.extract_strided_slice %19 {offsets = [0, 168], sizes = [8, 12], strides = [1, 1]} : vector<8x384xf32> to vector<8x12xf32>
    %275 = tpu.transpose %273, [1, 0] : vector<8x12xf32> -> vector<12x8xf32>
    %cst_86 = arith.constant dense<0.000000e+00> : vector<8x8xf32>
    %276 = tpu.matmul %272, %275, %cst_86 {dimension_numbers = #tpu.dot_dimension_numbers<[1], [0], [0], [1], [0, 0, 1, 1], [], []>} : vector<8x12xf32>, vector<12x8xf32>, vector<8x8xf32> -> vector<8x8xf32>
    %277 = arith.addf %276, %13 : vector<8x8xf32>
    %cst_87 = arith.constant dense<0xFF800000> : vector<8xf32>
    %278 = vector.multi_reduction <maximumf>, %277, %cst_87 [1] : vector<8x8xf32> to vector<8xf32>
    %279 = vector.shape_cast %278 : vector<8xf32> to vector<8x1xf32>
    %280 = vector.broadcast %279 : vector<8x1xf32> to vector<8x8xf32>
    %281 = arith.subf %277, %280 : vector<8x8xf32>
    %282 = math.exp %281 : vector<8x8xf32>
    %cst_88 = arith.constant dense<0.000000e+00> : vector<8xf32>
    %283 = vector.multi_reduction <add>, %282, %cst_88 [1] : vector<8x8xf32> to vector<8xf32>
    %284 = vector.shape_cast %283 : vector<8xf32> to vector<8x1xf32>
    %285 = tpu.reciprocal %284 {approx = true} : vector<8x1xf32> -> vector<8x1xf32>
    %286 = vector.broadcast %285 : vector<8x1xf32> to vector<8x8xf32>
    %287 = arith.mulf %282, %286 : vector<8x8xf32>
    %cst_89 = arith.constant dense<0.000000e+00> : vector<8x12xf32>
    %288 = tpu.matmul %287, %274, %cst_89 {dimension_numbers = #tpu.dot_dimension_numbers<[1], [0], [0], [1], [0, 0, 1, 1], [], []>} : vector<8x8xf32>, vector<8x12xf32>, vector<8x12xf32> -> vector<8x12xf32>
    %289 = vector.extract_strided_slice %33 {offsets = [0, 180], sizes = [8, 12], strides = [1, 1]} : vector<8x384xf32> to vector<8x12xf32>
    %290 = vector.extract_strided_slice %25 {offsets = [0, 180], sizes = [8, 12], strides = [1, 1]} : vector<8x384xf32> to vector<8x12xf32>
    %291 = vector.extract_strided_slice %19 {offsets = [0, 180], sizes = [8, 12], strides = [1, 1]} : vector<8x384xf32> to vector<8x12xf32>
    %292 = tpu.transpose %290, [1, 0] : vector<8x12xf32> -> vector<12x8xf32>
    %cst_90 = arith.constant dense<0.000000e+00> : vector<8x8xf32>
    %293 = tpu.matmul %289, %292, %cst_90 {dimension_numbers = #tpu.dot_dimension_numbers<[1], [0], [0], [1], [0, 0, 1, 1], [], []>} : vector<8x12xf32>, vector<12x8xf32>, vector<8x8xf32> -> vector<8x8xf32>
    %294 = arith.addf %293, %13 : vector<8x8xf32>
    %cst_91 = arith.constant dense<0xFF800000> : vector<8xf32>
    %295 = vector.multi_reduction <maximumf>, %294, %cst_91 [1] : vector<8x8xf32> to vector<8xf32>
    %296 = vector.shape_cast %295 : vector<8xf32> to vector<8x1xf32>
    %297 = vector.broadcast %296 : vector<8x1xf32> to vector<8x8xf32>
    %298 = arith.subf %294, %297 : vector<8x8xf32>
    %299 = math.exp %298 : vector<8x8xf32>
    %cst_92 = arith.constant dense<0.000000e+00> : vector<8xf32>
    %300 = vector.multi_reduction <add>, %299, %cst_92 [1] : vector<8x8xf32> to vector<8xf32>
    %301 = vector.shape_cast %300 : vector<8xf32> to vector<8x1xf32>
    %302 = tpu.reciprocal %301 {approx = true} : vector<8x1xf32> -> vector<8x1xf32>
    %303 = vector.broadcast %302 : vector<8x1xf32> to vector<8x8xf32>
    %304 = arith.mulf %299, %303 : vector<8x8xf32>
    %cst_93 = arith.constant dense<0.000000e+00> : vector<8x12xf32>
    %305 = tpu.matmul %304, %291, %cst_93 {dimension_numbers = #tpu.dot_dimension_numbers<[1], [0], [0], [1], [0, 0, 1, 1], [], []>} : vector<8x8xf32>, vector<8x12xf32>, vector<8x12xf32> -> vector<8x12xf32>
    %306 = vector.extract_strided_slice %33 {offsets = [0, 192], sizes = [8, 12], strides = [1, 1]} : vector<8x384xf32> to vector<8x12xf32>
    %307 = vector.extract_strided_slice %25 {offsets = [0, 192], sizes = [8, 12], strides = [1, 1]} : vector<8x384xf32> to vector<8x12xf32>
    %308 = vector.extract_strided_slice %19 {offsets = [0, 192], sizes = [8, 12], strides = [1, 1]} : vector<8x384xf32> to vector<8x12xf32>
    %309 = tpu.transpose %307, [1, 0] : vector<8x12xf32> -> vector<12x8xf32>
    %cst_94 = arith.constant dense<0.000000e+00> : vector<8x8xf32>
    %310 = tpu.matmul %306, %309, %cst_94 {dimension_numbers = #tpu.dot_dimension_numbers<[1], [0], [0], [1], [0, 0, 1, 1], [], []>} : vector<8x12xf32>, vector<12x8xf32>, vector<8x8xf32> -> vector<8x8xf32>
    %311 = arith.addf %310, %13 : vector<8x8xf32>
    %cst_95 = arith.constant dense<0xFF800000> : vector<8xf32>
    %312 = vector.multi_reduction <maximumf>, %311, %cst_95 [1] : vector<8x8xf32> to vector<8xf32>
    %313 = vector.shape_cast %312 : vector<8xf32> to vector<8x1xf32>
    %314 = vector.broadcast %313 : vector<8x1xf32> to vector<8x8xf32>
    %315 = arith.subf %311, %314 : vector<8x8xf32>
    %316 = math.exp %315 : vector<8x8xf32>
    %cst_96 = arith.constant dense<0.000000e+00> : vector<8xf32>
    %317 = vector.multi_reduction <add>, %316, %cst_96 [1] : vector<8x8xf32> to vector<8xf32>
    %318 = vector.shape_cast %317 : vector<8xf32> to vector<8x1xf32>
    %319 = tpu.reciprocal %318 {approx = true} : vector<8x1xf32> -> vector<8x1xf32>
    %320 = vector.broadcast %319 : vector<8x1xf32> to vector<8x8xf32>
    %321 = arith.mulf %316, %320 : vector<8x8xf32>
    %cst_97 = arith.constant dense<0.000000e+00> : vector<8x12xf32>
    %322 = tpu.matmul %321, %308, %cst_97 {dimension_numbers = #tpu.dot_dimension_numbers<[1], [0], [0], [1], [0, 0, 1, 1], [], []>} : vector<8x8xf32>, vector<8x12xf32>, vector<8x12xf32> -> vector<8x12xf32>
    %323 = vector.extract_strided_slice %33 {offsets = [0, 204], sizes = [8, 12], strides = [1, 1]} : vector<8x384xf32> to vector<8x12xf32>
    %324 = vector.extract_strided_slice %25 {offsets = [0, 204], sizes = [8, 12], strides = [1, 1]} : vector<8x384xf32> to vector<8x12xf32>
    %325 = vector.extract_strided_slice %19 {offsets = [0, 204], sizes = [8, 12], strides = [1, 1]} : vector<8x384xf32> to vector<8x12xf32>
    %326 = tpu.transpose %324, [1, 0] : vector<8x12xf32> -> vector<12x8xf32>
    %cst_98 = arith.constant dense<0.000000e+00> : vector<8x8xf32>
    %327 = tpu.matmul %323, %326, %cst_98 {dimension_numbers = #tpu.dot_dimension_numbers<[1], [0], [0], [1], [0, 0, 1, 1], [], []>} : vector<8x12xf32>, vector<12x8xf32>, vector<8x8xf32> -> vector<8x8xf32>
    %328 = arith.addf %327, %13 : vector<8x8xf32>
    %cst_99 = arith.constant dense<0xFF800000> : vector<8xf32>
    %329 = vector.multi_reduction <maximumf>, %328, %cst_99 [1] : vector<8x8xf32> to vector<8xf32>
    %330 = vector.shape_cast %329 : vector<8xf32> to vector<8x1xf32>
    %331 = vector.broadcast %330 : vector<8x1xf32> to vector<8x8xf32>
    %332 = arith.subf %328, %331 : vector<8x8xf32>
    %333 = math.exp %332 : vector<8x8xf32>
    %cst_100 = arith.constant dense<0.000000e+00> : vector<8xf32>
    %334 = vector.multi_reduction <add>, %333, %cst_100 [1] : vector<8x8xf32> to vector<8xf32>
    %335 = vector.shape_cast %334 : vector<8xf32> to vector<8x1xf32>
    %336 = tpu.reciprocal %335 {approx = true} : vector<8x1xf32> -> vector<8x1xf32>
    %337 = vector.broadcast %336 : vector<8x1xf32> to vector<8x8xf32>
    %338 = arith.mulf %333, %337 : vector<8x8xf32>
    %cst_101 = arith.constant dense<0.000000e+00> : vector<8x12xf32>
    %339 = tpu.matmul %338, %325, %cst_101 {dimension_numbers = #tpu.dot_dimension_numbers<[1], [0], [0], [1], [0, 0, 1, 1], [], []>} : vector<8x8xf32>, vector<8x12xf32>, vector<8x12xf32> -> vector<8x12xf32>
    %340 = vector.extract_strided_slice %33 {offsets = [0, 216], sizes = [8, 12], strides = [1, 1]} : vector<8x384xf32> to vector<8x12xf32>
    %341 = vector.extract_strided_slice %25 {offsets = [0, 216], sizes = [8, 12], strides = [1, 1]} : vector<8x384xf32> to vector<8x12xf32>
    %342 = vector.extract_strided_slice %19 {offsets = [0, 216], sizes = [8, 12], strides = [1, 1]} : vector<8x384xf32> to vector<8x12xf32>
    %343 = tpu.transpose %341, [1, 0] : vector<8x12xf32> -> vector<12x8xf32>
    %cst_102 = arith.constant dense<0.000000e+00> : vector<8x8xf32>
    %344 = tpu.matmul %340, %343, %cst_102 {dimension_numbers = #tpu.dot_dimension_numbers<[1], [0], [0], [1], [0, 0, 1, 1], [], []>} : vector<8x12xf32>, vector<12x8xf32>, vector<8x8xf32> -> vector<8x8xf32>
    %345 = arith.addf %344, %13 : vector<8x8xf32>
    %cst_103 = arith.constant dense<0xFF800000> : vector<8xf32>
    %346 = vector.multi_reduction <maximumf>, %345, %cst_103 [1] : vector<8x8xf32> to vector<8xf32>
    %347 = vector.shape_cast %346 : vector<8xf32> to vector<8x1xf32>
    %348 = vector.broadcast %347 : vector<8x1xf32> to vector<8x8xf32>
    %349 = arith.subf %345, %348 : vector<8x8xf32>
    %350 = math.exp %349 : vector<8x8xf32>
    %cst_104 = arith.constant dense<0.000000e+00> : vector<8xf32>
    %351 = vector.multi_reduction <add>, %350, %cst_104 [1] : vector<8x8xf32> to vector<8xf32>
    %352 = vector.shape_cast %351 : vector<8xf32> to vector<8x1xf32>
    %353 = tpu.reciprocal %352 {approx = true} : vector<8x1xf32> -> vector<8x1xf32>
    %354 = vector.broadcast %353 : vector<8x1xf32> to vector<8x8xf32>
    %355 = arith.mulf %350, %354 : vector<8x8xf32>
    %cst_105 = arith.constant dense<0.000000e+00> : vector<8x12xf32>
    %356 = tpu.matmul %355, %342, %cst_105 {dimension_numbers = #tpu.dot_dimension_numbers<[1], [0], [0], [1], [0, 0, 1, 1], [], []>} : vector<8x8xf32>, vector<8x12xf32>, vector<8x12xf32> -> vector<8x12xf32>
    %357 = vector.extract_strided_slice %33 {offsets = [0, 228], sizes = [8, 12], strides = [1, 1]} : vector<8x384xf32> to vector<8x12xf32>
    %358 = vector.extract_strided_slice %25 {offsets = [0, 228], sizes = [8, 12], strides = [1, 1]} : vector<8x384xf32> to vector<8x12xf32>
    %359 = vector.extract_strided_slice %19 {offsets = [0, 228], sizes = [8, 12], strides = [1, 1]} : vector<8x384xf32> to vector<8x12xf32>
    %360 = tpu.transpose %358, [1, 0] : vector<8x12xf32> -> vector<12x8xf32>
    %cst_106 = arith.constant dense<0.000000e+00> : vector<8x8xf32>
    %361 = tpu.matmul %357, %360, %cst_106 {dimension_numbers = #tpu.dot_dimension_numbers<[1], [0], [0], [1], [0, 0, 1, 1], [], []>} : vector<8x12xf32>, vector<12x8xf32>, vector<8x8xf32> -> vector<8x8xf32>
    %362 = arith.addf %361, %13 : vector<8x8xf32>
    %cst_107 = arith.constant dense<0xFF800000> : vector<8xf32>
    %363 = vector.multi_reduction <maximumf>, %362, %cst_107 [1] : vector<8x8xf32> to vector<8xf32>
    %364 = vector.shape_cast %363 : vector<8xf32> to vector<8x1xf32>
    %365 = vector.broadcast %364 : vector<8x1xf32> to vector<8x8xf32>
    %366 = arith.subf %362, %365 : vector<8x8xf32>
    %367 = math.exp %366 : vector<8x8xf32>
    %cst_108 = arith.constant dense<0.000000e+00> : vector<8xf32>
    %368 = vector.multi_reduction <add>, %367, %cst_108 [1] : vector<8x8xf32> to vector<8xf32>
    %369 = vector.shape_cast %368 : vector<8xf32> to vector<8x1xf32>
    %370 = tpu.reciprocal %369 {approx = true} : vector<8x1xf32> -> vector<8x1xf32>
    %371 = vector.broadcast %370 : vector<8x1xf32> to vector<8x8xf32>
    %372 = arith.mulf %367, %371 : vector<8x8xf32>
    %cst_109 = arith.constant dense<0.000000e+00> : vector<8x12xf32>
    %373 = tpu.matmul %372, %359, %cst_109 {dimension_numbers = #tpu.dot_dimension_numbers<[1], [0], [0], [1], [0, 0, 1, 1], [], []>} : vector<8x8xf32>, vector<8x12xf32>, vector<8x12xf32> -> vector<8x12xf32>
    %374 = vector.extract_strided_slice %33 {offsets = [0, 240], sizes = [8, 12], strides = [1, 1]} : vector<8x384xf32> to vector<8x12xf32>
    %375 = vector.extract_strided_slice %25 {offsets = [0, 240], sizes = [8, 12], strides = [1, 1]} : vector<8x384xf32> to vector<8x12xf32>
    %376 = vector.extract_strided_slice %19 {offsets = [0, 240], sizes = [8, 12], strides = [1, 1]} : vector<8x384xf32> to vector<8x12xf32>
    %377 = tpu.transpose %375, [1, 0] : vector<8x12xf32> -> vector<12x8xf32>
    %cst_110 = arith.constant dense<0.000000e+00> : vector<8x8xf32>
    %378 = tpu.matmul %374, %377, %cst_110 {dimension_numbers = #tpu.dot_dimension_numbers<[1], [0], [0], [1], [0, 0, 1, 1], [], []>} : vector<8x12xf32>, vector<12x8xf32>, vector<8x8xf32> -> vector<8x8xf32>
    %379 = arith.addf %378, %13 : vector<8x8xf32>
    %cst_111 = arith.constant dense<0xFF800000> : vector<8xf32>
    %380 = vector.multi_reduction <maximumf>, %379, %cst_111 [1] : vector<8x8xf32> to vector<8xf32>
    %381 = vector.shape_cast %380 : vector<8xf32> to vector<8x1xf32>
    %382 = vector.broadcast %381 : vector<8x1xf32> to vector<8x8xf32>
    %383 = arith.subf %379, %382 : vector<8x8xf32>
    %384 = math.exp %383 : vector<8x8xf32>
    %cst_112 = arith.constant dense<0.000000e+00> : vector<8xf32>
    %385 = vector.multi_reduction <add>, %384, %cst_112 [1] : vector<8x8xf32> to vector<8xf32>
    %386 = vector.shape_cast %385 : vector<8xf32> to vector<8x1xf32>
    %387 = tpu.reciprocal %386 {approx = true} : vector<8x1xf32> -> vector<8x1xf32>
    %388 = vector.broadcast %387 : vector<8x1xf32> to vector<8x8xf32>
    %389 = arith.mulf %384, %388 : vector<8x8xf32>
    %cst_113 = arith.constant dense<0.000000e+00> : vector<8x12xf32>
    %390 = tpu.matmul %389, %376, %cst_113 {dimension_numbers = #tpu.dot_dimension_numbers<[1], [0], [0], [1], [0, 0, 1, 1], [], []>} : vector<8x8xf32>, vector<8x12xf32>, vector<8x12xf32> -> vector<8x12xf32>
    %391 = vector.extract_strided_slice %33 {offsets = [0, 252], sizes = [8, 12], strides = [1, 1]} : vector<8x384xf32> to vector<8x12xf32>
    %392 = vector.extract_strided_slice %25 {offsets = [0, 252], sizes = [8, 12], strides = [1, 1]} : vector<8x384xf32> to vector<8x12xf32>
    %393 = vector.extract_strided_slice %19 {offsets = [0, 252], sizes = [8, 12], strides = [1, 1]} : vector<8x384xf32> to vector<8x12xf32>
    %394 = tpu.transpose %392, [1, 0] : vector<8x12xf32> -> vector<12x8xf32>
    %cst_114 = arith.constant dense<0.000000e+00> : vector<8x8xf32>
    %395 = tpu.matmul %391, %394, %cst_114 {dimension_numbers = #tpu.dot_dimension_numbers<[1], [0], [0], [1], [0, 0, 1, 1], [], []>} : vector<8x12xf32>, vector<12x8xf32>, vector<8x8xf32> -> vector<8x8xf32>
    %396 = arith.addf %395, %13 : vector<8x8xf32>
    %cst_115 = arith.constant dense<0xFF800000> : vector<8xf32>
    %397 = vector.multi_reduction <maximumf>, %396, %cst_115 [1] : vector<8x8xf32> to vector<8xf32>
    %398 = vector.shape_cast %397 : vector<8xf32> to vector<8x1xf32>
    %399 = vector.broadcast %398 : vector<8x1xf32> to vector<8x8xf32>
    %400 = arith.subf %396, %399 : vector<8x8xf32>
    %401 = math.exp %400 : vector<8x8xf32>
    %cst_116 = arith.constant dense<0.000000e+00> : vector<8xf32>
    %402 = vector.multi_reduction <add>, %401, %cst_116 [1] : vector<8x8xf32> to vector<8xf32>
    %403 = vector.shape_cast %402 : vector<8xf32> to vector<8x1xf32>
    %404 = tpu.reciprocal %403 {approx = true} : vector<8x1xf32> -> vector<8x1xf32>
    %405 = vector.broadcast %404 : vector<8x1xf32> to vector<8x8xf32>
    %406 = arith.mulf %401, %405 : vector<8x8xf32>
    %cst_117 = arith.constant dense<0.000000e+00> : vector<8x12xf32>
    %407 = tpu.matmul %406, %393, %cst_117 {dimension_numbers = #tpu.dot_dimension_numbers<[1], [0], [0], [1], [0, 0, 1, 1], [], []>} : vector<8x8xf32>, vector<8x12xf32>, vector<8x12xf32> -> vector<8x12xf32>
    %408 = vector.extract_strided_slice %33 {offsets = [0, 264], sizes = [8, 12], strides = [1, 1]} : vector<8x384xf32> to vector<8x12xf32>
    %409 = vector.extract_strided_slice %25 {offsets = [0, 264], sizes = [8, 12], strides = [1, 1]} : vector<8x384xf32> to vector<8x12xf32>
    %410 = vector.extract_strided_slice %19 {offsets = [0, 264], sizes = [8, 12], strides = [1, 1]} : vector<8x384xf32> to vector<8x12xf32>
    %411 = tpu.transpose %409, [1, 0] : vector<8x12xf32> -> vector<12x8xf32>
    %cst_118 = arith.constant dense<0.000000e+00> : vector<8x8xf32>
    %412 = tpu.matmul %408, %411, %cst_118 {dimension_numbers = #tpu.dot_dimension_numbers<[1], [0], [0], [1], [0, 0, 1, 1], [], []>} : vector<8x12xf32>, vector<12x8xf32>, vector<8x8xf32> -> vector<8x8xf32>
    %413 = arith.addf %412, %13 : vector<8x8xf32>
    %cst_119 = arith.constant dense<0xFF800000> : vector<8xf32>
    %414 = vector.multi_reduction <maximumf>, %413, %cst_119 [1] : vector<8x8xf32> to vector<8xf32>
    %415 = vector.shape_cast %414 : vector<8xf32> to vector<8x1xf32>
    %416 = vector.broadcast %415 : vector<8x1xf32> to vector<8x8xf32>
    %417 = arith.subf %413, %416 : vector<8x8xf32>
    %418 = math.exp %417 : vector<8x8xf32>
    %cst_120 = arith.constant dense<0.000000e+00> : vector<8xf32>
    %419 = vector.multi_reduction <add>, %418, %cst_120 [1] : vector<8x8xf32> to vector<8xf32>
    %420 = vector.shape_cast %419 : vector<8xf32> to vector<8x1xf32>
    %421 = tpu.reciprocal %420 {approx = true} : vector<8x1xf32> -> vector<8x1xf32>
    %422 = vector.broadcast %421 : vector<8x1xf32> to vector<8x8xf32>
    %423 = arith.mulf %418, %422 : vector<8x8xf32>
    %cst_121 = arith.constant dense<0.000000e+00> : vector<8x12xf32>
    %424 = tpu.matmul %423, %410, %cst_121 {dimension_numbers = #tpu.dot_dimension_numbers<[1], [0], [0], [1], [0, 0, 1, 1], [], []>} : vector<8x8xf32>, vector<8x12xf32>, vector<8x12xf32> -> vector<8x12xf32>
    %425 = vector.extract_strided_slice %33 {offsets = [0, 276], sizes = [8, 12], strides = [1, 1]} : vector<8x384xf32> to vector<8x12xf32>
    %426 = vector.extract_strided_slice %25 {offsets = [0, 276], sizes = [8, 12], strides = [1, 1]} : vector<8x384xf32> to vector<8x12xf32>
    %427 = vector.extract_strided_slice %19 {offsets = [0, 276], sizes = [8, 12], strides = [1, 1]} : vector<8x384xf32> to vector<8x12xf32>
    %428 = tpu.transpose %426, [1, 0] : vector<8x12xf32> -> vector<12x8xf32>
    %cst_122 = arith.constant dense<0.000000e+00> : vector<8x8xf32>
    %429 = tpu.matmul %425, %428, %cst_122 {dimension_numbers = #tpu.dot_dimension_numbers<[1], [0], [0], [1], [0, 0, 1, 1], [], []>} : vector<8x12xf32>, vector<12x8xf32>, vector<8x8xf32> -> vector<8x8xf32>
    %430 = arith.addf %429, %13 : vector<8x8xf32>
    %cst_123 = arith.constant dense<0xFF800000> : vector<8xf32>
    %431 = vector.multi_reduction <maximumf>, %430, %cst_123 [1] : vector<8x8xf32> to vector<8xf32>
    %432 = vector.shape_cast %431 : vector<8xf32> to vector<8x1xf32>
    %433 = vector.broadcast %432 : vector<8x1xf32> to vector<8x8xf32>
    %434 = arith.subf %430, %433 : vector<8x8xf32>
    %435 = math.exp %434 : vector<8x8xf32>
    %cst_124 = arith.constant dense<0.000000e+00> : vector<8xf32>
    %436 = vector.multi_reduction <add>, %435, %cst_124 [1] : vector<8x8xf32> to vector<8xf32>
    %437 = vector.shape_cast %436 : vector<8xf32> to vector<8x1xf32>
    %438 = tpu.reciprocal %437 {approx = true} : vector<8x1xf32> -> vector<8x1xf32>
    %439 = vector.broadcast %438 : vector<8x1xf32> to vector<8x8xf32>
    %440 = arith.mulf %435, %439 : vector<8x8xf32>
    %cst_125 = arith.constant dense<0.000000e+00> : vector<8x12xf32>
    %441 = tpu.matmul %440, %427, %cst_125 {dimension_numbers = #tpu.dot_dimension_numbers<[1], [0], [0], [1], [0, 0, 1, 1], [], []>} : vector<8x8xf32>, vector<8x12xf32>, vector<8x12xf32> -> vector<8x12xf32>
    %442 = vector.extract_strided_slice %33 {offsets = [0, 288], sizes = [8, 12], strides = [1, 1]} : vector<8x384xf32> to vector<8x12xf32>
    %443 = vector.extract_strided_slice %25 {offsets = [0, 288], sizes = [8, 12], strides = [1, 1]} : vector<8x384xf32> to vector<8x12xf32>
    %444 = vector.extract_strided_slice %19 {offsets = [0, 288], sizes = [8, 12], strides = [1, 1]} : vector<8x384xf32> to vector<8x12xf32>
    %445 = tpu.transpose %443, [1, 0] : vector<8x12xf32> -> vector<12x8xf32>
    %cst_126 = arith.constant dense<0.000000e+00> : vector<8x8xf32>
    %446 = tpu.matmul %442, %445, %cst_126 {dimension_numbers = #tpu.dot_dimension_numbers<[1], [0], [0], [1], [0, 0, 1, 1], [], []>} : vector<8x12xf32>, vector<12x8xf32>, vector<8x8xf32> -> vector<8x8xf32>
    %447 = arith.addf %446, %13 : vector<8x8xf32>
    %cst_127 = arith.constant dense<0xFF800000> : vector<8xf32>
    %448 = vector.multi_reduction <maximumf>, %447, %cst_127 [1] : vector<8x8xf32> to vector<8xf32>
    %449 = vector.shape_cast %448 : vector<8xf32> to vector<8x1xf32>
    %450 = vector.broadcast %449 : vector<8x1xf32> to vector<8x8xf32>
    %451 = arith.subf %447, %450 : vector<8x8xf32>
    %452 = math.exp %451 : vector<8x8xf32>
    %cst_128 = arith.constant dense<0.000000e+00> : vector<8xf32>
    %453 = vector.multi_reduction <add>, %452, %cst_128 [1] : vector<8x8xf32> to vector<8xf32>
    %454 = vector.shape_cast %453 : vector<8xf32> to vector<8x1xf32>
    %455 = tpu.reciprocal %454 {approx = true} : vector<8x1xf32> -> vector<8x1xf32>
    %456 = vector.broadcast %455 : vector<8x1xf32> to vector<8x8xf32>
    %457 = arith.mulf %452, %456 : vector<8x8xf32>
    %cst_129 = arith.constant dense<0.000000e+00> : vector<8x12xf32>
    %458 = tpu.matmul %457, %444, %cst_129 {dimension_numbers = #tpu.dot_dimension_numbers<[1], [0], [0], [1], [0, 0, 1, 1], [], []>} : vector<8x8xf32>, vector<8x12xf32>, vector<8x12xf32> -> vector<8x12xf32>
    %459 = vector.extract_strided_slice %33 {offsets = [0, 300], sizes = [8, 12], strides = [1, 1]} : vector<8x384xf32> to vector<8x12xf32>
    %460 = vector.extract_strided_slice %25 {offsets = [0, 300], sizes = [8, 12], strides = [1, 1]} : vector<8x384xf32> to vector<8x12xf32>
    %461 = vector.extract_strided_slice %19 {offsets = [0, 300], sizes = [8, 12], strides = [1, 1]} : vector<8x384xf32> to vector<8x12xf32>
    %462 = tpu.transpose %460, [1, 0] : vector<8x12xf32> -> vector<12x8xf32>
    %cst_130 = arith.constant dense<0.000000e+00> : vector<8x8xf32>
    %463 = tpu.matmul %459, %462, %cst_130 {dimension_numbers = #tpu.dot_dimension_numbers<[1], [0], [0], [1], [0, 0, 1, 1], [], []>} : vector<8x12xf32>, vector<12x8xf32>, vector<8x8xf32> -> vector<8x8xf32>
    %464 = arith.addf %463, %13 : vector<8x8xf32>
    %cst_131 = arith.constant dense<0xFF800000> : vector<8xf32>
    %465 = vector.multi_reduction <maximumf>, %464, %cst_131 [1] : vector<8x8xf32> to vector<8xf32>
    %466 = vector.shape_cast %465 : vector<8xf32> to vector<8x1xf32>
    %467 = vector.broadcast %466 : vector<8x1xf32> to vector<8x8xf32>
    %468 = arith.subf %464, %467 : vector<8x8xf32>
    %469 = math.exp %468 : vector<8x8xf32>
    %cst_132 = arith.constant dense<0.000000e+00> : vector<8xf32>
    %470 = vector.multi_reduction <add>, %469, %cst_132 [1] : vector<8x8xf32> to vector<8xf32>
    %471 = vector.shape_cast %470 : vector<8xf32> to vector<8x1xf32>
    %472 = tpu.reciprocal %471 {approx = true} : vector<8x1xf32> -> vector<8x1xf32>
    %473 = vector.broadcast %472 : vector<8x1xf32> to vector<8x8xf32>
    %474 = arith.mulf %469, %473 : vector<8x8xf32>
    %cst_133 = arith.constant dense<0.000000e+00> : vector<8x12xf32>
    %475 = tpu.matmul %474, %461, %cst_133 {dimension_numbers = #tpu.dot_dimension_numbers<[1], [0], [0], [1], [0, 0, 1, 1], [], []>} : vector<8x8xf32>, vector<8x12xf32>, vector<8x12xf32> -> vector<8x12xf32>
    %476 = vector.extract_strided_slice %33 {offsets = [0, 312], sizes = [8, 12], strides = [1, 1]} : vector<8x384xf32> to vector<8x12xf32>
    %477 = vector.extract_strided_slice %25 {offsets = [0, 312], sizes = [8, 12], strides = [1, 1]} : vector<8x384xf32> to vector<8x12xf32>
    %478 = vector.extract_strided_slice %19 {offsets = [0, 312], sizes = [8, 12], strides = [1, 1]} : vector<8x384xf32> to vector<8x12xf32>
    %479 = tpu.transpose %477, [1, 0] : vector<8x12xf32> -> vector<12x8xf32>
    %cst_134 = arith.constant dense<0.000000e+00> : vector<8x8xf32>
    %480 = tpu.matmul %476, %479, %cst_134 {dimension_numbers = #tpu.dot_dimension_numbers<[1], [0], [0], [1], [0, 0, 1, 1], [], []>} : vector<8x12xf32>, vector<12x8xf32>, vector<8x8xf32> -> vector<8x8xf32>
    %481 = arith.addf %480, %13 : vector<8x8xf32>
    %cst_135 = arith.constant dense<0xFF800000> : vector<8xf32>
    %482 = vector.multi_reduction <maximumf>, %481, %cst_135 [1] : vector<8x8xf32> to vector<8xf32>
    %483 = vector.shape_cast %482 : vector<8xf32> to vector<8x1xf32>
    %484 = vector.broadcast %483 : vector<8x1xf32> to vector<8x8xf32>
    %485 = arith.subf %481, %484 : vector<8x8xf32>
    %486 = math.exp %485 : vector<8x8xf32>
    %cst_136 = arith.constant dense<0.000000e+00> : vector<8xf32>
    %487 = vector.multi_reduction <add>, %486, %cst_136 [1] : vector<8x8xf32> to vector<8xf32>
    %488 = vector.shape_cast %487 : vector<8xf32> to vector<8x1xf32>
    %489 = tpu.reciprocal %488 {approx = true} : vector<8x1xf32> -> vector<8x1xf32>
    %490 = vector.broadcast %489 : vector<8x1xf32> to vector<8x8xf32>
    %491 = arith.mulf %486, %490 : vector<8x8xf32>
    %cst_137 = arith.constant dense<0.000000e+00> : vector<8x12xf32>
    %492 = tpu.matmul %491, %478, %cst_137 {dimension_numbers = #tpu.dot_dimension_numbers<[1], [0], [0], [1], [0, 0, 1, 1], [], []>} : vector<8x8xf32>, vector<8x12xf32>, vector<8x12xf32> -> vector<8x12xf32>
    %493 = vector.extract_strided_slice %33 {offsets = [0, 324], sizes = [8, 12], strides = [1, 1]} : vector<8x384xf32> to vector<8x12xf32>
    %494 = vector.extract_strided_slice %25 {offsets = [0, 324], sizes = [8, 12], strides = [1, 1]} : vector<8x384xf32> to vector<8x12xf32>
    %495 = vector.extract_strided_slice %19 {offsets = [0, 324], sizes = [8, 12], strides = [1, 1]} : vector<8x384xf32> to vector<8x12xf32>
    %496 = tpu.transpose %494, [1, 0] : vector<8x12xf32> -> vector<12x8xf32>
    %cst_138 = arith.constant dense<0.000000e+00> : vector<8x8xf32>
    %497 = tpu.matmul %493, %496, %cst_138 {dimension_numbers = #tpu.dot_dimension_numbers<[1], [0], [0], [1], [0, 0, 1, 1], [], []>} : vector<8x12xf32>, vector<12x8xf32>, vector<8x8xf32> -> vector<8x8xf32>
    %498 = arith.addf %497, %13 : vector<8x8xf32>
    %cst_139 = arith.constant dense<0xFF800000> : vector<8xf32>
    %499 = vector.multi_reduction <maximumf>, %498, %cst_139 [1] : vector<8x8xf32> to vector<8xf32>
    %500 = vector.shape_cast %499 : vector<8xf32> to vector<8x1xf32>
    %501 = vector.broadcast %500 : vector<8x1xf32> to vector<8x8xf32>
    %502 = arith.subf %498, %501 : vector<8x8xf32>
    %503 = math.exp %502 : vector<8x8xf32>
    %cst_140 = arith.constant dense<0.000000e+00> : vector<8xf32>
    %504 = vector.multi_reduction <add>, %503, %cst_140 [1] : vector<8x8xf32> to vector<8xf32>
    %505 = vector.shape_cast %504 : vector<8xf32> to vector<8x1xf32>
    %506 = tpu.reciprocal %505 {approx = true} : vector<8x1xf32> -> vector<8x1xf32>
    %507 = vector.broadcast %506 : vector<8x1xf32> to vector<8x8xf32>
    %508 = arith.mulf %503, %507 : vector<8x8xf32>
    %cst_141 = arith.constant dense<0.000000e+00> : vector<8x12xf32>
    %509 = tpu.matmul %508, %495, %cst_141 {dimension_numbers = #tpu.dot_dimension_numbers<[1], [0], [0], [1], [0, 0, 1, 1], [], []>} : vector<8x8xf32>, vector<8x12xf32>, vector<8x12xf32> -> vector<8x12xf32>
    %510 = vector.extract_strided_slice %33 {offsets = [0, 336], sizes = [8, 12], strides = [1, 1]} : vector<8x384xf32> to vector<8x12xf32>
    %511 = vector.extract_strided_slice %25 {offsets = [0, 336], sizes = [8, 12], strides = [1, 1]} : vector<8x384xf32> to vector<8x12xf32>
    %512 = vector.extract_strided_slice %19 {offsets = [0, 336], sizes = [8, 12], strides = [1, 1]} : vector<8x384xf32> to vector<8x12xf32>
    %513 = tpu.transpose %511, [1, 0] : vector<8x12xf32> -> vector<12x8xf32>
    %cst_142 = arith.constant dense<0.000000e+00> : vector<8x8xf32>
    %514 = tpu.matmul %510, %513, %cst_142 {dimension_numbers = #tpu.dot_dimension_numbers<[1], [0], [0], [1], [0, 0, 1, 1], [], []>} : vector<8x12xf32>, vector<12x8xf32>, vector<8x8xf32> -> vector<8x8xf32>
    %515 = arith.addf %514, %13 : vector<8x8xf32>
    %cst_143 = arith.constant dense<0xFF800000> : vector<8xf32>
    %516 = vector.multi_reduction <maximumf>, %515, %cst_143 [1] : vector<8x8xf32> to vector<8xf32>
    %517 = vector.shape_cast %516 : vector<8xf32> to vector<8x1xf32>
    %518 = vector.broadcast %517 : vector<8x1xf32> to vector<8x8xf32>
    %519 = arith.subf %515, %518 : vector<8x8xf32>
    %520 = math.exp %519 : vector<8x8xf32>
    %cst_144 = arith.constant dense<0.000000e+00> : vector<8xf32>
    %521 = vector.multi_reduction <add>, %520, %cst_144 [1] : vector<8x8xf32> to vector<8xf32>
    %522 = vector.shape_cast %521 : vector<8xf32> to vector<8x1xf32>
    %523 = tpu.reciprocal %522 {approx = true} : vector<8x1xf32> -> vector<8x1xf32>
    %524 = vector.broadcast %523 : vector<8x1xf32> to vector<8x8xf32>
    %525 = arith.mulf %520, %524 : vector<8x8xf32>
    %cst_145 = arith.constant dense<0.000000e+00> : vector<8x12xf32>
    %526 = tpu.matmul %525, %512, %cst_145 {dimension_numbers = #tpu.dot_dimension_numbers<[1], [0], [0], [1], [0, 0, 1, 1], [], []>} : vector<8x8xf32>, vector<8x12xf32>, vector<8x12xf32> -> vector<8x12xf32>
    %527 = vector.extract_strided_slice %33 {offsets = [0, 348], sizes = [8, 12], strides = [1, 1]} : vector<8x384xf32> to vector<8x12xf32>
    %528 = vector.extract_strided_slice %25 {offsets = [0, 348], sizes = [8, 12], strides = [1, 1]} : vector<8x384xf32> to vector<8x12xf32>
    %529 = vector.extract_strided_slice %19 {offsets = [0, 348], sizes = [8, 12], strides = [1, 1]} : vector<8x384xf32> to vector<8x12xf32>
    %530 = tpu.transpose %528, [1, 0] : vector<8x12xf32> -> vector<12x8xf32>
    %cst_146 = arith.constant dense<0.000000e+00> : vector<8x8xf32>
    %531 = tpu.matmul %527, %530, %cst_146 {dimension_numbers = #tpu.dot_dimension_numbers<[1], [0], [0], [1], [0, 0, 1, 1], [], []>} : vector<8x12xf32>, vector<12x8xf32>, vector<8x8xf32> -> vector<8x8xf32>
    %532 = arith.addf %531, %13 : vector<8x8xf32>
    %cst_147 = arith.constant dense<0xFF800000> : vector<8xf32>
    %533 = vector.multi_reduction <maximumf>, %532, %cst_147 [1] : vector<8x8xf32> to vector<8xf32>
    %534 = vector.shape_cast %533 : vector<8xf32> to vector<8x1xf32>
    %535 = vector.broadcast %534 : vector<8x1xf32> to vector<8x8xf32>
    %536 = arith.subf %532, %535 : vector<8x8xf32>
    %537 = math.exp %536 : vector<8x8xf32>
    %cst_148 = arith.constant dense<0.000000e+00> : vector<8xf32>
    %538 = vector.multi_reduction <add>, %537, %cst_148 [1] : vector<8x8xf32> to vector<8xf32>
    %539 = vector.shape_cast %538 : vector<8xf32> to vector<8x1xf32>
    %540 = tpu.reciprocal %539 {approx = true} : vector<8x1xf32> -> vector<8x1xf32>
    %541 = vector.broadcast %540 : vector<8x1xf32> to vector<8x8xf32>
    %542 = arith.mulf %537, %541 : vector<8x8xf32>
    %cst_149 = arith.constant dense<0.000000e+00> : vector<8x12xf32>
    %543 = tpu.matmul %542, %529, %cst_149 {dimension_numbers = #tpu.dot_dimension_numbers<[1], [0], [0], [1], [0, 0, 1, 1], [], []>} : vector<8x8xf32>, vector<8x12xf32>, vector<8x12xf32> -> vector<8x12xf32>
    %544 = vector.extract_strided_slice %33 {offsets = [0, 360], sizes = [8, 12], strides = [1, 1]} : vector<8x384xf32> to vector<8x12xf32>
    %545 = vector.extract_strided_slice %25 {offsets = [0, 360], sizes = [8, 12], strides = [1, 1]} : vector<8x384xf32> to vector<8x12xf32>
    %546 = vector.extract_strided_slice %19 {offsets = [0, 360], sizes = [8, 12], strides = [1, 1]} : vector<8x384xf32> to vector<8x12xf32>
    %547 = tpu.transpose %545, [1, 0] : vector<8x12xf32> -> vector<12x8xf32>
    %cst_150 = arith.constant dense<0.000000e+00> : vector<8x8xf32>
    %548 = tpu.matmul %544, %547, %cst_150 {dimension_numbers = #tpu.dot_dimension_numbers<[1], [0], [0], [1], [0, 0, 1, 1], [], []>} : vector<8x12xf32>, vector<12x8xf32>, vector<8x8xf32> -> vector<8x8xf32>
    %549 = arith.addf %548, %13 : vector<8x8xf32>
    %cst_151 = arith.constant dense<0xFF800000> : vector<8xf32>
    %550 = vector.multi_reduction <maximumf>, %549, %cst_151 [1] : vector<8x8xf32> to vector<8xf32>
    %551 = vector.shape_cast %550 : vector<8xf32> to vector<8x1xf32>
    %552 = vector.broadcast %551 : vector<8x1xf32> to vector<8x8xf32>
    %553 = arith.subf %549, %552 : vector<8x8xf32>
    %554 = math.exp %553 : vector<8x8xf32>
    %cst_152 = arith.constant dense<0.000000e+00> : vector<8xf32>
    %555 = vector.multi_reduction <add>, %554, %cst_152 [1] : vector<8x8xf32> to vector<8xf32>
    %556 = vector.shape_cast %555 : vector<8xf32> to vector<8x1xf32>
    %557 = tpu.reciprocal %556 {approx = true} : vector<8x1xf32> -> vector<8x1xf32>
    %558 = vector.broadcast %557 : vector<8x1xf32> to vector<8x8xf32>
    %559 = arith.mulf %554, %558 : vector<8x8xf32>
    %cst_153 = arith.constant dense<0.000000e+00> : vector<8x12xf32>
    %560 = tpu.matmul %559, %546, %cst_153 {dimension_numbers = #tpu.dot_dimension_numbers<[1], [0], [0], [1], [0, 0, 1, 1], [], []>} : vector<8x8xf32>, vector<8x12xf32>, vector<8x12xf32> -> vector<8x12xf32>
    %561 = vector.extract_strided_slice %33 {offsets = [0, 372], sizes = [8, 12], strides = [1, 1]} : vector<8x384xf32> to vector<8x12xf32>
    %562 = vector.extract_strided_slice %25 {offsets = [0, 372], sizes = [8, 12], strides = [1, 1]} : vector<8x384xf32> to vector<8x12xf32>
    %563 = vector.extract_strided_slice %19 {offsets = [0, 372], sizes = [8, 12], strides = [1, 1]} : vector<8x384xf32> to vector<8x12xf32>
    %564 = tpu.transpose %562, [1, 0] : vector<8x12xf32> -> vector<12x8xf32>
    %cst_154 = arith.constant dense<0.000000e+00> : vector<8x8xf32>
    %565 = tpu.matmul %561, %564, %cst_154 {dimension_numbers = #tpu.dot_dimension_numbers<[1], [0], [0], [1], [0, 0, 1, 1], [], []>} : vector<8x12xf32>, vector<12x8xf32>, vector<8x8xf32> -> vector<8x8xf32>
    %566 = arith.addf %565, %13 : vector<8x8xf32>
    %cst_155 = arith.constant dense<0xFF800000> : vector<8xf32>
    %567 = vector.multi_reduction <maximumf>, %566, %cst_155 [1] : vector<8x8xf32> to vector<8xf32>
    %568 = vector.shape_cast %567 : vector<8xf32> to vector<8x1xf32>
    %569 = vector.broadcast %568 : vector<8x1xf32> to vector<8x8xf32>
    %570 = arith.subf %566, %569 : vector<8x8xf32>
    %571 = math.exp %570 : vector<8x8xf32>
    %cst_156 = arith.constant dense<0.000000e+00> : vector<8xf32>
    %572 = vector.multi_reduction <add>, %571, %cst_156 [1] : vector<8x8xf32> to vector<8xf32>
    %573 = vector.shape_cast %572 : vector<8xf32> to vector<8x1xf32>
    %574 = tpu.reciprocal %573 {approx = true} : vector<8x1xf32> -> vector<8x1xf32>
    %575 = vector.broadcast %574 : vector<8x1xf32> to vector<8x8xf32>
    %576 = arith.mulf %571, %575 : vector<8x8xf32>
    %cst_157 = arith.constant dense<0.000000e+00> : vector<8x12xf32>
    %577 = tpu.matmul %576, %563, %cst_157 {dimension_numbers = #tpu.dot_dimension_numbers<[1], [0], [0], [1], [0, 0, 1, 1], [], []>} : vector<8x8xf32>, vector<8x12xf32>, vector<8x12xf32> -> vector<8x12xf32>
    %578 = tpu.concatenate %50, %67, %84, %101, %118, %135, %152, %169, %186, %203, %220, %237, %254, %271, %288, %305 in 1 : vector<8x12xf32>, vector<8x12xf32>, vector<8x12xf32>, vector<8x12xf32>, vector<8x12xf32>, vector<8x12xf32>, vector<8x12xf32>, vector<8x12xf32>, vector<8x12xf32>, vector<8x12xf32>, vector<8x12xf32>, vector<8x12xf32>, vector<8x12xf32>, vector<8x12xf32>, vector<8x12xf32>, vector<8x12xf32> -> vector<8x192xf32>
    %579 = tpu.concatenate %322, %339, %356, %373, %390, %407, %424, %441, %458, %475, %492, %509, %526, %543, %560, %577 in 1 : vector<8x12xf32>, vector<8x12xf32>, vector<8x12xf32>, vector<8x12xf32>, vector<8x12xf32>, vector<8x12xf32>, vector<8x12xf32>, vector<8x12xf32>, vector<8x12xf32>, vector<8x12xf32>, vector<8x12xf32>, vector<8x12xf32>, vector<8x12xf32>, vector<8x12xf32>, vector<8x12xf32>, vector<8x12xf32> -> vector<8x192xf32>
    %580 = tpu.concatenate %578, %579 in 1 : vector<8x192xf32>, vector<8x192xf32> -> vector<8x384xf32>
    %581 = arith.truncf %580 : vector<8x384xf32> to vector<8x384xbf16>
    %c0_158 = arith.constant 0 : index
    %c0_159 = arith.constant 0 : index
    %582 = vector.load %arg12[%c0_158, %c0_159] : memref<384x384xbf16, #tpu.memory_space<vmem>>, vector<384x384xbf16>
    %cst_160 = arith.constant dense<0.000000e+00> : vector<8x384xf32>
    %583 = tpu.matmul %581, %582, %cst_160 {dimension_numbers = #tpu.dot_dimension_numbers<[1], [0], [0], [1], [0, 0, 1, 1], [], []>} : vector<8x384xbf16>, vector<384x384xbf16>, vector<8x384xf32> -> vector<8x384xf32>
    %c0_161 = arith.constant 0 : index
    %c0_162 = arith.constant 0 : index
    %584 = vector.load %arg13[%c0_161, %c0_162] : memref<1x384xf32, #tpu.memory_space<vmem>>, vector<1x384xf32>
    %585 = vector.broadcast %584 : vector<1x384xf32> to vector<8x384xf32>
    %586 = arith.addf %583, %585 : vector<8x384xf32>
    %587 = arith.addf %5, %586 : vector<8x384xf32>
    %cst_163 = arith.constant dense<0.000000e+00> : vector<8xf32>
    %588 = vector.multi_reduction <add>, %587, %cst_163 [1] : vector<8x384xf32> to vector<8xf32>
    %589 = vector.shape_cast %588 : vector<8xf32> to vector<8x1xf32>
    %cst_164 = arith.constant 3.840000e+02 : f32
    %590 = vector.broadcast %cst_164 : f32 to vector<8x1xf32>
    %591 = arith.divf %589, %590 : vector<8x1xf32>
    %592 = vector.broadcast %591 : vector<8x1xf32> to vector<8x384xf32>
    %593 = arith.subf %587, %592 : vector<8x384xf32>
    %594 = arith.mulf %593, %593 : vector<8x384xf32>
    %cst_165 = arith.constant dense<0.000000e+00> : vector<8xf32>
    %595 = vector.multi_reduction <add>, %594, %cst_165 [1] : vector<8x384xf32> to vector<8xf32>
    %596 = vector.shape_cast %595 : vector<8xf32> to vector<8x1xf32>
    %cst_166 = arith.constant 3.840000e+02 : f32
    %597 = vector.broadcast %cst_166 : f32 to vector<8x1xf32>
    %598 = arith.divf %596, %597 : vector<8x1xf32>
    %599 = vector.broadcast %591 : vector<8x1xf32> to vector<8x384xf32>
    %600 = arith.subf %587, %599 : vector<8x384xf32>
    %cst_167 = arith.constant 9.99999974E-6 : f32
    %601 = vector.broadcast %cst_167 : f32 to vector<8x1xf32>
    %602 = arith.addf %598, %601 : vector<8x1xf32>
    %603 = math.rsqrt %602 : vector<8x1xf32>
    %604 = vector.broadcast %603 : vector<8x1xf32> to vector<8x384xf32>
    %605 = arith.mulf %600, %604 : vector<8x384xf32>
    %c0_168 = arith.constant 0 : index
    %c0_169 = arith.constant 0 : index
    %606 = vector.load %arg14[%c0_168, %c0_169] : memref<1x384xf32, #tpu.memory_space<vmem>>, vector<1x384xf32>
    %607 = vector.broadcast %606 : vector<1x384xf32> to vector<8x384xf32>
    %608 = arith.mulf %605, %607 : vector<8x384xf32>
    %c0_170 = arith.constant 0 : index
    %c0_171 = arith.constant 0 : index
    %609 = vector.load %arg15[%c0_170, %c0_171] : memref<1x384xf32, #tpu.memory_space<vmem>>, vector<1x384xf32>
    %610 = vector.broadcast %609 : vector<1x384xf32> to vector<8x384xf32>
    %611 = arith.addf %608, %610 : vector<8x384xf32>
    %612 = arith.truncf %611 : vector<8x384xf32> to vector<8x384xbf16>
    %c0_172 = arith.constant 0 : index
    %c0_173 = arith.constant 0 : index
    %613 = vector.load %arg18[%c0_172, %c0_173] : memref<384x64xbf16, #tpu.memory_space<vmem>>, vector<384x64xbf16>
    %cst_174 = arith.constant dense<0.000000e+00> : vector<8x64xf32>
    %614 = tpu.matmul %612, %613, %cst_174 {dimension_numbers = #tpu.dot_dimension_numbers<[1], [0], [0], [1], [0, 0, 1, 1], [], []>} : vector<8x384xbf16>, vector<384x64xbf16>, vector<8x64xf32> -> vector<8x64xf32>
    %c0_175 = arith.constant 0 : index
    %c0_176 = arith.constant 0 : index
    %615 = vector.load %arg19[%c0_175, %c0_176] : memref<1x64xf32, #tpu.memory_space<vmem>>, vector<1x64xf32>
    %616 = vector.broadcast %615 : vector<1x64xf32> to vector<8x64xf32>
    %617 = arith.addf %614, %616 : vector<8x64xf32>
    %cst_177 = arith.constant 0.000000e+00 : f32
    %618 = vector.broadcast %cst_177 : f32 to vector<8x64xf32>
    %619 = arith.maximumf %617, %618 : vector<8x64xf32>
    %620 = arith.truncf %619 : vector<8x64xf32> to vector<8x64xbf16>
    %c0_178 = arith.constant 0 : index
    %c0_179 = arith.constant 0 : index
    %621 = vector.load %arg20[%c0_178, %c0_179] : memref<64x384xbf16, #tpu.memory_space<vmem>>, vector<64x384xbf16>
    %cst_180 = arith.constant dense<0.000000e+00> : vector<8x384xf32>
    %622 = tpu.matmul %620, %621, %cst_180 {dimension_numbers = #tpu.dot_dimension_numbers<[1], [0], [0], [1], [0, 0, 1, 1], [], []>} : vector<8x64xbf16>, vector<64x384xbf16>, vector<8x384xf32> -> vector<8x384xf32>
    %c0_181 = arith.constant 0 : index
    %c0_182 = arith.constant 0 : index
    %623 = vector.load %arg21[%c0_181, %c0_182] : memref<1x384xf32, #tpu.memory_space<vmem>>, vector<1x384xf32>
    %624 = vector.broadcast %623 : vector<1x384xf32> to vector<8x384xf32>
    %625 = arith.addf %622, %624 : vector<8x384xf32>
    %626 = arith.addf %611, %625 : vector<8x384xf32>
    %cst_183 = arith.constant dense<0.000000e+00> : vector<8xf32>
    %627 = vector.multi_reduction <add>, %626, %cst_183 [1] : vector<8x384xf32> to vector<8xf32>
    %628 = vector.shape_cast %627 : vector<8xf32> to vector<8x1xf32>
    %cst_184 = arith.constant 3.840000e+02 : f32
    %629 = vector.broadcast %cst_184 : f32 to vector<8x1xf32>
    %630 = arith.divf %628, %629 : vector<8x1xf32>
    %631 = vector.broadcast %630 : vector<8x1xf32> to vector<8x384xf32>
    %632 = arith.subf %626, %631 : vector<8x384xf32>
    %633 = arith.mulf %632, %632 : vector<8x384xf32>
    %cst_185 = arith.constant dense<0.000000e+00> : vector<8xf32>
    %634 = vector.multi_reduction <add>, %633, %cst_185 [1] : vector<8x384xf32> to vector<8xf32>
    %635 = vector.shape_cast %634 : vector<8xf32> to vector<8x1xf32>
    %cst_186 = arith.constant 3.840000e+02 : f32
    %636 = vector.broadcast %cst_186 : f32 to vector<8x1xf32>
    %637 = arith.divf %635, %636 : vector<8x1xf32>
    %638 = vector.broadcast %630 : vector<8x1xf32> to vector<8x384xf32>
    %639 = arith.subf %626, %638 : vector<8x384xf32>
    %cst_187 = arith.constant 9.99999974E-6 : f32
    %640 = vector.broadcast %cst_187 : f32 to vector<8x1xf32>
    %641 = arith.addf %637, %640 : vector<8x1xf32>
    %642 = math.rsqrt %641 : vector<8x1xf32>
    %643 = vector.broadcast %642 : vector<8x1xf32> to vector<8x384xf32>
    %644 = arith.mulf %639, %643 : vector<8x384xf32>
    %c0_188 = arith.constant 0 : index
    %c0_189 = arith.constant 0 : index
    %645 = vector.load %arg16[%c0_188, %c0_189] : memref<1x384xf32, #tpu.memory_space<vmem>>, vector<1x384xf32>
    %646 = vector.broadcast %645 : vector<1x384xf32> to vector<8x384xf32>
    %647 = arith.mulf %644, %646 : vector<8x384xf32>
    %c0_190 = arith.constant 0 : index
    %c0_191 = arith.constant 0 : index
    %648 = vector.load %arg17[%c0_190, %c0_191] : memref<1x384xf32, #tpu.memory_space<vmem>>, vector<1x384xf32>
    %649 = vector.broadcast %648 : vector<1x384xf32> to vector<8x384xf32>
    %650 = arith.addf %647, %649 : vector<8x384xf32>
    %c0_192 = arith.constant 0 : index
    %c0_193 = arith.constant 0 : index
    %c0_194 = arith.constant 0 : index
    %651 = vector.load %arg22[%c0_192, %c0_193, %c0_194] : memref<1x8x384xf32, #tpu.memory_space<vmem>>, vector<1x8x384xf32>
    %652 = vector.shape_cast %651 : vector<1x8x384xf32> to vector<8x384xf32>
    %653 = vector.shape_cast %650 : vector<8x384xf32> to vector<1x8x384xf32>
    tpu.vector_store %arg22[%c0_192, %c0_193, %c0_194], %653 {strides = array<i32>} : memref<1x8x384xf32, #tpu.memory_space<vmem>>, vector<1x8x384xf32>,
    return
  }
  func.func @transform_0(%arg0: i32, %arg1: i32) -> (i32, i32, i32) {
    %c0_i32 = arith.constant 0 : i32
    %c0_i32_0 = arith.constant 0 : i32
    %c0_i32_1 = arith.constant 0 : i32
    return %arg0, %c0_i32, %c0_i32_0 : i32, i32, i32
  }
  func.func @transform_1(%arg0: i32, %arg1: i32) -> (i32, i32, i32) {
    %c0_i32 = arith.constant 0 : i32
    %c0_i32_0 = arith.constant 0 : i32
    %c0_i32_1 = arith.constant 0 : i32
    return %arg0, %c0_i32, %c0_i32_0 : i32, i32, i32
  }
  func.func @transform_2(%arg0: i32, %arg1: i32) -> (i32, i32, i32) {
    %c0_i32 = arith.constant 0 : i32
    %c0_i32_0 = arith.constant 0 : i32
    return %arg0, %arg1, %c0_i32 : i32, i32, i32
  }
  func.func @transform_3(%arg0: i32, %arg1: i32) -> (i32, i32, i32, i32) {
    %c0_i32 = arith.constant 0 : i32
    %c0_i32_0 = arith.constant 0 : i32
    %c0_i32_1 = arith.constant 0 : i32
    return %arg0, %c0_i32, %arg1, %c0_i32_0 : i32, i32, i32, i32
  }
  func.func @transform_4(%arg0: i32, %arg1: i32) -> (i32, i32) {
    %c0_i32 = arith.constant 0 : i32
    %c0_i32_0 = arith.constant 0 : i32
    %c0_i32_1 = arith.constant 0 : i32
    return %c0_i32, %c0_i32_0 : i32, i32
  }
  func.func @transform_5(%arg0: i32, %arg1: i32) -> (i32, i32) {
    %c0_i32 = arith.constant 0 : i32
    %c0_i32_0 = arith.constant 0 : i32
    %c0_i32_1 = arith.constant 0 : i32
    return %c0_i32, %c0_i32_0 : i32, i32
  }
  func.func @transform_6(%arg0: i32, %arg1: i32) -> (i32, i32) {
    %c0_i32 = arith.constant 0 : i32
    %c0_i32_0 = arith.constant 0 : i32
    %c0_i32_1 = arith.constant 0 : i32
    return %c0_i32, %c0_i32_0 : i32, i32
  }
  func.func @transform_7(%arg0: i32, %arg1: i32) -> (i32, i32) {
    %c0_i32 = arith.constant 0 : i32
    %c0_i32_0 = arith.constant 0 : i32
    %c0_i32_1 = arith.constant 0 : i32
    return %c0_i32, %c0_i32_0 : i32, i32
  }
  func.func @transform_8(%arg0: i32, %arg1: i32) -> (i32, i32) {
    %c0_i32 = arith.constant 0 : i32
    %c0_i32_0 = arith.constant 0 : i32
    %c0_i32_1 = arith.constant 0 : i32
    return %c0_i32, %c0_i32_0 : i32, i32
  }
  func.func @transform_9(%arg0: i32, %arg1: i32) -> (i32, i32) {
    %c0_i32 = arith.constant 0 : i32
    %c0_i32_0 = arith.constant 0 : i32
    %c0_i32_1 = arith.constant 0 : i32
    return %c0_i32, %c0_i32_0 : i32, i32
  }
  func.func @transform_10(%arg0: i32, %arg1: i32) -> (i32, i32) {
    %c0_i32 = arith.constant 0 : i32
    %c0_i32_0 = arith.constant 0 : i32
    %c0_i32_1 = arith.constant 0 : i32
    return %c0_i32, %c0_i32_0 : i32, i32
  }
  func.func @transform_11(%arg0: i32, %arg1: i32) -> (i32, i32) {
    %c0_i32 = arith.constant 0 : i32
    %c0_i32_0 = arith.constant 0 : i32
    %c0_i32_1 = arith.constant 0 : i32
    return %c0_i32, %c0_i32_0 : i32, i32
  }
  func.func @transform_12(%arg0: i32, %arg1: i32) -> (i32, i32) {
    %c0_i32 = arith.constant 0 : i32
    %c0_i32_0 = arith.constant 0 : i32
    %c0_i32_1 = arith.constant 0 : i32
    return %c0_i32, %c0_i32_0 : i32, i32
  }
  func.func @transform_13(%arg0: i32, %arg1: i32) -> (i32, i32) {
    %c0_i32 = arith.constant 0 : i32
    %c0_i32_0 = arith.constant 0 : i32
    %c0_i32_1 = arith.constant 0 : i32
    return %c0_i32, %c0_i32_0 : i32, i32
  }
  func.func @transform_14(%arg0: i32, %arg1: i32) -> (i32, i32) {
    %c0_i32 = arith.constant 0 : i32
    %c0_i32_0 = arith.constant 0 : i32
    %c0_i32_1 = arith.constant 0 : i32
    return %c0_i32, %c0_i32_0 : i32, i32
  }
  func.func @transform_15(%arg0: i32, %arg1: i32) -> (i32, i32) {
    %c0_i32 = arith.constant 0 : i32
    %c0_i32_0 = arith.constant 0 : i32
    %c0_i32_1 = arith.constant 0 : i32
    return %c0_i32, %c0_i32_0 : i32, i32
  }
  func.func @transform_16(%arg0: i32, %arg1: i32) -> (i32, i32) {
    %c0_i32 = arith.constant 0 : i32
    %c0_i32_0 = arith.constant 0 : i32
    %c0_i32_1 = arith.constant 0 : i32
    return %c0_i32, %c0_i32_0 : i32, i32
  }
  func.func @transform_17(%arg0: i32, %arg1: i32) -> (i32, i32) {
    %c0_i32 = arith.constant 0 : i32
    %c0_i32_0 = arith.constant 0 : i32
    %c0_i32_1 = arith.constant 0 : i32
    return %c0_i32, %c0_i32_0 : i32, i32
  }
  func.func @transform_18(%arg0: i32, %arg1: i32) -> (i32, i32) {
    %c0_i32 = arith.constant 0 : i32
    %c0_i32_0 = arith.constant 0 : i32
    %c0_i32_1 = arith.constant 0 : i32
    return %c0_i32, %c0_i32_0 : i32, i32
  }
  func.func @transform_19(%arg0: i32, %arg1: i32) -> (i32, i32) {
    %c0_i32 = arith.constant 0 : i32
    %c0_i32_0 = arith.constant 0 : i32
    %c0_i32_1 = arith.constant 0 : i32
    return %c0_i32, %c0_i32_0 : i32, i32
  }
  func.func @transform_20(%arg0: i32, %arg1: i32) -> (i32, i32, i32) {
    %c0_i32 = arith.constant 0 : i32
    %c0_i32_0 = arith.constant 0 : i32
    return %arg0, %arg1, %c0_i32 : i32, i32, i32
  }
}

</mosaic_0001>

<bundles_post_ra>
// kernel: tpu_custom_call.1
= control target key start
LH: loop header
LB: loop body
LE: loop exit
PB: predicated region body
PF: predicated region fallthrough
CT: control target
= control target key end

     0   :  { %s14898_s0 = inlined_call_operand.hbm [shape: f32[2,8,384], index: 0, kind: input, shape index: {}]   ;;  %s14899_s1 = inlined_call_operand.hbm [shape: f32[2,8,384], index: 1, kind: input, shape index: {}]   ;;  %s14900_s2 = inlined_call_operand.hbm [shape: f32[2,8,384], index: 2, kind: input, shape index: {}]   ;;  %s14901_s3 = inlined_call_operand.hbm [shape: s8[2,1,8,8], index: 3, kind: input, shape index: {}]   ;;  %s14902_s4 = inlined_call_operand.hbm [shape: bf16[384,384], index: 4, kind: input, shape index: {}]   ;;  %s14903_s5 = inlined_call_operand.hbm [shape: f32[1,384], index: 5, kind: input, shape index: {}]   ;;  %s14904_s6 = inlined_call_operand.hbm [shape: bf16[384,384], index: 6, kind: input, shape index: {}]   ;;  %s14905_s7 = inlined_call_operand.hbm [shape: f32[1,384], index: 7, kind: input, shape index: {}]   ;;  %s14906_s8 = inlined_call_operand.hbm [shape: bf16[384,384], index: 8, kind: input, shape index: {}]   ;;  %s14907_s9 = inlined_call_operand.hbm [shape: f32[1,384], index: 9, kind: input, shape index: {}]   ;;  %s14908_s10 = inlined_call_operand.hbm [shape: bf16[384,384], index: 10, kind: input, shape index: {}]   ;;  %s14909_s11 = inlined_call_operand.hbm [shape: f32[1,384], index: 11, kind: input, shape index: {}]   ;;  %s14910_s12 = inlined_call_operand.hbm [shape: f32[1,384], index: 12, kind: input, shape index: {}]   ;;  %s14911_s13 = inlined_call_operand.hbm [shape: f32[1,384], index: 13, kind: input, shape index: {}]   ;;  %s14912_s14 = inlined_call_operand.hbm [shape: f32[1,384], index: 14, kind: input, shape index: {}]   ;;  %s14913_s15 = inlined_call_operand.hbm [shape: f32[1,384], index: 15, kind: input, shape index: {}]   ;;  %s14914_s16 = inlined_call_operand.hbm [shape: bf16[384,64], index: 16, kind: input, shape index: {}]   ;;  %s14915_s17 = inlined_call_operand.hbm [shape: f32[1,64], index: 17, kind: input, shape index: {}]   ;;  %s14916_s18 = inlined_call_operand.hbm [shape: bf16[64,384], index: 18, kind: input, shape index: {}]   ;;  %s14917_s19 = inlined_call_operand.hbm [shape: f32[1,384], index: 19, kind: input, shape index: {}]   ;;  %s14918_s20 = inlined_call_operand.hbm [shape: f32[2,8,384], index: 20, kind: output, shape index: {}]  }
   0x1   :  { %15016 = sst [smem:[#allocation71_spill]] %s14898_s0 }
   0x2   :  { %15017 = sst [smem:[#allocation72_spill]] %s14899_s1 }
   0x3   :  { %15018 = sst [smem:[#allocation73_spill]] %s14900_s2 }
   0x4   :  { %15019 = sst [smem:[#allocation74_spill]] %s14901_s3 }
   0x5   :  { %15020 = sst [smem:[#allocation75_spill]] %s14902_s4 }
   0x6   :  { %15021 = sst [smem:[#allocation76_spill]] %s14903_s5 }
   0x7   :  { %15022 = sst [smem:[#allocation77_spill]] %s14904_s6 }
   0x8   :  { %15023 = sst [smem:[#allocation78_spill]] %s14905_s7 }
   0x9   :  { %15024 = sst [smem:[#allocation79_spill]] %s14906_s8 }
   0xa   :  { %15025 = sst [smem:[#allocation80_spill]] %s14907_s9 }
   0xb   :  { %15026 = sst [smem:[#allocation81_spill]] %s14908_s10 }
   0xc   :  { %15027 = sst [smem:[#allocation82_spill]] %s14909_s11 }
   0xd   :  { %15028 = sst [smem:[#allocation83_spill]] %s14910_s12 }
   0xe   :  { %15029 = sst [smem:[#allocation84_spill]] %s14911_s13 }
   0xf   :  { %15030 = sst [smem:[#allocation85_spill]] %s14912_s14 }
  0x10   :  { %15031 = sst [smem:[#allocation86_spill]] %s14913_s15 }
  0x11   :  { %15032 = sst [smem:[#allocation87_spill]] %s14914_s16 }
  0x12   :  { %15033 = sst [smem:[#allocation88_spill]] %s14915_s17 }
  0x13   :  { %15034 = sst [smem:[#allocation89_spill]] %s14916_s18 }
  0x14   :  { %15035 = sst [smem:[#allocation90_spill]] %s14917_s19 }
  0x15   :  { %15036 = sst [smem:[#allocation91_spill]] %s14918_s20 }
  0x16   :  { %25 = vsyncpa [#allocation3], 0 }
  0x17   :  { %27 = vsyncpa [#allocation3 + $0x1], 0 }
  0x18   :  { %28 = vsyncpa [#allocation6], 0 }
  0x19   :  { %30 = vsyncpa [#allocation6 + $0x1], 0 }
  0x1a   :  { %31 = vsyncpa [#allocation9], 0 }
  0x1b   :  { %33 = vsyncpa [#allocation9 + $0x1], 0 }
  0x1c   :  { %34 = vsyncpa [#allocation12], 0 }
  0x1d   :  { %35 = vsyncpa [#allocation15], 0 }
  0x1e   :  { %36 = vsyncpa [#allocation18], 0 }
  0x1f   :  { %37 = vsyncpa [#allocation21], 0 }
  0x20   :  { %38 = vsyncpa [#allocation24], 0 }
  0x21   :  { %39 = vsyncpa [#allocation27], 0 }
  0x22   :  { %40 = vsyncpa [#allocation30], 0 }
  0x23   :  { %41 = vsyncpa [#allocation33], 0 }
  0x24   :  { %42 = vsyncpa [#allocation4], 0 }
  0x25   :  { %44 = vsyncpa [#allocation4 + $0x1], 0  ;;  %s12964_s1 = smov 0   ;;  %s12966_s22 = smov 0  }
  0x26   :  { %s12968_s23 = smov 0   ;;  %s12970_s24 = smov 0  }
  0x27   :  { %s12972_s2 = smov 0   ;;  %s12974_s25 = smov 0  }
  0x28 LB: > { %15037 = sst [smem:[#allocation48_spill]] %s12778_s1  ;;  %s12995_s3 = sadd.s32 4294967295, %s12798_s25   ;;  %s12798_s25 = sphi %s12974_s25, %s50_s25   ;;  %s12794_s2 = sphi %s12972_s2, %s15173_s2   ;;  %s12790_s24 = sphi %s12970_s24, %s15172_s24   ;;  %s12786_s23 = sphi %s12968_s23, %s15168_s23   ;;  %s12782_s22 = sphi %s12966_s22, %s15171_s22   ;;  %s12778_s1 = sphi %s12964_s1, %s15170_s1  }
  0x29   : > { %15038 = sst [smem:[#allocation49_spill]] %s12786_s23  ;;  %p10051_p0 = scmp.ge.s32.totalorder %s12798_s25, 1 }
  0x2a   : > { %15039 = sst [smem:[#allocation50_spill]] %s12790_s24  ;;  %p14933_p1 = scmp.eq.s32.totalorder %s12995_s3, 0 }
  0x2b   : > { %p539_p2 = scmp.lt.s32.totalorder %s12798_s25, 3  ;;  %s12800_s27 = smov [#allocation10]  }
  0x2c   : > { %s551_s28 = sshll.u32 %s12800_s27, 4  ;;  %s12801_s29 = smov [#allocation11]   ;;  %s13004_s28 = int_to_ptr.vmem [resolvable:$true] %s551_s28 }
  0x2d   : > { %p13000_p3 = pnand %p10051_p0, %p539_p2  ;;  %s565_s30 = sshll.u32 %s12801_s29, 4  ;;  %s13015_s30 = int_to_ptr.vmem [resolvable:$true] %s565_s30 }
  0x2e   : > { %s12802_s0 = smov [#allocation14]   ;;  %s15043_s24 = sld [smem:[#allocation75_spill]] }
  0x2f   : > { %s15040_s26 = scalar_select %p13000_p3, 1, 0 }
  0x30   : > { %p11338_p4 = pneg %p13000_p3  ;;  %s13017_s21 = sshll.u32 %s12802_s0, 4  ;;  %s590_s21 = int_to_ptr.vmem [resolvable:$true] %s13017_s21 }
  0x31   : > { %15041 = sst [smem:[#allocation51_spill]] %s15040_s26 }
  0x32   : > { %p13011_p6 = pnand %p11338_p4, %p14933_p1 }
  0x34   : > { %s15042_s4 = scalar_select %p13011_p6, 1, 0 }
  0x35   : > { %s15044_s19 = smov %s15043_s24  ;;  %s12104_s18 = scalar_lea.hbm %s15043_s24, 9216 }
  0x36   : > { %p12105_p7 = scmp.ne.s32.totalorder %s15044_s19, %s12104_s18  ;;  %p13027_p8 = pneg %p13011_p6 }
  0x37   : > { %p12111_p11 = scmp.lt.u32.totalorder %s12104_s18, %s15044_s19 }
  0x38   : > { %s15045_s14 = scalar_select %p13027_p8, 1, 0 }
  0x39   : > { %p12107_p9 = pnand %p13027_p8, %p12105_p7 }
  0x3b   : > { %p12108_p10 = pneg %p12107_p9 }
  0x3d   : > { %p12113_p12 = pnand %p12111_p11, %p12108_p10 }
  0x3f   : > { %12116 = shalt.err (!%p12113_p12)
}
  0x40   : > { %s12117_s16 = scalar_lea.vmem %s13004_s28, 9216  ;;  %p12125_p4 = scmp.lt.s32.totalorder %s13004_s28, %s13004_s28 }
  0x41   : > { %p12118_p13 = scmp.ne.s32.totalorder %s13004_s28, %s12117_s16  ;;  %p12126_p5 = scmp.lt.s32.totalorder %s12117_s16, %s12117_s16 }
  0x43   : > { %p12120_p0 = pnand %p12118_p13, %p13027_p8  ;;  %p12127_p7 = por %p12126_p5, %p12125_p4 }
  0x45   : > { %p12121_p2 = pneg %p12120_p0 }
  0x47   : > { %p12128_p9 = pnand %p12127_p7, %p12121_p2 }
  0x49   : > { %12131 = shalt.err (!%p12128_p9)
}
  0x4a   : > { %s14935_s20 = smov 192   ;;  %s14937_s18 = smov 12  }
  0x4b   : > { %11341 = dma.hbm_to_vmem [thread:$0]  (!%p13011_p6), %s15044_s19, 9216, %s13004_s28, [#allocation9], %s14935_s20, %s14935_s20, %s14937_s18  }
  0x4c   : > { %s15046_s5 = sld [smem:[#allocation76_spill]] }
  0x52   : > { %s12132_s0 = scalar_lea.hbm %s15046_s5, 48 }
  0x53   : > { %p12133_p5 = scmp.ne.s32.totalorder %s15046_s5, %s12132_s0  ;;  %p12139_p12 = scmp.lt.u32.totalorder %s12132_s0, %s15046_s5 }
  0x55   : > { %p12135_p10 = pnand %p12133_p5, %p13027_p8 }
  0x57   : > { %p12136_p11 = pneg %p12135_p10 }
  0x59   : > { %p12141_p13 = pnand %p12139_p12, %p12136_p11 }
  0x5b   : > { %12144 = shalt.err (!%p12141_p13)
}
  0x5c   : > { %s12145_s28 = scalar_lea.vmem %s13015_s30, 48  ;;  %s12152_s12 = scalar_lea.vmem %s13015_s30, 64 }
  0x5d   : > { %p12146_p0 = scmp.ne.s32.totalorder %s13015_s30, %s12145_s28  ;;  %p12153_p7 = scmp.lt.s32.totalorder %s13015_s30, %s13015_s30 }
  0x5e   : > { %p12154_p9 = scmp.lt.s32.totalorder %s12152_s12, %s12145_s28 }
  0x5f   : > { %p12148_p2 = pnand %p12146_p0, %p13027_p8 }
  0x60   : > { %p12155_p5 = por %p12154_p9, %p12153_p7 }
  0x61   : > { %p12149_p4 = pneg %p12148_p2 }
  0x63   : > { %p12156_p10 = pnand %p12155_p5, %p12149_p4 }
  0x65   : > { %12159 = shalt.err (!%p12156_p10)
}
  0x66   : > { %11344 = dma.hbm_to_vmem [thread:$0]  (!%p13011_p6), %s15046_s5, 48, %s13015_s30, [#allocation12]  }
  0x67   : > { %s15047_s7 = sld [smem:[#allocation78_spill]] }
  0x6d   : > { %s12160_s27 = scalar_lea.hbm %s15047_s7, 48 }
  0x6e   : > { %p12161_p11 = scmp.ne.s32.totalorder %s15047_s7, %s12160_s27  ;;  %p12167_p0 = scmp.lt.u32.totalorder %s12160_s27, %s15047_s7 }
  0x70   : > { %p12163_p12 = pnand %p12161_p11, %p13027_p8 }
  0x72   : > { %p12164_p13 = pneg %p12163_p12 }
  0x74   : > { %p12169_p2 = pnand %p12167_p0, %p12164_p13 }
  0x76   : > { %12172 = shalt.err (!%p12169_p2)
}
  0x77   : > { %s12173_s12 = scalar_lea.vmem %s590_s21, 48  ;;  %s12180_s30 = scalar_lea.vmem %s590_s21, 64 }
  0x78   : > { %p12174_p4 = scmp.ne.s32.totalorder %s590_s21, %s12173_s12  ;;  %p12181_p5 = scmp.lt.s32.totalorder %s590_s21, %s590_s21 }
  0x79   : > { %p12182_p10 = scmp.lt.s32.totalorder %s12180_s30, %s12173_s12 }
  0x7a   : > { %p12176_p7 = pnand %p12174_p4, %p13027_p8 }
  0x7b   : > { %p12183_p1 = por %p12182_p10, %p12181_p5 }
  0x7c   : > { %p12177_p9 = pneg %p12176_p7 }
  0x7e   : > { %p12184_p3 = pnand %p12183_p1, %p12177_p9 }
  0x80   : > { %12187 = shalt.err (!%p12184_p3)
}
  0x81   : > { %11350 = dma.hbm_to_vmem [thread:$0]  (!%p13011_p6), %s15047_s7, 48, %s590_s21, [#allocation15]  }
  0x82   : > { %s12805_s24 = smov [#allocation17]   ;;  %s12806_s27 = smov [#allocation20]  }
  0x83   : > { %s613_s26 = sshll.u32 %s12805_s24, 4  ;;  %s637_s29 = sshll.u32 %s12806_s27, 4  ;;  %s614_s26 = int_to_ptr.vmem [resolvable:$true] %s613_s26  ;;  %s638_s29 = int_to_ptr.vmem [resolvable:$true] %s637_s29 }
  0x84   : > { %s15048_s9 = sld [smem:[#allocation80_spill]] }
  0x8a   : > { %s12188_s28 = scalar_lea.hbm %s15048_s9, 48 }
  0x8b   : > { %p12189_p1 = scmp.ne.s32.totalorder %s15048_s9, %s12188_s28  ;;  %p12195_p12 = scmp.lt.u32.totalorder %s12188_s28, %s15048_s9 }
  0x8d   : > { %p12191_p3 = pnand %p12189_p1, %p13027_p8 }
  0x8f   : > { %p12192_p11 = pneg %p12191_p3 }
  0x91   : > { %p12197_p13 = pnand %p12195_p12, %p12192_p11 }
  0x93   : > { %12200 = shalt.err (!%p12197_p13)
}
  0x94   : > { %s12201_s21 = scalar_lea.vmem %s614_s26, 48  ;;  %s12208_s10 = scalar_lea.vmem %s614_s26, 64 }
  0x95   : > { %p12202_p0 = scmp.ne.s32.totalorder %s614_s26, %s12201_s21  ;;  %p12209_p7 = scmp.lt.s32.totalorder %s614_s26, %s614_s26 }
  0x96   : > { %p12210_p9 = scmp.lt.s32.totalorder %s12208_s10, %s12201_s21 }
  0x97   : > { %p12204_p2 = pnand %p12202_p0, %p13027_p8 }
  0x98   : > { %p12211_p5 = por %p12210_p9, %p12209_p7 }
  0x99   : > { %p12205_p4 = pneg %p12204_p2 }
  0x9b   : > { %p12212_p10 = pnand %p12211_p5, %p12205_p4 }
  0x9d   : > { %12215 = shalt.err (!%p12212_p10)
}
  0x9e   : > { %11356 = dma.hbm_to_vmem [thread:$0]  (!%p13011_p6), %s15048_s9, 48, %s614_s26, [#allocation18]  }
  0x9f   : > { %s15049_s11 = sld [smem:[#allocation82_spill]] }
  0xa5   : > { %s12216_s16 = scalar_lea.hbm %s15049_s11, 48 }
  0xa6   : > { %p12217_p1 = scmp.ne.s32.totalorder %s15049_s11, %s12216_s16  ;;  %p12223_p12 = scmp.lt.u32.totalorder %s12216_s16, %s15049_s11 }
  0xa8   : > { %p12219_p3 = pnand %p12217_p1, %p13027_p8 }
  0xaa   : > { %p12220_p11 = pneg %p12219_p3 }
  0xac   : > { %p12225_p13 = pnand %p12223_p12, %p12220_p11 }
  0xae   : > { %12228 = shalt.err (!%p12225_p13)
}
  0xaf   : > { %s12229_s21 = scalar_lea.vmem %s638_s29, 48  ;;  %s12236_s26 = scalar_lea.vmem %s638_s29, 64 }
  0xb0   : > { %p12230_p0 = scmp.ne.s32.totalorder %s638_s29, %s12229_s21  ;;  %p12237_p7 = scmp.lt.s32.totalorder %s638_s29, %s638_s29 }
  0xb1   : > { %p12238_p9 = scmp.lt.s32.totalorder %s12236_s26, %s12229_s21 }
  0xb2   : > { %p12232_p2 = pnand %p12230_p0, %p13027_p8 }
  0xb3   : > { %p12239_p5 = por %p12238_p9, %p12237_p7 }
  0xb4   : > { %p12233_p4 = pneg %p12232_p2 }
  0xb6   : > { %p12240_p10 = pnand %p12239_p5, %p12233_p4 }
  0xb8   : > { %12243 = shalt.err (!%p12240_p10)
}
  0xb9   : > { %11362 = dma.hbm_to_vmem [thread:$0]  (!%p13011_p6), %s15049_s11, 48, %s638_s29, [#allocation21]  }
  0xba   : > { %s12807_s27 = smov [#allocation23]   ;;  %s12808_s0 = smov [#allocation26]  }
  0xbb   : > { %s659_s20 = sshll.u32 %s12807_s27, 4  ;;  %s681_s16 = sshll.u32 %s12808_s0, 4  ;;  %s660_s20 = int_to_ptr.vmem [resolvable:$true] %s659_s20  ;;  %s682_s16 = int_to_ptr.vmem [resolvable:$true] %s681_s16 }
  0xbc   : > { %s15050_s13 = sld [smem:[#allocation84_spill]] }
  0xc2   : > { %s12244_s30 = scalar_lea.hbm %s15050_s13, 48 }
  0xc3   : > { %p12245_p1 = scmp.ne.s32.totalorder %s15050_s13, %s12244_s30  ;;  %p12251_p12 = scmp.lt.u32.totalorder %s12244_s30, %s15050_s13 }
  0xc5   : > { %p12247_p3 = pnand %p12245_p1, %p13027_p8 }
  0xc7   : > { %p12248_p11 = pneg %p12247_p3 }
  0xc9   : > { %p12253_p13 = pnand %p12251_p12, %p12248_p11 }
  0xcb   : > { %12256 = shalt.err (!%p12253_p13)
}
  0xcc   : > { %s12257_s29 = scalar_lea.vmem %s660_s20, 48  ;;  %s12264_s24 = scalar_lea.vmem %s660_s20, 64 }
  0xcd   : > { %p12258_p0 = scmp.ne.s32.totalorder %s660_s20, %s12257_s29  ;;  %p12265_p7 = scmp.lt.s32.totalorder %s660_s20, %s660_s20 }
  0xce   : > { %p12266_p9 = scmp.lt.s32.totalorder %s12264_s24, %s12257_s29 }
  0xcf   : > { %p12260_p2 = pnand %p12258_p0, %p13027_p8 }
  0xd0   : > { %p12267_p5 = por %p12266_p9, %p12265_p7 }
  0xd1   : > { %p12261_p4 = pneg %p12260_p2 }
  0xd3   : > { %p12268_p10 = pnand %p12267_p5, %p12261_p4 }
  0xd5   : > { %12271 = shalt.err (!%p12268_p10)
}
  0xd6   : > { %11368 = dma.hbm_to_vmem [thread:$0]  (!%p13011_p6), %s15050_s13, 48, %s660_s20, [#allocation24]  }
  0xd7   : > { %s15051_s15 = sld [smem:[#allocation86_spill]] }
  0xdd   : > { %s12272_s30 = scalar_lea.hbm %s15051_s15, 48 }
  0xde   : > { %p12273_p1 = scmp.ne.s32.totalorder %s15051_s15, %s12272_s30  ;;  %p12279_p12 = scmp.lt.u32.totalorder %s12272_s30, %s15051_s15 }
  0xe0   : > { %p12275_p3 = pnand %p12273_p1, %p13027_p8 }
  0xe2   : > { %p12276_p11 = pneg %p12275_p3 }
  0xe4   : > { %p12281_p13 = pnand %p12279_p12, %p12276_p11 }
  0xe6   : > { %12284 = shalt.err (!%p12281_p13)
}
  0xe7   : > { %s12285_s29 = scalar_lea.vmem %s682_s16, 48  ;;  %s12292_s20 = scalar_lea.vmem %s682_s16, 64 }
  0xe8   : > { %p12286_p0 = scmp.ne.s32.totalorder %s682_s16, %s12285_s29  ;;  %p12293_p7 = scmp.lt.s32.totalorder %s682_s16, %s682_s16 }
  0xe9   : > { %p12294_p9 = scmp.lt.s32.totalorder %s12292_s20, %s12285_s29 }
  0xea   : > { %p12288_p2 = pnand %p12286_p0, %p13027_p8 }
  0xeb   : > { %p12295_p5 = por %p12294_p9, %p12293_p7 }
  0xec   : > { %p12289_p4 = pneg %p12288_p2 }
  0xee   : > { %p12296_p10 = pnand %p12295_p5, %p12289_p4 }
  0xf0   : > { %12299 = shalt.err (!%p12296_p10)
}
  0xf1   : > { %11374 = dma.hbm_to_vmem [thread:$0]  (!%p13011_p6), %s15051_s15, 48, %s682_s16, [#allocation27]  }
  0xf2   : > { %s12809_s0 = smov [#allocation29]   ;;  %s15052_s17 = sld [smem:[#allocation88_spill]] }
  0xf3   : > { %s705_s28 = sshll.u32 %s12809_s0, 4  ;;  %s706_s28 = int_to_ptr.vmem [resolvable:$true] %s705_s28 }
  0xf8   : > { %s12300_s8 = scalar_lea.hbm %s15052_s17, 16 }
  0xf9   : > { %p12301_p1 = scmp.ne.s32.totalorder %s15052_s17, %s12300_s8  ;;  %p12307_p12 = scmp.lt.u32.totalorder %s12300_s8, %s15052_s17 }
  0xfb   : > { %p12303_p3 = pnand %p12301_p1, %p13027_p8 }
  0xfd   : > { %p12304_p11 = pneg %p12303_p3 }
  0xff   : > { %p12309_p13 = pnand %p12307_p12, %p12304_p11 }
 0x101   : > { %12312 = shalt.err (!%p12309_p13)
}
 0x102   : > { %s12313_s16 = scalar_lea.vmem %s706_s28, 16  ;;  %s12320_s20 = scalar_lea.vmem %s706_s28, 32 }
 0x103   : > { %p12314_p0 = scmp.ne.s32.totalorder %s706_s28, %s12313_s16  ;;  %p12321_p7 = scmp.lt.s32.totalorder %s706_s28, %s706_s28 }
 0x104   : > { %p12322_p9 = scmp.lt.s32.totalorder %s12320_s20, %s12313_s16 }
 0x105   : > { %p12316_p2 = pnand %p12314_p0, %p13027_p8 }
 0x106   : > { %p12323_p5 = por %p12322_p9, %p12321_p7 }
 0x107   : > { %p12317_p4 = pneg %p12316_p2 }
 0x109   : > { %p12324_p10 = pnand %p12323_p5, %p12317_p4 }
 0x10b   : > { %12327 = shalt.err (!%p12324_p10)
}
 0x10c   : > { %11380 = dma.hbm_to_vmem [thread:$0]  (!%p13011_p6), %s15052_s17, 16, %s706_s28, [#allocation30]  }
 0x10d   : > { %s10050_s0 = sadd.s32 4294967294, %s12798_s25   ;;  %s62_s12 = sadd.s32 1, %s12794_s2 }
 0x10e   : > { %p64_p1 = scmp.ge.s32.totalorder %s62_s12, 2  ;;  %s69_s30 = sadd.s32 1, %s12786_s23 }
 0x10f   : > { %p76_p3 = scmp.ne.s32.totalorder %s12786_s23, %s12782_s22  ;;  %p77_p11 = scmp.eq.s32.totalorder %s12798_s25, 0 }
 0x110   : > { %s15175_s12 = smov (%p64_p1, %s62_s12), 0  ;;  %p82_p13 = scmp.ne.s32.totalorder %s12782_s22, %s12778_s1 }
 0x111   : > { %15053 = sst [smem:[#allocation52_spill]] %s15175_s12  ;;  %p13192_p12 = por %p77_p11, %p76_p3 }
 0x112   : > { %s66_s28 = ssub.s32 %s12794_s2, %s15175_s12  ;;  %p526_p0 = scmp.eq.s32.totalorder %s12995_s3, 1 }
 0x113   : > { %p67_p2 = scmp.eq.s32.totalorder %s66_s28, 0  ;;  %p15055_p4 = scmp.eq.s32.totalorder %s12995_s3, 0 }
 0x114   : > { %p13207_p9 = por %p526_p0, %p76_p3  ;;  %p532_p5 = scmp.eq.s32.totalorder %s10050_s0, 1 }
 0x115   : > { %p13203_p7 = por %p15055_p4, %p82_p13  ;;  %p11420_p1 = scmp.lt.s32.totalorder %s12798_s25, 2 }
 0x116   : > { %s15057_s26 = scalar_select %p13207_p9, 1, 0 }
 0x117   : > { %s15056_s21 = scalar_select %p13203_p7, 1, 0 }
 0x118   : > { %15058 = sst [smem:[#allocation53_spill]] %s15057_s26  ;;  %p13214_p10 = por %p532_p5, %p82_p13 }
 0x119   : > { %s13212_s10 = scalar_select %p67_p2, %s12786_s23, %s69_s30  }
 0x11a   : > { %s15060_s29 = scalar_select %p13214_p10, 1, 0 }
 0x11b   : > { %15059 = sst [smem:[#allocation54_spill]] %s13212_s10  ;;  %s13220_s16 = sand.u32 1, %s12786_s23  }
 0x11c   : > { %15061 = sst [smem:[#allocation55_spill]] %s15060_s29  ;;  %s13223_s20 = smul.u32 384, %s12794_s2 }
 0x11d   : > { %s13226_s24 = smul.u32 24, %s13220_s16  ;;  %p13230_p3 = pnand %p11420_p1, %p13192_p12 }
 0x11e   : > { %s14941_s0 = sand.u32 1, %s12798_s25   ;;  %s15063_s18 = sld [smem:[#allocation72_spill]] }
 0x11f   : > { %s15062_s27 = scalar_select %p13230_p3, 1, 0 }
 0x120   : > { %s763_s7 = scalar_lea.vmem [#allocation5], %s13226_s24  ;;  %s12810_s8 = smov [#allocation13]  }
 0x121   : > { %s771_s9 = sshll.u32 %s763_s7, 4  ;;  %s13244_s11 = sshll.u32 %s12810_s8, 4  ;;  %s13242_s9 = int_to_ptr.vmem [resolvable:$true] %s771_s9  ;;  %s576_s11 = int_to_ptr.vmem [resolvable:$true] %s13244_s11 }
 0x122   : > { %s13248_s13 = scalar_lea.sflag [#allocation6], %s14941_s0  ;;  %p13254_p12 = pneg %p13230_p3 }
 0x124   : > { %s13239_s5 = scalar_lea.hbm %s15063_s18, %s13223_s20  ;;  %s12333_s17 = scalar_lea.hbm %s15063_s18, 768 }
 0x125   : > { %s12328_s15 = scalar_lea.hbm %s13239_s5, 384  ;;  %p12334_p2 = scmp.lt.u32.totalorder %s13239_s5, %s15063_s18 }
 0x126   : > { %p12329_p11 = scmp.ne.s32.totalorder %s13239_s5, %s12328_s15  ;;  %p12335_p4 = scmp.lt.u32.totalorder %s12333_s17, %s12328_s15 }
 0x127   : > { %s15064_s30 = scalar_select %p13254_p12, 1, 0 }
 0x128   : > { %p12331_p13 = pnand %p13254_p12, %p12329_p11  ;;  %p12336_p5 = por %p12335_p4, %p12334_p2 }
 0x129   : > { %p12337_p1 = scmp.lt.u32.totalorder %s12328_s15, %s13239_s5 }
 0x12a   : > { %p12332_p0 = pneg %p12331_p13 }
 0x12b   : > { %p12338_p10 = por %p12337_p1, %p12336_p5 }
 0x12d   : > { %p12339_p9 = pnand %p12338_p10, %p12332_p0 }
 0x12f   : > { %12342 = shalt.err (!%p12339_p9)
}
 0x130   : > { %s12343_s0 = scalar_lea.vmem %s13242_s9, 384  ;;  %s12811_s7 = smov [#allocation5]  }
 0x131   : > { %p12344_p11 = scmp.ne.s32.totalorder %s13242_s9, %s12343_s0  ;;  %s12348_s28 = sshll.u32 %s12811_s7, 4  ;;  %s12349_s28 = int_to_ptr.vmem [resolvable:$false] %s12348_s28 }
 0x132   : > { %s12350_s19 = scalar_lea.vmem %s12349_s28, 768  ;;  %p12351_p6 = scmp.lt.s32.totalorder %s13242_s9, %s12349_s28 }
 0x133   : > { %p12346_p13 = pnand %p12344_p11, %p13254_p12  ;;  %p12352_p8 = scmp.lt.s32.totalorder %s12350_s19, %s12343_s0 }
 0x135   : > { %p12347_p7 = pneg %p12346_p13  ;;  %p12353_p2 = por %p12352_p8, %p12351_p6 }
 0x137   : > { %p12354_p4 = pnand %p12353_p2, %p12347_p7 }
 0x139   : > { %12357 = shalt.err (!%p12354_p4)
}
 0x13a   : > { %11393 = dma.hbm_to_vmem [thread:$0]  (!%p13230_p3), %s13239_s5, 384, %s13242_s9, %s13248_s13  }
 0x13b   : > { %s15065_s6 = sld [smem:[#allocation77_spill]]  ;;  %p15066_p6 = scmp.ne.s32.totalorder %s15045_s14, 0 }
 0x141   : > { %s12358_s8 = scalar_lea.hbm %s15065_s6, 9216 }
 0x142   : > { %p12359_p9 = scmp.ne.s32.totalorder %s15065_s6, %s12358_s8  ;;  %p12365_p10 = scmp.lt.u32.totalorder %s12358_s8, %s15065_s6 }
 0x144   : > { %p12361_p8 = pnand %p12359_p9, %p15066_p6 }
 0x146   : > { %p12362_p7 = pneg %p12361_p8 }
 0x148   : > { %p12367_p0 = pnand %p12365_p10, %p12362_p7 }
 0x14a   : > { %12370 = shalt.err (!%p12367_p0)
}
 0x14b   : > { %s12371_s19 = scalar_lea.vmem %s576_s11, 9216  ;;  %p12379_p13 = scmp.lt.s32.totalorder %s576_s11, %s576_s11 }
 0x14c   : > { %p12372_p5 = scmp.ne.s32.totalorder %s576_s11, %s12371_s19  ;;  %p12380_p2 = scmp.lt.s32.totalorder %s12371_s19, %s12371_s19 }
 0x14e   : > { %p12374_p1 = pnand %p12372_p5, %p15066_p6  ;;  %p12381_p4 = por %p12380_p2, %p12379_p13 }
 0x150   : > { %p12375_p11 = pneg %p12374_p1 }
 0x152   : > { %p12382_p3 = pnand %p12381_p4, %p12375_p11 }
 0x154   : > { %12385 = shalt.err (!%p12382_p3)
}
 0x155   : > { %p15067_p9 = scmp.ne.s32.totalorder %s15042_s4, 0  ;;  %s15068_s5 = smov 12  }
 0x156   : > { %s15069_s9 = smov 192   ;;  %s12812_s17 = smov [#allocation16]  }
 0x157   : > { %11347 = dma.hbm_to_vmem [thread:$0]  (!%p15067_p9), %s15065_s6, 9216, %s576_s11, [#allocation12], %s15069_s9, %s15069_s9, %s15068_s5  }
 0x158   : > { %s599_s8 = sshll.u32 %s12812_s17, 4  ;;  %s12813_s7 = smov [#allocation19]   ;;  %s600_s8 = int_to_ptr.vmem [resolvable:$true] %s599_s8 }
 0x159   : > { %s623_s0 = sshll.u32 %s12813_s7, 4  ;;  %s15070_s12 = sld [smem:[#allocation79_spill]]  ;;  %s624_s0 = int_to_ptr.vmem [resolvable:$true] %s623_s0 }
 0x15f   : > { %s12386_s10 = scalar_lea.hbm %s15070_s12, 9216 }
 0x160   : > { %p12387_p3 = scmp.ne.s32.totalorder %s15070_s12, %s12386_s10  ;;  %p12393_p10 = scmp.lt.u32.totalorder %s12386_s10, %s15070_s12 }
 0x162   : > { %p12389_p8 = pnand %p12387_p3, %p15066_p6 }
 0x164   : > { %p12390_p7 = pneg %p12389_p8 }
 0x166   : > { %p12395_p0 = pnand %p12393_p10, %p12390_p7 }
 0x168   : > { %12398 = shalt.err (!%p12395_p0)
}
 0x169   : > { %s12399_s11 = scalar_lea.vmem %s600_s8, 9216  ;;  %p12407_p13 = scmp.lt.s32.totalorder %s600_s8, %s600_s8 }
 0x16a   : > { %p12400_p5 = scmp.ne.s32.totalorder %s600_s8, %s12399_s11  ;;  %p12408_p2 = scmp.lt.s32.totalorder %s12399_s11, %s12399_s11 }
 0x16c   : > { %p12402_p1 = pnand %p12400_p5, %p15066_p6  ;;  %p12409_p4 = por %p12408_p2, %p12407_p13 }
 0x16e   : > { %p12403_p11 = pneg %p12402_p1 }
 0x170   : > { %p12410_p12 = pnand %p12409_p4, %p12403_p11 }
 0x172   : > { %12413 = shalt.err (!%p12410_p12)
}
 0x173   : > { %11353 = dma.hbm_to_vmem [thread:$0]  (!%p15067_p9), %s15070_s12, 9216, %s600_s8, [#allocation15], %s15069_s9, %s15069_s9, %s15068_s5  }
 0x174   : > { %s15071_s15 = sld [smem:[#allocation81_spill]] }
 0x17a   : > { %s12414_s17 = scalar_lea.hbm %s15071_s15, 9216 }
 0x17b   : > { %p12415_p3 = scmp.ne.s32.totalorder %s15071_s15, %s12414_s17  ;;  %p12421_p7 = scmp.lt.u32.totalorder %s12414_s17, %s15071_s15 }
 0x17d   : > { %p12417_p12 = pnand %p12415_p3, %p15066_p6 }
 0x17f   : > { %p12418_p8 = pneg %p12417_p12 }
 0x181   : > { %p12423_p10 = pnand %p12421_p7, %p12418_p8 }
 0x183   : > { %12426 = shalt.err (!%p12423_p10)
}
 0x184   : > { %s12427_s11 = scalar_lea.vmem %s624_s0, 9216  ;;  %p12435_p11 = scmp.lt.s32.totalorder %s624_s0, %s624_s0 }
 0x185   : > { %p12428_p0 = scmp.ne.s32.totalorder %s624_s0, %s12427_s11  ;;  %p12436_p13 = scmp.lt.s32.totalorder %s12427_s11, %s12427_s11 }
 0x187   : > { %p12430_p5 = pnand %p12428_p0, %p15066_p6  ;;  %p12437_p2 = por %p12436_p13, %p12435_p11 }
 0x189   : > { %p12431_p1 = pneg %p12430_p5 }
 0x18b   : > { %p12438_p4 = pnand %p12437_p2, %p12431_p1 }
 0x18d   : > { %12441 = shalt.err (!%p12438_p4)
}
 0x18e   : > { %11359 = dma.hbm_to_vmem [thread:$0]  (!%p15067_p9), %s15071_s15, 9216, %s624_s0, [#allocation18], %s15069_s9, %s15069_s9, %s15068_s5  }
 0x18f   : > { %s12814_s23 = smov [#allocation22]   ;;  %s12815_s29 = smov [#allocation25]  }
 0x190   : > { %s648_s10 = sshll.u32 %s12814_s23, 4  ;;  %s670_s17 = sshll.u32 %s12815_s29, 4  ;;  %s649_s10 = int_to_ptr.vmem [resolvable:$true] %s648_s10  ;;  %s671_s17 = int_to_ptr.vmem [resolvable:$true] %s670_s17 }
 0x191   : > { %s15072_s19 = sld [smem:[#allocation83_spill]] }
 0x197   : > { %s12442_s18 = scalar_lea.hbm %s15072_s19, 48 }
 0x198   : > { %p12443_p3 = scmp.ne.s32.totalorder %s15072_s19, %s12442_s18  ;;  %p12449_p7 = scmp.lt.u32.totalorder %s12442_s18, %s15072_s19 }
 0x19a   : > { %p12445_p12 = pnand %p12443_p3, %p15066_p6 }
 0x19c   : > { %p12446_p8 = pneg %p12445_p12 }
 0x19e   : > { %p12451_p10 = pnand %p12449_p7, %p12446_p8 }
 0x1a0   : > { %12454 = shalt.err (!%p12451_p10)
}
 0x1a1   : > { %s12455_s0 = scalar_lea.vmem %s649_s10, 48  ;;  %s12462_s1 = scalar_lea.vmem %s649_s10, 64 }
 0x1a2   : > { %p12456_p0 = scmp.ne.s32.totalorder %s649_s10, %s12455_s0  ;;  %p12463_p11 = scmp.lt.s32.totalorder %s649_s10, %s649_s10 }
 0x1a3   : > { %p12464_p13 = scmp.lt.s32.totalorder %s12462_s1, %s12455_s0 }
 0x1a4   : > { %p12458_p5 = pnand %p12456_p0, %p15066_p6 }
 0x1a5   : > { %p12465_p2 = por %p12464_p13, %p12463_p11 }
 0x1a6   : > { %p12459_p1 = pneg %p12458_p5 }
 0x1a8   : > { %p12466_p4 = pnand %p12465_p2, %p12459_p1 }
 0x1aa   : > { %12469 = shalt.err (!%p12466_p4)
}
 0x1ab   : > { %11365 = dma.hbm_to_vmem [thread:$0]  (!%p15067_p9), %s15072_s19, 48, %s649_s10, [#allocation21]  }
 0x1ac   : > { %s15073_s7 = sld [smem:[#allocation85_spill]] }
 0x1b2   : > { %s12470_s28 = scalar_lea.hbm %s15073_s7, 48 }
 0x1b3   : > { %p12471_p3 = scmp.ne.s32.totalorder %s15073_s7, %s12470_s28  ;;  %p12477_p7 = scmp.lt.u32.totalorder %s12470_s28, %s15073_s7 }
 0x1b5   : > { %p12473_p12 = pnand %p12471_p3, %p15066_p6 }
 0x1b7   : > { %p12474_p8 = pneg %p12473_p12 }
 0x1b9   : > { %p12479_p10 = pnand %p12477_p7, %p12474_p8 }
 0x1bb   : > { %12482 = shalt.err (!%p12479_p10)
}
 0x1bc   : > { %s12483_s1 = scalar_lea.vmem %s671_s17, 48  ;;  %s12490_s10 = scalar_lea.vmem %s671_s17, 64 }
 0x1bd   : > { %p12484_p0 = scmp.ne.s32.totalorder %s671_s17, %s12483_s1  ;;  %p12491_p11 = scmp.lt.s32.totalorder %s671_s17, %s671_s17 }
 0x1be   : > { %p12492_p13 = scmp.lt.s32.totalorder %s12490_s10, %s12483_s1 }
 0x1bf   : > { %p12486_p5 = pnand %p12484_p0, %p15066_p6 }
 0x1c0   : > { %p12493_p2 = por %p12492_p13, %p12491_p11 }
 0x1c1   : > { %p12487_p1 = pneg %p12486_p5 }
 0x1c3   : > { %p12494_p4 = pnand %p12493_p2, %p12487_p1 }
 0x1c5   : > { %12497 = shalt.err (!%p12494_p4)
}
 0x1c6   : > { %11371 = dma.hbm_to_vmem [thread:$0]  (!%p15067_p9), %s15073_s7, 48, %s671_s17, [#allocation24]  }
 0x1c7   : > { %s12816_s12 = smov [#allocation28]   ;;  %s15074_s11 = sld [smem:[#allocation87_spill]] }
 0x1c8   : > { %s691_s29 = sshll.u32 %s12816_s12, 4  ;;  %s692_s29 = int_to_ptr.vmem [resolvable:$true] %s691_s29 }
 0x1cd   : > { %s12498_s8 = scalar_lea.hbm %s15074_s11, 3072 }
 0x1ce   : > { %p12499_p3 = scmp.ne.s32.totalorder %s15074_s11, %s12498_s8  ;;  %p12505_p7 = scmp.lt.u32.totalorder %s12498_s8, %s15074_s11 }
 0x1d0   : > { %p12501_p12 = pnand %p12499_p3, %p15066_p6 }
 0x1d2   : > { %p12502_p8 = pneg %p12501_p12 }
 0x1d4   : > { %p12507_p10 = pnand %p12505_p7, %p12502_p8 }
 0x1d6   : > { %12510 = shalt.err (!%p12507_p10)
}
 0x1d7   : > { %s12511_s17 = scalar_lea.vmem %s692_s29, 3072  ;;  %p12519_p11 = scmp.lt.s32.totalorder %s692_s29, %s692_s29 }
 0x1d8   : > { %p12512_p0 = scmp.ne.s32.totalorder %s692_s29, %s12511_s17  ;;  %p12520_p13 = scmp.lt.s32.totalorder %s12511_s17, %s12511_s17 }
 0x1da   : > { %p12514_p5 = pnand %p12512_p0, %p15066_p6  ;;  %p12521_p2 = por %p12520_p13, %p12519_p11 }
 0x1dc   : > { %p12515_p1 = pneg %p12514_p5 }
 0x1de   : > { %p12522_p4 = pnand %p12521_p2, %p12515_p1 }
 0x1e0   : > { %12525 = shalt.err (!%p12522_p4)
}
 0x1e1   : > { %s12817_s15 = smov 64   ;;  %s12818_s6 = smov 4  }
 0x1e2   : > { %11377 = dma.hbm_to_vmem [thread:$0]  (!%p15067_p9), %s15074_s11, 3072, %s692_s29, [#allocation27], %s12817_s15, %s12817_s15, %s12818_s6  }
 0x1e3   : > { %s12819_s28 = smov [#allocation31]   ;;  %s12820_s8 = smov [#allocation32]  }
 0x1e4   : > { %s715_s18 = sshll.u32 %s12819_s28, 4  ;;  %s729_s0 = sshll.u32 %s12820_s8, 4  ;;  %s716_s18 = int_to_ptr.vmem [resolvable:$true] %s715_s18  ;;  %s13396_s0 = int_to_ptr.vmem [resolvable:$true] %s729_s0 }
 0x1e5   : > { %s15075_s17 = sld [smem:[#allocation89_spill]] }
 0x1eb   : > { %s12526_s7 = scalar_lea.hbm %s15075_s17, 1536 }
 0x1ec   : > { %p12527_p3 = scmp.ne.s32.totalorder %s15075_s17, %s12526_s7  ;;  %p12533_p7 = scmp.lt.u32.totalorder %s12526_s7, %s15075_s17 }
 0x1ee   : > { %p12529_p12 = pnand %p12527_p3, %p15066_p6 }
 0x1f0   : > { %p12530_p8 = pneg %p12529_p12 }
 0x1f2   : > { %p12535_p10 = pnand %p12533_p7, %p12530_p8 }
 0x1f4   : > { %12538 = shalt.err (!%p12535_p10)
}
 0x1f5   : > { %s12539_s15 = scalar_lea.vmem %s716_s18, 1536  ;;  %p12547_p11 = scmp.lt.s32.totalorder %s716_s18, %s716_s18 }
 0x1f6   : > { %p12540_p0 = scmp.ne.s32.totalorder %s716_s18, %s12539_s15  ;;  %p12548_p13 = scmp.lt.s32.totalorder %s12539_s15, %s12539_s15 }
 0x1f8   : > { %p12542_p5 = pnand %p12540_p0, %p15066_p6  ;;  %p12549_p2 = por %p12548_p13, %p12547_p11 }
 0x1fa   : > { %p12543_p1 = pneg %p12542_p5 }
 0x1fc   : > { %p12550_p4 = pnand %p12549_p2, %p12543_p1 }
 0x1fe   : > { %12553 = shalt.err (!%p12550_p4)
}
 0x1ff   : > { %11383 = dma.hbm_to_vmem [thread:$0]  (!%p15067_p9), %s15075_s17, 1536, %s716_s18, [#allocation30], %s15069_s9, %s15069_s9, %s15068_s5  }
 0x200   : > { %s15076_s12 = sld [smem:[#allocation90_spill]] }
 0x206   : > { %s12554_s28 = scalar_lea.hbm %s15076_s12, 48 }
 0x207   : > { %p12555_p3 = scmp.ne.s32.totalorder %s15076_s12, %s12554_s28  ;;  %p12561_p7 = scmp.lt.u32.totalorder %s12554_s28, %s15076_s12 }
 0x209   : > { %p12557_p12 = pnand %p12555_p3, %p15066_p6 }
 0x20b   : > { %p12558_p8 = pneg %p12557_p12 }
 0x20d   : > { %p12563_p10 = pnand %p12561_p7, %p12558_p8 }
 0x20f   : > { %12566 = shalt.err (!%p12563_p10)
}
 0x210   : > { %s12567_s5 = scalar_lea.vmem %s13396_s0, 48  ;;  %s12574_s9 = scalar_lea.vmem %s13396_s0, 64 }
 0x211   : > { %p12568_p0 = scmp.ne.s32.totalorder %s13396_s0, %s12567_s5  ;;  %p12575_p11 = scmp.lt.s32.totalorder %s13396_s0, %s13396_s0 }
 0x212   : > { %p12576_p13 = scmp.lt.s32.totalorder %s12574_s9, %s12567_s5 }
 0x213   : > { %p12570_p5 = pnand %p12568_p0, %p15066_p6 }
 0x214   : > { %p12577_p2 = por %p12576_p13, %p12575_p11 }
 0x215   : > { %p12571_p1 = pneg %p12570_p5 }
 0x217   : > { %p12578_p4 = pnand %p12577_p2, %p12571_p1 }
 0x219   : > { %12581 = shalt.err (!%p12578_p4)
}
 0x21a   : > { %11386 = dma.hbm_to_vmem [thread:$0]  (!%p15067_p9), %s15076_s12, 48, %s13396_s0, [#allocation33]  }
 0x21b   : > { %s15077_s26 = sld [smem:[#allocation71_spill]]  ;;  %s744_s7 = scalar_lea.vmem [#allocation2], %s13226_s24 }
 0x21c   : > { %s752_s4 = sshll.u32 %s744_s7, 4  ;;  %s741_s6 = scalar_lea.sflag [#allocation3], %s13220_s16  ;;  %s753_s4 = int_to_ptr.vmem [resolvable:$true] %s752_s4 }
 0x21d   : > { %p15078_p3 = scmp.ne.s32.totalorder %s15064_s30, 0 }
 0x221   : > { %s13447_s19 = scalar_lea.hbm %s15077_s26, %s13223_s20  ;;  %s12587_s1 = scalar_lea.hbm %s15077_s26, 768 }
 0x222   : > { %s12582_s28 = scalar_lea.hbm %s13447_s19, 384  ;;  %p12588_p9 = scmp.lt.u32.totalorder %s13447_s19, %s15077_s26 }
 0x223   : > { %p12583_p6 = scmp.ne.s32.totalorder %s13447_s19, %s12582_s28  ;;  %p12589_p7 = scmp.lt.u32.totalorder %s12587_s1, %s12582_s28 }
 0x224   : > { %p12591_p0 = scmp.lt.u32.totalorder %s12582_s28, %s13447_s19 }
 0x225   : > { %p12585_p12 = pnand %p12583_p6, %p15078_p3  ;;  %p12590_p10 = por %p12589_p7, %p12588_p9 }
 0x227   : > { %p12586_p8 = pneg %p12585_p12  ;;  %p12592_p5 = por %p12591_p0, %p12590_p10 }
 0x229   : > { %p12593_p1 = pnand %p12592_p5, %p12586_p8 }
 0x22b   : > { %12596 = shalt.err (!%p12593_p1)
}
 0x22c   : > { %s12597_s5 = scalar_lea.vmem %s753_s4, 384  ;;  %s12821_s9 = smov [#allocation2]  }
 0x22d   : > { %p12598_p11 = scmp.ne.s32.totalorder %s753_s4, %s12597_s5  ;;  %s12602_s18 = sshll.u32 %s12821_s9, 4  ;;  %s12603_s18 = int_to_ptr.vmem [resolvable:$false] %s12602_s18 }
 0x22e   : > { %s12604_s29 = scalar_lea.vmem %s12603_s18, 768  ;;  %p12605_p4 = scmp.lt.s32.totalorder %s753_s4, %s12603_s18 }
 0x22f   : > { %p12600_p13 = pnand %p12598_p11, %p15078_p3  ;;  %p12606_p6 = scmp.lt.s32.totalorder %s12604_s29, %s12597_s5 }
 0x231   : > { %p12601_p2 = pneg %p12600_p13  ;;  %p12607_p12 = por %p12606_p6, %p12605_p4 }
 0x233   : > { %p12608_p7 = pnand %p12607_p12, %p12601_p2 }
 0x235   : > { %12611 = shalt.err (!%p12608_p7)
}
 0x236   : > { %p15079_p9 = scmp.ne.s32.totalorder %s15062_s27, 0  ;;  %s15080_s7 = sld [smem:[#allocation73_spill]] }
 0x237   : > { %s782_s8 = scalar_lea.vmem [#allocation7], %s13226_s24  ;;  %s10072_s1 = sshll.u32 %s13220_s16, 1 }
 0x238   : > { %11390 = dma.hbm_to_vmem [thread:$0]  (!%p15079_p9), %s13447_s19, 384, %s753_s4, %s741_s6  }
 0x239   : > { %s792_s0 = sshll.u32 %s782_s8, 4  ;;  %s793_s0 = int_to_ptr.vmem [resolvable:$true] %s792_s0 }
 0x23c   : > { %s13472_s28 = scalar_lea.hbm %s15080_s7, %s13223_s20  ;;  %s12617_s4 = scalar_lea.hbm %s15080_s7, 768 }
 0x23d   : > { %s12612_s10 = scalar_lea.hbm %s13472_s28, 384  ;;  %p12618_p5 = scmp.lt.u32.totalorder %s13472_s28, %s15080_s7 }
 0x23e   : > { %p12613_p8 = scmp.ne.s32.totalorder %s13472_s28, %s12612_s10  ;;  %p12619_p1 = scmp.lt.u32.totalorder %s12617_s4, %s12612_s10 }
 0x23f   : > { %p12621_p13 = scmp.lt.u32.totalorder %s12612_s10, %s13472_s28 }
 0x240   : > { %p12615_p10 = pnand %p12613_p8, %p15078_p3  ;;  %p12620_p11 = por %p12619_p1, %p12618_p5 }
 0x242   : > { %p12616_p0 = pneg %p12615_p10  ;;  %p12622_p2 = por %p12621_p13, %p12620_p11 }
 0x244   : > { %p12623_p4 = pnand %p12622_p2, %p12616_p0 }
 0x246   : > { %12626 = shalt.err (!%p12623_p4)
}
 0x247   : > { %s12627_s24 = scalar_lea.vmem %s793_s0, 384  ;;  %s12822_s5 = smov [#allocation7]  }
 0x248   : > { %p12628_p6 = scmp.ne.s32.totalorder %s793_s0, %s12627_s24  ;;  %s12632_s9 = sshll.u32 %s12822_s5, 4  ;;  %s12633_s9 = int_to_ptr.vmem [resolvable:$false] %s12632_s9 }
 0x249   : > { %s12634_s18 = scalar_lea.vmem %s12633_s9, 768  ;;  %p12635_p8 = scmp.lt.s32.totalorder %s793_s0, %s12633_s9 }
 0x24a   : > { %p12630_p12 = pnand %p12628_p6, %p15078_p3  ;;  %p12636_p10 = scmp.lt.s32.totalorder %s12634_s18, %s12627_s24 }
 0x24c   : > { %p12631_p7 = pneg %p12630_p12  ;;  %p12637_p9 = por %p12636_p10, %p12635_p8 }
 0x24e   : > { %p12638_p1 = pnand %p12637_p9, %p12631_p7 }
 0x250   : > { %12641 = shalt.err (!%p12638_p1)
}
 0x251   : > { %p15081_p5 = scmp.ne.s32.totalorder %s15062_s27, 0  ;;  %s10073_s29 = sshll.u32 %s12794_s2, 5 }
 0x252   : > { %s15082_s8 = sld [smem:[#allocation74_spill]]  ;;  %s803_s23 = scalar_lea.vmem [#allocation8], %s10072_s1 }
 0x253   : > { %11396 = dma.hbm_to_vmem [thread:$0]  (!%p15081_p5), %s13472_s28, 384, %s793_s0, %s13248_s13  }
 0x254   : > { %s811_s19 = sshll.u32 %s803_s23, 4  ;;  %s15083_s4 = sand.u32 1, %s12798_s25   ;;  %s812_s19 = int_to_ptr.vmem [resolvable:$true] %s811_s19 }
 0x255   : > { %s800_s6 = scalar_lea.sflag [#allocation9], %s15083_s4 }
 0x258   : > { %s13498_s10 = scalar_lea.hbm %s15082_s8, %s10073_s29  ;;  %s12647_s0 = scalar_lea.hbm %s15082_s8, 64 }
 0x259   : > { %s12642_s20 = scalar_lea.hbm %s13498_s10, 32  ;;  %p12648_p13 = scmp.lt.u32.totalorder %s13498_s10, %s15082_s8 }
 0x25a   : > { %p12643_p9 = scmp.ne.s32.totalorder %s13498_s10, %s12642_s20  ;;  %p12649_p2 = scmp.lt.u32.totalorder %s12647_s0, %s12642_s20 }
 0x25b   : > { %p12651_p6 = scmp.lt.u32.totalorder %s12642_s20, %s13498_s10 }
 0x25c   : > { %p12645_p0 = pnand %p12643_p9, %p15078_p3  ;;  %p12650_p4 = por %p12649_p2, %p12648_p13 }
 0x25e   : > { %p12646_p11 = pneg %p12645_p0  ;;  %p12652_p12 = por %p12651_p6, %p12650_p4 }
 0x260   : > { %p12653_p7 = pnand %p12652_p12, %p12646_p11 }
 0x262   : > { %12656 = shalt.err (!%p12653_p7)
}
 0x263   : > { %s12657_s1 = scalar_lea.vmem %s812_s19, 32  ;;  %s12823_s5 = smov [#allocation8]  }
 0x264   : > { %p12658_p8 = scmp.ne.s32.totalorder %s812_s19, %s12657_s1  ;;  %s12662_s9 = sshll.u32 %s12823_s5, 4  ;;  %s12663_s9 = int_to_ptr.vmem [resolvable:$false] %s12662_s9 }
 0x265   : > { %s12664_s18 = scalar_lea.vmem %s12663_s9, 64  ;;  %p12665_p9 = scmp.lt.s32.totalorder %s812_s19, %s12663_s9 }
 0x266   : > { %p12660_p10 = pnand %p12658_p8, %p15078_p3  ;;  %p12666_p0 = scmp.lt.s32.totalorder %s12664_s18, %s12657_s1 }
 0x268   : > { %p12661_p1 = pneg %p12660_p10  ;;  %p12667_p5 = por %p12666_p0, %p12665_p9 }
 0x26a   : > { %p12668_p2 = pnand %p12667_p5, %p12661_p1 }
 0x26c   : > { %12671 = shalt.err (!%p12668_p2)
}
 0x26d   : > { %p15084_p13 = scmp.ne.s32.totalorder %s15062_s27, 0  ;;  %s15085_s29 = sld [smem:[#allocation51_spill]] }
 0x26f   : > { %11399 = dma.hbm_to_vmem [thread:$0]  (!%p15084_p13), %s13498_s10, 32, %s812_s19, %s800_s6  }
 0x273   : > { %p15086_p11 = scmp.ne.s32.totalorder %s15085_s29, 0 }
 0x275   : > { %820 = sbr.rel (%p15086_p11) target bundleno = 5283 (0x14a3), region = 100 }
 0x27c   : > { %s13524_s30 = sand.u32 1, %s12782_s22   ;;  %p15087_p3 = scmp.ne.s32.totalorder %s15056_s21, 0 }
 0x27d   : > { %s13527_s14 = smul.u32 24, %s13524_s30  ;;  %s823_s15 = scalar_lea.sflag [#allocation3], %s13524_s30 }
 0x27f   : > { %s13531_s23 = scalar_lea.vmem [#allocation2], %s13527_s14 }
 0x280   : > { %12725 = dma.done.wait (%p15087_p3), %s823_s15, 384  }
 0x281   : > { %12727 = vsyncadd (%p15087_p3), %s823_s15, 4294966912  ;;  %s831_s27 = sand.u32 1, %s12995_s3   ;;  %s13539_s19 = scalar_lea.vmem [#allocation5], %s13527_s14 }
 0x282   : > { %s832_s10 = scalar_lea.sflag [#allocation6], %s831_s27 }
 0x283   : > { %12729 = dma.done.wait (%p15087_p3), %s832_s10, 768  }
 0x284   : > { %12731 = vsyncadd (%p15087_p3), %s832_s10, 4294966528  ;;  %s10075_s4 = sshll.u32 %s13524_s30, 1  ;;  %s13547_s6 = scalar_lea.vmem [#allocation7], %s13527_s14 }
 0x285   : > { %s850_s20 = scalar_lea.sflag [#allocation9], %s831_s27  ;;  %s13549_s13 = scalar_lea.vmem [#allocation8], %s10075_s4 }
 0x286   : > { %12733 = dma.done.wait (%p15087_p3), %s850_s20, 32  }
 0x287   : > { %12735 = vsyncadd (%p15087_p3), %s850_s20, 4294967264  ;;  %p15088_p5 = scmp.eq.s32.totalorder %s12995_s3, 0 }
 0x289   : > { %12737 = dma.done.wait (%p15088_p5), [#allocation9], 9216   ;;  %p15089_p4 = pmov %p15088_p5 }
 0x28b   : > { %12739 = vsyncadd (%p15089_p4), [#allocation9], 4294958080  ;;  %p15090_p6 = pmov %p15089_p4 }
 0x28c   : > { %p15091_p12 = pmov %p15089_p4 }
 0x28d   : > { %12741 = dma.done.wait (%p15090_p6), [#allocation12], 9264  }
 0x28e   : > { %12743 = vsyncadd (%p15091_p12), [#allocation12], 4294958032  ;;  %p15092_p7 = pmov %p15089_p4 }
 0x28f   : > { %p15093_p8 = pmov %p15089_p4 }
 0x290   : > { %12745 = dma.done.wait (%p15092_p7), [#allocation15], 9264  }
 0x291   : > { %12747 = vsyncadd (%p15093_p8), [#allocation15], 4294958032  ;;  %p15094_p10 = pmov %p15089_p4 }
 0x292   : > { %p15095_p1 = pmov %p15089_p4 }
 0x293   : > { %12749 = dma.done.wait (%p15094_p10), [#allocation18], 9264  }
 0x294   : > { %12751 = vsyncadd (%p15095_p1), [#allocation18], 4294958032  ;;  %p15096_p9 = pmov %p15095_p1 }
 0x295   : > { %p15097_p0 = pmov %p15095_p1 }
 0x296   : > { %12753 = dma.done.wait (%p15096_p9), [#allocation21], 96  }
 0x297   : > { %12755 = vsyncadd (%p15097_p0), [#allocation21], 4294967200  ;;  %p15098_p2 = pmov %p15097_p0 }
 0x298   : > { %p15099_p13 = pmov %p15097_p0 }
 0x299   : > { %12757 = dma.done.wait (%p15098_p2), [#allocation24], 96  }
 0x29a   : > { %12759 = vsyncadd (%p15099_p13), [#allocation24], 4294967200  ;;  %p15100_p11 = pmov %p15097_p0 }
 0x29b   : > { %p15101_p3 = pmov %p15097_p0 }
 0x29c   : > { %12761 = dma.done.wait (%p15100_p11), [#allocation27], 3120  }
 0x29d   : > { %12763 = vsyncadd (%p15101_p3), [#allocation27], 4294964176  ;;  %p15102_p5 = pmov %p15097_p0 }
 0x29e   : > { %p15103_p4 = pmov %p15097_p0 }
 0x29f   : > { %12765 = dma.done.wait (%p15102_p5), [#allocation30], 1552  }
 0x2a0   : > { %12767 = vsyncadd (%p15103_p4), [#allocation30], 4294965744  ;;  %p15104_p6 = pmov %p15097_p0 }
 0x2a1   : > { %p15105_p12 = pmov %p15097_p0 }
 0x2a2   : > { %12769 = dma.done.wait (%p15104_p6), [#allocation33], 48  }
 0x2a3   : > { %12771 = vsyncadd (%p15105_p12), [#allocation33], 4294967248  ;;  %v11545_v0 = vld [vmem:[#allocation10 + $0x4] ss:$12 sps:$4 sm:$0xff]   ;;  %v11547_v1 = vld [vmem:[#allocation10] ss:$12 sps:$4 sm:$0xff]  }
 0x2a4   : > { %1504 = vmatprep.subr.bf16.mxu0 %v11545_v0  ;;  %v11548_v2 = vld [vmem:[#allocation10 + $0x1c] ss:$12 sps:$4 sm:$0xff]   ;;  %v11550_v3 = vld [vmem:[#allocation10 + $0x18] ss:$12 sps:$4 sm:$0xff]   ;;  %v11551_v4 = vld [vmem:[#allocation10 + $0x34] ss:$12 sps:$4 sm:$0xff]  }
 0x2a5   : > { %1505 = vmatpush1.bf16.msra.mxu0 %v11547_v1  ;;  %v11553_v5 = vld [vmem:[#allocation10 + $0x30] ss:$12 sps:$4 sm:$0xff]   ;;  %v11554_v6 = vld [vmem:[#allocation10 + $0x4c] ss:$12 sps:$4 sm:$0xff]   ;;  %v11556_v7 = vld [vmem:[#allocation10 + $0x48] ss:$12 sps:$4 sm:$0xff]  }
 0x2a6   : > { %1506 = vmatprep.subr.bf16.mxu0 %v11548_v2  ;;  %v11557_v8 = vld [vmem:[#allocation10 + $0x64] ss:$12 sps:$4 sm:$0xff]   ;;  %v11559_v9 = vld [vmem:[#allocation10 + $0x60] ss:$12 sps:$4 sm:$0xff]   ;;  %v11560_v10 = vld [vmem:[#allocation10 + $0x7c] ss:$12 sps:$4 sm:$0xff]  }
 0x2a7   : > { %v11562_v11 = vld [vmem:[#allocation10 + $0x78] ss:$12 sps:$4 sm:$0xff]   ;;  %v11563_v12 = vld [vmem:[#allocation10 + $0x94] ss:$12 sps:$4 sm:$0xff]   ;;  %v11565_v15 = vld [vmem:[#allocation10 + $0x90] ss:$12 sps:$4 sm:$0xff]  }
 0x2a8   : > { %v11589_v13 = vld [vmem:[#allocation10 + $0xc8] ss:$12 sps:$4 sm:$0xff]   ;;  %v11594_v16 = vld [vmem:[#allocation10 + $0xe0] ss:$12 sps:$4 sm:$0xff]   ;;  %v11600_v22 = vld [vmem:[#allocation10 + $0xf8] ss:$12 sps:$4 sm:$0xff]  }
 0x2a9   : > { %1507 = vmatpush1.bf16.msra.mxu0 %v11550_v3  ;;  %v11591_v14 = vld [vmem:[#allocation10 + $0x8] ss:$12 sps:$4 sm:$0xff]   ;;  %10518 = vmatprep.subr.bf16.mxu1 %v11589_v13  ;;  %v11566_v17 = vld [vmem:[#allocation10 + $0xac] ss:$12 sps:$4 sm:$0xff]   ;;  %v11569_v23 = vld [vmem:[#allocation10 + $0xc4] ss:$12 sps:$4 sm:$0xff]  }
 0x2aa   : > { %1508 = vmatprep.subr.bf16.mxu0 %v11551_v4  ;;  %10519 = vmatpush3.bf16.msra.mxu1 %v11591_v14  ;;  %v11596_v18 = vld [vmem:[#allocation10 + $0x20] ss:$12 sps:$4 sm:$0xff]   ;;  %v11568_v20 = vld [vmem:[#allocation10 + $0xa8] ss:$12 sps:$4 sm:$0xff]   ;;  %v11601_v24 = vld [vmem:[#allocation10 + $0x38] ss:$12 sps:$4 sm:$0xff]  }
 0x2ab   : > { %10520 = vmatprep.subr.bf16.mxu1 %v11594_v16  ;;  %v991_v19 = vld [vmem:[%s13531_s23 + $0x8] sm:$0xff]  ;;  %v11572_v26 = vld [vmem:[#allocation10 + $0xdc] ss:$12 sps:$4 sm:$0xff]   ;;  %v14999_v50 = vmov 0.0   ;;  %vm12825_vm0 = vmmov 0   ;;  %v14997_v62 = vmov 0  }
 0x2ac   : > { %v1005_v21 = vpack.c.bf16 %v991_v19, %v991_v19  ;;  %v11571_v25 = vld [vmem:[#allocation10 + $0xc0] ss:$12 sps:$4 sm:$0xff]   ;;  %v11605_v27 = vld [vmem:[#allocation10 + $0x110] ss:$12 sps:$4 sm:$0xff]   ;;  %v11574_v29 = vld [vmem:[#allocation10 + $0xd8] ss:$12 sps:$4 sm:$0xff]  }
 0x2ad   : > { %1509 = vmatpush1.bf16.msra.mxu0 %v11553_v5  ;;  %v11606_v28 = vld [vmem:[#allocation10 + $0x50] ss:$12 sps:$4 sm:$0xff]   ;;  %v11610_v30 = vld [vmem:[#allocation10 + $0x128] ss:$12 sps:$4 sm:$0xff]   ;;  %v11615_v34 = vld [vmem:[#allocation10 + $0x140] ss:$12 sps:$4 sm:$0xff]  }
 0x2ae   : > { %1510 = vmatprep.subr.bf16.mxu0 %v11554_v6  ;;  %10521 = vmatpush3.bf16.msra.mxu1 %v11596_v18  ;;  %v11611_v31 = vld [vmem:[#allocation10 + $0x68] ss:$12 sps:$4 sm:$0xff]   ;;  %v11577_v33 = vld [vmem:[#allocation10 + $0xf0] ss:$12 sps:$4 sm:$0xff]   ;;  %v11616_v35 = vld [vmem:[#allocation10 + $0x80] ss:$12 sps:$4 sm:$0xff]  }
 0x2af   : > { %1536 = vmatprep.mubr.bf16.mxu0 %v1005_v21  ;;  %10522 = vmatprep.subr.bf16.mxu1 %v11600_v22  ;;  %v11575_v32 = vld [vmem:[#allocation10 + $0xf4] ss:$12 sps:$4 sm:$0xff]   ;;  %v11578_v36 = vld [vmem:[#allocation10 + $0x10c] ss:$12 sps:$4 sm:$0xff]   ;;  %v11581_v39 = vld [vmem:[#allocation10 + $0x124] ss:$12 sps:$4 sm:$0xff]  }
 0x2b0   : > { %1618 = vmatprep.mubr.bf16.mxu1 %v1005_v21  ;;  %v11620_v37 = vld [vmem:[#allocation10 + $0x158] ss:$12 sps:$4 sm:$0xff]   ;;  %v11580_v38 = vld [vmem:[#allocation10 + $0x108] ss:$12 sps:$4 sm:$0xff]   ;;  %v11625_v41 = vld [vmem:[#allocation10 + $0x170] ss:$12 sps:$4 sm:$0xff]  }
 0x2b1   : > { %1511 = vmatpush1.bf16.msra.mxu0 %v11556_v7  ;;  %v11621_v40 = vld [vmem:[#allocation10 + $0x98] ss:$12 sps:$4 sm:$0xff]   ;;  %v11583_v42 = vld [vmem:[#allocation10 + $0x120] ss:$12 sps:$4 sm:$0xff]   ;;  %v11626_v43 = vld [vmem:[#allocation10 + $0xb0] ss:$12 sps:$4 sm:$0xff]  }
 0x2b2   : > { %1512 = vmatprep.subr.bf16.mxu0 %v11557_v8  ;;  %10523 = vmatpush3.bf16.msra.mxu1 %v11601_v24  ;;  %v11584_v44 = vld [vmem:[#allocation10 + $0x13c] ss:$12 sps:$4 sm:$0xff]   ;;  %v11586_v46 = vld [vmem:[#allocation10 + $0x138] ss:$12 sps:$4 sm:$0xff]   ;;  %v11587_v48 = vld [vmem:[#allocation10 + $0x154] ss:$12 sps:$4 sm:$0xff]  }
 0x2b3   : > { %10524 = vmatprep.subr.bf16.mxu1 %v11605_v27  ;;  %v990_v45 = vld [vmem:[%s13531_s23] sm:$0xff]  ;;  %v11609_v61 = vld [vmem:[#allocation10 + $0x1b4] ss:$12 sps:$4 sm:$0xff]   ;;  %vm2993_vm1 = vcmask 97280   ;;  %s12827_s3 = smov 116   ;;  %vm3070_vm3 = vcmask 64512  }
 0x2b4   : > { %v11630_v47 = vld [vmem:[#allocation10 + $0x188] ss:$12 sps:$4 sm:$0xff]   ;;  %v1004_v49 = vpack.c.bf16 %v990_v45, %v990_v45  ;;  %v11590_v51 = vld [vmem:[#allocation10 + $0x150] ss:$12 sps:$4 sm:$0xff]   ;;  %v11634_v52 = vld [vmem:[#allocation10 + $0x1a0] ss:$12 sps:$4 sm:$0xff]  }
 0x2b5   : > { %1513 = vmatpush1.bf16.msra.mxu0 %v11559_v9  ;;  %v11592_v53 = vld [vmem:[#allocation10 + $0x16c] ss:$12 sps:$4 sm:$0xff]   ;;  %v11595_v54 = vld [vmem:[#allocation10 + $0x168] ss:$12 sps:$4 sm:$0xff]   ;;  %v11599_v56 = vld [vmem:[#allocation10 + $0x184] ss:$12 sps:$4 sm:$0xff]  }
 0x2b6   : > { %1514 = vmatprep.subr.bf16.mxu0 %v11560_v10  ;;  %10525 = vmatpush3.bf16.msra.mxu1 %v11606_v28  ;;  %v11636_v55 = vld [vmem:[#allocation10 + $0x1b8] ss:$12 sps:$4 sm:$0xff]   ;;  %v11597_v57 = vld [vmem:[#allocation10 + $0x180] ss:$12 sps:$4 sm:$0xff]   ;;  %v11604_v58 = vld [vmem:[#allocation10 + $0x19c] ss:$12 sps:$4 sm:$0xff]  }
 0x2b7   : > { %10526 = vmatprep.subr.bf16.mxu1 %v11610_v30  ;;  %v11639_v59 = vld [vmem:[#allocation10 + $0x1d0] ss:$12 sps:$4 sm:$0xff]   ;;  %v11602_v60 = vld [vmem:[#allocation10 + $0x198] ss:$12 sps:$4 sm:$0xff]   ;;  %v11642_v63 = vld [vmem:[#allocation10 + $0x1e8] ss:$12 sps:$4 sm:$0xff]  }
 0x2b8   : > { %v11607_v0 = vld [vmem:[#allocation10 + $0x1b0] ss:$12 sps:$4 sm:$0xff]   ;;  %v11614_v1 = vld [vmem:[#allocation10 + $0x1cc] ss:$12 sps:$4 sm:$0xff]   ;;  %v11612_v3 = vld [vmem:[#allocation10 + $0x1c8] ss:$12 sps:$4 sm:$0xff]  }
 0x2b9   : > { %1515 = vmatpush1.bf16.msra.mxu0 %v11562_v11  ;;  %v11645_v2 = vld [vmem:[#allocation10 + $0x200] ss:$12 sps:$4 sm:$0xff]   ;;  %v11619_v4 = vld [vmem:[#allocation10 + $0x1e4] ss:$12 sps:$4 sm:$0xff]   ;;  %v11624_v7 = vld [vmem:[#allocation10 + $0x1fc] ss:$12 sps:$4 sm:$0xff]  }
 0x2ba   : > { %1516 = vmatprep.subr.bf16.mxu0 %v11563_v12  ;;  %10527 = vmatpush3.bf16.msra.mxu1 %v11611_v31  ;;  %v11648_v5 = vld [vmem:[#allocation10 + $0x218] ss:$12 sps:$4 sm:$0xff]   ;;  %v11617_v6 = vld [vmem:[#allocation10 + $0x1e0] ss:$12 sps:$4 sm:$0xff]   ;;  %v11651_v8 = vld [vmem:[#allocation10 + $0x230] ss:$12 sps:$4 sm:$0xff]  }
 0x2bb   : > { %10528 = vmatprep.subr.bf16.mxu1 %v11615_v34  ;;  %v11622_v9 = vld [vmem:[#allocation10 + $0x1f8] ss:$12 sps:$4 sm:$0xff]   ;;  %v11655_v10 = vld [vmem:[#allocation13 + $0x4] ss:$12 sps:$4 sm:$0xff]   ;;  %v11660_v16 = vld [vmem:[#allocation13 + $0x1c] ss:$12 sps:$4 sm:$0xff]  }
 0x2bc   : > { %v992_v11 = vld [vmem:[%s13531_s23 + $0x10] sm:$0xff]  ;;  %v11653_v13 = vld [vmem:[#allocation13] ss:$12 sps:$4 sm:$0xff]   ;;  %s12828_s21 = smov 104   ;;  %s12829_s28 = smov 80   ;;  %vm6473_vm4 = vcmask 31744  }
 0x2bd   : > { %1517 = vmatpush1.bf16.msra.mxu0 %v11565_v15  ;;  %v11629_v12 = vld [vmem:[#allocation10 + $0x214] ss:$12 sps:$4 sm:$0xff]   ;;  %v1006_v15 = vpack.c.bf16 %v992_v11, %v992_v11  ;;  %v11633_v18 = vld [vmem:[#allocation10 + $0x22c] ss:$12 sps:$4 sm:$0xff]   ;;  %v11638_v27 = vld [vmem:[#allocation13 + $0xe0] ss:$12 sps:$4 sm:$0xff]  }
 0x2be   : > { %1518 = vmatprep.subr.bf16.mxu0 %v11566_v17  ;;  %10529 = vmatpush3.bf16.msra.mxu1 %v11616_v35  ;;  %v994_v14 = vld [vmem:[%s13539_s19 + $0x8] sm:$0xff]  ;;  %v11667_v28 = vld [vmem:[#allocation13 + $0x48] ss:$12 sps:$4 sm:$0xff]   ;;  %s14985_s0 = smov 44   ;;  %s14984_s24 = smov 32   ;;  %vm8357_vm5 = vcmask 195584  }
 0x2bf   : > { %10530 = vmatprep.subr.bf16.mxu1 %v11620_v37  ;;  %v11627_v17 = vld [vmem:[#allocation10 + $0x210] ss:$12 sps:$4 sm:$0xff]   ;;  %v1667_v19 = vpack.c.bf16 %v994_v14, %v994_v14  ;;  %v11665_v21 = vld [vmem:[#allocation13 + $0x34] ss:$12 sps:$4 sm:$0xff]   ;;  %v11631_v22 = vld [vmem:[#allocation10 + $0x228] ss:$12 sps:$4 sm:$0xff]  }
 0x2c0   : > { %v11663_v24 = vld [vmem:[#allocation13 + $0x30] ss:$12 sps:$4 sm:$0xff]   ;;  %v11640_v30 = vld [vmem:[#allocation13 + $0x20] ss:$12 sps:$4 sm:$0xff]   ;;  %v11641_v31 = vld [vmem:[#allocation13 + $0xf8] ss:$12 sps:$4 sm:$0xff]  }
 0x2c1   : > { %1519 = vmatpush1.bf16.msra.mxu0 %v11568_v20  ;;  %v11658_v20 = vld [vmem:[#allocation13 + $0x18] ss:$12 sps:$4 sm:$0xff]   ;;  %v11644_v35 = vld [vmem:[#allocation13 + $0x110] ss:$12 sps:$4 sm:$0xff]   ;;  %v11681_v37 = vld [vmem:[#allocation13 + $0x94] ss:$12 sps:$4 sm:$0xff]  }
 0x2c2   : > { %1520 = vmatprep.subr.bf16.mxu0 %v11569_v23  ;;  %10531 = vmatpush3.bf16.msra.mxu1 %v11621_v40  ;;  %v11635_v23 = vld [vmem:[#allocation13 + $0xc8] ss:$12 sps:$4 sm:$0xff]   ;;  %v11643_v34 = vld [vmem:[#allocation13 + $0x38] ss:$12 sps:$4 sm:$0xff]   ;;  %v11679_v40 = vld [vmem:[#allocation13 + $0x90] ss:$12 sps:$4 sm:$0xff]  }
 0x2c3   : > { %10532 = vmatprep.subr.bf16.mxu1 %v11625_v41  ;;  %v11685_v41 = vld [vmem:[#allocation13 + $0xac] ss:$12 sps:$4 sm:$0xff]   ;;  %v11689_v45 = vld [vmem:[#allocation13 + $0xc4] ss:$12 sps:$4 sm:$0xff]   ;;  %v11739_v14 = vld [vmem:[#allocation13 + $0x19c] ss:$12 sps:$4 sm:$0xff]  }
 0x2c4   : > { %v11733_v11 = vld [vmem:[#allocation13 + $0x184] ss:$12 sps:$4 sm:$0xff]   ;;  %s12832_s16 = smov 20   ;;  %s14993_s1 = smov 8   ;;  %vm8359_vm6 = vcmask 293888   ;;  %vm8361_vm7 = vcmask 392192  }
 0x2c5   : > { %1521 = vmatpush1.bf16.msra.mxu0 %v11571_v25  ;;  %v11669_v25 = vld [vmem:[#allocation13 + $0x4c] ss:$12 sps:$4 sm:$0xff]   ;;  %s14986_s5 = smov 124   ;;  %s14987_s9 = smov 112   ;;  %vm8363_vm8 = vcmask 490496   ;;  %vm8365_vm9 = vcmask 588800  }
 0x2c6   : > { %1522 = vmatprep.subr.bf16.mxu0 %v11572_v26  ;;  %10533 = vmatpush3.bf16.msra.mxu1 %v11626_v43  ;;  %v11637_v26 = vld [vmem:[#allocation13 + $0x8] ss:$12 sps:$4 sm:$0xff]   ;;  %v11650_v43 = vld [vmem:[#allocation13 + $0x140] ss:$12 sps:$4 sm:$0xff]   ;;  %s14988_s18 = smov 100   ;;  %s14990_s29 = smov 88  }
 0x2c7   : > { %10806 = vmatprep.subr.bf16.mxu1 %v14999_v50  ;;  %s14989_s15 = smov 76   ;;  %s14970_s23 = smov 64   ;;  %vm8367_vm10 = vcmask 687104   ;;  %vm8376_vm11 = vcmask 130048   ;;  %vm8369_vm12 = vcmask 785408   ;;  %vm8378_vm13 = vcmask 228352  }
 0x2c8   : > { %s14968_s27 = smov 52   ;;  %s14962_s10 = smov 40   ;;  %vm8371_vm14 = vcmask 883712   ;;  %vm8380_vm15 = vcmask 326656  }
 0x2c9   : > { %1523 = vmatpush1.bf16.msra.mxu0 %v11574_v29  ;;  %1619 = vmatmul.mubr.bf16.vlgmr.msra.gmra.mrb[0].mxu1 %v1004_v49  ;;  %v11673_v29 = vld [vmem:[#allocation13 + $0x64] ss:$12 sps:$4 sm:$0xff]   ;;  %s14966_s4 = smov 16   ;;  %s14972_s20 = smov 4  }
 0x2ca   : > { %1524 = vmatprep.subr.bf16.mxu0 %v11575_v32  ;;  %10807 = vmatpush3.bf16.msra.mxu1 %v11630_v47  ;;  %v11671_v32 = vld [vmem:[#allocation13 + $0x60] ss:$12 sps:$4 sm:$0xff]   ;;  %v11656_v47 = vld [vmem:[#allocation13 + $0x158] ss:$12 sps:$4 sm:$0xff]  }
 0x2cb   : > { %10808 = vmatprep.subr.bf16.mxu1 %v14999_v50  ;;  %10822 = vmatprep.mubr.msk.bf16.mxu1 %vm12825_vm0, %v14999_v50 }
 0x2cd   : > { %1525 = vmatpush1.bf16.msra.mxu0 %v11577_v33  ;;  %v11677_v33 = vld [vmem:[#allocation13 + $0x7c] ss:$12 sps:$4 sm:$0xff]  }
 0x2ce   : > { %1526 = vmatprep.subr.bf16.mxu0 %v11578_v36  ;;  %10809 = vmatpush3.bf16.msra.mxu1 %v11634_v52  ;;  %v11675_v36 = vld [vmem:[#allocation13 + $0x78] ss:$12 sps:$4 sm:$0xff]   ;;  %v11661_v52 = vld [vmem:[#allocation13 + $0x170] ss:$12 sps:$4 sm:$0xff]  }
 0x2cf   : > { %10810 = vmatprep.subr.bf16.mxu1 %v14999_v50 }
 0x2d1   : > { %1527 = vmatpush1.bf16.msra.mxu0 %v11580_v38  ;;  %v11646_v38 = vld [vmem:[#allocation13 + $0x50] ss:$12 sps:$4 sm:$0xff]  }
 0x2d2   : > { %1528 = vmatprep.subr.bf16.mxu0 %v11581_v39  ;;  %10811 = vmatpush3.bf16.msra.mxu1 %v11636_v55  ;;  %v11647_v39 = vld [vmem:[#allocation13 + $0x128] ss:$12 sps:$4 sm:$0xff]   ;;  %v11662_v55 = vld [vmem:[#allocation13 + $0xb0] ss:$12 sps:$4 sm:$0xff]  }
 0x2d3   : > { %10812 = vmatprep.subr.bf16.mxu1 %v14999_v50 }
 0x2d5   : > { %1529 = vmatpush1.bf16.msra.mxu0 %v11583_v42  ;;  %v11649_v42 = vld [vmem:[#allocation13 + $0x68] ss:$12 sps:$4 sm:$0xff]  }
 0x2d6   : > { %1530 = vmatprep.subr.bf16.mxu0 %v11584_v44  ;;  %10813 = vmatpush3.bf16.msra.mxu1 %v11639_v59  ;;  %v11683_v44 = vld [vmem:[#allocation13 + $0xa8] ss:$12 sps:$4 sm:$0xff]  }
 0x2d7   : > { %10814 = vmatprep.subr.bf16.mxu1 %v14999_v50 }
 0x2d9   : > { %1531 = vmatpush1.bf16.msra.mxu0 %v11586_v46  ;;  %v11652_v46 = vld [vmem:[#allocation13 + $0x80] ss:$12 sps:$4 sm:$0xff]  }
 0x2da   : > { %1532 = vmatprep.subr.bf16.mxu0 %v11587_v48  ;;  %10815 = vmatpush3.bf16.msra.mxu1 %v11642_v63  ;;  %v11687_v48 = vld [vmem:[#allocation13 + $0xc0] ss:$12 sps:$4 sm:$0xff]   ;;  %v11709_v63 = vld [vmem:[#allocation13 + $0x124] ss:$12 sps:$4 sm:$0xff]  }
 0x2db   : > { %10816 = vmatprep.subr.bf16.mxu1 %v14999_v50 }
 0x2dd   : > { %1533 = vmatpush1.bf16.msra.mxu0 %v11590_v51  ;;  %v11657_v51 = vld [vmem:[#allocation13 + $0x98] ss:$12 sps:$4 sm:$0xff]  }
 0x2de   : > { %1534 = vmatprep.subr.bf16.mxu0 %v11592_v53  ;;  %10817 = vmatpush3.bf16.msra.mxu1 %v11645_v2  ;;  %v11691_v53 = vld [vmem:[#allocation13 + $0xd8] ss:$12 sps:$4 sm:$0xff]   ;;  %v11715_v2 = vld [vmem:[#allocation13 + $0x13c] ss:$12 sps:$4 sm:$0xff]  }
 0x2df   : > { %10818 = vmatprep.subr.bf16.mxu1 %v14999_v50 }
 0x2e1   : > { %1535 = vmatpush1.bf16.msra.mxu0 %v11595_v54  ;;  %v11697_v54 = vld [vmem:[#allocation13 + $0xf4] ss:$12 sps:$4 sm:$0xff]  }
 0x2e2   : > { %1545 = vmatprep.subr.bf16.mxu0 %v11599_v56  ;;  %10819 = vmatpush3.bf16.msra.mxu1 %v11648_v5  ;;  %v993_v56 = vld [vmem:[%s13539_s19] sm:$0xff] }
 0x2e3   : > { %10820 = vmatprep.subr.bf16.mxu1 %v14999_v50  ;;  %v1666_v59 = vpack.c.bf16 %v993_v56, %v993_v56  ;;  %v11721_v5 = vld [vmem:[#allocation13 + $0x154] ss:$12 sps:$4 sm:$0xff]  }
 0x2e4   : > { %1537 = vmatmul.mubr.bf16.vlgmr.msra.gmra.mrb[0].mxu0 %v1004_v49  ;;  %v11693_v49 = vld [vmem:[#allocation13 + $0xdc] ss:$12 sps:$4 sm:$0xff]   ;;  %v11758_v56 = vld [vmem:[#allocation16 + $0xf0] ss:$12 sps:$4 sm:$0xff]  }
 0x2e5   : > { %1546 = vmatpush1.bf16.msra.mxu0 %v11597_v57  ;;  %1577 = vmatprep.mubr.bf16.mxu0 %v14997_v62  ;;  %v11695_v57 = vld [vmem:[#allocation13 + $0xf0] ss:$12 sps:$4 sm:$0xff]  }
 0x2e6   : > { %1547 = vmatprep.subr.bf16.mxu0 %v11604_v58  ;;  %10821 = vmatpush3.bf16.msra.mxu1 %v11651_v8  ;;  %v11703_v58 = vld [vmem:[#allocation13 + $0x10c] ss:$12 sps:$4 sm:$0xff]  }
 0x2e7   : > { %2166 = vmatprep.subr.bf16.mxu1 %v11655_v10  ;;  %v11727_v8 = vld [vmem:[#allocation13 + $0x16c] ss:$12 sps:$4 sm:$0xff]   ;;  %v11725_v10 = vld [vmem:[#allocation13 + $0x168] ss:$12 sps:$4 sm:$0xff]  }
 0x2e9   : > { %1548 = vmatpush1.bf16.msra.mxu0 %v11602_v60  ;;  %10823 = vmatmul.mubr.bf16.vlgmr.msra.gmra.mrb[4].mxu1 %v1006_v15  ;;  %v11666_v60 = vld [vmem:[#allocation13 + $0x188] ss:$12 sps:$4 sm:$0xff]  }
 0x2ea   : > { %1549 = vmatprep.subr.bf16.mxu0 %v11609_v61  ;;  %2167 = vmatpush1.bf16.msra.mxu1 %v11653_v13  ;;  %v11701_v61 = vld [vmem:[#allocation13 + $0x108] ss:$12 sps:$4 sm:$0xff]   ;;  %v11731_v13 = vld [vmem:[#allocation13 + $0x180] ss:$12 sps:$4 sm:$0xff]  }
 0x2eb   : > { %2168 = vmatprep.subr.bf16.mxu1 %v11660_v16  ;;  %2198 = vmatprep.mubr.bf16.mxu1 %v1667_v19  ;;  %v11737_v16 = vld [vmem:[#allocation13 + $0x198] ss:$12 sps:$4 sm:$0xff]  }
 0x2ed   : > { %1550 = vmatpush1.bf16.msra.mxu0 %v11607_v0  ;;  %v11670_v0 = vld [vmem:[#allocation13 + $0x1a0] ss:$12 sps:$4 sm:$0xff]  }
 0x2ee   : > { %1551 = vmatprep.subr.bf16.mxu0 %v11614_v1  ;;  %2169 = vmatpush1.bf16.msra.mxu1 %v11658_v20  ;;  %v11707_v1 = vld [vmem:[#allocation13 + $0x120] ss:$12 sps:$4 sm:$0xff]   ;;  %v11700_v20 = vld [vmem:[#allocation16 + $0x4] ss:$12 sps:$4 sm:$0xff]  }
 0x2ef   : > { %2170 = vmatprep.subr.bf16.mxu1 %v11665_v21  ;;  %v11743_v21 = vld [vmem:[#allocation13 + $0x1b0] ss:$12 sps:$4 sm:$0xff]  }
 0x2f1   : > { %1552 = vmatpush1.bf16.msra.mxu0 %v11612_v3  ;;  %v11674_v3 = vld [vmem:[#allocation13 + $0x1b8] ss:$12 sps:$4 sm:$0xff]  }
 0x2f2   : > { %1553 = vmatprep.subr.bf16.mxu0 %v11619_v4  ;;  %2171 = vmatpush1.bf16.msra.mxu1 %v11663_v24  ;;  %v11713_v4 = vld [vmem:[#allocation13 + $0x138] ss:$12 sps:$4 sm:$0xff]  }
 0x2f3   : > { %2172 = vmatprep.subr.bf16.mxu1 %v11669_v25  ;;  %v11698_v24 = vld [vmem:[#allocation16] ss:$12 sps:$4 sm:$0xff]  }
 0x2f5   : > { %1554 = vmatpush1.bf16.msra.mxu0 %v11617_v6  ;;  %v11678_v6 = vld [vmem:[#allocation13 + $0x1d0] ss:$12 sps:$4 sm:$0xff]  }
 0x2f6   : > { %1555 = vmatprep.subr.bf16.mxu0 %v11624_v7  ;;  %2173 = vmatpush1.bf16.msra.mxu1 %v11667_v28  ;;  %v11719_v7 = vld [vmem:[#allocation13 + $0x150] ss:$12 sps:$4 sm:$0xff]  }
 0x2f7   : > { %2174 = vmatprep.subr.bf16.mxu1 %v11673_v29  ;;  %v11757_v28 = vld [vmem:[#allocation13 + $0x1e4] ss:$12 sps:$4 sm:$0xff]  }
 0x2f9   : > { %1556 = vmatpush1.bf16.msra.mxu0 %v11622_v9  ;;  %v11682_v9 = vld [vmem:[#allocation13 + $0x1e8] ss:$12 sps:$4 sm:$0xff]  }
 0x2fa   : > { %1557 = vmatprep.subr.bf16.mxu0 %v11629_v12  ;;  %2175 = vmatpush1.bf16.msra.mxu1 %v11671_v32  ;;  %v11686_v12 = vld [vmem:[#allocation13 + $0x200] ss:$12 sps:$4 sm:$0xff]  }
 0x2fb   : > { %2176 = vmatprep.subr.bf16.mxu1 %v11677_v33  ;;  %v11755_v32 = vld [vmem:[#allocation13 + $0x1e0] ss:$12 sps:$4 sm:$0xff]   ;;  %v11763_v33 = vld [vmem:[#allocation13 + $0x1fc] ss:$12 sps:$4 sm:$0xff]  }
 0x2fd   : > { %1558 = vmatpush1.bf16.msra.mxu0 %v11627_v17  ;;  %v11745_v17 = vld [vmem:[#allocation13 + $0x1b4] ss:$12 sps:$4 sm:$0xff]  }
 0x2fe   : > { %1559 = vmatprep.subr.bf16.mxu0 %v11633_v18  ;;  %2177 = vmatpush1.bf16.msra.mxu1 %v11675_v36  ;;  %v11694_v18 = vld [vmem:[#allocation13 + $0x230] ss:$12 sps:$4 sm:$0xff]   ;;  %v11761_v36 = vld [vmem:[#allocation13 + $0x1f8] ss:$12 sps:$4 sm:$0xff]  }
 0x2ff   : > { %2178 = vmatprep.subr.bf16.mxu1 %v11681_v37  ;;  %v11769_v37 = vld [vmem:[#allocation13 + $0x214] ss:$12 sps:$4 sm:$0xff]  }
 0x301   : > { %1560 = vmatpush1.bf16.msra.mxu0 %v11631_v22  ;;  %v997_v22 = vld [vmem:[%s13547_s6 + $0x8] sm:$0xff] }
 0x302   : > { %10549 = vmatprep.subr.bf16.mxu0 %v11635_v23  ;;  %2179 = vmatpush1.bf16.msra.mxu1 %v11679_v40  ;;  %v11751_v23 = vld [vmem:[#allocation13 + $0x1cc] ss:$12 sps:$4 sm:$0xff]   ;;  %v2329_v29 = vpack.c.bf16 %v997_v22, %v997_v22  ;;  %v11767_v40 = vld [vmem:[#allocation13 + $0x210] ss:$12 sps:$4 sm:$0xff]  }
 0x303   : > { %2180 = vmatprep.subr.bf16.mxu1 %v11685_v41  ;;  %v11775_v41 = vld [vmem:[#allocation13 + $0x22c] ss:$12 sps:$4 sm:$0xff]  }
 0x304   : > { %1578 = vmatmul.mubr.bf16.vlgmr.msra.gmra.mrb[0].mxu0 %v1006_v15  ;;  %v11690_v15 = vld [vmem:[#allocation13 + $0x218] ss:$12 sps:$4 sm:$0xff]  }
 0x305   : > { %10550 = vmatpush3.bf16.msra.mxu0 %v11637_v26  ;;  %2280 = vmatprep.mubr.bf16.mxu0 %v1667_v19  ;;  %v995_v19 = vld [vmem:[%s13539_s19 + $0x10] sm:$0xff]  ;;  %s14964_s19 = smov 28  }
 0x306   : > { %10551 = vmatprep.subr.bf16.mxu0 %v11638_v27  ;;  %2181 = vmatpush1.bf16.msra.mxu1 %v11683_v44  ;;  %v1668_v25 = vpack.c.bf16 %v995_v19, %v995_v19  ;;  %v11706_v26 = vld [vmem:[#allocation16 + $0x1c] ss:$12 sps:$4 sm:$0xff]   ;;  %v11749_v27 = vld [vmem:[#allocation13 + $0x1c8] ss:$12 sps:$4 sm:$0xff]   ;;  %v11797_v19 = vld [vmem:[#allocation16 + $0x1e0] ss:$12 sps:$4 sm:$0xff]  }
 0x307   : > { %2182 = vmatprep.subr.bf16.mxu1 %v11689_v45  ;;  %v11773_v44 = vld [vmem:[#allocation13 + $0x228] ss:$12 sps:$4 sm:$0xff]   ;;  %v11805_v22 = vld [vmem:[#allocation16 + $0x214] ss:$12 sps:$4 sm:$0xff]  }
 0x308   : > { %v11728_v45 = vld [vmem:[#allocation16 + $0x78] ss:$12 sps:$4 sm:$0xff]  }
 0x309   : > { %10552 = vmatpush3.bf16.msra.mxu0 %v11640_v30  ;;  %v11704_v30 = vld [vmem:[#allocation16 + $0x18] ss:$12 sps:$4 sm:$0xff]  }
 0x30a   : > { %10553 = vmatprep.subr.bf16.mxu0 %v11641_v31  ;;  %2183 = vmatpush1.bf16.msra.mxu1 %v11687_v48  ;;  %v11712_v31 = vld [vmem:[#allocation16 + $0x34] ss:$12 sps:$4 sm:$0xff]   ;;  %v11742_v48 = vld [vmem:[#allocation16 + $0xac] ss:$12 sps:$4 sm:$0xff]  }
 0x30b   : > { %2184 = vmatprep.subr.bf16.mxu1 %v11693_v49  ;;  %v11740_v49 = vld [vmem:[#allocation16 + $0xa8] ss:$12 sps:$4 sm:$0xff]  }
 0x30d   : > { %10554 = vmatpush3.bf16.msra.mxu0 %v11643_v34  ;;  %v11710_v34 = vld [vmem:[#allocation16 + $0x30] ss:$12 sps:$4 sm:$0xff]  }
 0x30e   : > { %10555 = vmatprep.subr.bf16.mxu0 %v11644_v35  ;;  %2185 = vmatpush1.bf16.msra.mxu1 %v11691_v53  ;;  %v11718_v35 = vld [vmem:[#allocation16 + $0x4c] ss:$12 sps:$4 sm:$0xff]   ;;  %v11754_v53 = vld [vmem:[#allocation16 + $0xdc] ss:$12 sps:$4 sm:$0xff]  }
 0x30f   : > { %2186 = vmatprep.subr.bf16.mxu1 %v11697_v54  ;;  %v11752_v54 = vld [vmem:[#allocation16 + $0xd8] ss:$12 sps:$4 sm:$0xff]  }
 0x311   : > { %10556 = vmatpush3.bf16.msra.mxu0 %v11646_v38  ;;  %v11716_v38 = vld [vmem:[#allocation16 + $0x48] ss:$12 sps:$4 sm:$0xff]  }
 0x312   : > { %10557 = vmatprep.subr.bf16.mxu0 %v11647_v39  ;;  %2187 = vmatpush1.bf16.msra.mxu1 %v11695_v57  ;;  %v11724_v39 = vld [vmem:[#allocation16 + $0x64] ss:$12 sps:$4 sm:$0xff]   ;;  %v11766_v57 = vld [vmem:[#allocation16 + $0x10c] ss:$12 sps:$4 sm:$0xff]  }
 0x313   : > { %2188 = vmatprep.subr.bf16.mxu1 %v11703_v58  ;;  %v11764_v58 = vld [vmem:[#allocation16 + $0x108] ss:$12 sps:$4 sm:$0xff]  }
 0x315   : > { %10558 = vmatpush3.bf16.msra.mxu0 %v11649_v42  ;;  %v11722_v42 = vld [vmem:[#allocation16 + $0x60] ss:$12 sps:$4 sm:$0xff]  }
 0x316   : > { %10559 = vmatprep.subr.bf16.mxu0 %v11650_v43  ;;  %2189 = vmatpush1.bf16.msra.mxu1 %v11701_v61  ;;  %v11730_v43 = vld [vmem:[#allocation16 + $0x7c] ss:$12 sps:$4 sm:$0xff]  }
 0x317   : > { %2190 = vmatprep.subr.bf16.mxu1 %v11709_v63  ;;  %v11778_v61 = vld [vmem:[#allocation16 + $0x13c] ss:$12 sps:$4 sm:$0xff]   ;;  %v11776_v63 = vld [vmem:[#allocation16 + $0x138] ss:$12 sps:$4 sm:$0xff]  }
 0x319   : > { %10560 = vmatpush3.bf16.msra.mxu0 %v11652_v46  ;;  %v11736_v46 = vld [vmem:[#allocation16 + $0x94] ss:$12 sps:$4 sm:$0xff]  }
 0x31a   : > { %10561 = vmatprep.subr.bf16.mxu0 %v11656_v47  ;;  %2191 = vmatpush1.bf16.msra.mxu1 %v11707_v1  ;;  %v11734_v47 = vld [vmem:[#allocation16 + $0x90] ss:$12 sps:$4 sm:$0xff]  }
 0x31b   : > { %2192 = vmatprep.subr.bf16.mxu1 %v11715_v2  ;;  %v11779_v1 = vld [vmem:[#allocation16 + $0x150] ss:$12 sps:$4 sm:$0xff]   ;;  %v11784_v2 = vld [vmem:[#allocation16 + $0x16c] ss:$12 sps:$4 sm:$0xff]  }
 0x31d   : > { %10562 = vmatpush3.bf16.msra.mxu0 %v11657_v51  ;;  %v11748_v51 = vld [vmem:[#allocation16 + $0xc4] ss:$12 sps:$4 sm:$0xff]  }
 0x31e   : > { %10563 = vmatprep.subr.bf16.mxu0 %v11661_v52  ;;  %2193 = vmatpush1.bf16.msra.mxu1 %v11713_v4  ;;  %v11746_v52 = vld [vmem:[#allocation16 + $0xc0] ss:$12 sps:$4 sm:$0xff]   ;;  %v11810_v4 = vld [vmem:[#allocation16 + $0x8] ss:$12 sps:$4 sm:$0xff]  }
 0x31f   : > { %2194 = vmatprep.subr.bf16.mxu1 %v11721_v5  ;;  %v11811_v5 = vld [vmem:[#allocation16 + $0xe0] ss:$12 sps:$4 sm:$0xff]  }
 0x321   : > { %10564 = vmatpush3.bf16.msra.mxu0 %v11662_v55  ;;  %v11760_v55 = vld [vmem:[#allocation16 + $0xf4] ss:$12 sps:$4 sm:$0xff]  }
 0x322   : > { %10826 = vmatprep.subr.bf16.mxu0 %v14999_v50  ;;  %2195 = vmatpush1.bf16.msra.mxu1 %v11719_v7  ;;  %v996_v7 = vld [vmem:[%s13547_s6] sm:$0xff] }
 0x323   : > { %2196 = vmatprep.subr.bf16.mxu1 %v11727_v8  ;;  %v11812_v8 = vld [vmem:[#allocation16 + $0x20] ss:$12 sps:$4 sm:$0xff]  }
 0x324   : > { %2281 = vmatmul.mubr.bf16.vlgmr.msra.gmra.mrb[4].mxu0 %v1666_v59 }
 0x325   : > { %10827 = vmatpush3.bf16.msra.mxu0 %v11666_v60  ;;  %10842 = vmatprep.mubr.msk.bf16.mxu0 %vm12825_vm0, %v14999_v50  ;;  %v11770_v60 = vld [vmem:[#allocation16 + $0x120] ss:$12 sps:$4 sm:$0xff]  }
 0x326   : > { %10828 = vmatprep.subr.bf16.mxu0 %v14999_v50  ;;  %2197 = vmatpush1.bf16.msra.mxu1 %v11725_v10  ;;  %v13621_v10 = vpack.c.bf16 %v996_v7, %v996_v7 }
 0x327   : > { %2207 = vmatprep.subr.bf16.mxu1 %v11733_v11  ;;  %v11785_v11 = vld [vmem:[#allocation16 + $0x180] ss:$12 sps:$4 sm:$0xff]  }
 0x329   : > { %10829 = vmatpush3.bf16.msra.mxu0 %v11670_v0  ;;  %2199 = vmatmul.mubr.bf16.vlgmr.msra.gmra.mrb[8].mxu1 %v1666_v59  ;;  %v11772_v59 = vld [vmem:[#allocation16 + $0x124] ss:$12 sps:$4 sm:$0xff]   ;;  %v11781_v0 = vld [vmem:[#allocation16 + $0x154] ss:$12 sps:$4 sm:$0xff]  }
 0x32a   : > { %10830 = vmatprep.subr.bf16.mxu0 %v14999_v50  ;;  %2208 = vmatpush1.bf16.msra.mxu1 %v11731_v13  ;;  %v11788_v13 = vld [vmem:[#allocation16 + $0x198] ss:$12 sps:$4 sm:$0xff]  }
 0x32b   : > { %2209 = vmatprep.subr.bf16.mxu1 %v11739_v14  ;;  %2239 = vmatprep.mubr.bf16.mxu1 %v14997_v62  ;;  %v11793_v14 = vld [vmem:[#allocation16 + $0x1b4] ss:$12 sps:$4 sm:$0xff]  }
 0x32d   : > { %10831 = vmatpush3.bf16.msra.mxu0 %v11674_v3  ;;  %v11809_v3 = vld [vmem:[#allocation16 + $0xc8] ss:$12 sps:$4 sm:$0xff]  }
 0x32e   : > { %10832 = vmatprep.subr.bf16.mxu0 %v14999_v50  ;;  %2210 = vmatpush1.bf16.msra.mxu1 %v11737_v16  ;;  %v11796_v16 = vld [vmem:[#allocation16 + $0x1cc] ss:$12 sps:$4 sm:$0xff]  }
 0x32f   : > { %2211 = vmatprep.subr.bf16.mxu1 %v11745_v17  ;;  %v11794_v17 = vld [vmem:[#allocation16 + $0x1c8] ss:$12 sps:$4 sm:$0xff]  }
 0x331   : > { %10833 = vmatpush3.bf16.msra.mxu0 %v11678_v6  ;;  %v11782_v6 = vld [vmem:[#allocation16 + $0x168] ss:$12 sps:$4 sm:$0xff]  }
 0x332   : > { %10834 = vmatprep.subr.bf16.mxu0 %v14999_v50  ;;  %2212 = vmatpush1.bf16.msra.mxu1 %v11743_v21  ;;  %v11800_v21 = vld [vmem:[#allocation16 + $0x1f8] ss:$12 sps:$4 sm:$0xff]  }
 0x333   : > { %2213 = vmatprep.subr.bf16.mxu1 %v11751_v23  ;;  %v11813_v23 = vld [vmem:[#allocation16 + $0xf8] ss:$12 sps:$4 sm:$0xff]  }
 0x335   : > { %10835 = vmatpush3.bf16.msra.mxu0 %v11682_v9  ;;  %v11787_v9 = vld [vmem:[#allocation16 + $0x184] ss:$12 sps:$4 sm:$0xff]  }
 0x336   : > { %10836 = vmatprep.subr.bf16.mxu0 %v14999_v50  ;;  %2214 = vmatpush1.bf16.msra.mxu1 %v11749_v27  ;;  %v11815_v27 = vld [vmem:[#allocation16 + $0x110] ss:$12 sps:$4 sm:$0xff]  }
 0x337   : > { %2215 = vmatprep.subr.bf16.mxu1 %v11757_v28  ;;  %v11816_v28 = vld [vmem:[#allocation16 + $0x50] ss:$12 sps:$4 sm:$0xff]  }
 0x339   : > { %10837 = vmatpush3.bf16.msra.mxu0 %v11686_v12  ;;  %v11790_v12 = vld [vmem:[#allocation16 + $0x19c] ss:$12 sps:$4 sm:$0xff]  }
 0x33a   : > { %10838 = vmatprep.subr.bf16.mxu0 %v14999_v50  ;;  %2216 = vmatpush1.bf16.msra.mxu1 %v11755_v32  ;;  %v11818_v32 = vld [vmem:[#allocation16 + $0x68] ss:$12 sps:$4 sm:$0xff]  }
 0x33b   : > { %2217 = vmatprep.subr.bf16.mxu1 %v11763_v33 }
 0x33d   : > { %10839 = vmatpush3.bf16.msra.mxu0 %v11690_v15  ;;  %v11791_v15 = vld [vmem:[#allocation16 + $0x1b0] ss:$12 sps:$4 sm:$0xff]  }
 0x33e   : > { %10840 = vmatprep.subr.bf16.mxu0 %v14999_v50  ;;  %2218 = vmatpush1.bf16.msra.mxu1 %v11761_v36  ;;  %v11820_v36 = vld [vmem:[#allocation16 + $0x80] ss:$12 sps:$4 sm:$0xff]  }
 0x33f   : > { %2219 = vmatprep.subr.bf16.mxu1 %v11769_v37  ;;  %v11821_v37 = vld [vmem:[#allocation16 + $0x158] ss:$12 sps:$4 sm:$0xff]  }
 0x341   : > { %10841 = vmatpush3.bf16.msra.mxu0 %v11694_v18  ;;  %v11799_v18 = vld [vmem:[#allocation16 + $0x1e4] ss:$12 sps:$4 sm:$0xff]  }
 0x342   : > { %2828 = vmatprep.subr.bf16.mxu0 %v11700_v20  ;;  %2220 = vmatpush1.bf16.msra.mxu1 %v11767_v40  ;;  %v11802_v20 = vld [vmem:[#allocation16 + $0x1fc] ss:$12 sps:$4 sm:$0xff]   ;;  %v11822_v40 = vld [vmem:[#allocation16 + $0x98] ss:$12 sps:$4 sm:$0xff]  }
 0x343   : > { %2221 = vmatprep.subr.bf16.mxu1 %v11775_v41  ;;  %v11823_v41 = vld [vmem:[#allocation16 + $0x170] ss:$12 sps:$4 sm:$0xff]  }
 0x344   : > { %10843 = vmatmul.mubr.bf16.vlgmr.msra.gmra.mrb[8].mxu0 %v1668_v25 }
 0x345   : > { %2829 = vmatpush1.bf16.msra.mxu0 %v11698_v24  ;;  %2860 = vmatprep.mubr.bf16.mxu0 %v2329_v29  ;;  %v11814_v24 = vld [vmem:[#allocation16 + $0x38] ss:$12 sps:$4 sm:$0xff]  }
 0x346   : > { %2830 = vmatprep.subr.bf16.mxu0 %v11706_v26  ;;  %2222 = vmatpush1.bf16.msra.mxu1 %v11773_v44  ;;  %v11808_v26 = vld [vmem:[#allocation16 + $0x22c] ss:$12 sps:$4 sm:$0xff]  }
 0x347   : > { %10580 = vmatprep.subr.bf16.mxu1 %v11809_v3 }
 0x349   : > { %2831 = vmatpush1.bf16.msra.mxu0 %v11704_v30  ;;  %2240 = vmatmul.mubr.bf16.vlgmr.msra.gmra.mrb[8].mxu1 %v1668_v25  ;;  %v11803_v25 = vld [vmem:[#allocation16 + $0x210] ss:$12 sps:$4 sm:$0xff]   ;;  %v11806_v30 = vld [vmem:[#allocation16 + $0x228] ss:$12 sps:$4 sm:$0xff]  }
 0x34a   : > { %2832 = vmatprep.subr.bf16.mxu0 %v11712_v31  ;;  %2942 = vmatprep.mubr.bf16.mxu1 %v2329_v29  ;;  %v11817_v29 = vld [vmem:[#allocation16 + $0x128] ss:$12 sps:$4 sm:$0xff]  }
 0x34b   : > { %10581 = vmatpush3.bf16.msra.mxu1 %v11810_v4  ;;  %v998_v31 = vld [vmem:[%s13547_s6 + $0x10] sm:$0xff] }
 0x34c   : > { %10582 = vmatprep.subr.bf16.mxu1 %v11811_v5  ;;  %v2330_v33 = vpack.c.bf16 %v998_v31, %v998_v31  ;;  %v13678_v31 = vld [vmem:[#allocation17] sm:$0x7] }
 0x34d   : > { %2833 = vmatpush1.bf16.msra.mxu0 %v11710_v34  ;;  %v11819_v34 = vld [vmem:[#allocation16 + $0x140] ss:$12 sps:$4 sm:$0xff]  }
 0x34e   : > { %2834 = vmatprep.subr.bf16.mxu0 %v11718_v35  ;;  %v1105_v35 = vlaneseq }
 0x34f   : > { %10583 = vmatpush3.bf16.msra.mxu1 %v11812_v8 }
 0x350   : > { %10584 = vmatprep.subr.bf16.mxu1 %v11813_v23 }
 0x351   : > { %2835 = vmatpush1.bf16.msra.mxu0 %v11716_v38  ;;  %v13627_v38 = vshrl.u32 %v1105_v35, 7 }
 0x352   : > { %2836 = vmatprep.subr.bf16.mxu0 %v11724_v39 }
 0x353   : > { %10585 = vmatpush3.bf16.msra.mxu1 %v11814_v24  ;;  %v13632_v39 = vsub.s32 2, %v13627_v38 }
 0x354   : > { %10586 = vmatprep.subr.bf16.mxu1 %v11815_v27 }
 0x355   : > { %2837 = vmatpush1.bf16.msra.mxu0 %v11722_v42  ;;  %15106 = vst [vmem:[#allocation56_spill] sm:$0xff] %v13632_v39  ;;  %v13634_v42 = vld [vmem:[#allocation11] sm:$0x7] }
 0x356   : > { %2838 = vmatprep.subr.bf16.mxu0 %v11730_v43  ;;  %v1116_v44 = vrot.slane %v13634_v42, %v13632_v39 }
 0x357   : > { %10587 = vmatpush3.bf16.msra.mxu1 %v11816_v28 }
 0x358   : > { %10588 = vmatprep.subr.bf16.mxu1 %v11817_v29 }
 0x359   : > { %2839 = vmatpush1.bf16.msra.mxu0 %v11728_v45  ;;  %v11824_v45 = vld [vmem:[#allocation16 + $0xb0] ss:$12 sps:$4 sm:$0xff]  }
 0x35a   : > { %2840 = vmatprep.subr.bf16.mxu0 %v11736_v46 }
 0x35b   : > { %10589 = vmatpush3.bf16.msra.mxu1 %v11818_v32 }
 0x35c   : > { %10590 = vmatprep.subr.bf16.mxu1 %v11819_v34 }
 0x35d   : > { %2841 = vmatpush1.bf16.msra.mxu0 %v11734_v47 }
 0x35e   : > { %2842 = vmatprep.subr.bf16.mxu0 %v11742_v48 }
 0x35f   : > { %10591 = vmatpush3.bf16.msra.mxu1 %v11820_v36 }
 0x360   : > { %10592 = vmatprep.subr.bf16.mxu1 %v11821_v37 }
 0x361   : > { %2843 = vmatpush1.bf16.msra.mxu0 %v11740_v49 }
 0x362   : > { %2844 = vmatprep.subr.bf16.mxu0 %v11748_v51 }
 0x363   : > { %10593 = vmatpush3.bf16.msra.mxu1 %v11822_v40 }
 0x364   : > { %10594 = vmatprep.subr.bf16.mxu1 %v11823_v41 }
 0x365   : > { %2845 = vmatpush1.bf16.msra.mxu0 %v11746_v52  ;;  %v11825_v52 = vld [vmem:[#allocation16 + $0x188] ss:$12 sps:$4 sm:$0xff]  }
 0x366   : > { %2846 = vmatprep.subr.bf16.mxu0 %v11754_v53  ;;  %v11826_v53 = vld [vmem:[#allocation16 + $0x1a0] ss:$12 sps:$4 sm:$0xff]  }
 0x367   : > { %10595 = vmatpush3.bf16.msra.mxu1 %v11824_v45 }
 0x368   : > { %10846 = vmatprep.subr.bf16.mxu1 %v14999_v50 }
 0x369   : > { %2847 = vmatpush1.bf16.msra.mxu0 %v11752_v54  ;;  %v11827_v54 = vld [vmem:[#allocation16 + $0x1b8] ss:$12 sps:$4 sm:$0xff]  }
 0x36a   : > { %2848 = vmatprep.subr.bf16.mxu0 %v11760_v55  ;;  %2943 = vmatmul.mubr.bf16.vlgmr.msra.gmra.mrb[12].mxu1 %v13621_v10  ;;  %v11828_v55 = vld [vmem:[#allocation16 + $0x1d0] ss:$12 sps:$4 sm:$0xff]  }
 0x36b   : > { %10847 = vmatpush3.bf16.msra.mxu1 %v11825_v52  ;;  %10862 = vmatprep.mubr.msk.bf16.mxu1 %vm12825_vm0, %v14999_v50 }
 0x36c   : > { %10848 = vmatprep.subr.bf16.mxu1 %v14999_v50 }
 0x36d   : > { %2849 = vmatpush1.bf16.msra.mxu0 %v11758_v56  ;;  %v11829_v56 = vld [vmem:[#allocation16 + $0x1e8] ss:$12 sps:$4 sm:$0xff]  }
 0x36e   : > { %2850 = vmatprep.subr.bf16.mxu0 %v11766_v57  ;;  %v11830_v57 = vld [vmem:[#allocation16 + $0x200] ss:$12 sps:$4 sm:$0xff]  }
 0x36f   : > { %10849 = vmatpush3.bf16.msra.mxu1 %v11826_v53 }
 0x370   : > { %10850 = vmatprep.subr.bf16.mxu1 %v14999_v50 }
 0x371   : > { %2851 = vmatpush1.bf16.msra.mxu0 %v11764_v58  ;;  %v11831_v58 = vld [vmem:[#allocation16 + $0x218] ss:$12 sps:$4 sm:$0xff]  }
 0x372   : > { %2852 = vmatprep.subr.bf16.mxu0 %v11772_v59  ;;  %v11832_v59 = vld [vmem:[#allocation16 + $0x230] ss:$12 sps:$4 sm:$0xff]  }
 0x373   : > { %10851 = vmatpush3.bf16.msra.mxu1 %v11827_v54 }
 0x374   : > { %10852 = vmatprep.subr.bf16.mxu1 %v14999_v50 }
 0x375   : > { %2853 = vmatpush1.bf16.msra.mxu0 %v11770_v60 }
 0x376   : > { %2854 = vmatprep.subr.bf16.mxu0 %v11778_v61 }
 0x377   : > { %10853 = vmatpush3.bf16.msra.mxu1 %v11828_v55  ;;  %v999_v55 = vld [vmem:[%s13549_s13] sm:$0x3]  ;;  %s14974_s13 = smov 120  }
 0x378   : > { %10854 = vmatprep.subr.bf16.mxu1 %v14999_v50 }
 0x379   : > { %2855 = vmatpush1.bf16.msra.mxu0 %v11776_v63 }
 0x37a   : > { %2856 = vmatprep.subr.bf16.mxu0 %v11781_v0 }
 0x37b   : > { %10855 = vmatpush3.bf16.msra.mxu1 %v11829_v56  ;;  %v1000_v56 = vunpack.c.0.s8 %v999_v55 }
 0x37c   : > { %10856 = vmatprep.subr.bf16.mxu1 %v14999_v50 }
 0x37d   : > { %2857 = vmatpush1.bf16.msra.mxu0 %v11779_v1 }
 0x37e   : > { %2858 = vmatprep.subr.bf16.mxu0 %v11784_v2  ;;  %v13653_v2 = vsub.s32 1, %v13627_v38 }
 0x37f   : > { %10857 = vmatpush3.bf16.msra.mxu1 %v11830_v57  ;;  %v1001_v57 = vcvt.s32.f32 %v1000_v56 }
 0x380   : > { %10858 = vmatprep.subr.bf16.mxu1 %v14999_v50  ;;  %15107 = vst [vmem:[#allocation57_spill] sm:$0xff] %v13653_v2  ;;  %v1112_v3 = vrot.slane %v13634_v42, %v13653_v2 }
 0x381   : > { %2859 = vmatpush1.bf16.msra.mxu0 %v11782_v6  ;;  %vm1002_vm2 = vcmp.eq.f32.partialorder %v1001_v57, 0.0 }
 0x382   : > { %2869 = vmatprep.subr.bf16.mxu0 %v11787_v9  ;;  %v1765_v9 = vld [vmem:[#allocation14] sm:$0x7] }
 0x383   : > { %10859 = vmatpush3.bf16.msra.mxu1 %v11831_v58  ;;  %v1774_v24 = vrot.slane %v1765_v9, %v13653_v2  ;;  %v13704_v58 = vsel %vm1002_vm2, -1e+20, %v14999_v50  ;;  %vm8373_vm2 = vcmask 982016  }
 0x384   : > { %2861 = vmatmul.mubr.bf16.vlgmr.msra.gmra.mrb[12].mxu0 %v13621_v10  ;;  %10860 = vmatprep.subr.bf16.mxu1 %v14999_v50 }
 0x385   : > { %2870 = vmatpush1.bf16.msra.mxu0 %v11785_v11  ;;  %2901 = vmatprep.mubr.bf16.mxu0 %v14997_v62  ;;  %v1778_v11 = vrot.slane %v1765_v9, %v13632_v39 }
 0x386   : > { %2871 = vmatprep.subr.bf16.mxu0 %v11790_v12 }
 0x387   : > { %10861 = vmatpush3.bf16.msra.mxu1 %v11832_v59 }
 0x388   : > { %10866 = vmatprep.subr.mxu1 %v14999_v50 }
 0x389   : > { %2872 = vmatpush1.bf16.msra.mxu0 %v11788_v13 }
 0x38a   : > { %2873 = vmatprep.subr.bf16.mxu0 %v11793_v14  ;;  %10863 = vmatmul.mubr.bf16.vlgmr.msra.gmra.mrb[16].mxu1 %v2330_v33 }
 0x38b   : > { %10868 = vmatprep.mubr.msk.f32.mxu1 %vm12825_vm0, %v14999_v50 }
 0x38d   : > { %2874 = vmatpush1.bf16.msra.mxu0 %v11791_v15 }
 0x38e   : > { %2875 = vmatprep.subr.bf16.mxu0 %v11796_v16 }
 0x391   : > { %2876 = vmatpush1.bf16.msra.mxu0 %v11794_v17 }
 0x392   : > { %2877 = vmatprep.subr.bf16.mxu0 %v11799_v18 }
 0x395   : > { %2878 = vmatpush1.bf16.msra.mxu0 %v11797_v19 }
 0x396   : > { %2879 = vmatprep.subr.bf16.mxu0 %v11802_v20 }
 0x399   : > { %2880 = vmatpush1.bf16.msra.mxu0 %v11800_v21 }
 0x39a   : > { %2881 = vmatprep.subr.bf16.mxu0 %v11805_v22  ;;  %v13665_v22 = vsub.s32 0, %v13627_v38 }
 0x39c   : > { %v10534_v43 = vpop.f32.mrb[0].mxu1  ;;  %15108 = vst [vmem:[#allocation58_spill] sm:$0xff] %v13665_v22  ;;  %v1770_v23 = vrot.slane %v1765_v9, %v13665_v22  ;;  %v2432_v32 = vrot.slane %v13678_v31, %v13665_v22 }
 0x39d   : > { %2882 = vmatpush1.bf16.msra.mxu0 %v11803_v25  ;;  %v10535_v46 = vpop.f32.mrb[1].mxu1 }
 0x39e   : > { %2883 = vmatprep.subr.bf16.mxu0 %v11808_v26  ;;  %v10536_v47 = vadd.f32 %v10535_v46, %v10534_v43  ;;  %v10537_v48 = vpop.f32.mrb[2].mxu1 }
 0x39f   : > { %v10538_v49 = vpop.f32.mrb[3].mxu1 }
 0x3a0   : > { %v1621_v51 = vadd.f32 %v10536_v47, %v1116_v44  ;;  %v2440_v47 = vrot.slane %v13678_v31, %v13632_v39 }
 0x3a1   : > { %2884 = vmatpush1.bf16.msra.mxu0 %v11806_v30 }
 0x3a2   : > { %10906 = vmatprep.subr.mxu0 %v14999_v50 }
 0x3a4   : > { %2902 = vmatmul.mubr.bf16.vlgmr.msra.gmra.mrb[12].mxu0 %v2330_v33  ;;  %v1108_v33 = vrot.slane %v13634_v42, %v13665_v22 }
 0x3a5   : > { %10908 = vmatprep.mubr.msk.f32.mxu0 %vm12825_vm0, %v14999_v50 }
 0x3bc   : > { %v1660_v60 = vpop.f32.mrb[4].mxu1 }
 0x3bd   : > { %v13649_v61 = vadd.f32 %v1660_v60, %v1621_v51  ;;  %v10824_v63 = vpop.f32.mrb[5].mxu1 }
 0x3be   : > { %v1663_v0 = vpop.f32.mrb[6].mxu1 }
 0x3bf   : > { %v10825_v1 = vpop.f32.mrb[7].mxu1 }
 0x3d7   : > { %v1579_v4 = vpop.f32.mrb[0].mxu0 }
 0x3d8   : > { %v1581_v5 = vpop.f32.mrb[1].mxu0  ;;  %v13688_v41 = vadd.f32 %v1579_v4, %v1108_v33 }
 0x3d9   : > { %v13659_v6 = vadd.f32 %v1581_v5, %v1112_v3  ;;  %v1583_v7 = vpop.f32.mrb[2].mxu0 }
 0x3da   : > { %v1584_v8 = vpop.f32.mrb[3].mxu0 }
 0x3f7   : > { %v10565_v10 = vpop.f32.mrb[4].mxu0 }
 0x3f8   : > { %v10566_v12 = vpop.f32.mrb[5].mxu0 }
 0x3f9   : > { %v10567_v13 = vadd.f32 %v10566_v12, %v10565_v10  ;;  %v10568_v14 = vpop.f32.mrb[6].mxu0 }
 0x3fa   : > { %v10569_v15 = vpop.f32.mrb[7].mxu0 }
 0x3fb   : > { %v2283_v16 = vadd.f32 %v10567_v13, %v1778_v11 }
 0x417   : > { %v2322_v17 = vpop.f32.mrb[8].mxu0 }
 0x418   : > { %v13662_v18 = vadd.f32 %v2322_v17, %v2283_v16  ;;  %v10844_v19 = vpop.f32.mrb[9].mxu0 }
 0x419   : > { %v2325_v20 = vpop.f32.mrb[10].mxu0 }
 0x41a   : > { %v10845_v21 = vpop.f32.mrb[11].mxu0  ;;  %v2436_v20 = vrot.slane %v13678_v31, %v13653_v2 }
 0x41c   : > { %v2241_v25 = vpop.f32.mrb[8].mxu1 }
 0x41d   : > { %v13669_v26 = vadd.f32 %v2241_v25, %v1770_v23  ;;  %v2243_v27 = vpop.f32.mrb[9].mxu1 }
 0x41e   : > { %v13671_v28 = vadd.f32 %v2243_v27, %v1774_v24  ;;  %v2245_v29 = vpop.f32.mrb[10].mxu1 }
 0x41f   : > { %v2246_v30 = vpop.f32.mrb[11].mxu1  ;;  %3157 = vrot.lane.b32.xlu1 %v13669_v26, %s12827_s3  ;;  %10867 = vmatpush3.xpose.msk.msra.mxu1 %vm2993_vm1, %v13669_v26 }
 0x420   : > { %10871 = vmatprep.subr.mxu1 %v14999_v50 }
 0x43d   : > { %v10596_v42 = vpop.f32.mrb[12].mxu1 }
 0x43e   : > { %v10597_v43 = vpop.f32.mrb[13].mxu1 }
 0x43f   : > { %v10598_v44 = vadd.f32 %v10597_v43, %v10596_v42  ;;  %v10599_v45 = vpop.f32.mrb[14].mxu1 }
 0x440   : > { %v10600_v46 = vpop.f32.mrb[15].mxu1 }
 0x441   : > { %v2945_v48 = vadd.f32 %v10598_v44, %v2440_v47 }
 0x45d   : > { %v2984_v49 = vpop.f32.mrb[16].mxu1 }
 0x45e   : > { %v13700_v51 = vadd.f32 %v2984_v49, %v2945_v48  ;;  %v10864_v52 = vpop.f32.mrb[17].mxu1 }
 0x45f   : > { %v2987_v53 = vpop.f32.mrb[18].mxu1 }
 0x460   : > { %v10865_v54 = vpop.f32.mrb[19].mxu1  ;;  %v2992_v24 = vmul.f32 0.28867513, %v13700_v51 }
 0x477   : > { %v2903_v34 = vpop.f32.mrb[12].mxu0 }
 0x478   : > { %v11242_v35 = vadd.f32 %v2903_v34, %v2432_v32  ;;  %v13684_v36 = vpop.f32.mrb[13].mxu0 }
 0x479   : > { %v2907_v37 = vpop.f32.mrb[14].mxu0  ;;  %v11243_v21 = vadd.f32 %v13684_v36, %v2436_v20 }
 0x47a   : > { %v13686_v38 = vmul.f32 0.28867513, %v11242_v35  ;;  %v2908_v40 = vpop.f32.mrb[15].mxu0 }
 0x47b   : > { %v13743_v23 = vmul.f32 0.28867513, %v11243_v21 }
 0x47c   : > { %3155 = vrot.lane.b32.xlu1 %v13686_v38, %s12827_s3  ;;  %10869 = vmatmul.mubr.msk.f32.vlgmr.msra.gmra.mrb[20].mxu1 %vm2993_vm1, %v13686_v38 }
 0x47d   : > { %10872 = vmatpush3.msra.mxu1 %v13688_v41  ;;  %10873 = vmatprep.mubr.msk.f32.mxu1 %vm12825_vm0, %v14999_v50 }
 0x47e   : > { %10876 = vmatprep.subr.mxu1 %v14999_v50 }
 0x491   : > { %v3158_v11 = vpop.permute.xlu1 %3157 }
 0x4ee   : > { %v3156_v12 = vpop.permute.xlu1 %3155 }
 0x54f   : > { %v3066_v59 = vpop.f32.mrb[20].mxu1 }
 0x550   : > { %v3067_v60 = vadd.f32 %v3066_v59, %v13704_v58  ;;  %v10870_v63 = vpop.f32.mrb[21].mxu1 }
 0x552   : > { %v3071_v0 = vsel %vm3070_vm3, %v3067_v60, -inf }
 0x553   : > { %3072 = vmax.xlane.f32.xlu0 %v3071_v0 }
 0x5e0   : > { %v3073_v1 = vpop.xlane.xlu0 %3072 }
 0x5e1   : > { %v3074_v3 = vsub.f32 %v3067_v60, %v3073_v1 }
 0x5e3   : > { %v3075_v4 = vmul.f32 1.442695, %v3074_v3 }
 0x5e5   : > { %11969 = vpow2.f32 %v3075_v4 }
 0x5ef   : > { %v11970_v5 = vpop.eup %11969 }
 0x5f0   : > { %v3077_v7 = vsel %vm3070_vm3, %v11970_v5, 0.0 }
 0x5f1   : > { %3078 = vadd.xlane.f32.xlu0 %v3077_v7 }
 0x67e   : > { %v3079_v8 = vpop.xlane.xlu0 %3078 }
 0x67f   : > { %11971 = vrcp.f32 %v3079_v8 }
 0x689   : > { %v11972_v9 = vpop.eup %11971 }
 0x68a   : > { %v3081_v10 = vmul.f32 %v11972_v9, %v11970_v5 }
 0x68c   : > { %10874 = vmatmul.mubr.msk.f32.vlgmr.msra.gmra.mrb[22].mxu1 %vm3070_vm3, %v3081_v10 }
 0x68d   : > { %10877 = vmatpush3.xpose.msk.msra.mxu1 %vm2993_vm1, %v3158_v11  ;;  %10878 = vmatprep.mubr.msk.f32.mxu1 %vm12825_vm0, %v14999_v50 }
 0x68e   : > { %10881 = vmatprep.subr.mxu1 %v14999_v50 }
 0x690   : > { %10879 = vmatmul.mubr.msk.f32.vlgmr.msra.gmra.mrb[24].mxu1 %vm2993_vm1, %v3156_v12 }
 0x691   : > { %10883 = vmatprep.mubr.msk.f32.mxu1 %vm12825_vm0, %v14999_v50 }
 0x75f   : > { %v13717_v13 = vpop.f32.mrb[22].mxu1 }
 0x760   : > { %15109 = vst [vmem:[#allocation59_spill] sm:$0xff] %v13717_v13  ;;  %v10875_v14 = vpop.f32.mrb[23].mxu1 }
 0x763   : > { %v3229_v15 = vpop.f32.mrb[24].mxu1 }
 0x764   : > { %v13720_v16 = vadd.f32 %v3229_v15, %v13704_v58  ;;  %v10880_v17 = vpop.f32.mrb[25].mxu1 }
 0x766   : > { %v3233_v19 = vsel %vm3070_vm3, %v13720_v16, -inf }
 0x767   : > { %3234 = vmax.xlane.f32.xlu0 %v3233_v19 }
 0x77d   : > { %3245 = vrot.lane.b32.xlu0 %v13688_v41, %s12827_s3  ;;  %s14991_s3 = smov 108  }
 0x781   : > { %3323 = vrot.lane.b32.xlu0 %v13669_v26, %s12828_s21 }
 0x785   : > { %3321 = vrot.lane.b32.xlu0 %v13686_v38, %s12828_s21 }
 0x789   : > { %3653 = vrot.lane.b32.xlu0 %v13669_v26, %s12829_s28 }
 0x78d   : > { %4146 = vrot.lane.b32.xlu0 %v13686_v38, %s14985_s0 }
 0x791   : > { %4311 = vrot.lane.b32.xlu0 %v13686_v38, %s14984_s24 }
 0x795   : > { %4476 = vrot.lane.b32.xlu0 %v13686_v38, %s12832_s16 }
 0x799   : > { %4650 = vrot.lane.b32.xlu0 %v13671_v28, %s14993_s1 }
 0x79d   : > { %4644 = vrot.lane.b32.xlu0 %v13743_v23, %s14993_s1 }
 0x7a1   : > { %4818 = vrot.lane.b32.xlu0 %v13743_v23, %s14986_s5 }
 0x7a5   : > { %4983 = vrot.lane.b32.xlu0 %v13743_v23, %s14987_s9 }
 0x7a9   : > { %5148 = vrot.lane.b32.xlu0 %v13743_v23, %s14988_s18 }
 0x7ad   : > { %5313 = vrot.lane.b32.xlu0 %v13743_v23, %s14990_s29 }
 0x7b1   : > { %5478 = vrot.lane.b32.xlu0 %v13743_v23, %s14989_s15 }
 0x7b5   : > { %5643 = vrot.lane.b32.xlu0 %v13743_v23, %s14970_s23  ;;  %s12851_s23 = smov 48  }
 0x7b9   : > { %5808 = vrot.lane.b32.xlu0 %v13743_v23, %s14968_s27  ;;  %s12850_s27 = smov 60  }
 0x7bd   : > { %5973 = vrot.lane.b32.xlu0 %v13743_v23, %s14962_s10  ;;  %s14976_s10 = smov 96  }
 0x7c1   : > { %6138 = vrot.lane.b32.xlu0 %v13743_v23, %s14964_s19  ;;  %s12848_s19 = smov 84  }
 0x7c5   : > { %6303 = vrot.lane.b32.xlu0 %v13743_v23, %s14966_s4  ;;  %s14995_s4 = smov 72  }
 0x7c9   : > { %6478 = vrot.lane.b32.xlu0 %v13662_v18, %s14972_s20 }
 0x7cd   : > { %6471 = vrot.lane.b32.xlu0 %v2992_v24, %s14972_s20  ;;  %s14982_s20 = smov 36  }
 0x7d1   : > { %6646 = vrot.lane.b32.xlu0 %v2992_v24, %s14974_s13  ;;  %s14980_s13 = smov 24  }
 0x7d5   : > { %6811 = vrot.lane.b32.xlu0 %v2992_v24, %s14991_s3 }
 0x7d9   : > { %6976 = vrot.lane.b32.xlu0 %v2992_v24, %s14976_s10  ;;  %s14978_s10 = smov 12  }
 0x7dd   : > { %7141 = vrot.lane.b32.xlu0 %v2992_v24, %s12848_s19 }
 0x7e1   : > { %7306 = vrot.lane.b32.xlu0 %v2992_v24, %s14995_s4 }
 0x7e5   : > { %7471 = vrot.lane.b32.xlu0 %v2992_v24, %s12850_s27 }
 0x7e9   : > { %7636 = vrot.lane.b32.xlu0 %v2992_v24, %s12851_s23 }
 0x7ed   : > { %7801 = vrot.lane.b32.xlu0 %v2992_v24, %s14982_s20  ;;  %s12857_s20 = smov 56  }
 0x7f1   : > { %7966 = vrot.lane.b32.xlu0 %v2992_v24, %s14980_s13  ;;  %s12856_s13 = smov 68  }
 0x7f4   : > { %v3235_v25 = vpop.xlane.xlu0 %3234 }
 0x7f5   : > { %v3236_v27 = vsub.f32 %v13720_v16, %v3235_v25  ;;  %8131 = vrot.lane.b32.xlu0 %v2992_v24, %s14978_s10  ;;  %s12855_s10 = smov 92  }
 0x7f7   : > { %v3237_v29 = vmul.f32 1.442695, %v3236_v27 }
 0x7f8   : > { %v3246_v30 = vpop.permute.xlu0 %3245 }
 0x7f9   : > { %11973 = vpow2.f32 %v3237_v29  ;;  %10882 = vmatpush3.msra.mxu1 %v3246_v30 }
 0x7fa   : > { %10886 = vmatprep.subr.mxu1 %v14999_v50 }
 0x7fc   : > { %v3324_v31 = vpop.permute.xlu0 %3323 }
 0x800   : > { %v13783_v32 = vpop.permute.xlu0 %3321 }
 0x803   : > { %v11974_v33 = vpop.eup %11973 }
 0x804   : > { %v3654_v34 = vpop.permute.xlu0 %3653  ;;  %v3239_v35 = vsel %vm3070_vm3, %v11974_v33, 0.0 }
 0x805   : > { %3240 = vadd.xlane.f32.xlu1 %v3239_v35  ;;  %10907 = vmatpush3.xpose.msk.msra.mxu0 %vm2993_vm1, %v3654_v34 }
 0x806   : > { %10916 = vmatprep.subr.mxu0 %v14999_v50 }
 0x816   : > { %3410 = vrot.lane.b32.xlu1 %v13688_v41, %s12828_s21  ;;  %s15110_s21 = smov 64  }
 0x81a   : > { %3488 = vrot.lane.b32.xlu1 %v13669_v26, %s12855_s10 }
 0x81e   : > { %3486 = vrot.lane.b32.xlu1 %v13686_v38, %s12855_s10 }
 0x822   : > { %3651 = vrot.lane.b32.xlu1 %v13686_v38, %s12829_s28 }
 0x826   : > { %3818 = vrot.lane.b32.xlu1 %v13669_v26, %s12856_s13 }
 0x82a   : > { %3816 = vrot.lane.b32.xlu1 %v13686_v38, %s12856_s13 }
 0x82e   : > { %3983 = vrot.lane.b32.xlu1 %v13669_v26, %s12857_s20 }
 0x832   : > { %3981 = vrot.lane.b32.xlu1 %v13686_v38, %s12857_s20 }
 0x836   : > { %4148 = vrot.lane.b32.xlu1 %v13669_v26, %s14985_s0  ;;  %s15112_s0 = smov 40  }
 0x83a   : > { %4313 = vrot.lane.b32.xlu1 %v13669_v26, %s14984_s24  ;;  %s15111_s24 = smov 52  }
 0x83e   : > { %4478 = vrot.lane.b32.xlu1 %v13669_v26, %s12832_s16 }
 0x842   : > { %4648 = vrot.lane.b32.xlu1 %v13669_v26, %s14993_s1  ;;  %v4147_v26 = vpop.permute.xlu0 %4146 }
 0x846   : > { %4642 = vrot.lane.b32.xlu1 %v13686_v38, %s14993_s1  ;;  %s15119_s1 = smov 24  }
 0x84a   : > { %4820 = vrot.lane.b32.xlu1 %v13671_v28, %s14986_s5  ;;  %s15113_s5 = smov 28  }
 0x84e   : > { %4985 = vrot.lane.b32.xlu1 %v13671_v28, %s14987_s9  ;;  %s15114_s9 = smov 16  }
 0x852   : > { %5150 = vrot.lane.b32.xlu1 %v13671_v28, %s14988_s18  ;;  %s15115_s18 = smov 4  }
 0x856   : > { %5315 = vrot.lane.b32.xlu1 %v13671_v28, %s14990_s29  ;;  %s15117_s29 = smov 96  }
 0x85a   : > { %5480 = vrot.lane.b32.xlu1 %v13671_v28, %s14989_s15  ;;  %s15116_s15 = smov 120  }
 0x85e   : > { %5645 = vrot.lane.b32.xlu1 %v13671_v28, %s15110_s21 }
 0x862   : > { %5810 = vrot.lane.b32.xlu1 %v13671_v28, %s15111_s24 }
 0x866   : > { %5975 = vrot.lane.b32.xlu1 %v13671_v28, %s15112_s0 }
 0x86a   : > { %6140 = vrot.lane.b32.xlu1 %v13671_v28, %s15113_s5 }
 0x86e   : > { %6305 = vrot.lane.b32.xlu1 %v13671_v28, %s15114_s9 }
 0x872   : > { %6476 = vrot.lane.b32.xlu1 %v13671_v28, %s15115_s18  ;;  %v4312_v28 = vpop.permute.xlu0 %4311 }
 0x876   : > { %6469 = vrot.lane.b32.xlu1 %v13743_v23, %s15115_s18  ;;  %v4477_v36 = vpop.permute.xlu0 %4476 }
 0x87a   : > { %6648 = vrot.lane.b32.xlu1 %v13662_v18, %s15116_s15  ;;  %v4651_v40 = vpop.permute.xlu0 %4650 }
 0x87e   : > { %6813 = vrot.lane.b32.xlu1 %v13662_v18, %s14991_s3  ;;  %s15118_s3 = smov 36   ;;  %v4645_v44 = vpop.permute.xlu0 %4644 }
 0x882   : > { %6978 = vrot.lane.b32.xlu1 %v13662_v18, %s15117_s29  ;;  %v4819_v48 = vpop.permute.xlu0 %4818 }
 0x886   : > { %7143 = vrot.lane.b32.xlu1 %v13662_v18, %s12848_s19  ;;  %v4984_v49 = vpop.permute.xlu0 %4983 }
 0x88a   : > { %7308 = vrot.lane.b32.xlu1 %v13662_v18, %s14995_s4  ;;  %s15120_s4 = smov 12   ;;  %v5149_v53 = vpop.permute.xlu0 %5148 }
 0x88e   : > { %7473 = vrot.lane.b32.xlu1 %v13662_v18, %s12850_s27  ;;  %v5314_v55 = vpop.permute.xlu0 %5313 }
 0x892   : > { %7638 = vrot.lane.b32.xlu1 %v13662_v18, %s12851_s23  ;;  %v3241_v37 = vpop.xlane.xlu1 %3240  ;;  %v5479_v59 = vpop.permute.xlu0 %5478 }
 0x893   : > { %11975 = vrcp.f32 %v3241_v37 }
 0x896   : > { %7803 = vrot.lane.b32.xlu1 %v13662_v18, %s15118_s3  ;;  %v3411_v38 = vpop.permute.xlu1 %3410  ;;  %v5644_v63 = vpop.permute.xlu0 %5643 }
 0x89a   : > { %7968 = vrot.lane.b32.xlu1 %v13662_v18, %s15119_s1  ;;  %v13856_v42 = vpop.permute.xlu1 %3488  ;;  %v5809_v4 = vpop.permute.xlu0 %5808 }
 0x89d   : > { %v11976_v43 = vpop.eup %11975 }
 0x89e   : > { %8133 = vrot.lane.b32.xlu1 %v13662_v18, %s15120_s4  ;;  %v13860_v45 = vpop.permute.xlu1 %3486  ;;  %v3243_v46 = vmul.f32 %v11976_v43, %v11974_v33  ;;  %v5974_v8 = vpop.permute.xlu0 %5973 }
 0x8a0   : > { %10884 = vmatmul.mubr.msk.f32.vlgmr.msra.gmra.mrb[26].mxu1 %vm3070_vm3, %v3243_v46 }
 0x8a1   : > { %10887 = vmatpush3.xpose.msk.msra.mxu1 %vm2993_vm1, %v3324_v31  ;;  %10888 = vmatprep.mubr.msk.f32.mxu1 %vm12825_vm0, %v14999_v50 }
 0x8a2   : > { %v3652_v47 = vpop.permute.xlu1 %3651  ;;  %10891 = vmatprep.subr.mxu1 %v14999_v50  ;;  %v6139_v11 = vpop.permute.xlu0 %6138 }
 0x8a3   : > { %10909 = vmatmul.mubr.msk.f32.vlgmr.msra.gmra.mrb[16].mxu0 %vm2993_vm1, %v3652_v47 }
 0x8a4   : > { %10889 = vmatmul.mubr.msk.f32.vlgmr.msra.gmra.mrb[28].mxu1 %vm2993_vm1, %v13783_v32  ;;  %10918 = vmatprep.mubr.msk.f32.mxu0 %vm12825_vm0, %v14999_v50 }
 0x8a5   : > { %10892 = vmatpush3.msra.mxu1 %v3411_v38  ;;  %10893 = vmatprep.mubr.msk.f32.mxu1 %vm12825_vm0, %v14999_v50 }
 0x8a6   : > { %v3819_v18 = vpop.permute.xlu1 %3818  ;;  %10896 = vmatprep.subr.mxu1 %v14999_v50  ;;  %v6304_v14 = vpop.permute.xlu0 %6303 }
 0x8a7   : > { %10917 = vmatpush3.xpose.msk.msra.mxu0 %vm2993_vm1, %v3819_v18 }
 0x8a8   : > { %10926 = vmatprep.subr.mxu0 %v14999_v50 }
 0x8aa   : > { %v3817_v51 = vpop.permute.xlu1 %3816  ;;  %v6479_v17 = vpop.permute.xlu0 %6478 }
 0x8ab   : > { %10919 = vmatmul.mubr.msk.f32.vlgmr.msra.gmra.mrb[18].mxu0 %vm2993_vm1, %v3817_v51 }
 0x8ac   : > { %10928 = vmatprep.mubr.msk.f32.mxu0 %vm12825_vm0, %v14999_v50 }
 0x8ae   : > { %v3984_v52 = vpop.permute.xlu1 %3983  ;;  %v6472_v20 = vpop.permute.xlu0 %6471 }
 0x8af   : > { %10927 = vmatpush3.xpose.msk.msra.mxu0 %vm2993_vm1, %v3984_v52 }
 0x8b0   : > { %10936 = vmatprep.subr.mxu0 %v14999_v50 }
 0x8b2   : > { %v3982_v54 = vpop.permute.xlu1 %3981  ;;  %v6647_v24 = vpop.permute.xlu0 %6646 }
 0x8b3   : > { %10929 = vmatmul.mubr.msk.f32.vlgmr.msra.gmra.mrb[20].mxu0 %vm2993_vm1, %v3982_v54 }
 0x8b4   : > { %10938 = vmatprep.mubr.msk.f32.mxu0 %vm12825_vm0, %v14999_v50 }
 0x8b6   : > { %v4149_v56 = vpop.permute.xlu1 %4148  ;;  %v6812_v27 = vpop.permute.xlu0 %6811 }
 0x8b7   : > { %10937 = vmatpush3.xpose.msk.msra.mxu0 %vm2993_vm1, %v4149_v56 }
 0x8b8   : > { %10946 = vmatprep.subr.mxu0 %v14999_v50 }
 0x8ba   : > { %v4314_v57 = vpop.permute.xlu1 %4313  ;;  %10939 = vmatmul.mubr.msk.f32.vlgmr.msra.gmra.mrb[22].mxu0 %vm2993_vm1, %v4147_v26  ;;  %v6977_v32 = vpop.permute.xlu0 %6976 }
 0x8bb   : > { %10947 = vmatpush3.xpose.msk.msra.mxu0 %vm2993_vm1, %v4314_v57  ;;  %10948 = vmatprep.mubr.msk.f32.mxu0 %vm12825_vm0, %v14999_v50 }
 0x8bc   : > { %10956 = vmatprep.subr.mxu0 %v14999_v50 }
 0x8be   : > { %v4479_v60 = vpop.permute.xlu1 %4478  ;;  %10949 = vmatmul.mubr.msk.f32.vlgmr.msra.gmra.mrb[24].mxu0 %vm2993_vm1, %v4312_v28  ;;  %v7142_v35 = vpop.permute.xlu0 %7141 }
 0x8bf   : > { %10957 = vmatpush3.xpose.msk.msra.mxu0 %vm2993_vm1, %v4479_v60  ;;  %10958 = vmatprep.mubr.msk.f32.mxu0 %vm12825_vm0, %v14999_v50 }
 0x8c0   : > { %10966 = vmatprep.subr.mxu0 %v14999_v50 }
 0x8c2   : > { %v4649_v0 = vpop.permute.xlu1 %4648  ;;  %10959 = vmatmul.mubr.msk.f32.vlgmr.msra.gmra.mrb[26].mxu0 %vm2993_vm1, %v4477_v36  ;;  %v7307_v36 = vpop.permute.xlu0 %7306 }
 0x8c3   : > { %v4652_v1 = vsel %vm3070_vm3, %v4649_v0, %v4651_v40  ;;  %10968 = vmatprep.mubr.msk.f32.mxu0 %vm12825_vm0, %v14999_v50 }
 0x8c4   : > { %10967 = vmatpush3.xpose.msk.msra.mxu0 %vm2993_vm1, %v4652_v1 }
 0x8c5   : > { %10976 = vmatprep.subr.mxu0 %v14999_v50 }
 0x8c6   : > { %v4643_v3 = vpop.permute.xlu1 %4642  ;;  %v7472_v38 = vpop.permute.xlu0 %7471 }
 0x8c7   : > { %v4646_v5 = vsel %vm3070_vm3, %v4643_v3, %v4645_v44 }
 0x8c8   : > { %10969 = vmatmul.mubr.msk.f32.vlgmr.msra.gmra.mrb[28].mxu0 %vm2993_vm1, %v4646_v5 }
 0x8c9   : > { %10978 = vmatprep.mubr.msk.f32.mxu0 %vm12825_vm0, %v14999_v50 }
 0x8ca   : > { %v4821_v7 = vpop.permute.xlu1 %4820  ;;  %v7637_v44 = vpop.permute.xlu0 %7636 }
 0x8cb   : > { %10977 = vmatpush3.xpose.msk.msra.mxu0 %vm2993_vm1, %v4821_v7 }
 0x8cc   : > { %10986 = vmatprep.subr.mxu0 %v14999_v50 }
 0x8ce   : > { %v4986_v9 = vpop.permute.xlu1 %4985  ;;  %10979 = vmatmul.mubr.msk.f32.vlgmr.msra.gmra.mrb[30].mxu0 %vm2993_vm1, %v4819_v48  ;;  %v7802_v47 = vpop.permute.xlu0 %7801 }
 0x8cf   : > { %10987 = vmatpush3.xpose.msk.msra.mxu0 %vm2993_vm1, %v4986_v9  ;;  %10988 = vmatprep.mubr.msk.f32.mxu0 %vm12825_vm0, %v14999_v50 }
 0x8d0   : > { %10996 = vmatprep.subr.mxu0 %v14999_v50 }
 0x8d2   : > { %v5151_v10 = vpop.permute.xlu1 %5150  ;;  %10989 = vmatmul.mubr.msk.f32.vlgmr.msra.gmra.mrb[32].mxu0 %vm2993_vm1, %v4984_v49  ;;  %v7967_v49 = vpop.permute.xlu0 %7966 }
 0x8d3   : > { %10997 = vmatpush3.xpose.msk.msra.mxu0 %vm2993_vm1, %v5151_v10  ;;  %10998 = vmatprep.mubr.msk.f32.mxu0 %vm12825_vm0, %v14999_v50 }
 0x8d4   : > { %11006 = vmatprep.subr.mxu0 %v14999_v50 }
 0x8d6   : > { %v5316_v12 = vpop.permute.xlu1 %5315  ;;  %10999 = vmatmul.mubr.msk.f32.vlgmr.msra.gmra.mrb[34].mxu0 %vm2993_vm1, %v5149_v53  ;;  %v8132_v52 = vpop.permute.xlu0 %8131 }
 0x8d7   : > { %11007 = vmatpush3.xpose.msk.msra.mxu0 %vm2993_vm1, %v5316_v12  ;;  %11008 = vmatprep.mubr.msk.f32.mxu0 %vm12825_vm0, %v14999_v50 }
 0x8d8   : > { %11016 = vmatprep.subr.mxu0 %v14999_v50 }
 0x8da   : > { %v5481_v15 = vpop.permute.xlu1 %5480  ;;  %11009 = vmatmul.mubr.msk.f32.vlgmr.msra.gmra.mrb[36].mxu0 %vm2993_vm1, %v5314_v55 }
 0x8db   : > { %11017 = vmatpush3.xpose.msk.msra.mxu0 %vm2993_vm1, %v5481_v15  ;;  %11018 = vmatprep.mubr.msk.f32.mxu0 %vm12825_vm0, %v14999_v50 }
 0x8dc   : > { %11026 = vmatprep.subr.mxu0 %v14999_v50 }
 0x8de   : > { %v5646_v16 = vpop.permute.xlu1 %5645  ;;  %11019 = vmatmul.mubr.msk.f32.vlgmr.msra.gmra.mrb[38].mxu0 %vm2993_vm1, %v5479_v59 }
 0x8df   : > { %11027 = vmatpush3.xpose.msk.msra.mxu0 %vm2993_vm1, %v5646_v16  ;;  %11028 = vmatprep.mubr.msk.f32.mxu0 %vm12825_vm0, %v14999_v50 }
 0x8e0   : > { %11036 = vmatprep.subr.mxu0 %v14999_v50 }
 0x8e2   : > { %v5811_v19 = vpop.permute.xlu1 %5810  ;;  %11029 = vmatmul.mubr.msk.f32.vlgmr.msra.gmra.mrb[40].mxu0 %vm2993_vm1, %v5644_v63 }
 0x8e3   : > { %11037 = vmatpush3.xpose.msk.msra.mxu0 %vm2993_vm1, %v5811_v19  ;;  %11038 = vmatprep.mubr.msk.f32.mxu0 %vm12825_vm0, %v14999_v50 }
 0x8e4   : > { %11046 = vmatprep.subr.mxu0 %v14999_v50 }
 0x8e6   : > { %v5976_v21 = vpop.permute.xlu1 %5975  ;;  %11039 = vmatmul.mubr.msk.f32.vlgmr.msra.gmra.mrb[42].mxu0 %vm2993_vm1, %v5809_v4 }
 0x8e7   : > { %11047 = vmatpush3.xpose.msk.msra.mxu0 %vm2993_vm1, %v5976_v21  ;;  %11048 = vmatprep.mubr.msk.f32.mxu0 %vm12825_vm0, %v14999_v50 }
 0x8e8   : > { %11056 = vmatprep.subr.mxu0 %v14999_v50 }
 0x8ea   : > { %v6141_v23 = vpop.permute.xlu1 %6140  ;;  %11049 = vmatmul.mubr.msk.f32.vlgmr.msra.gmra.mrb[44].mxu0 %vm2993_vm1, %v5974_v8 }
 0x8eb   : > { %11057 = vmatpush3.xpose.msk.msra.mxu0 %vm2993_vm1, %v6141_v23  ;;  %11058 = vmatprep.mubr.msk.f32.mxu0 %vm12825_vm0, %v14999_v50 }
 0x8ec   : > { %11066 = vmatprep.subr.mxu0 %v14999_v50 }
 0x8ee   : > { %v6306_v25 = vpop.permute.xlu1 %6305  ;;  %11059 = vmatmul.mubr.msk.f32.vlgmr.msra.gmra.mrb[46].mxu0 %vm2993_vm1, %v6139_v11 }
 0x8ef   : > { %11067 = vmatpush3.xpose.msk.msra.mxu0 %vm2993_vm1, %v6306_v25  ;;  %11068 = vmatprep.mubr.msk.f32.mxu0 %vm12825_vm0, %v14999_v50 }
 0x8f0   : > { %11076 = vmatprep.subr.mxu0 %v14999_v50 }
 0x8f2   : > { %v6477_v29 = vpop.permute.xlu1 %6476  ;;  %11069 = vmatmul.mubr.msk.f32.vlgmr.msra.gmra.mrb[48].mxu0 %vm2993_vm1, %v6304_v14 }
 0x8f3   : > { %v6480_v30 = vsel %vm6473_vm4, %v6477_v29, %v6479_v17  ;;  %11078 = vmatprep.mubr.msk.f32.mxu0 %vm12825_vm0, %v14999_v50 }
 0x8f4   : > { %11077 = vmatpush3.xpose.msk.msra.mxu0 %vm2993_vm1, %v6480_v30 }
 0x8f5   : > { %11086 = vmatprep.subr.mxu0 %v14999_v50 }
 0x8f6   : > { %v6470_v31 = vpop.permute.xlu1 %6469 }
 0x8f7   : > { %v6474_v33 = vsel %vm6473_vm4, %v6470_v31, %v6472_v20 }
 0x8f8   : > { %11079 = vmatmul.mubr.msk.f32.vlgmr.msra.gmra.mrb[50].mxu0 %vm2993_vm1, %v6474_v33 }
 0x8f9   : > { %11088 = vmatprep.mubr.msk.f32.mxu0 %vm12825_vm0, %v14999_v50 }
 0x8fa   : > { %v6649_v34 = vpop.permute.xlu1 %6648 }
 0x8fb   : > { %11087 = vmatpush3.xpose.msk.msra.mxu0 %vm2993_vm1, %v6649_v34 }
 0x8fc   : > { %11096 = vmatprep.subr.mxu0 %v14999_v50 }
 0x8fe   : > { %v6814_v26 = vpop.permute.xlu1 %6813  ;;  %11089 = vmatmul.mubr.msk.f32.vlgmr.msra.gmra.mrb[52].mxu0 %vm2993_vm1, %v6647_v24 }
 0x8ff   : > { %11097 = vmatpush3.xpose.msk.msra.mxu0 %vm2993_vm1, %v6814_v26  ;;  %11098 = vmatprep.mubr.msk.f32.mxu0 %vm12825_vm0, %v14999_v50 }
 0x900   : > { %11106 = vmatprep.subr.mxu0 %v14999_v50 }
 0x902   : > { %v6979_v28 = vpop.permute.xlu1 %6978  ;;  %11099 = vmatmul.mubr.msk.f32.vlgmr.msra.gmra.mrb[54].mxu0 %vm2993_vm1, %v6812_v27 }
 0x903   : > { %11107 = vmatpush3.xpose.msk.msra.mxu0 %vm2993_vm1, %v6979_v28  ;;  %11108 = vmatprep.mubr.msk.f32.mxu0 %vm12825_vm0, %v14999_v50 }
 0x904   : > { %11116 = vmatprep.subr.mxu0 %v14999_v50 }
 0x906   : > { %v7144_v37 = vpop.permute.xlu1 %7143  ;;  %11109 = vmatmul.mubr.msk.f32.vlgmr.msra.gmra.mrb[56].mxu0 %vm2993_vm1, %v6977_v32 }
 0x907   : > { %11117 = vmatpush3.xpose.msk.msra.mxu0 %vm2993_vm1, %v7144_v37  ;;  %11118 = vmatprep.mubr.msk.f32.mxu0 %vm12825_vm0, %v14999_v50 }
 0x908   : > { %11126 = vmatprep.subr.mxu0 %v14999_v50 }
 0x90a   : > { %v7309_v40 = vpop.permute.xlu1 %7308  ;;  %11119 = vmatmul.mubr.msk.f32.vlgmr.msra.gmra.mrb[58].mxu0 %vm2993_vm1, %v7142_v35 }
 0x90b   : > { %11127 = vmatpush3.xpose.msk.msra.mxu0 %vm2993_vm1, %v7309_v40  ;;  %11128 = vmatprep.mubr.msk.f32.mxu0 %vm12825_vm0, %v14999_v50 }
 0x90c   : > { %11136 = vmatprep.subr.mxu0 %v14999_v50 }
 0x90e   : > { %v7474_v43 = vpop.permute.xlu1 %7473  ;;  %11129 = vmatmul.mubr.msk.f32.vlgmr.msra.gmra.mrb[60].mxu0 %vm2993_vm1, %v7307_v36 }
 0x90f   : > { %11137 = vmatpush3.xpose.msk.msra.mxu0 %vm2993_vm1, %v7474_v43  ;;  %11138 = vmatprep.mubr.msk.f32.mxu0 %vm12825_vm0, %v14999_v50 }
 0x910   : > { %11146 = vmatprep.subr.mxu0 %v14999_v50 }
 0x912   : > { %v7639_v46 = vpop.permute.xlu1 %7638  ;;  %11139 = vmatmul.mubr.msk.f32.vlgmr.msra.gmra.mrb[62].mxu0 %vm2993_vm1, %v7472_v38 }
 0x913   : > { %11147 = vmatpush3.xpose.msk.msra.mxu0 %vm2993_vm1, %v7639_v46  ;;  %11148 = vmatprep.mubr.msk.f32.mxu0 %vm12825_vm0, %v14999_v50 }
 0x914   : > { %11156 = vmatprep.subr.mxu0 %v14999_v50 }
 0x916   : > { %v7804_v48 = vpop.permute.xlu1 %7803  ;;  %11149 = vmatmul.mubr.msk.f32.vlgmr.msra.gmra.mrb[64].mxu0 %vm2993_vm1, %v7637_v44 }
 0x917   : > { %11157 = vmatpush3.xpose.msk.msra.mxu0 %vm2993_vm1, %v7804_v48  ;;  %11158 = vmatprep.mubr.msk.f32.mxu0 %vm12825_vm0, %v14999_v50 }
 0x918   : > { %11166 = vmatprep.subr.mxu0 %v14999_v50 }
 0x91a   : > { %v7969_v18 = vpop.permute.xlu1 %7968  ;;  %11159 = vmatmul.mubr.msk.f32.vlgmr.msra.gmra.mrb[66].mxu0 %vm2993_vm1, %v7802_v47 }
 0x91b   : > { %11167 = vmatpush3.xpose.msk.msra.mxu0 %vm2993_vm1, %v7969_v18  ;;  %11168 = vmatprep.mubr.msk.f32.mxu0 %vm12825_vm0, %v14999_v50 }
 0x91c   : > { %11176 = vmatprep.subr.mxu0 %v14999_v50 }
 0x91e   : > { %v8134_v51 = vpop.permute.xlu1 %8133  ;;  %11169 = vmatmul.mubr.msk.f32.vlgmr.msra.gmra.mrb[68].mxu0 %vm2993_vm1, %v7967_v49 }
 0x91f   : > { %11177 = vmatpush3.xpose.msk.msra.mxu0 %vm2993_vm1, %v8134_v51  ;;  %11178 = vmatprep.mubr.msk.f32.mxu0 %vm12825_vm0, %v14999_v50 }
 0x922   : > { %11179 = vmatmul.mubr.msk.f32.vlgmr.msra.gmra.mrb[70].mxu0 %vm2993_vm1, %v8132_v52 }
 0x973   : > { %v14011_v53 = vpop.f32.mrb[26].mxu1 }
 0x974   : > { %15121 = vst [vmem:[#allocation60_spill] sm:$0xff] %v14011_v53  ;;  %v10885_v54 = vpop.f32.mrb[27].mxu1 }
 0x976   : > { %v3725_v55 = vpop.f32.mrb[16].mxu0 }
 0x977   : > { %v14014_v56 = vadd.f32 %v3725_v55, %v13704_v58  ;;  %v3395_v57 = vpop.f32.mrb[28].mxu1  ;;  %v10910_v59 = vpop.f32.mrb[17].mxu0 }
 0x978   : > { %v10890_v60 = vpop.f32.mrb[29].mxu1  ;;  %v14062_v43 = vadd.f32 %v3395_v57, %v13704_v58 }
 0x979   : > { %v3729_v63 = vsel %vm3070_vm3, %v14014_v56, -inf }
 0x97a   : > { %3730 = vmax.xlane.f32.xlu0 %v3729_v63  ;;  %v3399_v49 = vsel %vm3070_vm3, %v14062_v43, -inf }
 0x97e   : > { %v3890_v0 = vpop.f32.mrb[18].mxu0 }
 0x97f   : > { %v14019_v1 = vadd.f32 %v3890_v0, %v13704_v58  ;;  %v10920_v3 = vpop.f32.mrb[19].mxu0 }
 0x981   : > { %v3894_v4 = vsel %vm3070_vm3, %v14019_v1, -inf }
 0x982   : > { %3895 = vmax.xlane.f32.xlu0 %v3894_v4 }
 0x986   : > { %v4055_v5 = vpop.f32.mrb[20].mxu0 }
 0x987   : > { %v14024_v7 = vadd.f32 %v4055_v5, %v13704_v58  ;;  %v10930_v8 = vpop.f32.mrb[21].mxu0 }
 0x989   : > { %v4059_v9 = vsel %vm3070_vm3, %v14024_v7, -inf }
 0x98a   : > { %4060 = vmax.xlane.f32.xlu1 %v4059_v9 }
 0x98d   : > { %v4220_v10 = vpop.f32.mrb[22].mxu0 }
 0x98e   : > { %v14029_v11 = vadd.f32 %v4220_v10, %v13704_v58  ;;  %v10940_v12 = vpop.f32.mrb[23].mxu0 }
 0x990   : > { %v4224_v14 = vsel %vm3070_vm3, %v14029_v11, -inf }
 0x991   : > { %4225 = vmax.xlane.f32.xlu0 %v4224_v14  ;;  %v4385_v15 = vpop.f32.mrb[24].mxu0 }
 0x992   : > { %v14034_v16 = vadd.f32 %v4385_v15, %v13704_v58  ;;  %v10950_v17 = vpop.f32.mrb[25].mxu0 }
 0x994   : > { %v4389_v19 = vsel %vm3070_vm3, %v14034_v16, -inf }
 0x995   : > { %4390 = vmax.xlane.f32.xlu1 %v4389_v19  ;;  %v4550_v20 = vpop.f32.mrb[26].mxu0 }
 0x996   : > { %v14039_v21 = vadd.f32 %v4550_v20, %v13704_v58  ;;  %v10960_v23 = vpop.f32.mrb[27].mxu0 }
 0x998   : > { %v4554_v24 = vsel %vm3070_vm3, %v14039_v21, -inf }
 0x999   : > { %4555 = vmax.xlane.f32.xlu0 %v4554_v24 }
 0x99b   : > { %v4723_v25 = vpop.f32.mrb[28].mxu0 }
 0x99c   : > { %v14044_v27 = vadd.f32 %v4723_v25, %v13704_v58  ;;  %v10970_v29 = vpop.f32.mrb[29].mxu0 }
 0x99e   : > { %v4727_v30 = vsel %vm3070_vm3, %v14044_v27, -inf }
 0x99f   : > { %4728 = vmax.xlane.f32.xlu1 %v4727_v30 }
 0x9a1   : > { %v4892_v31 = vpop.f32.mrb[30].mxu0 }
 0x9a2   : > { %v14049_v32 = vadd.f32 %v4892_v31, %v13704_v58  ;;  %v10980_v33 = vpop.f32.mrb[31].mxu0 }
 0x9a4   : > { %v4896_v34 = vsel %vm3070_vm3, %v14049_v32, -inf }
 0x9a5   : > { %4897 = vmax.xlane.f32.xlu0 %v4896_v34  ;;  %v5057_v35 = vpop.f32.mrb[32].mxu0 }
 0x9a6   : > { %v14054_v26 = vadd.f32 %v5057_v35, %v13704_v58  ;;  %v10990_v28 = vpop.f32.mrb[33].mxu0 }
 0x9a8   : > { %v5061_v36 = vsel %vm3070_vm3, %v14054_v26, -inf }
 0x9a9   : > { %5062 = vmax.xlane.f32.xlu1 %v5061_v36  ;;  %v5222_v37 = vpop.f32.mrb[34].mxu0 }
 0x9aa   : > { %v14059_v38 = vadd.f32 %v5222_v37, %v13704_v58  ;;  %v11000_v40 = vpop.f32.mrb[35].mxu0 }
 0x9ac   : > { %v5226_v44 = vsel %vm3070_vm3, %v14059_v38, -inf }
 0x9ad   : > { %5227 = vmax.xlane.f32.xlu0 %v5226_v44  ;;  %v5387_v46 = vpop.f32.mrb[36].mxu0 }
 0x9ae   : > { %v14067_v47 = vadd.f32 %v5387_v46, %v13704_v58  ;;  %v11010_v48 = vpop.f32.mrb[37].mxu0 }
 0x9b0   : > { %v5391_v18 = vsel %vm3070_vm3, %v14067_v47, -inf }
 0x9b1   : > { %5392 = vmax.xlane.f32.xlu1 %v5391_v18  ;;  %v5552_v51 = vpop.f32.mrb[38].mxu0  ;;  %3400 = vmax.xlane.f32.xlu0 %v3399_v49 }
 0x9b2   : > { %v14074_v52 = vadd.f32 %v5552_v51, %v13704_v58  ;;  %v11020_v54 = vpop.f32.mrb[39].mxu0 }
 0x9b4   : > { %v5556_v55 = vsel %vm3070_vm3, %v14074_v52, -inf }
 0x9b5   : > { %v5717_v57 = vpop.f32.mrb[40].mxu0  ;;  %5557 = vmax.xlane.f32.xlu0 %v5556_v55 }
 0x9b6   : > { %v14079_v59 = vadd.f32 %v5717_v57, %v13704_v58  ;;  %v11030_v60 = vpop.f32.mrb[41].mxu0 }
 0x9b8   : > { %v5721_v63 = vsel %vm3070_vm3, %v14079_v59, -inf }
 0x9b9   : > { %5722 = vmax.xlane.f32.xlu1 %v5721_v63  ;;  %v5882_v0 = vpop.f32.mrb[42].mxu0 }
 0x9ba   : > { %v14084_v3 = vadd.f32 %v5882_v0, %v13704_v58  ;;  %v11040_v4 = vpop.f32.mrb[43].mxu0 }
 0x9bc   : > { %v5886_v5 = vsel %vm3070_vm3, %v14084_v3, -inf }
 0x9bd   : > { %v6047_v8 = vpop.f32.mrb[44].mxu0  ;;  %5887 = vmax.xlane.f32.xlu0 %v5886_v5 }
 0x9be   : > { %v14089_v9 = vadd.f32 %v6047_v8, %v13704_v58  ;;  %v11050_v10 = vpop.f32.mrb[45].mxu0 }
 0x9c0   : > { %v6051_v12 = vsel %vm3070_vm3, %v14089_v9, -inf }
 0x9c1   : > { %6052 = vmax.xlane.f32.xlu1 %v6051_v12  ;;  %v6212_v14 = vpop.f32.mrb[46].mxu0 }
 0x9c2   : > { %v14094_v15 = vadd.f32 %v6212_v14, %v13704_v58  ;;  %v11060_v17 = vpop.f32.mrb[47].mxu0 }
 0x9c4   : > { %v6216_v19 = vsel %vm3070_vm3, %v14094_v15, -inf }
 0x9c5   : > { %v6377_v20 = vpop.f32.mrb[48].mxu0  ;;  %6217 = vmax.xlane.f32.xlu0 %v6216_v19 }
 0x9c6   : > { %v14099_v23 = vadd.f32 %v6377_v20, %v13704_v58  ;;  %v11070_v24 = vpop.f32.mrb[49].mxu0 }
 0x9c8   : > { %v6381_v25 = vsel %vm3070_vm3, %v14099_v23, -inf }
 0x9c9   : > { %6382 = vmax.xlane.f32.xlu1 %v6381_v25 }
 0x9cb   : > { %v6551_v29 = vpop.f32.mrb[50].mxu0 }
 0x9cc   : > { %v14104_v30 = vadd.f32 %v6551_v29, %v13704_v58  ;;  %v11080_v31 = vpop.f32.mrb[51].mxu0 }
 0x9ce   : > { %v6555_v33 = vsel %vm3070_vm3, %v14104_v30, -inf }
 0x9cf   : > { %6556 = vmax.xlane.f32.xlu0 %v6555_v33 }
 0x9d1   : > { %v6720_v34 = vpop.f32.mrb[52].mxu0 }
 0x9d2   : > { %v14109_v35 = vadd.f32 %v6720_v34, %v13704_v58  ;;  %v11090_v28 = vpop.f32.mrb[53].mxu0 }
 0x9d4   : > { %v6724_v36 = vsel %vm3070_vm3, %v14109_v35, -inf }
 0x9d5   : > { %6725 = vmax.xlane.f32.xlu1 %v6724_v36  ;;  %v6885_v37 = vpop.f32.mrb[54].mxu0 }
 0x9d6   : > { %v14114_v40 = vadd.f32 %v6885_v37, %v13704_v58  ;;  %v11100_v44 = vpop.f32.mrb[55].mxu0 }
 0x9d8   : > { %v6889_v46 = vsel %vm3070_vm3, %v14114_v40, -inf }
 0x9d9   : > { %v7050_v48 = vpop.f32.mrb[56].mxu0  ;;  %6890 = vmax.xlane.f32.xlu0 %v6889_v46 }
 0x9da   : > { %v14119_v18 = vadd.f32 %v7050_v48, %v13704_v58  ;;  %v11110_v49 = vpop.f32.mrb[57].mxu0 }
 0x9dc   : > { %v7054_v51 = vsel %vm3070_vm3, %v14119_v18, -inf }
 0x9dd   : > { %7055 = vmax.xlane.f32.xlu1 %v7054_v51  ;;  %v7215_v54 = vpop.f32.mrb[58].mxu0 }
 0x9de   : > { %v14124_v55 = vadd.f32 %v7215_v54, %v13704_v58  ;;  %v11120_v57 = vpop.f32.mrb[59].mxu0 }
 0x9e0   : > { %v7219_v60 = vsel %vm3070_vm3, %v14124_v55, -inf }
 0x9e1   : > { %7220 = vmax.xlane.f32.xlu1 %v7219_v60  ;;  %v7380_v63 = vpop.f32.mrb[60].mxu0 }
 0x9e2   : > { %v14129_v0 = vadd.f32 %v7380_v63, %v13704_v58  ;;  %v11130_v4 = vpop.f32.mrb[61].mxu0 }
 0x9e4   : > { %v7384_v5 = vsel %vm3070_vm3, %v14129_v0, -inf }
 0x9e5   : > { %7385 = vmax.xlane.f32.xlu1 %v7384_v5  ;;  %v7545_v8 = vpop.f32.mrb[62].mxu0 }
 0x9e6   : > { %v14134_v10 = vadd.f32 %v7545_v8, %v13704_v58  ;;  %v11140_v12 = vpop.f32.mrb[63].mxu0 }
 0x9e8   : > { %v7549_v14 = vsel %vm3070_vm3, %v14134_v10, -inf }
 0x9e9   : > { %7550 = vmax.xlane.f32.xlu1 %v7549_v14  ;;  %v7710_v17 = vpop.f32.mrb[64].mxu0 }
 0x9ea   : > { %v14139_v19 = vadd.f32 %v7710_v17, %v13704_v58  ;;  %v11150_v20 = vpop.f32.mrb[65].mxu0 }
 0x9ec   : > { %v7714_v24 = vsel %vm3070_vm3, %v14139_v19, -inf }
 0x9ed   : > { %7715 = vmax.xlane.f32.xlu1 %v7714_v24  ;;  %v7875_v25 = vpop.f32.mrb[66].mxu0 }
 0x9ee   : > { %v14144_v29 = vadd.f32 %v7875_v25, %v13704_v58  ;;  %v11160_v31 = vpop.f32.mrb[67].mxu0 }
 0x9f0   : > { %v7879_v33 = vsel %vm3070_vm3, %v14144_v29, -inf }
 0x9f1   : > { %7880 = vmax.xlane.f32.xlu1 %v7879_v33  ;;  %v8040_v34 = vpop.f32.mrb[68].mxu0 }
 0x9f2   : > { %v14149_v28 = vadd.f32 %v8040_v34, %v13704_v58  ;;  %v11170_v36 = vpop.f32.mrb[69].mxu0 }
 0x9f4   : > { %v8044_v37 = vsel %vm3070_vm3, %v14149_v28, -inf }
 0x9f5   : > { %8045 = vmax.xlane.f32.xlu1 %v8044_v37  ;;  %v8205_v44 = vpop.f32.mrb[70].mxu0 }
 0x9f6   : > { %v14154_v46 = vadd.f32 %v8205_v44, %v13704_v58  ;;  %v11180_v48 = vpop.f32.mrb[71].mxu0 }
 0x9f8   : > { %v8209_v49 = vsel %vm3070_vm3, %v14154_v46, -inf }
 0x9f9   : > { %8210 = vmax.xlane.f32.xlu1 %v8209_v49 }
 0xa07   : > { %v3731_v51 = vpop.xlane.xlu0 %3730 }
 0xa08   : > { %v3732_v54 = vsub.f32 %v14014_v56, %v3731_v51 }
 0xa0a   : > { %v3733_v57 = vmul.f32 1.442695, %v3732_v54 }
 0xa0c   : > { %11977 = vpow2.f32 %v3733_v57 }
 0xa0f   : > { %v3896_v60 = vpop.xlane.xlu0 %3895 }
 0xa10   : > { %v3897_v63 = vsub.f32 %v14019_v1, %v3896_v60 }
 0xa12   : > { %v3898_v4 = vmul.f32 1.442695, %v3897_v63 }
 0xa14   : > { %11979 = vpow2.f32 %v3898_v4 }
 0xa16   : > { %v14160_v5 = vpop.eup %11977 }
 0xa17   : > { %v4061_v8 = vpop.xlane.xlu1 %4060  ;;  %v3735_v12 = vsel %vm3070_vm3, %v14160_v5, 0.0 }
 0xa18   : > { %v4062_v14 = vsub.f32 %v14024_v7, %v4061_v8  ;;  %3736 = vadd.xlane.f32.xlu0 %v3735_v12 }
 0xa1a   : > { %v4063_v17 = vmul.f32 1.442695, %v4062_v14 }
 0xa1c   : > { %11981 = vpow2.f32 %v4063_v17 }
 0xa1e   : > { %v14165_v20 = vpop.eup %11979  ;;  %v4226_v56 = vpop.xlane.xlu0 %4225 }
 0xa1f   : > { %v4227_v24 = vsub.f32 %v14029_v11, %v4226_v56  ;;  %v3900_v1 = vsel %vm3070_vm3, %v14165_v20, 0.0 }
 0xa20   : > { %3901 = vadd.xlane.f32.xlu0 %v3900_v1 }
 0xa21   : > { %v4228_v25 = vmul.f32 1.442695, %v4227_v24 }
 0xa22   : > { %v4391_v31 = vpop.xlane.xlu1 %4390 }
 0xa23   : > { %11983 = vpow2.f32 %v4228_v25  ;;  %v4392_v33 = vsub.f32 %v14034_v16, %v4391_v31 }
 0xa25   : > { %v4393_v34 = vmul.f32 1.442695, %v4392_v33 }
 0xa26   : > { %v14171_v36 = vpop.eup %11981  ;;  %v4556_v7 = vpop.xlane.xlu0 %4555 }
 0xa27   : > { %11985 = vpow2.f32 %v4393_v34  ;;  %v4557_v37 = vsub.f32 %v14039_v21, %v4556_v7  ;;  %v4065_v44 = vsel %vm3070_vm3, %v14171_v36, 0.0 }
 0xa28   : > { %4066 = vadd.xlane.f32.xlu0 %v4065_v44 }
 0xa29   : > { %v4558_v11 = vmul.f32 1.442695, %v4557_v37 }
 0xa2b   : > { %11987 = vpow2.f32 %v4558_v11 }
 0xa2c   : > { %v4729_v48 = vpop.xlane.xlu1 %4728 }
 0xa2d   : > { %v14176_v49 = vpop.eup %11983  ;;  %v4730_v51 = vsub.f32 %v14044_v27, %v4729_v48 }
 0xa2e   : > { %v4230_v16 = vsel %vm3070_vm3, %v14176_v49, 0.0 }
 0xa2f   : > { %v4731_v54 = vmul.f32 1.442695, %v4730_v51  ;;  %4231 = vadd.xlane.f32.xlu0 %v4230_v16 }
 0xa31   : > { %v14181_v57 = vpop.eup %11985  ;;  %11989 = vpow2.f32 %v4731_v54 }
 0xa32   : > { %v4395_v21 = vsel %vm3070_vm3, %v14181_v57, 0.0  ;;  %v4898_v8 = vpop.xlane.xlu0 %4897 }
 0xa33   : > { %4396 = vadd.xlane.f32.xlu0 %v4395_v21  ;;  %v4899_v14 = vsub.f32 %v14049_v32, %v4898_v8 }
 0xa35   : > { %v14185_v60 = vpop.eup %11987  ;;  %v4900_v56 = vmul.f32 1.442695, %v4899_v14 }
 0xa36   : > { %v4560_v63 = vsel %vm3070_vm3, %v14185_v60, 0.0  ;;  %v5063_v32 = vpop.xlane.xlu1 %5062 }
 0xa37   : > { %4561 = vadd.xlane.f32.xlu0 %v4560_v63  ;;  %11991 = vpow2.f32 %v4900_v56  ;;  %v5064_v44 = vsub.f32 %v14054_v26, %v5063_v32 }
 0xa39   : > { %v5065_v11 = vmul.f32 1.442695, %v5064_v44 }
 0xa3a   : > { %v5228_v12 = vpop.xlane.xlu0 %5227 }
 0xa3b   : > { %v14189_v4 = vpop.eup %11989  ;;  %v5229_v48 = vsub.f32 %v14059_v38, %v5228_v12 }
 0xa3c   : > { %v4733_v27 = vsel %vm3070_vm3, %v14189_v4, 0.0 }
 0xa3d   : > { %4734 = vadd.xlane.f32.xlu1 %v4733_v27  ;;  %v5230_v51 = vmul.f32 1.442695, %v5229_v48 }
 0xa3e   : > { %v3401_v17 = vpop.xlane.xlu0 %3400 }
 0xa3f   : > { %v3402_v24 = vsub.f32 %v14062_v43, %v3401_v17  ;;  %v5393_v43 = vpop.xlane.xlu1 %5392 }
 0xa40   : > { %v5394_v7 = vsub.f32 %v14067_v47, %v5393_v43 }
 0xa41   : > { %v3403_v1 = vmul.f32 1.442695, %v3402_v24  ;;  %v14199_v25 = vpop.eup %11991 }
 0xa42   : > { %v4902_v31 = vsel %vm3070_vm3, %v14199_v25, 0.0  ;;  %v5395_v37 = vmul.f32 1.442695, %v5394_v7  ;;  %v5558_v8 = vpop.xlane.xlu0 %5557 }
 0xa43   : > { %11993 = vpow2.f32 %v3403_v1 }
 0xa44   : > { %11995 = vpow2.f32 %v5395_v37 }
 0xa45   : > { %11997 = vpow2.f32 %v5065_v11 }
 0xa46   : > { %11999 = vpow2.f32 %v5230_v51  ;;  %v5723_v38 = vpop.xlane.xlu1 %5722 }
 0xa47   : > { %v5724_v43 = vsub.f32 %v14079_v59, %v5723_v38 }
 0xa4a   : > { %v5888_v14 = vpop.xlane.xlu0 %5887 }
 0xa4b   : > { %v5889_v56 = vsub.f32 %v14084_v3, %v5888_v14 }
 0xa4d   : > { %3575 = vrot.lane.b32.xlu0 %v13688_v41, %s12855_s10  ;;  %v14203_v33 = vpop.eup %11993  ;;  %s15123_s10 = smov 44   ;;  %v5890_v1 = vmul.f32 1.442695, %v5889_v56 }
 0xa4e   : > { %3740 = vrot.lane.b32.xlu1 %v13688_v41, %s12829_s28  ;;  %v3405_v34 = vsel %vm3070_vm3, %v14203_v33, 0.0  ;;  %v14214_v16 = vpop.eup %11995  ;;  %v6053_v27 = vpop.xlane.xlu1 %6052  ;;  %s15122_s28 = smov 8  }
 0xa4f   : > { %v5397_v54 = vsel %vm3070_vm3, %v14214_v16, 0.0  ;;  %v14218_v21 = vpop.eup %11997  ;;  %12001 = vpow2.f32 %v5890_v1 }
 0xa50   : > { %v5067_v47 = vsel %vm3070_vm3, %v14218_v21, 0.0  ;;  %v14222_v63 = vpop.eup %11999 }
 0xa51   : > { %v5232_v26 = vsel %vm3070_vm3, %v14222_v63, 0.0 }
 0xa56   : > { %v14232_v12 = vpop.xlane.xlu1 %6382 }
 0xa59   : > { %v14247_v37 = vpop.eup %12001 }
 0xa5a   : > { %v5892_v3 = vsel %vm3070_vm3, %v14247_v37, 0.0 }
 0xa62   : > { %v14236_v17 = vpop.xlane.xlu1 %6725 }
 0xa6a   : > { %v14239_v24 = vpop.xlane.xlu1 %7055 }
 0xa6c   : > { %4903 = vadd.xlane.f32.xlu0 %v4902_v31 }
 0xa6e   : > { %v14241_v31 = vpop.xlane.xlu1 %7220 }
 0xa72   : > { %3406 = vadd.xlane.f32.xlu1 %v3405_v34  ;;  %v5559_v34 = vsub.f32 %v14074_v52, %v5558_v8  ;;  %v14245_v7 = vpop.xlane.xlu1 %7385 }
 0xa74   : > { %v5560_v32 = vmul.f32 1.442695, %v5559_v34 }
 0xa76   : > { %12003 = vpow2.f32 %v5560_v32  ;;  %v14249_v44 = vpop.xlane.xlu1 %7550 }
 0xa7a   : > { %v14253_v11 = vpop.xlane.xlu1 %7715 }
 0xa7e   : > { %v14261_v51 = vpop.xlane.xlu1 %7880 }
 0xa80   : > { %v14255_v48 = vpop.eup %12003 }
 0xa81   : > { %v5562_v52 = vsel %vm3070_vm3, %v14255_v48, 0.0 }
 0xa82   : > { %4070 = vrot.lane.b32.xlu0 %v13688_v41, %s12857_s20  ;;  %s15124_s20 = smov 32   ;;  %v14265_v38 = vpop.xlane.xlu1 %8045 }
 0xa83   : > { %3905 = vrot.lane.b32.xlu1 %v13688_v41, %s12856_s13  ;;  %s15126_s13 = smov 124  }
 0xa86   : > { %v14269_v14 = vpop.xlane.xlu1 %8210 }
 0xaa1   : > { %5398 = vadd.xlane.f32.xlu0 %v5397_v54  ;;  %v6218_v54 = vpop.xlane.xlu0 %6217 }
 0xaa2   : > { %v6219_v32 = vsub.f32 %v14094_v15, %v6218_v54  ;;  %v6054_v54 = vsub.f32 %v14089_v9, %v6053_v27  ;;  %v6384_v27 = vsub.f32 %v14099_v23, %v14232_v12 }
 0xaa7   : > { %5068 = vadd.xlane.f32.xlu1 %v5067_v47 }
 0xaab   : > { %5233 = vadd.xlane.f32.xlu1 %v5232_v26  ;;  %v6557_v26 = vpop.xlane.xlu0 %6556 }
 0xaaf   : > { %v6891_v8 = vpop.xlane.xlu0 %6890 }
 0xab0   : > { %v6892_v12 = vsub.f32 %v14114_v40, %v6891_v8  ;;  %v6727_v8 = vsub.f32 %v14109_v35, %v14236_v17  ;;  %v7222_v35 = vsub.f32 %v14124_v55, %v14241_v31  ;;  %v7057_v55 = vsub.f32 %v14119_v18, %v14239_v24 }
 0xab1   : > { %v7387_v24 = vsub.f32 %v14129_v0, %v14245_v7 }
 0xab2   : > { %v6728_v53 = vmul.f32 1.442695, %v6727_v8  ;;  %v7223_v17 = vmul.f32 1.442695, %v7222_v35  ;;  %v7058_v31 = vmul.f32 1.442695, %v7057_v55 }
 0xab3   : > { %v14271_v56 = vpop.xlane.xlu0 %3736 }
 0xab7   : > { %4565 = vrot.lane.b32.xlu0 %v13688_v41, %s12832_s16  ;;  %s15125_s16 = smov 112   ;;  %v14275_v34 = vpop.xlane.xlu0 %3901 }
 0xabb   : > { %4739 = vrot.lane.b32.xlu0 %v13688_v41, %s15122_s28 }
 0xabc   : > { %4235 = vrot.lane.b32.xlu1 %v13688_v41, %s15123_s10  ;;  %s15131_s10 = smov 100  }
 0xac0   : > { %4400 = vrot.lane.b32.xlu1 %v13688_v41, %s15124_s20  ;;  %v5725_v41 = vmul.f32 1.442695, %v5724_v43  ;;  %v14280_v43 = vpop.xlane.xlu0 %4066  ;;  %s15134_s20 = smov 76  }
 0xac2   : > { %12005 = vpow2.f32 %v5725_v41 }
 0xaca   : > { %v14273_v1 = vpop.xlane.xlu1 %4734 }
 0xacc   : > { %v14259_v59 = vpop.eup %12005 }
 0xacd   : > { %v5727_v47 = vsel %vm3070_vm3, %v14259_v59, 0.0 }
 0xace   : > { %v14282_v41 = vpop.permute.xlu1 %3740 }
 0xada   : > { %5893 = vadd.xlane.f32.xlu0 %v5892_v3  ;;  %v6220_v3 = vmul.f32 1.442695, %v6219_v32 }
 0xae4   : > { %5563 = vadd.xlane.f32.xlu1 %v5562_v52  ;;  %v14286_v52 = vpop.xlane.xlu0 %4231 }
 0xae8   : > { %5728 = vadd.xlane.f32.xlu1 %v5727_v47  ;;  %v14288_v62 = vpop.xlane.xlu0 %4396 }
 0xaec   : > { %v14293_v39 = vpop.xlane.xlu0 %4561 }
 0xaf0   : > { %5072 = vrot.lane.b32.xlu0 %v13659_v6, %s15125_s16  ;;  %v3576_v9 = vpop.permute.xlu0 %3575  ;;  %s15138_s16 = smov 108  }
 0xaf9   : > { %4741 = vrot.lane.b32.xlu1 %v13659_v6, %s15122_s28  ;;  %s15130_s28 = smov 88  }
 0xafd   : > { %4907 = vrot.lane.b32.xlu1 %v13659_v6, %s15126_s13  ;;  %s15140_s13 = smov 72  }
 0xaff   : > { %v3407_v47 = vpop.xlane.xlu1 %3406 }
 0xb00   : > { %12007 = vrcp.f32 %v3407_v47  ;;  %v6055_v47 = vmul.f32 1.442695, %v6054_v54 }
 0xb01   : > { %12009 = vpow2.f32 %v6220_v3  ;;  %v15128_v3 = vmov 0.0  }
 0xb02   : > { %12011 = vpow2.f32 %v6055_v47 }
 0xb0a   : > { %v12008_v50 = vpop.eup %12007 }
 0xb0b   : > { %v14290_v15 = vpop.eup %12009  ;;  %v3409_v2 = vmul.f32 %v12008_v50, %v14203_v33 }
 0xb0c   : > { %15127 = vst [vmem:[#allocation61_spill] sm:$0xff] %v14290_v15  ;;  %v6222_v32 = vsel %vm3070_vm3, %v14290_v15, 0.0  ;;  %v14309_v50 = vpop.eup %12011 }
 0xb0d   : > { %10894 = vmatmul.mubr.msk.f32.vlgmr.msra.gmra.mrb[30].mxu1 %vm3070_vm3, %v3409_v2  ;;  %15129 = vst [vmem:[#allocation62_spill] sm:$0xff] %v14309_v50  ;;  %v6057_v2 = vsel %vm3070_vm3, %v14309_v50, 0.0 }
 0xb0e   : > { %10897 = vmatpush3.xpose.msk.msra.mxu1 %vm2993_vm1, %v13856_v42  ;;  %10898 = vmatprep.mubr.msk.f32.mxu1 %vm12825_vm0, %v15128_v3  ;;  %v6558_v42 = vsub.f32 %v14104_v30, %v6557_v26  ;;  %v14328_v26 = vpop.permute.xlu1 %3905 }
 0xb0f   : > { %6223 = vadd.xlane.f32.xlu0 %v6222_v32  ;;  %10901 = vmatprep.subr.mxu1 %v15128_v3  ;;  %v6385_v32 = vmul.f32 1.442695, %v6384_v27 }
 0xb10   : > { %v6559_v33 = vmul.f32 1.442695, %v6558_v42  ;;  %v6893_v42 = vmul.f32 1.442695, %v6892_v12 }
 0xb11   : > { %10899 = vmatmul.mubr.msk.f32.vlgmr.msra.gmra.mrb[32].mxu1 %vm2993_vm1, %v13860_v45 }
 0xb12   : > { %10902 = vmatpush3.msra.mxu1 %v3576_v9  ;;  %10903 = vmatprep.mubr.msk.f32.mxu1 %vm12825_vm0, %v15128_v3  ;;  %12013 = vpow2.f32 %v6559_v33 }
 0xb13   : > { %10911 = vmatprep.subr.mxu1 %v15128_v3  ;;  %12015 = vpow2.f32 %v6385_v32 }
 0xb14   : > { %12017 = vpow2.f32 %v6893_v42 }
 0xb15   : > { %12019 = vpow2.f32 %v6728_v53 }
 0xb16   : > { %12021 = vpow2.f32 %v7223_v17 }
 0xb1c   : > { %v14318_v45 = vpop.eup %12013 }
 0xb1d   : > { %15132 = vst [vmem:[#allocation63_spill] sm:$0xff] %v14318_v45  ;;  %v6561_v54 = vsel %vm3070_vm3, %v14318_v45, 0.0  ;;  %v14324_v47 = vpop.eup %12015 }
 0xb1e   : > { %15133 = vst [vmem:[#allocation64_spill] sm:$0xff] %v14324_v47  ;;  %v6387_v30 = vsel %vm3070_vm3, %v14324_v47, 0.0  ;;  %v14353_v40 = vpop.eup %12017 }
 0xb1f   : > { %v6895_v13 = vsel %vm3070_vm3, %v14353_v40, 0.0  ;;  %v14364_v15 = vpop.eup %12019 }
 0xb20   : > { %v6730_v50 = vsel %vm3070_vm3, %v14364_v15, 0.0 }
 0xb21   : > { %6058 = vadd.xlane.f32.xlu1 %v6057_v2  ;;  %v14337_v2 = vpop.xlane.xlu0 %4903 }
 0xb25   : > { %5402 = vrot.lane.b32.xlu0 %v13659_v6, %s15130_s28  ;;  %v14343_v27 = vpop.permute.xlu0 %4070 }
 0xb32   : > { %5237 = vrot.lane.b32.xlu1 %v13659_v6, %s15131_s10 }
 0xb34   : > { %v14332_v9 = vpop.xlane.xlu1 %5068 }
 0xb38   : > { %v14334_v23 = vpop.xlane.xlu1 %5233 }
 0xb3c   : > { %v14339_v33 = vpop.permute.xlu1 %4235 }
 0xb40   : > { %v14347_v32 = vpop.permute.xlu1 %4400 }
 0xb44   : > { %6562 = vadd.xlane.f32.xlu0 %v6561_v54  ;;  %v14345_v54 = vpop.xlane.xlu0 %5398 }
 0xb48   : > { %v14351_v22 = vpop.permute.xlu0 %4565 }
 0xb4c   : > { %v4740_v42 = vpop.permute.xlu0 %4739 }
 0xb56   : > { %6388 = vadd.xlane.f32.xlu1 %v6387_v30 }
 0xb5a   : > { %5732 = vrot.lane.b32.xlu0 %v13659_v6, %s15110_s21 }
 0xb67   : > { %5567 = vrot.lane.b32.xlu1 %v13659_v6, %s15134_s20 }
 0xb71   : > { %v14349_v30 = vpop.xlane.xlu1 %5563 }
 0xb75   : > { %v14357_v12 = vpop.xlane.xlu1 %5728 }
 0xb79   : > { %v4742_v45 = vpop.permute.xlu1 %4741  ;;  %6896 = vadd.xlane.f32.xlu0 %v6895_v13  ;;  %v14374_v13 = vpop.eup %12021 }
 0xb7a   : > { %v14362_v47 = vsel %vm3070_vm3, %v4740_v42, %v4742_v45  ;;  %15135 = vst [vmem:[#allocation65_spill] sm:$0xff] %v14374_v13  ;;  %v7225_v53 = vsel %vm3070_vm3, %v14374_v13, 0.0 }
 0xb7d   : > { %v14410_v0 = vpop.permute.xlu1 %4907 }
 0xb8b   : > { %6731 = vadd.xlane.f32.xlu1 %v6730_v50  ;;  %v7552_v50 = vsub.f32 %v14134_v10, %v14249_v44 }
 0xb8d   : > { %v7553_v45 = vmul.f32 1.442695, %v7552_v50 }
 0xb8f   : > { %6062 = vrot.lane.b32.xlu0 %v13659_v6, %s15112_s0  ;;  %12023 = vpow2.f32 %v7553_v45  ;;  %v7388_v45 = vmul.f32 1.442695, %v7387_v24 }
 0xb90   : > { %12025 = vpow2.f32 %v7058_v31  ;;  %v7717_v31 = vsub.f32 %v14139_v19, %v14253_v11 }
 0xb91   : > { %12027 = vpow2.f32 %v7388_v45 }
 0xb99   : > { %v14384_v8 = vpop.eup %12023 }
 0xb9a   : > { %v7555_v17 = vsel %vm3070_vm3, %v14384_v8, 0.0  ;;  %v14392_v50 = vpop.eup %12025 }
 0xb9b   : > { %v7060_v18 = vsel %vm3070_vm3, %v14392_v50, 0.0  ;;  %v14400_v55 = vpop.eup %12027 }
 0xb9c   : > { %5897 = vrot.lane.b32.xlu1 %v13659_v6, %s15111_s24 }
 0xbae   : > { %7226 = vadd.xlane.f32.xlu0 %v7225_v53 }
 0xbc4   : > { %6392 = vrot.lane.b32.xlu0 %v13659_v6, %s15114_s9 }
 0xbe0   : > { %v14386_v42 = vpop.f32.mrb[30].mxu1 }
 0xbe1   : > { %15136 = vst [vmem:[#allocation66_spill] sm:$0xff] %v14386_v42  ;;  %v10895_v35 = vpop.f32.mrb[31].mxu1 }
 0xbe2   : > { %v7718_v35 = vmul.f32 1.442695, %v7717_v31 }
 0xbe3   : > { %7556 = vadd.xlane.f32.xlu0 %v7555_v17  ;;  %v14414_v17 = vpop.xlane.xlu1 %6058 }
 0xbe4   : > { %v3560_v53 = vpop.f32.mrb[32].mxu1  ;;  %12029 = vpow2.f32 %v7718_v35 }
 0xbe5   : > { %v3561_v13 = vadd.f32 %v3560_v53, %v13704_v58  ;;  %v10900_v10 = vpop.f32.mrb[33].mxu1  ;;  %v7390_v58 = vsel %vm3070_vm3, %v14400_v55, 0.0 }
 0xbe7   : > { %v3564_v44 = vsel %vm3070_vm3, %v3561_v13, -inf  ;;  %v14418_v10 = vpop.permute.xlu1 %5237 }
 0xbe8   : > { %3565 = vmax.xlane.f32.xlu1 %v3564_v44 }
 0xbec   : > { %7061 = vadd.xlane.f32.xlu1 %v7060_v18 }
 0xbee   : > { %v14412_v7 = vpop.eup %12029 }
 0xbef   : > { %15137 = vst [vmem:[#allocation67_spill] sm:$0xff] %v14412_v7  ;;  %v7720_v53 = vsel %vm3070_vm3, %v14412_v7, 0.0 }
 0xbfd   : > { %6227 = vrot.lane.b32.xlu1 %v13659_v6, %s15113_s5 }
 0xc21   : > { %7391 = vadd.xlane.f32.xlu1 %v7390_v58  ;;  %v8047_v58 = vsub.f32 %v14149_v28, %v14265_v38  ;;  %v7882_v28 = vsub.f32 %v14144_v29, %v14261_v51  ;;  %v8212_v29 = vsub.f32 %v14154_v46, %v14269_v14  ;;  %v14461_v51 = vpop.xlane.xlu0 %5893 }
 0xc23   : > { %v8048_v31 = vmul.f32 1.442695, %v8047_v58  ;;  %v7883_v38 = vmul.f32 1.442695, %v7882_v28 }
 0xc32   : > { %6567 = vrot.lane.b32.xlu1 %v13659_v6, %s15115_s18  ;;  %v14420_v6 = vpop.xlane.xlu1 %6388 }
 0xc36   : > { %6569 = vrot.lane.b32.xlu1 %v13649_v61, %s15115_s18  ;;  %v14422_v44 = vpop.permute.xlu1 %5567 }
 0xc3a   : > { %v14424_v18 = vpop.xlane.xlu1 %6731 }
 0xc3e   : > { %v14428_v19 = vpop.permute.xlu1 %5897 }
 0xc5a   : > { %7721 = vadd.xlane.f32.xlu1 %v7720_v53 }
 0xc6b   : > { %6900 = vrot.lane.b32.xlu1 %v13649_v61, %s15138_s16 }
 0xc75   : > { %v3566_v11 = vpop.xlane.xlu1 %3565 }
 0xc76   : > { %v3567_v24 = vsub.f32 %v3561_v13, %v3566_v11  ;;  %v8213_v11 = vmul.f32 1.442695, %v8212_v29 }
 0xc78   : > { %v3568_v45 = vmul.f32 1.442695, %v3567_v24  ;;  %v14463_v24 = vpop.permute.xlu0 %5072 }
 0xc7a   : > { %12031 = vpow2.f32 %v3568_v45 }
 0xc7b   : > { %12033 = vpow2.f32 %v8048_v31 }
 0xc7c   : > { %12035 = vpow2.f32 %v7883_v38  ;;  %v14465_v45 = vpop.xlane.xlu0 %6223 }
 0xc7d   : > { %12037 = vpow2.f32 %v8213_v11 }
 0xc80   : > { %v14469_v31 = vpop.permute.xlu0 %5402 }
 0xc84   : > { %v12032_v35 = vpop.eup %12031  ;;  %v14473_v28 = vpop.xlane.xlu0 %6562 }
 0xc85   : > { %v3570_v53 = vsel %vm3070_vm3, %v12032_v35, 0.0  ;;  %v14433_v42 = vpop.eup %12033 }
 0xc86   : > { %3571 = vadd.xlane.f32.xlu0 %v3570_v53  ;;  %15139 = vst [vmem:[#allocation68_spill] sm:$0xff] %v14433_v42  ;;  %v8050_v7 = vsel %vm3070_vm3, %v14433_v42, 0.0  ;;  %v14453_v13 = vpop.eup %12035 }
 0xc87   : > { %15141 = vst [vmem:[#allocation69_spill] sm:$0xff] %v14453_v13  ;;  %v14467_v58 = vpop.eup %12037 }
 0xc88   : > { %15142 = vst [vmem:[#allocation70_spill] sm:$0xff] %v14467_v58  ;;  %v8215_v53 = vsel %vm3070_vm3, %v14467_v58, 0.0  ;;  %v14475_v38 = vpop.permute.xlu0 %5732 }
 0xc8c   : > { %v14477_v46 = vpop.xlane.xlu0 %6896 }
 0xc8f   : > { %8051 = vadd.xlane.f32.xlu1 %v8050_v7  ;;  %v7885_v7 = vsel %vm3070_vm3, %v14453_v13, 0.0 }
 0xc90   : > { %v14479_v14 = vpop.permute.xlu0 %6062 }
 0xc9c   : > { %6735 = vrot.lane.b32.xlu0 %v13649_v61, %s15116_s15 }
 0xca0   : > { %7230 = vrot.lane.b32.xlu1 %v13649_v61, %s12848_s19 }
 0xca4   : > { %7395 = vrot.lane.b32.xlu1 %v13649_v61, %s15140_s13 }
 0xca8   : > { %7560 = vrot.lane.b32.xlu1 %v13649_v61, %s12850_s27 }
 0xcac   : > { %7725 = vrot.lane.b32.xlu1 %v13649_v61, %s12851_s23 }
 0xcb0   : > { %8055 = vrot.lane.b32.xlu1 %v13649_v61, %s15119_s1 }
 0xcb4   : > { %8220 = vrot.lane.b32.xlu1 %v13649_v61, %s15120_s4 }
 0xcbb   : > { %7886 = vadd.xlane.f32.xlu0 %v7885_v7  ;;  %v14481_v7 = vpop.xlane.xlu0 %7226 }
 0xcbf   : > { %v14485_v29 = vpop.permute.xlu0 %6392 }
 0xcc3   : > { %v14487_v11 = vpop.xlane.xlu0 %7556 }
 0xcd1   : > { %7065 = vrot.lane.b32.xlu0 %v13649_v61, %s15117_s29 }
 0xcf0   : > { %8216 = vadd.xlane.f32.xlu0 %v8215_v53 }
 0xd06   : > { %7890 = vrot.lane.b32.xlu0 %v13649_v61, %s15118_s3 }
 0xd13   : > { %v3572_v42 = vpop.xlane.xlu0 %3571 }
 0xd14   : > { %12039 = vrcp.f32 %v3572_v42 }
 0xd15   : > { %12041 = vrcp.f32 %v14271_v56 }
 0xd16   : > { %12043 = vrcp.f32 %v14275_v34 }
 0xd17   : > { %12045 = vrcp.f32 %v14280_v43 }
 0xd18   : > { %12047 = vrcp.f32 %v14286_v52 }
 0xd19   : > { %12049 = vrcp.f32 %v14288_v62 }
 0xd1a   : > { %12051 = vrcp.f32 %v14293_v39 }
 0xd1b   : > { %12053 = vrcp.f32 %v14273_v1 }
 0xd1c   : > { %12055 = vrcp.f32 %v14337_v2 }
 0xd1d   : > { %12057 = vrcp.f32 %v14332_v9 }
 0xd1e   : > { %v12040_v53 = vpop.eup %12039  ;;  %12059 = vrcp.f32 %v14334_v23 }
 0xd1f   : > { %v3574_v58 = vmul.f32 %v12040_v53, %v12032_v35  ;;  %v12042_v13 = vpop.eup %12041  ;;  %12061 = vrcp.f32 %v14345_v54 }
 0xd20   : > { %v3739_v61 = vmul.f32 %v12042_v13, %v14160_v5  ;;  %v12044_v56 = vpop.eup %12043  ;;  %12063 = vrcp.f32 %v14349_v30 }
 0xd21   : > { %10904 = vmatmul.mubr.msk.f32.vlgmr.msra.gmra.mrb[34].mxu1 %vm3070_vm3, %v3574_v58  ;;  %v3904_v34 = vmul.f32 %v12044_v56, %v14165_v20  ;;  %v12046_v43 = vpop.eup %12045  ;;  %12065 = vrcp.f32 %v14357_v12 }
 0xd22   : > { %10912 = vmatpush3.msra.mxu1 %v14282_v41  ;;  %10913 = vmatprep.mubr.msk.f32.mxu1 %vm12825_vm0, %v15128_v3  ;;  %v4069_v62 = vmul.f32 %v12046_v43, %v14171_v36  ;;  %v12048_v5 = vpop.eup %12047  ;;  %12067 = vrcp.f32 %v14461_v51  ;;  %v15146_v51 = vld [vmem:[#allocation63_spill] sm:$0xff] }
 0xd23   : > { %10921 = vmatprep.subr.mxu1 %v15128_v3  ;;  %v4234_v39 = vmul.f32 %v12048_v5, %v14176_v49  ;;  %v12050_v20 = vpop.eup %12049  ;;  %12069 = vrcp.f32 %v14414_v17 }
 0xd24   : > { %v4399_v36 = vmul.f32 %v12050_v20, %v14181_v57  ;;  %v12052_v1 = vpop.eup %12051  ;;  %12071 = vrcp.f32 %v14465_v45  ;;  %v6736_v45 = vpop.permute.xlu0 %6735 }
 0xd25   : > { %10914 = vmatmul.mubr.msk.f32.vlgmr.msra.gmra.mrb[36].mxu1 %vm3070_vm3, %v3739_v61  ;;  %v4564_v49 = vmul.f32 %v12052_v1, %v14185_v60  ;;  %v12054_v41 = vpop.eup %12053  ;;  %12073 = vrcp.f32 %v14420_v6 }
 0xd26   : > { %10922 = vmatpush3.msra.mxu1 %v14328_v26  ;;  %10923 = vmatprep.mubr.msk.f32.mxu1 %vm12825_vm0, %v15128_v3  ;;  %v12056_v57 = vpop.eup %12055  ;;  %v14555_v26 = vpop.xlane.xlu1 %7061  ;;  %12075 = vrcp.f32 %v14473_v28 }
 0xd27   : > { %10931 = vmatprep.subr.mxu1 %v15128_v3  ;;  %v4906_v60 = vmul.f32 %v12056_v57, %v14199_v25  ;;  %v12058_v52 = vpop.eup %12057  ;;  %12077 = vrcp.f32 %v14424_v18 }
 0xd28   : > { %12079 = vrcp.f32 %v14477_v46 }
 0xd29   : > { %10924 = vmatmul.mubr.msk.f32.vlgmr.msra.gmra.mrb[38].mxu1 %vm3070_vm3, %v3904_v34  ;;  %12081 = vrcp.f32 %v14555_v26 }
 0xd2a   : > { %10932 = vmatpush3.msra.mxu1 %v14343_v27  ;;  %10933 = vmatprep.mubr.msk.f32.mxu1 %vm12825_vm0, %v15128_v3  ;;  %v6228_v23 = vpop.permute.xlu1 %6227  ;;  %12083 = vrcp.f32 %v14481_v7 }
 0xd2b   : > { %10941 = vmatprep.subr.mxu1 %v15128_v3 }
 0xd2d   : > { %10934 = vmatmul.mubr.msk.f32.vlgmr.msra.gmra.mrb[40].mxu1 %vm3070_vm3, %v4069_v62 }
 0xd2e   : > { %10942 = vmatpush3.msra.mxu1 %v14339_v33  ;;  %10943 = vmatprep.mubr.msk.f32.mxu1 %vm12825_vm0, %v15128_v3  ;;  %v7392_v33 = vpop.xlane.xlu1 %7391 }
 0xd2f   : > { %10951 = vmatprep.subr.mxu1 %v15128_v3  ;;  %12085 = vrcp.f32 %v7392_v33 }
 0xd30   : > { %12087 = vrcp.f32 %v14487_v11 }
 0xd31   : > { %10944 = vmatmul.mubr.msk.f32.vlgmr.msra.gmra.mrb[42].mxu1 %vm3070_vm3, %v4234_v39 }
 0xd32   : > { %10952 = vmatpush3.msra.mxu1 %v14347_v32  ;;  %10953 = vmatprep.mubr.msk.f32.mxu1 %vm12825_vm0, %v15128_v3  ;;  %v6568_v32 = vpop.permute.xlu1 %6567 }
 0xd33   : > { %10961 = vmatprep.subr.mxu1 %v15128_v3 }
 0xd35   : > { %10954 = vmatmul.mubr.msk.f32.vlgmr.msra.gmra.mrb[44].mxu1 %vm3070_vm3, %v4399_v36 }
 0xd36   : > { %10962 = vmatpush3.msra.mxu1 %v14351_v22  ;;  %10963 = vmatprep.mubr.msk.f32.mxu1 %vm12825_vm0, %v15128_v3  ;;  %v4737_v22 = vmul.f32 %v12054_v41, %v14189_v4  ;;  %v5071_v4 = vmul.f32 %v12058_v52, %v14218_v21  ;;  %v6570_v42 = vpop.permute.xlu1 %6569  ;;  %v15150_v52 = vld [vmem:[#allocation68_spill] sm:$0xff] }
 0xd37   : > { %10971 = vmatprep.subr.mxu1 %v15128_v3  ;;  %v6571_v35 = vsel %vm6473_vm4, %v6568_v32, %v6570_v42 }
 0xd39   : > { %10964 = vmatmul.mubr.msk.f32.vlgmr.msra.gmra.mrb[46].mxu1 %vm3070_vm3, %v4564_v49 }
 0xd3a   : > { %10972 = vmatpush3.msra.mxu1 %v14362_v47  ;;  %10973 = vmatprep.mubr.msk.f32.mxu1 %vm12825_vm0, %v15128_v3  ;;  %v12060_v47 = vpop.eup %12059 }
 0xd3b   : > { %10981 = vmatprep.subr.mxu1 %v15128_v3  ;;  %v5236_v25 = vmul.f32 %v12060_v47, %v14222_v63  ;;  %v12062_v9 = vpop.eup %12061 }
 0xd3c   : > { %v5401_v21 = vmul.f32 %v12062_v9, %v14214_v16  ;;  %v12064_v2 = vpop.eup %12063 }
 0xd3d   : > { %10974 = vmatmul.mubr.msk.f32.vlgmr.msra.gmra.mrb[48].mxu1 %vm3070_vm3, %v4737_v22  ;;  %v5566_v63 = vmul.f32 %v12064_v2, %v14255_v48  ;;  %v12066_v27 = vpop.eup %12065  ;;  %v15149_v22 = vld [vmem:[#allocation69_spill] sm:$0xff] }
 0xd3e   : > { %10982 = vmatpush3.msra.mxu1 %v14410_v0  ;;  %10983 = vmatprep.mubr.msk.f32.mxu1 %vm12825_vm0, %v15128_v3  ;;  %v5731_v16 = vmul.f32 %v12066_v27, %v14259_v59  ;;  %v12068_v54 = vpop.eup %12067  ;;  %v15143_v59 = vld [vmem:[#allocation62_spill] sm:$0xff] }
 0xd3f   : > { %10991 = vmatprep.subr.mxu1 %v15128_v3  ;;  %v5896_v48 = vmul.f32 %v12068_v54, %v14247_v37  ;;  %v12070_v30 = vpop.eup %12069  ;;  %v15144_v37 = vld [vmem:[#allocation61_spill] sm:$0xff] }
 0xd40   : > { %v6061_v12 = vmul.f32 %v12070_v30, %v15143_v59  ;;  %v12072_v0 = vpop.eup %12071 }
 0xd41   : > { %10984 = vmatmul.mubr.msk.f32.vlgmr.msra.gmra.mrb[50].mxu1 %vm3070_vm3, %v4906_v60  ;;  %v6226_v17 = vmul.f32 %v12072_v0, %v15144_v37  ;;  %v12074_v6 = vpop.eup %12073 }
 0xd42   : > { %10992 = vmatpush3.msra.mxu1 %v14463_v24  ;;  %10993 = vmatprep.mubr.msk.f32.mxu1 %vm12825_vm0, %v15128_v3 }
 0xd43   : > { %11001 = vmatprep.subr.mxu1 %v15128_v3 }
 0xd45   : > { %10994 = vmatmul.mubr.msk.f32.vlgmr.msra.gmra.mrb[52].mxu1 %vm3070_vm3, %v5071_v4 }
 0xd46   : > { %11002 = vmatpush3.msra.mxu1 %v14418_v10  ;;  %11003 = vmatprep.mubr.msk.f32.mxu1 %vm12825_vm0, %v15128_v3  ;;  %v7722_v10 = vpop.xlane.xlu1 %7721 }
 0xd47   : > { %11011 = vmatprep.subr.mxu1 %v15128_v3  ;;  %12089 = vrcp.f32 %v7722_v10 }
 0xd49   : > { %11004 = vmatmul.mubr.msk.f32.vlgmr.msra.gmra.mrb[54].mxu1 %vm3070_vm3, %v5236_v25  ;;  %v15151_v25 = vld [vmem:[#allocation70_spill] sm:$0xff] }
 0xd4a   : > { %11012 = vmatpush3.msra.mxu1 %v14469_v31  ;;  %11013 = vmatprep.mubr.msk.f32.mxu1 %vm12825_vm0, %v15128_v3  ;;  %v6901_v13 = vpop.permute.xlu1 %6900 }
 0xd4b   : > { %11021 = vmatprep.subr.mxu1 %v15128_v3 }
 0xd4d   : > { %11014 = vmatmul.mubr.msk.f32.vlgmr.msra.gmra.mrb[56].mxu1 %vm3070_vm3, %v5401_v21  ;;  %v15152_v21 = vmov 0  }
 0xd4e   : > { %11022 = vmatpush3.msra.mxu1 %v14422_v44  ;;  %11023 = vmatprep.mubr.msk.f32.mxu1 %vm12825_vm0, %v15128_v3  ;;  %v15145_v44 = vld [vmem:[#allocation64_spill] sm:$0xff]  ;;  %v8052_v31 = vpop.xlane.xlu1 %8051 }
 0xd4f   : > { %11031 = vmatprep.subr.mxu1 %v15128_v3  ;;  %v6391_v18 = vmul.f32 %v12074_v6, %v15145_v44 }
 0xd51   : > { %11024 = vmatmul.mubr.msk.f32.vlgmr.msra.gmra.mrb[58].mxu1 %vm3070_vm3, %v5566_v63 }
 0xd52   : > { %11032 = vmatpush3.msra.mxu1 %v14475_v38  ;;  %11033 = vmatprep.mubr.msk.f32.mxu1 %vm12825_vm0, %v15128_v3  ;;  %v7887_v38 = vpop.xlane.xlu0 %7886  ;;  %v7231_v7 = vpop.permute.xlu1 %7230 }
 0xd53   : > { %11041 = vmatprep.subr.mxu1 %v15128_v3  ;;  %12091 = vrcp.f32 %v7887_v38 }
 0xd54   : > { %12093 = vrcp.f32 %v8052_v31 }
 0xd55   : > { %11034 = vmatmul.mubr.msk.f32.vlgmr.msra.gmra.mrb[60].mxu1 %vm3070_vm3, %v5731_v16 }
 0xd56   : > { %11042 = vmatpush3.msra.mxu1 %v14428_v19  ;;  %11043 = vmatprep.mubr.msk.f32.mxu1 %vm12825_vm0, %v15128_v3  ;;  %v12076_v19 = vpop.eup %12075  ;;  %v7066_v53 = vpop.permute.xlu0 %7065 }
 0xd57   : > { %11051 = vmatprep.subr.mxu1 %v15128_v3  ;;  %v6565_v24 = vmul.f32 %v12076_v19, %v15146_v51  ;;  %v12078_v58 = vpop.eup %12077  ;;  %v7396_v56 = vpop.permute.xlu1 %7395 }
 0xd58   : > { %v6734_v28 = vmul.f32 %v12078_v58, %v14364_v15  ;;  %v12080_v46 = vpop.eup %12079 }
 0xd59   : > { %11044 = vmatmul.mubr.msk.f32.vlgmr.msra.gmra.mrb[62].mxu1 %vm3070_vm3, %v5896_v48 }
 0xd5a   : > { %11052 = vmatpush3.msra.mxu1 %v14479_v14  ;;  %11053 = vmatprep.mubr.msk.f32.mxu1 %vm12825_vm0, %v15128_v3  ;;  %v6899_v14 = vmul.f32 %v12080_v46, %v14353_v40  ;;  %v15147_v40 = vld [vmem:[#allocation65_spill] sm:$0xff] }
 0xd5b   : > { %11061 = vmatprep.subr.mxu1 %v15128_v3  ;;  %v7561_v43 = vpop.permute.xlu1 %7560 }
 0xd5d   : > { %11054 = vmatmul.mubr.msk.f32.vlgmr.msra.gmra.mrb[64].mxu1 %vm3070_vm3, %v6061_v12 }
 0xd5e   : > { %11062 = vmatpush3.msra.mxu1 %v6228_v23  ;;  %11063 = vmatprep.mubr.msk.f32.mxu1 %vm12825_vm0, %v15128_v3 }
 0xd5f   : > { %11071 = vmatprep.subr.mxu1 %v15128_v3  ;;  %v7726_v36 = vpop.permute.xlu1 %7725 }
 0xd61   : > { %11064 = vmatmul.mubr.msk.f32.vlgmr.msra.gmra.mrb[66].mxu1 %vm3070_vm3, %v6226_v17 }
 0xd62   : > { %11072 = vmatpush3.msra.mxu1 %v14485_v29  ;;  %11073 = vmatprep.mubr.msk.f32.mxu1 %vm12825_vm0, %v15128_v3  ;;  %v12082_v29 = vpop.eup %12081 }
 0xd63   : > { %11081 = vmatprep.subr.mxu1 %v15128_v3  ;;  %v7064_v15 = vmul.f32 %v12082_v29, %v14392_v50  ;;  %v12084_v61 = vpop.eup %12083 }
 0xd64   : > { %v7229_v34 = vmul.f32 %v12084_v61, %v15147_v40  ;;  %v12086_v11 = vpop.eup %12085 }
 0xd65   : > { %11074 = vmatmul.mubr.msk.f32.vlgmr.msra.gmra.mrb[68].mxu1 %vm3070_vm3, %v6391_v18  ;;  %v7394_v50 = vmul.f32 %v12086_v11, %v14400_v55  ;;  %v12088_v62 = vpop.eup %12087  ;;  %v15148_v55 = vld [vmem:[#allocation67_spill] sm:$0xff] }
 0xd66   : > { %11082 = vmatpush3.msra.mxu1 %v6571_v35  ;;  %11083 = vmatprep.mubr.msk.f32.mxu1 %vm12825_vm0, %v15128_v3  ;;  %v7559_v5 = vmul.f32 %v12088_v62, %v14384_v8  ;;  %v12090_v20 = vpop.eup %12089  ;;  %v8056_v8 = vpop.permute.xlu1 %8055 }
 0xd67   : > { %11091 = vmatprep.subr.mxu1 %v15128_v3  ;;  %v7724_v1 = vmul.f32 %v12090_v20, %v15148_v55  ;;  %v12092_v49 = vpop.eup %12091 }
 0xd68   : > { %v7889_v57 = vmul.f32 %v12092_v49, %v15149_v22  ;;  %v12094_v60 = vpop.eup %12093 }
 0xd69   : > { %11084 = vmatmul.mubr.msk.f32.vlgmr.msra.gmra.mrb[70].mxu1 %vm3070_vm3, %v6565_v24  ;;  %v8054_v4 = vmul.f32 %v12094_v60, %v15150_v52 }
 0xd6a   : > { %11092 = vmatpush3.msra.mxu1 %v6736_v45  ;;  %11093 = vmatprep.mubr.msk.f32.mxu1 %vm12825_vm0, %v15128_v3  ;;  %v8221_v26 = vpop.permute.xlu1 %8220 }
 0xd6b   : > { %11101 = vmatprep.subr.mxu1 %v15128_v3 }
 0xd6d   : > { %11094 = vmatmul.mubr.msk.f32.vlgmr.msra.gmra.mrb[72].mxu1 %vm3070_vm3, %v6734_v28 }
 0xd6e   : > { %11102 = vmatpush3.msra.mxu1 %v6901_v13  ;;  %11103 = vmatprep.mubr.msk.f32.mxu1 %vm12825_vm0, %v15128_v3 }
 0xd6f   : > { %11111 = vmatprep.subr.mxu1 %v15128_v3 }
 0xd71   : > { %11104 = vmatmul.mubr.msk.f32.vlgmr.msra.gmra.mrb[74].mxu1 %vm3070_vm3, %v6899_v14 }
 0xd72   : > { %11112 = vmatpush3.msra.mxu1 %v7066_v53  ;;  %11113 = vmatprep.mubr.msk.f32.mxu1 %vm12825_vm0, %v15128_v3 }
 0xd73   : > { %11121 = vmatprep.subr.mxu1 %v15128_v3 }
 0xd75   : > { %11114 = vmatmul.mubr.msk.f32.vlgmr.msra.gmra.mrb[76].mxu1 %vm3070_vm3, %v7064_v15 }
 0xd76   : > { %11122 = vmatpush3.msra.mxu1 %v7231_v7  ;;  %11123 = vmatprep.mubr.msk.f32.mxu1 %vm12825_vm0, %v15128_v3 }
 0xd77   : > { %11131 = vmatprep.subr.mxu1 %v15128_v3 }
 0xd79   : > { %11124 = vmatmul.mubr.msk.f32.vlgmr.msra.gmra.mrb[78].mxu1 %vm3070_vm3, %v7229_v34 }
 0xd7a   : > { %11132 = vmatpush3.msra.mxu1 %v7396_v56  ;;  %11133 = vmatprep.mubr.msk.f32.mxu1 %vm12825_vm0, %v15128_v3 }
 0xd7b   : > { %11141 = vmatprep.subr.mxu1 %v15128_v3 }
 0xd7d   : > { %11134 = vmatmul.mubr.msk.f32.vlgmr.msra.gmra.mrb[80].mxu1 %vm3070_vm3, %v7394_v50  ;;  %v8217_v39 = vpop.xlane.xlu0 %8216 }
 0xd7e   : > { %11142 = vmatpush3.msra.mxu1 %v7561_v43  ;;  %11143 = vmatprep.mubr.msk.f32.mxu1 %vm12825_vm0, %v15128_v3  ;;  %12095 = vrcp.f32 %v8217_v39 }
 0xd7f   : > { %11151 = vmatprep.subr.mxu1 %v15128_v3 }
 0xd81   : > { %11144 = vmatmul.mubr.msk.f32.vlgmr.msra.gmra.mrb[82].mxu1 %vm3070_vm3, %v7559_v5  ;;  %v7891_v41 = vpop.permute.xlu0 %7890 }
 0xd82   : > { %11152 = vmatpush3.msra.mxu1 %v7726_v36  ;;  %11153 = vmatprep.mubr.msk.f32.mxu1 %vm12825_vm0, %v15128_v3 }
 0xd83   : > { %11161 = vmatprep.subr.mxu1 %v15128_v3 }
 0xd85   : > { %11154 = vmatmul.mubr.msk.f32.vlgmr.msra.gmra.mrb[84].mxu1 %vm3070_vm3, %v7724_v1 }
 0xd86   : > { %11162 = vmatpush3.msra.mxu1 %v7891_v41  ;;  %11163 = vmatprep.mubr.msk.f32.mxu1 %vm12825_vm0, %v15128_v3 }
 0xd87   : > { %11171 = vmatprep.subr.mxu1 %v15128_v3 }
 0xd88   : > { %v12096_v47 = vpop.eup %12095 }
 0xd89   : > { %11164 = vmatmul.mubr.msk.f32.vlgmr.msra.gmra.mrb[86].mxu1 %vm3070_vm3, %v7889_v57  ;;  %v8219_v9 = vmul.f32 %v12096_v47, %v15151_v25  ;;  %v11833_v25 = vld [vmem:[#allocation19] ss:$12 sps:$4 sm:$0xff]  }
 0xd8a   : > { %11172 = vmatpush3.msra.mxu1 %v8056_v8  ;;  %11173 = vmatprep.mubr.msk.f32.mxu1 %vm12825_vm0, %v15128_v3 }
 0xd8b   : > { %11181 = vmatprep.subr.mxu1 %v15128_v3 }
 0xd8d   : > { %11174 = vmatmul.mubr.msk.f32.vlgmr.msra.gmra.mrb[88].mxu1 %vm3070_vm3, %v8054_v4  ;;  %v15153_v4 = vld [vmem:[#allocation60_spill] sm:$0xff] }
 0xd8e   : > { %11182 = vmatpush3.msra.mxu1 %v8221_v26  ;;  %11183 = vmatprep.mubr.msk.f32.mxu1 %vm12825_vm0, %v15128_v3  ;;  %v15154_v26 = vld [vmem:[#allocation66_spill] sm:$0xff] }
 0xd91   : > { %11184 = vmatmul.mubr.msk.f32.vlgmr.msra.gmra.mrb[90].mxu1 %vm3070_vm3, %v8219_v9  ;;  %v11835_v9 = vld [vmem:[#allocation19 + $0x4] ss:$12 sps:$4 sm:$0xff]   ;;  %vm8382_vm3 = vcmask 424960  }
 0xd92   : > { %9043 = vmatprep.mubr.bf16.mxu1 %v15152_v21  ;;  %8970 = vmatprep.subr.bf16.mxu0 %v11835_v9  ;;  %v11904_v9 = vld [vmem:[#allocation19 + $0x16c] ss:$12 sps:$4 sm:$0xff]  }
 0xd93   : > { %8971 = vmatpush1.bf16.msra.mxu0 %v11833_v25 }
 0xdf4   : > { %v14672_v23 = vpop.f32.mrb[34].mxu1 }
 0xdf5   : > { %v10905_v2 = vpop.f32.mrb[35].mxu1 }
 0xdf6   : > { %v11836_v2 = vld [vmem:[#allocation19 + $0x18] ss:$12 sps:$4 sm:$0xff]  }
 0xdf8   : > { %v14674_v63 = vpop.f32.mrb[36].mxu1 }
 0xdf9   : > { %v10915_v33 = vpop.f32.mrb[37].mxu1 }
 0xdfa   : > { %v11857_v33 = vld [vmem:[#allocation19 + $0x180] ss:$12 sps:$4 sm:$0xff]  }
 0xdfc   : > { %v14676_v27 = vpop.f32.mrb[38].mxu1 }
 0xdfd   : > { %v10925_v16 = vpop.f32.mrb[39].mxu1 }
 0xdfe   : > { %v11839_v16 = vld [vmem:[#allocation19 + $0x30] ss:$12 sps:$4 sm:$0xff]  }
 0xe00   : > { %v14678_v54 = vpop.f32.mrb[40].mxu1 }
 0xe01   : > { %v10935_v32 = vpop.f32.mrb[41].mxu1 }
 0xe02   : > { %v11865_v32 = vld [vmem:[#allocation19 + $0x19c] ss:$12 sps:$4 sm:$0xff]  }
 0xe04   : > { %v14680_v48 = vpop.f32.mrb[42].mxu1 }
 0xe05   : > { %v10945_v30 = vpop.f32.mrb[43].mxu1 }
 0xe06   : > { %v11863_v30 = vld [vmem:[#allocation19 + $0x198] ss:$12 sps:$4 sm:$0xff]  }
 0xe08   : > { %v14682_v59 = vpop.f32.mrb[44].mxu1 }
 0xe09   : > { %v10955_v12 = vpop.f32.mrb[45].mxu1 }
 0xe0a   : > { %v11871_v12 = vld [vmem:[#allocation19 + $0x1b4] ss:$12 sps:$4 sm:$0xff]  }
 0xe0c   : > { %v14684_v42 = vpop.f32.mrb[46].mxu1 }
 0xe0d   : > { %v10965_v0 = vpop.f32.mrb[47].mxu1 }
 0xe0e   : > { %v11847_v0 = vld [vmem:[#allocation19 + $0x64] ss:$12 sps:$4 sm:$0xff]  }
 0xe10   : > { %v4814_v37 = vpop.f32.mrb[48].mxu1 }
 0xe11   : > { %v10975_v17 = vpop.f32.mrb[49].mxu1 }
 0xe12   : > { %v11845_v17 = vld [vmem:[#allocation19 + $0x60] ss:$12 sps:$4 sm:$0xff]  }
 0xe14   : > { %v4979_v10 = vpop.f32.mrb[50].mxu1 }
 0xe15   : > { %v10985_v6 = vpop.f32.mrb[51].mxu1 }
 0xe16   : > { %v11875_v6 = vld [vmem:[#allocation19 + $0x1c8] ss:$12 sps:$4 sm:$0xff]  }
 0xe18   : > { %v5144_v44 = vpop.f32.mrb[52].mxu1 }
 0xe19   : > { %v10995_v18 = vpop.f32.mrb[53].mxu1 }
 0xe1a   : > { %v11848_v18 = vld [vmem:[#allocation19 + $0x78] ss:$12 sps:$4 sm:$0xff]  }
 0xe1c   : > { %v5309_v19 = vpop.f32.mrb[54].mxu1 }
 0xe1d   : > { %v11005_v35 = vpop.f32.mrb[55].mxu1 }
 0xe1e   : > { %v11889_v35 = vld [vmem:[#allocation19 + $0x1fc] ss:$12 sps:$4 sm:$0xff]  }
 0xe20   : > { %v5474_v13 = vpop.f32.mrb[56].mxu1 }
 0xe21   : > { %v11015_v51 = vpop.f32.mrb[57].mxu1 }
 0xe22   : > { %v11856_v51 = vld [vmem:[#allocation19 + $0xac] ss:$12 sps:$4 sm:$0xff]  }
 0xe24   : > { %v14686_v24 = vpop.f32.mrb[58].mxu1 }
 0xe25   : > { %v11025_v45 = vpop.f32.mrb[59].mxu1 }
 0xe26   : > { %v11887_v45 = vld [vmem:[#allocation19 + $0x1f8] ss:$12 sps:$4 sm:$0xff]  }
 0xe28   : > { %v14688_v58 = vpop.f32.mrb[60].mxu1 }
 0xe29   : > { %v11035_v31 = vpop.f32.mrb[61].mxu1 }
 0xe2a   : > { %v11895_v31 = vld [vmem:[#allocation19 + $0x214] ss:$12 sps:$4 sm:$0xff]  }
 0xe2c   : > { %v5969_v28 = vpop.f32.mrb[62].mxu1 }
 0xe2d   : > { %8385 = vrot.lane.b32.xlu1 %v5969_v28, %s15120_s4  ;;  %v11045_v38 = vpop.f32.mrb[63].mxu1  ;;  %v11854_v28 = vld [vmem:[#allocation19 + $0xa8] ss:$12 sps:$4 sm:$0xff]  }
 0xe2e   : > { %v11862_v38 = vld [vmem:[#allocation19 + $0xc4] ss:$12 sps:$4 sm:$0xff]  }
 0xe30   : > { %v6134_v46 = vpop.f32.mrb[64].mxu1 }
 0xe31   : > { %8389 = vrot.lane.b32.xlu1 %v6134_v46, %s15119_s1  ;;  %v11055_v14 = vpop.f32.mrb[65].mxu1  ;;  %v11893_v46 = vld [vmem:[#allocation19 + $0x210] ss:$12 sps:$4 sm:$0xff]  }
 0xe32   : > { %v11860_v14 = vld [vmem:[#allocation19 + $0xc0] ss:$12 sps:$4 sm:$0xff]  }
 0xe34   : > { %v6299_v7 = vpop.f32.mrb[66].mxu1 }
 0xe35   : > { %8393 = vrot.lane.b32.xlu1 %v6299_v7, %s15118_s3  ;;  %v11065_v29 = vpop.f32.mrb[67].mxu1  ;;  %v11868_v7 = vld [vmem:[#allocation19 + $0xdc] ss:$12 sps:$4 sm:$0xff]  }
 0xe36   : > { %v11866_v29 = vld [vmem:[#allocation19 + $0xd8] ss:$12 sps:$4 sm:$0xff]  }
 0xe38   : > { %v6464_v53 = vpop.f32.mrb[68].mxu1 }
 0xe39   : > { %8397 = vrot.lane.b32.xlu0 %v6464_v53, %s12851_s23  ;;  %v11075_v15 = vpop.f32.mrb[69].mxu1  ;;  %v11874_v53 = vld [vmem:[#allocation19 + $0xf4] ss:$12 sps:$4 sm:$0xff]  }
 0xe3a   : > { %v11872_v15 = vld [vmem:[#allocation19 + $0xf0] ss:$12 sps:$4 sm:$0xff]  }
 0xe3c   : > { %v6642_v61 = vpop.f32.mrb[70].mxu1 }
 0xe3d   : > { %8401 = vrot.lane.b32.xlu1 %v6642_v61, %s12850_s27  ;;  %v11085_v56 = vpop.f32.mrb[71].mxu1  ;;  %v11880_v61 = vld [vmem:[#allocation19 + $0x10c] ss:$12 sps:$4 sm:$0xff]  }
 0xe3e   : > { %v11878_v56 = vld [vmem:[#allocation19 + $0x108] ss:$12 sps:$4 sm:$0xff]  }
 0xe40   : > { %v6807_v40 = vpop.f32.mrb[72].mxu1 }
 0xe41   : > { %8405 = vrot.lane.b32.xlu0 %v6807_v40, %s15140_s13  ;;  %v11095_v34 = vpop.f32.mrb[73].mxu1  ;;  %v11886_v40 = vld [vmem:[#allocation19 + $0x124] ss:$12 sps:$4 sm:$0xff]  }
 0xe42   : > { %v11884_v34 = vld [vmem:[#allocation19 + $0x120] ss:$12 sps:$4 sm:$0xff]  }
 0xe44   : > { %v6972_v11 = vpop.f32.mrb[74].mxu1 }
 0xe45   : > { %8409 = vrot.lane.b32.xlu1 %v6972_v11, %s12848_s19  ;;  %v11105_v50 = vpop.f32.mrb[75].mxu1  ;;  %v11892_v11 = vld [vmem:[#allocation19 + $0x13c] ss:$12 sps:$4 sm:$0xff]  }
 0xe48   : > { %v7137_v43 = vpop.f32.mrb[76].mxu1 }
 0xe49   : > { %8413 = vrot.lane.b32.xlu1 %v7137_v43, %s15117_s29  ;;  %v11115_v62 = vpop.f32.mrb[77].mxu1  ;;  %v11890_v43 = vld [vmem:[#allocation19 + $0x138] ss:$12 sps:$4 sm:$0xff]  }
 0xe4c   : > { %v7302_v5 = vpop.f32.mrb[78].mxu1 }
 0xe4d   : > { %8417 = vrot.lane.b32.xlu1 %v7302_v5, %s15138_s16  ;;  %v11125_v39 = vpop.f32.mrb[79].mxu1 }
 0xe50   : > { %v7467_v20 = vpop.f32.mrb[80].mxu1 }
 0xe51   : > { %8421 = vrot.lane.b32.xlu1 %v7467_v20, %s15116_s15  ;;  %v11135_v36 = vpop.f32.mrb[81].mxu1 }
 0xe54   : > { %v7632_v55 = vpop.f32.mrb[82].mxu1 }
 0xe55   : > { %8425 = vrot.lane.b32.xlu0 %v7632_v55, %s15115_s18  ;;  %v11145_v1 = vpop.f32.mrb[83].mxu1 }
 0xe58   : > { %v7797_v49 = vpop.f32.mrb[84].mxu1 }
 0xe59   : > { %8429 = vrot.lane.b32.xlu0 %v7797_v49, %s15114_s9  ;;  %v11155_v41 = vpop.f32.mrb[85].mxu1 }
 0xe5c   : > { %v7962_v8 = vpop.f32.mrb[86].mxu1 }
 0xe5d   : > { %8433 = vrot.lane.b32.xlu0 %v7962_v8, %s15113_s5  ;;  %v11165_v22 = vpop.f32.mrb[87].mxu1 }
 0xe5e   : > { %v11898_v22 = vld [vmem:[#allocation19 + $0x154] ss:$12 sps:$4 sm:$0xff]  }
 0xe60   : > { %v8127_v57 = vpop.f32.mrb[88].mxu1 }
 0xe61   : > { %8437 = vrot.lane.b32.xlu0 %v8127_v57, %s15112_s0  ;;  %v11175_v60 = vpop.f32.mrb[89].mxu1  ;;  %v11901_v57 = vld [vmem:[#allocation19 + $0x22c] ss:$12 sps:$4 sm:$0xff]  }
 0xe62   : > { %v11896_v60 = vld [vmem:[#allocation19 + $0x150] ss:$12 sps:$4 sm:$0xff]  }
 0xe64   : > { %v8292_v52 = vpop.f32.mrb[90].mxu1 }
 0xe65   : > { %8297 = vrot.lane.b32.xlu0 %v15153_v4, %s15120_s4  ;;  %8441 = vrot.lane.b32.xlu1 %v8292_v52, %s15111_s24  ;;  %v11185_v47 = vpop.f32.mrb[91].mxu1  ;;  %v11899_v52 = vld [vmem:[#allocation19 + $0x228] ss:$12 sps:$4 sm:$0xff]  }
 0xe69   : > { %8305 = vrot.lane.b32.xlu0 %v14672_v23, %s15118_s3  ;;  %8301 = vrot.lane.b32.xlu1 %v15154_v26, %s15119_s1  ;;  %v11838_v23 = vld [vmem:[#allocation19 + $0x1c] ss:$12 sps:$4 sm:$0xff]   ;;  %s15160_s1 = sld [smem:[#allocation53_spill]] }
 0xe6a   : > { %8972 = vmatprep.subr.bf16.mxu0 %v11838_v23  ;;  %v11905_v23 = vld [vmem:[#allocation19 + $0xc8] ss:$12 sps:$4 sm:$0xff]  }
 0xe6b   : > { %8973 = vmatpush1.bf16.msra.mxu0 %v11836_v2 }
 0xe6d   : > { %8333 = vrot.lane.b32.xlu0 %v4814_v37, %s15116_s15  ;;  %8309 = vrot.lane.b32.xlu1 %v14674_v63, %s12851_s23  ;;  %v11841_v63 = vld [vmem:[#allocation19 + $0x34] ss:$12 sps:$4 sm:$0xff]   ;;  %v11869_v37 = vld [vmem:[#allocation19 + $0x1b0] ss:$12 sps:$4 sm:$0xff]  }
 0xe6e   : > { %8974 = vmatprep.subr.bf16.mxu0 %v11841_v63  ;;  %v11902_v63 = vld [vmem:[#allocation19 + $0x168] ss:$12 sps:$4 sm:$0xff]  }
 0xe6f   : > { %8975 = vmatpush1.bf16.msra.mxu0 %v11839_v16  ;;  %p15162_p8 = scmp.ne.s32.totalorder %s15160_s1, 0 }
 0xe71   : > { %8313 = vrot.lane.b32.xlu0 %v14676_v27, %s12850_s27  ;;  %8337 = vrot.lane.b32.xlu1 %v4979_v10, %s15115_s18  ;;  %v11859_v27 = vld [vmem:[#allocation19 + $0x184] ss:$12 sps:$4 sm:$0xff]   ;;  %v11850_v10 = vld [vmem:[#allocation19 + $0x7c] ss:$12 sps:$4 sm:$0xff]   ;;  %s12858_s27 = smov [#allocation34]  }
 0xe72   : > { %9011 = vmatprep.subr.bf16.mxu1 %v11859_v27 }
 0xe73   : > { %9012 = vmatpush1.bf16.msra.mxu1 %v11857_v33 }
 0xe74   : > { %9013 = vmatprep.subr.bf16.mxu1 %v11865_v32 }
 0xe75   : > { %8345 = vrot.lane.b32.xlu0 %v5309_v19, %s15113_s5  ;;  %8341 = vrot.lane.b32.xlu1 %v5144_v44, %s15114_s9  ;;  %v11883_v44 = vld [vmem:[#allocation19 + $0x1e4] ss:$12 sps:$4 sm:$0xff]   ;;  %v11881_v19 = vld [vmem:[#allocation19 + $0x1e0] ss:$12 sps:$4 sm:$0xff]  }
 0xe77   : > { %9014 = vmatpush1.bf16.msra.mxu1 %v11863_v30 }
 0xe78   : > { %9015 = vmatprep.subr.bf16.mxu1 %v11871_v12 }
 0xe79   : > { %8349 = vrot.lane.b32.xlu0 %v5474_v13, %s15112_s0  ;;  %8317 = vrot.lane.b32.xlu1 %v14678_v54, %s15140_s13  ;;  %v11844_v54 = vld [vmem:[#allocation19 + $0x4c] ss:$12 sps:$4 sm:$0xff]   ;;  %v11851_v13 = vld [vmem:[#allocation19 + $0x90] ss:$12 sps:$4 sm:$0xff]  }
 0xe7a   : > { %8976 = vmatprep.subr.bf16.mxu0 %v11844_v54 }
 0xe7b   : > { %9016 = vmatpush1.bf16.msra.mxu1 %v11869_v37 }
 0xe7d   : > { %8321 = vrot.lane.b32.xlu1 %v14680_v48, %s12848_s19  ;;  %v11842_v48 = vld [vmem:[#allocation19 + $0x48] ss:$12 sps:$4 sm:$0xff]   ;;  %s12676_s19 = sshll.u32 %s12858_s27, 4  ;;  %s12677_s19 = int_to_ptr.vmem [resolvable:$false] %s12676_s19 }
 0xe7e   : > { %8977 = vmatpush1.bf16.msra.mxu0 %v11842_v48  ;;  %s12678_s4 = scalar_lea.vmem %s12677_s19, 768 }
 0xe7f   : > { %8978 = vmatprep.subr.bf16.mxu0 %v11847_v0 }
 0xe81   : > { %8325 = vrot.lane.b32.xlu1 %v14682_v59, %s15117_s29  ;;  %v11877_v59 = vld [vmem:[#allocation19 + $0x1cc] ss:$12 sps:$4 sm:$0xff]   ;;  %s15161_s29 = sld [smem:[#allocation91_spill]] }
 0xe82   : > { %9017 = vmatprep.subr.bf16.mxu1 %v11877_v59  ;;  %8979 = vmatpush1.bf16.msra.mxu0 %v11845_v17 }
 0xe83   : > { %8980 = vmatprep.subr.bf16.mxu0 %v11850_v10  ;;  %9018 = vmatpush1.bf16.msra.mxu1 %v11875_v6 }
 0xe84   : > { %9019 = vmatprep.subr.bf16.mxu1 %v11883_v44 }
 0xe85   : > { %8329 = vrot.lane.b32.xlu1 %v14684_v42, %s15138_s16  ;;  %v11853_v42 = vld [vmem:[#allocation19 + $0x94] ss:$12 sps:$4 sm:$0xff]  }
 0xe86   : > { %8981 = vmatpush1.bf16.msra.mxu0 %v11848_v18  ;;  %v15155_v18 = vld [vmem:[#allocation59_spill] sm:$0xff] }
 0xe87   : > { %8982 = vmatprep.subr.bf16.mxu0 %v11853_v42  ;;  %9020 = vmatpush1.bf16.msra.mxu1 %v11881_v19 }
 0xe88   : > { %9021 = vmatprep.subr.bf16.mxu1 %v11889_v35 }
 0xe8a   : > { %8983 = vmatpush1.bf16.msra.mxu0 %v11851_v13 }
 0xe8b   : > { %8984 = vmatprep.subr.bf16.mxu0 %v11856_v51  ;;  %9022 = vmatpush1.bf16.msra.mxu1 %v11887_v45 }
 0xe8c   : > { %9023 = vmatprep.subr.bf16.mxu1 %v11895_v31 }
 0xe8e   : > { %8985 = vmatpush1.bf16.msra.mxu0 %v11854_v28 }
 0xe8f   : > { %8986 = vmatprep.subr.bf16.mxu0 %v11862_v38  ;;  %9024 = vmatpush1.bf16.msra.mxu1 %v11893_v46 }
 0xe90   : > { %9025 = vmatprep.subr.bf16.mxu1 %v11901_v57  ;;  %v11907_v57 = vld [vmem:[#allocation19 + $0xe0] ss:$12 sps:$4 sm:$0xff]  }
 0xe92   : > { %8987 = vmatpush1.bf16.msra.mxu0 %v11860_v14 }
 0xe93   : > { %8988 = vmatprep.subr.bf16.mxu0 %v11868_v7  ;;  %9026 = vmatpush1.bf16.msra.mxu1 %v11899_v52 }
 0xe94   : > { %10739 = vmatprep.subr.bf16.mxu1 %v11905_v23  ;;  %v11911_v23 = vld [vmem:[#allocation19 + $0x38] ss:$12 sps:$4 sm:$0xff]  }
 0xe96   : > { %8989 = vmatpush1.bf16.msra.mxu0 %v11866_v29 }
 0xe97   : > { %8990 = vmatprep.subr.bf16.mxu0 %v11874_v53 }
 0xe9a   : > { %8991 = vmatpush1.bf16.msra.mxu0 %v11872_v15 }
 0xe9b   : > { %8992 = vmatprep.subr.bf16.mxu0 %v11880_v61 }
 0xe9e   : > { %8993 = vmatpush1.bf16.msra.mxu0 %v11878_v56 }
 0xe9f   : > { %8994 = vmatprep.subr.bf16.mxu0 %v11886_v40  ;;  %v8386_v50 = vpop.permute.xlu1 %8385 }
 0xea0   : > { %v8444_v4 = vsel %vm2993_vm1, %v14688_v58, %v8386_v50 }
 0xea2   : > { %8995 = vmatpush1.bf16.msra.mxu0 %v11884_v34 }
 0xea3   : > { %8996 = vmatprep.subr.bf16.mxu0 %v11892_v11  ;;  %v8390_v62 = vpop.permute.xlu1 %8389 }
 0xea4   : > { %v8445_v26 = vsel %vm8357_vm5, %v8444_v4, %v8390_v62 }
 0xea6   : > { %8997 = vmatpush1.bf16.msra.mxu0 %v11890_v43 }
 0xea7   : > { %v8394_v5 = vpop.permute.xlu1 %8393  ;;  %8998 = vmatprep.subr.bf16.mxu0 %v11898_v22 }
 0xea8   : > { %v8446_v25 = vsel %vm8359_vm6, %v8445_v26, %v8394_v5  ;;  %v11909_v26 = vld [vmem:[#allocation19 + $0x188] ss:$12 sps:$4 sm:$0xff]  }
 0xeaa   : > { %8999 = vmatpush1.bf16.msra.mxu0 %v11896_v60 }
 0xeab   : > { %v8398_v20 = vpop.permute.xlu0 %8397  ;;  %9000 = vmatprep.subr.bf16.mxu0 %v11904_v9  ;;  %v11910_v9 = vld [vmem:[#allocation19 + $0xf8] ss:$12 sps:$4 sm:$0xff]  }
 0xeac   : > { %v8447_v2 = vsel %vm8361_vm7, %v8446_v25, %v8398_v20 }
 0xeae   : > { %9001 = vmatpush1.bf16.msra.mxu0 %v11902_v63  ;;  %v11913_v63 = vld [vmem:[#allocation19 + $0x110] ss:$12 sps:$4 sm:$0xff]  }
 0xeaf   : > { %v8402_v39 = vpop.permute.xlu1 %8401  ;;  %11186 = vmatprep.subr.bf16.mxu0 %v15128_v3 }
 0xeb0   : > { %v8448_v58 = vsel %vm8363_vm8, %v8447_v2, %v8402_v39  ;;  %v11912_v2 = vld [vmem:[#allocation19 + $0x1a0] ss:$12 sps:$4 sm:$0xff]  }
 0xeb3   : > { %v8406_v55 = vpop.permute.xlu0 %8405 }
 0xeb4   : > { %v8449_v16 = vsel %vm8365_vm9, %v8448_v58, %v8406_v55  ;;  %v11914_v58 = vld [vmem:[#allocation19 + $0x50] ss:$12 sps:$4 sm:$0xff]  }
 0xeb7   : > { %v8410_v36 = vpop.permute.xlu1 %8409 }
 0xeb8   : > { %v8450_v54 = vsel %vm8367_vm10, %v8449_v16, %v8410_v36  ;;  %v11917_v16 = vld [vmem:[#allocation19 + $0x68] ss:$12 sps:$4 sm:$0xff]  }
 0xebb   : > { %v8414_v1 = vpop.permute.xlu1 %8413 }
 0xebc   : > { %v8451_v12 = vsel %vm8369_vm12, %v8450_v54, %v8414_v1  ;;  %v11919_v54 = vld [vmem:[#allocation19 + $0x140] ss:$12 sps:$4 sm:$0xff]  }
 0xebf   : > { %v8418_v8 = vpop.permute.xlu1 %8417 }
 0xec0   : > { %v8452_v0 = vsel %vm8371_vm14, %v8451_v12, %v8418_v8  ;;  %v11921_v12 = vld [vmem:[#allocation19 + $0x1e8] ss:$12 sps:$4 sm:$0xff]  }
 0xec3   : > { %v8422_v33 = vpop.permute.xlu1 %8421 }
 0xec4   : > { %v8453_v10 = vsel %vm8373_vm2, %v8452_v0, %v8422_v33  ;;  %v11923_v0 = vld [vmem:[#allocation19 + $0x98] ss:$12 sps:$4 sm:$0xff]  }
 0xec7   : > { %v8426_v49 = vpop.permute.xlu0 %8425 }
 0xec8   : > { %v8454_v32 = vsel %vm6473_vm4, %v8422_v33, %v8426_v49  ;;  %v11915_v33 = vld [vmem:[#allocation19 + $0x1b8] ss:$12 sps:$4 sm:$0xff]  }
 0xecb   : > { %v8430_v41 = vpop.permute.xlu0 %8429 }
 0xecc   : > { %v8455_v30 = vsel %vm8376_vm11, %v8454_v32, %v8430_v41  ;;  %v11906_v41 = vld [vmem:[#allocation19 + $0x8] ss:$12 sps:$4 sm:$0xff]   ;;  %v11918_v32 = vld [vmem:[#allocation19 + $0x1d0] ss:$12 sps:$4 sm:$0xff]  }
 0xecf   : > { %v8434_v47 = vpop.permute.xlu0 %8433 }
 0xed0   : > { %v8456_v48 = vsel %vm8378_vm13, %v8455_v30, %v8434_v47  ;;  %v11908_v47 = vld [vmem:[#allocation19 + $0x20] ss:$12 sps:$4 sm:$0xff]  }
 0xed1   : > { %v11920_v30 = vld [vmem:[#allocation19 + $0x80] ss:$12 sps:$4 sm:$0xff]  }
 0xed3   : > { %v8438_v27 = vpop.permute.xlu0 %8437 }
 0xed4   : > { %v8457_v37 = vsel %vm8380_vm15, %v8456_v48, %v8438_v27  ;;  %v11916_v27 = vld [vmem:[#allocation19 + $0x128] ss:$12 sps:$4 sm:$0xff]   ;;  %v11922_v48 = vld [vmem:[#allocation19 + $0x158] ss:$12 sps:$4 sm:$0xff]  }
 0xed7   : > { %v8298_v59 = vpop.permute.xlu0 %8297  ;;  %v8442_v17 = vpop.permute.xlu1 %8441 }
 0xed8   : > { %v8458_v6 = vsel %vm8382_vm3, %v8457_v37, %v8442_v17  ;;  %v8356_v42 = vsel %vm2993_vm1, %v15155_v18, %v8298_v59  ;;  %vm8465_vm1 = vcmask 523264   ;;  %v11924_v37 = vld [vmem:[#allocation19 + $0x200] ss:$12 sps:$4 sm:$0xff]   ;;  %v11925_v59 = vld [vmem:[#allocation19 + $0x170] ss:$12 sps:$4 sm:$0xff]  }
 0xed9   : > { %v11540_v44 = vpack.i.bf16 %v8458_v6, %v8453_v10  ;;  %v11926_v17 = vld [vmem:[#allocation19 + $0xb0] ss:$12 sps:$4 sm:$0xff]   ;;  %v11927_v10 = vld [vmem:[#allocation19 + $0x218] ss:$12 sps:$4 sm:$0xff]  }
 0xeda   : > { %v11928_v6 = vld [vmem:[#allocation19 + $0x230] ss:$12 sps:$4 sm:$0xff]  }
 0xedb   : > { %v8306_v19 = vpop.permute.xlu0 %8305  ;;  %11541 = vrot.lane.b32.xlu0 %v11540_v44, %s15110_s21  ;;  %v8302_v35 = vpop.permute.xlu1 %8301  ;;  %v8569_v44 = vld [vmem:[#allocation20] sm:$0x7] }
 0xedc   : > { %v8358_v13 = vsel %vm8357_vm5, %v8356_v42, %v8302_v35 }
 0xedd   : > { %v8360_v51 = vsel %vm8359_vm6, %v8358_v13, %v8306_v19  ;;  %v15156_v19 = vld [vmem:[#allocation58_spill] sm:$0xff] }
 0xede   : > { %v8574_v35 = vrot.slane %v8569_v44, %v15156_v19 }
 0xedf   : > { %v8334_v45 = vpop.permute.xlu0 %8333  ;;  %8353 = vrot.lane.b32.xlu0 %v14686_v24, %s15111_s24  ;;  %v8310_v31 = vpop.permute.xlu1 %8309  ;;  %s988_s24 = scalar_lea.vmem [#allocation34], %s13527_s14  ;;  %s9730_s14 = scalar_lea.sflag [#allocation4], %s13524_s30 }
 0xee0   : > { %v8362_v28 = vsel %vm8361_vm7, %v8360_v51, %v8310_v31  ;;  %v15157_v51 = vld [vmem:[#allocation57_spill] sm:$0xff]  ;;  %s9746_s5 = sshll.u32 %s988_s24, 4  ;;  %s14851_s5 = int_to_ptr.vmem [resolvable:$true] %s9746_s5 }
 0xee1   : > { %s12672_s23 = scalar_lea.vmem %s14851_s5, 384  ;;  %p12679_p9 = scmp.lt.s32.totalorder %s14851_s5, %s12677_s19 }
 0xee2   : > { %p12673_p7 = scmp.ne.s32.totalorder %s14851_s5, %s12672_s23  ;;  %p12680_p0 = scmp.lt.s32.totalorder %s12678_s4, %s12672_s23 }
 0xee3   : > { %v8314_v38 = vpop.permute.xlu0 %8313  ;;  %v8338_v46 = vpop.permute.xlu1 %8337 }
 0xee4   : > { %v8364_v14 = vsel %vm8363_vm8, %v8362_v28, %v8314_v38  ;;  %v8375_v7 = vsel %vm6473_vm4, %v8334_v45, %v8338_v46  ;;  %p12674_p10 = pnand %p12673_p7, %p15162_p8  ;;  %p12681_p2 = por %p12680_p0, %p12679_p9 }
 0xee6   : > { %p12675_p1 = pneg %p12674_p10 }
 0xee7   : > { %v8346_v29 = vpop.permute.xlu0 %8345  ;;  %v8342_v53 = vpop.permute.xlu1 %8341 }
 0xee8   : > { %v8377_v15 = vsel %vm8376_vm11, %v8375_v7, %v8342_v53  ;;  %p12682_p13 = pnand %p12681_p2, %p12675_p1 }
 0xee9   : > { %v8379_v61 = vsel %vm8378_vm13, %v8377_v15, %v8346_v29 }
 0xeeb   : > { %v8350_v56 = vpop.permute.xlu0 %8349  ;;  %v8318_v40 = vpop.permute.xlu1 %8317 }
 0xeec   : > { %v8381_v34 = vsel %vm8380_vm15, %v8379_v61, %v8350_v56  ;;  %v8366_v24 = vsel %vm8365_vm9, %v8364_v14, %v8318_v40  ;;  %v15158_v56 = vld [vmem:[#allocation56_spill] sm:$0xff] }
 0xeed   : > { %v8582_v40 = vrot.slane %v8569_v44, %v15158_v56 }
 0xeef   : > { %v8322_v11 = vpop.permute.xlu1 %8321 }
 0xef0   : > { %v8368_v50 = vsel %vm8367_vm10, %v8366_v24, %v8322_v11 }
 0xef3   : > { %v8326_v43 = vpop.permute.xlu1 %8325 }
 0xef4   : > { %v8370_v62 = vsel %vm8369_vm12, %v8368_v50, %v8326_v43  ;;  %v12101_v43 = vld [vmem:[%s13547_s6] sm:$0xff] }
 0xef7   : > { %v8330_v5 = vpop.permute.xlu1 %8329 }
 0xef8   : > { %v8372_v39 = vsel %vm8371_vm14, %v8370_v62, %v8330_v5  ;;  %v12102_v5 = vld [vmem:[%s13547_s6 + $0x8] sm:$0xff] }
 0xef9   : > { %v8374_v20 = vsel %vm8373_vm2, %v8372_v39, %v8334_v45  ;;  %v8578_v45 = vrot.slane %v8569_v44, %v15157_v51  ;;  %v11943_v44 = vld [vmem:[#allocation28 + $0x20] sm:$0xff]  }
 0xefa   : > { %v8470_v25 = vpack.c.bf16 %v8374_v20, %v8374_v20 }
 0xf4d   : > { %v11542_v36 = vpop.permute.xlu0 %11541 }
 0xf4e   : > { %v11544_v55 = vunpack.i.h.bf16 %v11542_v36  ;;  %v11543_v1 = vunpack.i.l.bf16 %v11542_v36 }
 0xf50   : > { %v8466_v49 = vsel %vm8465_vm1, %v11543_v1, %v11544_v55 }
 0xf51   : > { %v14764_v8 = vpack.c.bf16 %v8466_v49, %v8466_v49  ;;  %v8354_v22 = vpop.permute.xlu0 %8353 }
 0xf52   : > { %v8383_v60 = vsel %vm8382_vm3, %v8381_v34, %v8354_v22 }
 0xf53   : > { %v8469_v52 = vsel %vm8465_vm1, %v8383_v60, %v11543_v1  ;;  %9044 = vmatmul.mubr.bf16.vlgmr.msra.gmra.mrb[92].mxu1 %v14764_v8 }
 0xf54   : > { %10740 = vmatpush3.bf16.msra.mxu1 %v11906_v41  ;;  %v8471_v4 = vpack.c.bf16 %v8469_v52, %v8469_v52  ;;  %v11929_v52 = vld [vmem:[#allocation28 + $0x40] sm:$0xff]  }
 0xf55   : > { %10741 = vmatprep.subr.bf16.mxu1 %v11907_v57 }
 0xf56   : > { %9002 = vmatprep.mubr.bf16.mxu0 %v8471_v4  ;;  %9084 = vmatprep.mubr.bf16.mxu1 %v8471_v4  ;;  %v11930_v4 = vld [vmem:[#allocation28 + $0x80] sm:$0xff]  }
 0xf57   : > { %9003 = vmatmul.mubr.bf16.vlgmr.msra.gmra.mrb[72].mxu0 %v8470_v25 }
 0xf58   : > { %10742 = vmatpush3.bf16.msra.mxu1 %v11908_v47  ;;  %11187 = vmatpush3.bf16.msra.mxu0 %v11909_v26  ;;  %v11931_v47 = vld [vmem:[#allocation28] sm:$0xff]   ;;  %v11932_v26 = vld [vmem:[#allocation28 + $0x48] sm:$0xff]  }
 0xf59   : > { %10743 = vmatprep.subr.bf16.mxu1 %v11910_v9  ;;  %11188 = vmatprep.subr.bf16.mxu0 %v15128_v3  ;;  %v11934_v9 = vld [vmem:[#allocation28 + $0x8] sm:$0xff]  }
 0xf5a   : > { %11202 = vmatprep.mubr.msk.bf16.mxu0 %vm12825_vm0, %v15128_v3 }
 0xf5c   : > { %10744 = vmatpush3.bf16.msra.mxu1 %v11911_v23  ;;  %11189 = vmatpush3.bf16.msra.mxu0 %v11912_v2 }
 0xf5d   : > { %10745 = vmatprep.subr.bf16.mxu1 %v11913_v63  ;;  %11190 = vmatprep.subr.bf16.mxu0 %v15128_v3 }
 0xf60   : > { %10746 = vmatpush3.bf16.msra.mxu1 %v11914_v58  ;;  %11191 = vmatpush3.bf16.msra.mxu0 %v11915_v33 }
 0xf61   : > { %10747 = vmatprep.subr.bf16.mxu1 %v11916_v27  ;;  %11192 = vmatprep.subr.bf16.mxu0 %v15128_v3 }
 0xf64   : > { %10748 = vmatpush3.bf16.msra.mxu1 %v11917_v16  ;;  %11193 = vmatpush3.bf16.msra.mxu0 %v11918_v32 }
 0xf65   : > { %10749 = vmatprep.subr.bf16.mxu1 %v11919_v54  ;;  %11194 = vmatprep.subr.bf16.mxu0 %v15128_v3 }
 0xf68   : > { %10750 = vmatpush3.bf16.msra.mxu1 %v11920_v30  ;;  %11195 = vmatpush3.bf16.msra.mxu0 %v11921_v12  ;;  %v11935_v12 = vld [vmem:[#allocation28 + $0x50] sm:$0xff]  }
 0xf69   : > { %10751 = vmatprep.subr.bf16.mxu1 %v11922_v48  ;;  %11196 = vmatprep.subr.bf16.mxu0 %v15128_v3  ;;  %v11936_v48 = vld [vmem:[#allocation28 + $0x90] sm:$0xff]  }
 0xf6c   : > { %10752 = vmatpush3.bf16.msra.mxu1 %v11923_v0  ;;  %11197 = vmatpush3.bf16.msra.mxu0 %v11924_v37  ;;  %v11937_v0 = vld [vmem:[#allocation28 + $0x10] sm:$0xff]   ;;  %v11938_v37 = vld [vmem:[#allocation28 + $0x58] sm:$0xff]  }
 0xf6d   : > { %10753 = vmatprep.subr.bf16.mxu1 %v11925_v59  ;;  %11198 = vmatprep.subr.bf16.mxu0 %v15128_v3  ;;  %v11939_v59 = vld [vmem:[#allocation28 + $0x98] sm:$0xff]  }
 0xf70   : > { %10754 = vmatpush3.bf16.msra.mxu1 %v11926_v17  ;;  %11199 = vmatpush3.bf16.msra.mxu0 %v11927_v10  ;;  %v11940_v17 = vld [vmem:[#allocation28 + $0x18] sm:$0xff]   ;;  %v11941_v10 = vld [vmem:[#allocation28 + $0x60] sm:$0xff]  }
 0xf71   : > { %11200 = vmatprep.subr.bf16.mxu0 %v15128_v3  ;;  %10770 = vmatprep.subr.bf16.mxu1 %v11929_v52  ;;  %v11953_v52 = vld [vmem:[#allocation31] ss:$12 sps:$4 sm:$0xff]  }
 0xf73   : > { %9085 = vmatmul.mubr.bf16.vlgmr.msra.gmra.mrb[96].mxu1 %v8470_v25  ;;  %v11933_v25 = vld [vmem:[#allocation28 + $0x88] sm:$0xff]  }
 0xf74   : > { %11201 = vmatpush3.bf16.msra.mxu0 %v11928_v6  ;;  %10771 = vmatpush3.bf16.msra.mxu1 %v11931_v47  ;;  %v11942_v6 = vld [vmem:[#allocation28 + $0xa0] sm:$0xff]  }
 0xf75   : > { %11206 = vmatprep.subr.bf16.mxu0 %v15128_v3  ;;  %10772 = vmatprep.subr.bf16.mxu1 %v11932_v26  ;;  %v11956_v47 = vld [vmem:[#allocation31 + $0x18] ss:$12 sps:$4 sm:$0xff]   ;;  %v11961_v26 = vld [vmem:[#allocation31 + $0x34] ss:$12 sps:$4 sm:$0xff]  }
 0xf77   : > { %11203 = vmatmul.mubr.bf16.vlgmr.msra.gmra.mrb[76].mxu0 %v14764_v8  ;;  %v12103_v8 = vld [vmem:[%s13547_s6 + $0x10] sm:$0xff]  ;;  %s15159_s6 = sld [smem:[#allocation50_spill]] }
 0xf78   : > { %11222 = vmatprep.mubr.msk.bf16.mxu0 %vm12825_vm0, %v15128_v3  ;;  %11207 = vmatpush3.bf16.msra.mxu0 %v11930_v4  ;;  %v11958_v4 = vld [vmem:[#allocation31 + $0x1c] ss:$12 sps:$4 sm:$0xff]  }
 0xf79   : > { %11208 = vmatprep.subr.bf16.mxu0 %v15128_v3  ;;  %10773 = vmatpush3.bf16.msra.mxu1 %v11934_v9  ;;  %v11964_v9 = vld [vmem:[#allocation31 + $0x4c] ss:$12 sps:$4 sm:$0xff]  }
 0xf7a   : > { %10774 = vmatprep.subr.bf16.mxu1 %v11935_v12 }
 0xf7c   : > { %11209 = vmatpush3.bf16.msra.mxu0 %v11933_v25  ;;  %v11959_v25 = vld [vmem:[#allocation31 + $0x30] ss:$12 sps:$4 sm:$0xff]  }
 0xf7d   : > { %11210 = vmatprep.subr.bf16.mxu0 %v15128_v3  ;;  %10775 = vmatpush3.bf16.msra.mxu1 %v11937_v0  ;;  %s11263_s0 = smul.u32 384, %s15159_s6 }
 0xf7e   : > { %10776 = vmatprep.subr.bf16.mxu1 %v11938_v37  ;;  %v11965_v37 = vld [vmem:[#allocation31 + $0x8] ss:$12 sps:$4 sm:$0xff]  }
 0xf7f   : > { %s14849_s15 = scalar_lea.hbm %s15161_s29, %s11263_s0 }
 0xf80   : > { %11211 = vmatpush3.bf16.msra.mxu0 %v11936_v48 }
 0xf81   : > { %11212 = vmatprep.subr.bf16.mxu0 %v15128_v3  ;;  %10777 = vmatpush3.bf16.msra.mxu1 %v11940_v17  ;;  %v11966_v17 = vld [vmem:[#allocation31 + $0x20] ss:$12 sps:$4 sm:$0xff]  }
 0xf82   : > { %10778 = vmatprep.subr.bf16.mxu1 %v11941_v10  ;;  %v11967_v10 = vld [vmem:[#allocation31 + $0x38] ss:$12 sps:$4 sm:$0xff]  }
 0xf84   : > { %11213 = vmatpush3.bf16.msra.mxu0 %v11939_v59 }
 0xf85   : > { %11214 = vmatprep.subr.bf16.mxu0 %v15128_v3  ;;  %10779 = vmatpush3.bf16.msra.mxu1 %v11943_v44 }
 0xf88   : > { %11215 = vmatpush3.bf16.msra.mxu0 %v11942_v6  ;;  %v11968_v6 = vld [vmem:[#allocation31 + $0x50] ss:$12 sps:$4 sm:$0xff]  }
 0xf89   : > { %11216 = vmatprep.subr.bf16.mxu0 %v15128_v3 }
0x1026   : > { %v9045_v18 = vpop.f32.mrb[92].mxu1 }
0x1027   : > { %v9047_v42 = vpop.f32.mrb[93].mxu1 }
0x1028   : > { %v9049_v13 = vpop.f32.mrb[94].mxu1 }
0x1029   : > { %v9050_v31 = vpop.f32.mrb[95].mxu1  ;;  %v11947_v13 = vld [vmem:[#allocation28 + $0x70] sm:$0xff]  }
0x102a   : > { %v9004_v28 = vpop.f32.mrb[72].mxu0  ;;  %v11949_v31 = vld [vmem:[#allocation28 + $0x30] sm:$0xff]  }
0x102b   : > { %v9005_v38 = vadd.f32 %v9004_v28, %v8574_v35  ;;  %v9006_v46 = vpop.f32.mrb[73].mxu0  ;;  %v11946_v35 = vld [vmem:[#allocation28 + $0x28] sm:$0xff]   ;;  %v11950_v28 = vld [vmem:[#allocation28 + $0x78] sm:$0xff]  }
0x102c   : > { %v9007_v14 = vadd.f32 %v9006_v46, %v8578_v45  ;;  %v9008_v7 = vpop.f32.mrb[74].mxu0  ;;  %v11948_v45 = vld [vmem:[#allocation28 + $0xb0] sm:$0xff]   ;;  %v11952_v46 = vld [vmem:[#allocation28 + $0x38] sm:$0xff]  }
0x102d   : > { %v9046_v29 = vadd.f32 %v9045_v18, %v9005_v38  ;;  %v9009_v53 = vpop.f32.mrb[75].mxu0  ;;  %v11944_v18 = vld [vmem:[#allocation28 + $0x68] sm:$0xff]   ;;  %v11951_v38 = vld [vmem:[#allocation28 + $0xb8] sm:$0xff]  }
0x102e   : > { %v9048_v15 = vadd.f32 %v9047_v42, %v9007_v14  ;;  %v11945_v42 = vld [vmem:[#allocation28 + $0xa8] sm:$0xff]   ;;  %10780 = vmatprep.subr.bf16.mxu1 %v11944_v18 }
0x102f   : > { %v9132_v62 = vadd.f32 %v12101_v43, %v9046_v29  ;;  %11217 = vmatpush3.bf16.msra.mxu0 %v11945_v42  ;;  %10781 = vmatpush3.bf16.msra.mxu1 %v11946_v35  ;;  %v11955_v14 = vld [vmem:[#allocation31 + $0x4] ss:$12 sps:$4 sm:$0xff]  }
0x1030   : > { %v9133_v39 = vadd.f32 %v12102_v5, %v9048_v15  ;;  %11218 = vmatprep.subr.bf16.mxu0 %v15128_v3  ;;  %10782 = vmatprep.subr.bf16.mxu1 %v11947_v13  ;;  %v9157_v15 = vld [vmem:[#allocation22] sm:$0x7]  ;;  %v9497_v13 = vld [vmem:[#allocation32] sm:$0x7] }
0x1032   : > { %v9135_v57 = vadd.f32 %v9133_v39, %v9132_v62 }
0x1033   : > { %11219 = vmatpush3.bf16.msra.mxu0 %v11948_v45  ;;  %10783 = vmatpush3.bf16.msra.mxu1 %v11949_v31  ;;  %v9502_v45 = vrot.slane %v9497_v13, %v15156_v19  ;;  %v9506_v31 = vrot.slane %v9497_v13, %v15157_v51 }
0x1034   : > { %11220 = vmatprep.subr.bf16.mxu0 %v15128_v3  ;;  %10784 = vmatprep.subr.bf16.mxu1 %v11950_v28 }
0x1037   : > { %11221 = vmatpush3.bf16.msra.mxu0 %v11951_v38  ;;  %10785 = vmatpush3.bf16.msra.mxu1 %v11952_v46  ;;  %v9510_v46 = vrot.slane %v9497_v13, %v15158_v56 }
0x1038   : > { %9581 = vmatprep.subr.bf16.mxu1 %v11955_v14 }
0x1046   : > { %v10755_v61 = vpop.f32.mrb[96].mxu1 }
0x1047   : > { %v10756_v34 = vpop.f32.mrb[97].mxu1 }
0x1048   : > { %v10757_v24 = vadd.f32 %v10756_v34, %v10755_v61  ;;  %v10758_v11 = vpop.f32.mrb[98].mxu1  ;;  %v9177_v61 = vld [vmem:[#allocation23] sm:$0x7]  ;;  %v9170_v34 = vrot.slane %v9157_v15, %v15158_v56 }
0x1049   : > { %v10759_v50 = vpop.f32.mrb[99].mxu1  ;;  %v9190_v43 = vrot.slane %v9177_v61, %v15158_v56 }
0x104a   : > { %v9087_v20 = vadd.f32 %v10757_v24, %v8582_v40  ;;  %v9126_v36 = vpop.f32.mrb[76].mxu0  ;;  %v9166_v40 = vrot.slane %v9157_v15, %v15157_v51  ;;  %v9162_v24 = vrot.slane %v9157_v15, %v15156_v19  ;;  %v9186_v50 = vrot.slane %v9177_v61, %v15157_v51 }
0x104b   : > { %v11204_v55 = vpop.f32.mrb[77].mxu0 }
0x104c   : > { %v9127_v1 = vadd.f32 %v9126_v36, %v9087_v20  ;;  %v9129_v49 = vpop.f32.mrb[78].mxu0  ;;  %v9182_v20 = vrot.slane %v9177_v61, %v15156_v19 }
0x104d   : > { %v11205_v41 = vpop.f32.mrb[79].mxu0 }
0x104e   : > { %v9134_v22 = vadd.f32 %v12103_v8, %v9127_v1 }
0x1050   : > { %v9136_v60 = vadd.f32 %v9135_v57, %v9134_v22 }
0x1052   : > { %9137 = vadd.xlane.f32.xlu0 %v9136_v60 }
0x10df   : > { %v9138_v23 = vpop.xlane.xlu0 %9137 }
0x10e0   : > { %v9140_v2 = vmul.f32 0.0026041667, %v9138_v23  ;;  %v11962_v23 = vld [vmem:[#allocation31 + $0x48] ss:$12 sps:$4 sm:$0xff]  }
0x10e2   : > { %v14790_v63 = vsub.f32 %v9132_v62, %v9140_v2  ;;  %v14792_v58 = vsub.f32 %v9133_v39, %v9140_v2  ;;  %v14794_v33 = vsub.f32 %v9134_v22, %v9140_v2 }
0x10e4   : > { %v9144_v27 = vmul.f32 %v14790_v63, %v14790_v63  ;;  %v9145_v16 = vmul.f32 %v14792_v58, %v14792_v58  ;;  %v9146_v32 = vmul.f32 %v14794_v33, %v14794_v33 }
0x10e6   : > { %v9147_v54 = vadd.f32 %v9145_v16, %v9144_v27 }
0x10e8   : > { %v9148_v30 = vadd.f32 %v9147_v54, %v9146_v32 }
0x10ea   : > { %9149 = vadd.xlane.f32.xlu1 %v9148_v30 }
0x1177   : > { %v9150_v7 = vpop.xlane.xlu1 %9149 }
0x1178   : > { %v9151_v29 = vmul.f32 0.0026041667, %v9150_v7 }
0x117a   : > { %v9152_v53 = vadd.f32 1e-05, %v9151_v29 }
0x117c   : > { %12097 = vrsqrt.f32 %v9152_v53 }
0x1186   : > { %v12098_v11 = vpop.eup %12097 }
0x1187   : > { %v9155_v62 = vmul.f32 %v12098_v11, %v14792_v58  ;;  %v9156_v5 = vmul.f32 %v12098_v11, %v14794_v33  ;;  %v9154_v39 = vmul.f32 %v12098_v11, %v14790_v63  ;;  %v10476_v33 = vld [vmem:[#allocation29] ss:$0 sm:$0xff] }
0x1189   : > { %v9175_v36 = vmul.f32 %v9166_v40, %v9155_v62  ;;  %v9176_v55 = vmul.f32 %v9170_v34, %v9156_v5  ;;  %v9174_v1 = vmul.f32 %v9162_v24, %v9154_v39 }
0x118b   : > { %v14816_v49 = vadd.f32 %v9186_v50, %v9175_v36  ;;  %v14818_v41 = vadd.f32 %v9190_v43, %v9176_v55  ;;  %v9194_v8 = vadd.f32 %v9182_v20, %v9174_v1 }
0x118d   : > { %v9198_v22 = vpack.c.bf16 %v14816_v49, %v14816_v49  ;;  %v9199_v57 = vpack.c.bf16 %v14818_v41, %v14818_v41  ;;  %v9197_v60 = vpack.c.bf16 %v9194_v8, %v9194_v8 }
0x118f   : > { %9431 = vmatprep.mubr.bf16.mxu1 %v9198_v22  ;;  %11223 = vmatmul.mubr.bf16.vlgmr.msra.gmra.mrb[80].mxu0 %v9199_v57  ;;  %v9706_v57 = vld [vmem:[#allocation26] sm:$0x7] }
0x1190   : > { %9432 = vmatmul.mubr.bf16.vlgmr.msra.gmra.mrb[100].mxu1 %v9197_v60 }
0x1191   : > { %9582 = vmatpush1.bf16.msra.mxu1 %v11953_v52  ;;  %9613 = vmatprep.mubr.bf16.mxu1 %v15152_v21 }
0x1192   : > { %9583 = vmatprep.subr.bf16.mxu1 %v11958_v4 }
0x1195   : > { %9584 = vmatpush1.bf16.msra.mxu1 %v11956_v47 }
0x1196   : > { %9585 = vmatprep.subr.bf16.mxu1 %v11961_v26  ;;  %v9711_v26 = vrot.slane %v9706_v57, %v15156_v19 }
0x1199   : > { %9586 = vmatpush1.bf16.msra.mxu1 %v11959_v25  ;;  %v9715_v25 = vrot.slane %v9706_v57, %v15157_v51 }
0x119a   : > { %9587 = vmatprep.subr.bf16.mxu1 %v11964_v9 }
0x119d   : > { %9588 = vmatpush1.bf16.msra.mxu1 %v11962_v23 }
0x119e   : > { %11226 = vmatprep.subr.bf16.mxu1 %v15128_v3 }
0x1262   : > { %v9473_v2 = vpop.f32.mrb[80].mxu0 }
0x1263   : > { %v10786_v63 = vpop.f32.mrb[100].mxu1  ;;  %v11224_v58 = vpop.f32.mrb[81].mxu0 }
0x1264   : > { %v10787_v27 = vpop.f32.mrb[101].mxu1  ;;  %v9476_v21 = vpop.f32.mrb[82].mxu0 }
0x1265   : > { %v10788_v16 = vadd.f32 %v10787_v27, %v10786_v63  ;;  %v10789_v32 = vpop.f32.mrb[102].mxu1  ;;  %v11225_v54 = vpop.f32.mrb[83].mxu0  ;;  %v9719_v63 = vrot.slane %v9706_v57, %v15158_v56 }
0x1266   : > { %v10790_v30 = vpop.f32.mrb[103].mxu1 }
0x1267   : > { %v9434_v12 = vadd.f32 %v10788_v16, %v10476_v33 }
0x1269   : > { %v9474_v48 = vadd.f32 %v9473_v2, %v9434_v12 }
0x126b   : > { %v9479_v0 = vmax.f32 %v9474_v48, 0.0 }
0x126d   : > { %v9480_v59 = vpack.c.bf16 %v9479_v0, %v9479_v0 }
0x126f   : > { %10513 = vmatmul.mubr.msk.bf16.vlgmr.msra.gmra.mrb[104].mxu1 %vm8465_vm1, %v9480_v59 }
0x1270   : > { %11227 = vmatpush3.bf16.msra.mxu1 %v11965_v37  ;;  %11234 = vmatprep.mubr.msk.bf16.mxu1 %vm12825_vm0, %v15128_v3 }
0x1271   : > { %11228 = vmatprep.subr.bf16.mxu1 %v15128_v3 }
0x1274   : > { %11229 = vmatpush3.bf16.msra.mxu1 %v11966_v17 }
0x1275   : > { %11230 = vmatprep.subr.bf16.mxu1 %v15128_v3 }
0x1278   : > { %11231 = vmatpush3.bf16.msra.mxu1 %v11967_v10 }
0x1279   : > { %11232 = vmatprep.subr.bf16.mxu1 %v15128_v3 }
0x127c   : > { %11233 = vmatpush3.bf16.msra.mxu1 %v11968_v6 }
0x127f   : > { %11235 = vmatmul.mubr.msk.bf16.vlgmr.msra.gmra.mrb[108].mxu1 %vm8465_vm1, %v9480_v59 }
0x1342   : > { %v9615_v44 = vpop.f32.mrb[104].mxu1 }
0x1343   : > { %v9617_v18 = vpop.f32.mrb[105].mxu1  ;;  %v9616_v28 = vadd.f32 %v9615_v44, %v9502_v45 }
0x1344   : > { %v9619_v42 = vpop.f32.mrb[106].mxu1  ;;  %v9618_v38 = vadd.f32 %v9617_v18, %v9506_v31 }
0x1345   : > { %v9620_v35 = vpop.f32.mrb[107].mxu1  ;;  %v9662_v14 = vadd.f32 %v9616_v28, %v9194_v8 }
0x1346   : > { %v9663_v7 = vadd.f32 %v9618_v38, %v14816_v49 }
0x1348   : > { %v9665_v61 = vadd.f32 %v9663_v7, %v9662_v14 }
0x1352   : > { %v9656_v3 = vpop.f32.mrb[108].mxu1 }
0x1353   : > { %v9657_v29 = vadd.f32 %v9656_v3, %v9510_v46  ;;  %v11236_v53 = vpop.f32.mrb[109].mxu1 }
0x1354   : > { %v9659_v15 = vpop.f32.mrb[110].mxu1 }
0x1355   : > { %v9664_v40 = vadd.f32 %v9657_v29, %v14818_v41  ;;  %v11237_v34 = vpop.f32.mrb[111].mxu1  ;;  %v9686_v41 = vld [vmem:[#allocation25] sm:$0x7] }
0x1356   : > { %v9691_v60 = vrot.slane %v9686_v41, %v15156_v19  ;;  %v9695_v52 = vrot.slane %v9686_v41, %v15157_v51  ;;  %v9699_v4 = vrot.slane %v9686_v41, %v15158_v56 }
0x1357   : > { %v9666_v24 = vadd.f32 %v9665_v61, %v9664_v40 }
0x1359   : > { %9667 = vadd.xlane.f32.xlu0 %v9666_v24 }
0x13e6   : > { %v9668_v11 = vpop.xlane.xlu0 %9667 }
0x13e7   : > { %v9669_v50 = vmul.f32 0.0026041667, %v9668_v11 }
0x13e9   : > { %v9670_v43 = vsub.f32 %v9662_v14, %v9669_v50  ;;  %v9671_v62 = vsub.f32 %v9663_v7, %v9669_v50  ;;  %v9672_v5 = vsub.f32 %v9664_v40, %v9669_v50 }
0x13eb   : > { %v9673_v39 = vmul.f32 %v9670_v43, %v9670_v43  ;;  %v9674_v20 = vmul.f32 %v9671_v62, %v9671_v62  ;;  %v9675_v36 = vmul.f32 %v9672_v5, %v9672_v5 }
0x13ed   : > { %v9676_v55 = vadd.f32 %v9674_v20, %v9673_v39 }
0x13ef   : > { %v9677_v1 = vadd.f32 %v9676_v55, %v9675_v36 }
0x13f1   : > { %9678 = vadd.xlane.f32.xlu0 %v9677_v1 }
0x147e   : > { %v9679_v49 = vpop.xlane.xlu0 %9678 }
0x147f   : > { %v9680_v8 = vmul.f32 0.0026041667, %v9679_v49 }
0x1481   : > { %v9681_v22 = vadd.f32 1e-05, %v9680_v8 }
0x1483   : > { %12099 = vrsqrt.f32 %v9681_v22 }
0x148d   : > { %v12100_v47 = vpop.eup %12099 }
0x148e   : > { %v9683_v9 = vmul.f32 %v12100_v47, %v9670_v43  ;;  %v9684_v23 = vmul.f32 %v12100_v47, %v9671_v62  ;;  %v9685_v2 = vmul.f32 %v12100_v47, %v9672_v5 }
0x1490   : > { %v9703_v58 = vmul.f32 %v9691_v60, %v9683_v9  ;;  %v9704_v33 = vmul.f32 %v9695_v52, %v9684_v23  ;;  %v9705_v27 = vmul.f32 %v9699_v4, %v9685_v2 }
0x1492   : > { %v9723_v21 = vadd.f32 %v9711_v26, %v9703_v58  ;;  %v9724_v16 = vadd.f32 %v9715_v25, %v9704_v33  ;;  %v9725_v32 = vadd.f32 %v9719_v63, %v9705_v27 }
0x1494   : > { %9726 = vst [vmem:[%s988_s24] sm:$0xff] %v9723_v21  ;;  %9727 = vst [vmem:[%s988_s24 + $0x8] sm:$0xff] %v9724_v16 }
0x1495   : > { %9728 = vst [vmem:[%s988_s24 + $0x10] sm:$0xff] %v9725_v32 }
0x1496   : > { %12685 = shalt.err (!%p12682_p13)
}
0x1497   : > { %s12686_s30 = scalar_lea.hbm %s14849_s15, 384  ;;  %s12690_s28 = scalar_lea.hbm %s15161_s29, 768 }
0x1498   : > { %p12687_p11 = scmp.ne.s32.totalorder %s14849_s15, %s12686_s30  ;;  %p12691_p4 = scmp.lt.u32.totalorder %s14849_s15, %s15161_s29 }
0x1499   : > { %p12692_p6 = scmp.lt.u32.totalorder %s12690_s28, %s12686_s30  ;;  %p12694_p7 = scmp.lt.u32.totalorder %s12686_s30, %s14849_s15 }
0x149a   : > { %p12688_p3 = pnand %p12687_p11, %p15162_p8 }
0x149b   : > { %p12693_p12 = por %p12692_p6, %p12691_p4 }
0x149c   : > { %p12689_p5 = pneg %p12688_p3 }
0x149d   : > { %p12695_p10 = por %p12694_p7, %p12693_p12 }
0x149f   : > { %p12696_p1 = pnand %p12695_p10, %p12689_p5 }
0x14a1   : > { %12699 = shalt.err (!%p12696_p1)
}
0x14a2   : > { %11336 = dma.vmem_to_hbm [thread:$0]  (%p15162_p8), %s14851_s5, 384, %s14849_s15, %s9730_s14  }
0x14a3 PF: > { %s15163_s16 = sld [smem:[#allocation48_spill]]  ;;  %s15164_s13 = sld [smem:[#allocation55_spill]] }
0x14a4   : > { %p15166_p0 = scmp.ge.s32.totalorder %s12798_s25, 2 }
0x14a9   : > { %s9758_s6 = sand.u32 1, %s15163_s16   ;;  %p15165_p9 = scmp.ne.s32.totalorder %s15164_s13, 0 }
0x14aa   : > { %s9759_s0 = scalar_lea.sflag [#allocation4], %s9758_s6 }
0x14ab   : > { %p11401_p2 = pnand %p15166_p0, %p15165_p9 }
0x14ad   : > { %12773 = dma.done.wait (!%p11401_p2), %s9759_s0, 384  }
0x14ae   : > { %12775 = vsyncadd (!%p11401_p2), %s9759_s0, 4294966912  ;;  %s50_s25 = sadd.s32 1, %s12798_s25   ;;  %s15167_s24 = sld [smem:[#allocation49_spill]] }
0x14af   : > { %p47_p13 = scmp.ge.s32.totalorder %s50_s25, 4   ;;  %s15168_s23 = sld [smem:[#allocation54_spill]] }
0x14b0   : > { %s15169_s9 = sld [smem:[#allocation52_spill]]  ;;  %s15170_s1 = smov %s12782_s22 }
0x14b1   :  { %49 = sbr.rel (!%p47_p13) target bundleno = 40 (0x28), region = 246 }
0x14b4   : > { %s15171_s22 = smov %s15167_s24  ;;  %s15172_s24 = smov %s12794_s2 }
0x14b6   : > { %s15173_s2 = smov %s15169_s9 }
0x14b8   :  { %9764 = vsyncpa [#allocation3], 1 }
0x14b9   :  { %9766 = vsyncpa [#allocation3 + $0x1], 1 }
0x14ba   :  { %9767 = vsyncpa [#allocation6], 1 }
0x14bb   :  { %9769 = vsyncpa [#allocation6 + $0x1], 1 }
0x14bc   :  { %9770 = vsyncpa [#allocation9], 1 }
0x14bd   :  { %9772 = vsyncpa [#allocation9 + $0x1], 1 }
0x14be   :  { %9773 = vsyncpa [#allocation12], 1 }
0x14bf   :  { %9774 = vsyncpa [#allocation15], 1 }
0x14c0   :  { %9775 = vsyncpa [#allocation18], 1 }
0x14c1   :  { %9776 = vsyncpa [#allocation21], 1 }
0x14c2   :  { %9777 = vsyncpa [#allocation24], 1 }
0x14c3   :  { %9778 = vsyncpa [#allocation27], 1 }
0x14c4   :  { %9779 = vsyncpa [#allocation30], 1 }
0x14c5   :  { %9780 = vsyncpa [#allocation33], 1 }
0x14c6   :  { %9781 = vsyncpa [#allocation4], 1 }
0x14c7   :  { %9783 = vsyncpa [#allocation4 + $0x1], 1 }

</bundles_post_ra>
